<compile_context>
chip_gen: v7x
topology: tpu7x:2x2x1
jax: 0.10.0
libtpu: 0.0.40
codegen_flags: <defaults>
</compile_context>

<pallas_src>
import functools

import jax
import jax.numpy as jnp
from jax.experimental import pallas as pl
from jax.experimental.pallas import tpu as pltpu


# ----------------------------------------------------------------------------
# Kernel 1: fused 1x1-conv stack (conv+BN+ReLU x4), all rows in one tile.
# ----------------------------------------------------------------------------
def conv_stack_kernel(x_ref, w1_ref, b1_ref, w2_ref, b2_ref,
                      w3_ref, b3_ref, w4_ref, b4_ref, o_ref):
    # layer 1: in_channels == 1, so it is a broadcast multiply (avoid K=1 matmul)
    h = x_ref[...] * w1_ref[...] + b1_ref[...]          # (T,1)*(1,16)+(1,16) -> (T,16)
    h = jnp.maximum(h, 0.0)
    h = jnp.maximum(
        jnp.dot(h, w2_ref[...], preferred_element_type=jnp.float32) + b2_ref[...], 0.0)
    h = jnp.maximum(
        jnp.dot(h, w3_ref[...], preferred_element_type=jnp.float32) + b3_ref[...], 0.0)
    h = jnp.maximum(
        jnp.dot(h, w4_ref[...], preferred_element_type=jnp.float32) + b4_ref[...], 0.0)
    o_ref[...] = h.astype(o_ref.dtype)


def conv_stack(x_rows, params):
    """x_rows: (R, 1) float32 with R = B*Lp.  Returns (R, 64)."""
    R = x_rows.shape[0]
    (w1, b1), (w2, b2), (w3, b3), (w4, b4) = params

    def full_spec(arr):
        return pl.BlockSpec(arr.shape, lambda i: (0, 0))

    # Whole stack output is ~tens of KB: single grid step is enough.
    return pl.pallas_call(
        conv_stack_kernel,
        out_shape=jax.ShapeDtypeStruct((R, 64), jnp.float32),
        grid_spec=pltpu.PrefetchScalarGridSpec(
            num_scalar_prefetch=0,
            grid=(1,),
            in_specs=[
                pl.BlockSpec((R, 1), lambda i: (0, 0)),
                full_spec(w1), full_spec(b1),
                full_spec(w2), full_spec(b2),
                full_spec(w3), full_spec(b3),
                full_spec(w4), full_spec(b4),
            ],
            out_specs=pl.BlockSpec((R, 64), lambda i: (0, 0)),
        ),
        compiler_params=pltpu.CompilerParams(
            dimension_semantics=("parallel",)),
    )(x_rows, w1, b1, w2, b2, w3, b3, w4, b4)


# ----------------------------------------------------------------------------
# Kernel 2: Linear + ReLU   y = relu(x @ W + b), W stored (K, N) in bf16.
# Weight-streaming: full-K blocks, single grid axis over N tiles.
# ----------------------------------------------------------------------------
def linear_relu_kernel(x_ref, w_ref, b_ref, o_ref):
    x = x_ref[...].astype(jnp.bfloat16)                  # bf16 MXU path
    acc = jnp.dot(x, w_ref[...], preferred_element_type=jnp.float32)
    o_ref[...] = jnp.maximum(acc + b_ref[...], 0.0).astype(o_ref.dtype)


def linear_relu(x, w, b, *, tn=512):
    """x: (M, K) f32, w: (K, N) bf16, b: (1, N) f32 -> relu(x @ w + b) f32."""
    M, K = x.shape
    _, N = w.shape
    assert N % tn == 0 and K % 128 == 0
    return pl.pallas_call(
        linear_relu_kernel,
        out_shape=jax.ShapeDtypeStruct((M, N), jnp.float32),
        grid_spec=pltpu.PrefetchScalarGridSpec(
            num_scalar_prefetch=0,
            grid=(N // tn,),
            in_specs=[
                pl.BlockSpec((M, K), lambda j: (0, 0)),     # tiny, stays resident
                pl.BlockSpec((K, tn), lambda j: (0, j)),    # streamed bf16 weights
                pl.BlockSpec((1, tn), lambda j: (0, j)),
            ],
            out_specs=pl.BlockSpec((M, tn), lambda j: (0, j)),
        ),
        compiler_params=pltpu.CompilerParams(
            dimension_semantics=("parallel",)),   # v7x: split weight stream across TCs
    )(x, w, b)


# ----------------------------------------------------------------------------
# Parameter construction (deterministic, in-script) with BN folded in.
# ----------------------------------------------------------------------------
BN_EPS = 1e-5


def fold_bn(w, b, gamma, beta, mean, var):
    scale = gamma / jnp.sqrt(var + BN_EPS)            # (C_out,)
    return w * scale[None, :], ((b - mean) * scale + beta)[None, :]


def make_params(key, in_dim):
    dims = [(1, 16), (16, 32), (32, 64), (64, 64)]
    conv_params = []
    keys = jax.random.split(key, 8)
    for idx, (cin, cout) in enumerate(dims):
        w = jax.random.normal(keys[2 * idx], (cin, cout), jnp.float32) * 0.1
        b = jax.random.normal(keys[2 * idx + 1], (cout,), jnp.float32) * 0.1
        # PyTorch BN defaults (eval mode): gamma=1, beta=0, mean=0, var=1
        gamma = jnp.ones((cout,), jnp.float32)
        beta = jnp.zeros((cout,), jnp.float32)
        mean = jnp.zeros((cout,), jnp.float32)
        var = jnp.ones((cout,), jnp.float32)
        conv_params.append(fold_bn(w, b, gamma, beta, mean, var))

    kf = jax.random.split(keys[-1], 4)
    flat_dim = in_dim * 32                             # = 4096 when in_dim = 128
    # bf16 FC weights: halves weight HBM traffic (dominant cost at batch=2).
    w_fc1 = (jax.random.normal(kf[0], (flat_dim, 2048), jnp.float32)
             * 0.02).astype(jnp.bfloat16)
    b_fc1 = jax.random.normal(kf[1], (1, 2048), jnp.float32) * 0.02
    w_fc2 = (jax.random.normal(kf[2], (2048, 1024), jnp.float32)
             * 0.02).astype(jnp.bfloat16)
    b_fc2 = jax.random.normal(kf[3], (1, 1024), jnp.float32) * 0.02
    return conv_params, (w_fc1, b_fc1), (w_fc2, b_fc2)


# ----------------------------------------------------------------------------
# Full MLP forward (matches the PyTorch module's forward).
# ----------------------------------------------------------------------------
def mlp_forward(x, conv_params, fc1, fc2, *, in_dim):
    B = x.shape[0]
    L = in_dim
    Lp = L // 2
    # torch.reshape(x, (-1, 1, in_dim)) gives NCL (B, 1, L) with C=1.
    # AvgPool1d(kernel=1, stride=2) commutes with the pointwise conv stack:
    # subsample positions first -> rows layout (B*Lp, 1), row r = b*Lp + l.
    x_rows = x[:, ::2].reshape(B * Lp, 1).astype(jnp.float32)

    h = conv_stack(x_rows, conv_params)                # (B*Lp, 64)

    # torch.reshape(x, (-1, in_dim*32)) flattens NCL channel-major -> transpose.
    h = jnp.transpose(h.reshape(B, Lp, 64), (0, 2, 1)).reshape(B, 64 * Lp)  # (B, 4096)

    h = linear_relu(h, fc1[0], fc1[1])                 # (B, 2048)
    h = linear_relu(h, fc2[0], fc2[1])                 # (B, 1024)
    return h


# ----------------------------------------------------------------------------
# Pure-JAX reference (same math incl. bf16 weights, no Pallas) for sanity check.
# ----------------------------------------------------------------------------
def mlp_reference(x, conv_params, fc1, fc2, *, in_dim):
    B = x.shape[0]
    L = in_dim
    Lp = L // 2
    h = x[:, ::2].reshape(B * Lp, 1).astype(jnp.float32)
    for (w, b) in conv_params:
        h = jnp.maximum(h @ w + b, 0.0)
    h = jnp.transpose(h.reshape(B, Lp, 64), (0, 2, 1)).reshape(B, 32 * in_dim)
    h = jnp.maximum(
        jnp.dot(h.astype(jnp.bfloat16), fc1[0],
                preferred_element_type=jnp.float32) + fc1[1], 0.0)
    h = jnp.maximum(
        jnp.dot(h.astype(jnp.bfloat16), fc2[0],
                preferred_element_type=jnp.float32) + fc2[1], 0.0)
    return h


if __name__ == "__main__":
    IN_DIM = 128      # forced by the architecture: in_dim * 32 == 4096
    NUM_CLASS = 10    # unused in forward (matches PyTorch module)
    BATCH = 2

    key = jax.random.PRNGKey(0)
    k_x, k_p = jax.random.split(key)
    x = jax.random.normal(k_x, (BATCH, IN_DIM), jnp.float32)

    conv_params, fc1, fc2 = make_params(k_p, IN_DIM)

    fwd = jax.jit(functools.partial(mlp_forward, in_dim=IN_DIM))
    out = fwd(x, conv_params, fc1, fc2)
    out = jax.block_until_ready(out)

    ref = mlp_reference(x, conv_params, fc1, fc2, in_dim=IN_DIM)
    assert out.shape == (BATCH, 1024), out.shape
    assert jnp.allclose(out, ref, atol=2e-2, rtol=2e-2), "mismatch vs reference"

    print("KERNEL_OK")
</pallas_src>

<mosaic_0001>
module attributes {stable_mosaic.version = 11 : i64} {
  func.func @conv_stack_kernel(%arg0: i32, %arg1: memref<128x1xf32, #tpu.memory_space<vmem>>, %arg2: memref<1x16xf32, #tpu.memory_space<vmem>>, %arg3: memref<1x16xf32, #tpu.memory_space<vmem>>, %arg4: memref<16x32xf32, #tpu.memory_space<vmem>>, %arg5: memref<1x32xf32, #tpu.memory_space<vmem>>, %arg6: memref<32x64xf32, #tpu.memory_space<vmem>>, %arg7: memref<1x64xf32, #tpu.memory_space<vmem>>, %arg8: memref<64x64xf32, #tpu.memory_space<vmem>>, %arg9: memref<1x64xf32, #tpu.memory_space<vmem>>, %arg10: memref<128x64xf32, #tpu.memory_space<vmem>>) attributes {dimension_semantics = [#tpu.dimension_semantics<parallel>], iteration_bounds = array<i64: 1>, scalar_prefetch = 0 : i64, scratch_operands = 0 : i64, tpu.core_type = #tpu.core_type<tc>, window_params = [{pipeline_mode = #tpu.pipeline_mode<synchronous>, transform_indices = @transform_0, window_bounds = array<i64: 128, 1>}, {pipeline_mode = #tpu.pipeline_mode<synchronous>, transform_indices = @transform_1, window_bounds = array<i64: 1, 16>}, {pipeline_mode = #tpu.pipeline_mode<synchronous>, transform_indices = @transform_2, window_bounds = array<i64: 1, 16>}, {pipeline_mode = #tpu.pipeline_mode<synchronous>, transform_indices = @transform_3, window_bounds = array<i64: 16, 32>}, {pipeline_mode = #tpu.pipeline_mode<synchronous>, transform_indices = @transform_4, window_bounds = array<i64: 1, 32>}, {pipeline_mode = #tpu.pipeline_mode<synchronous>, transform_indices = @transform_5, window_bounds = array<i64: 32, 64>}, {pipeline_mode = #tpu.pipeline_mode<synchronous>, transform_indices = @transform_6, window_bounds = array<i64: 1, 64>}, {pipeline_mode = #tpu.pipeline_mode<synchronous>, transform_indices = @transform_7, window_bounds = array<i64: 64, 64>}, {pipeline_mode = #tpu.pipeline_mode<synchronous>, transform_indices = @transform_8, window_bounds = array<i64: 1, 64>}, {pipeline_mode = #tpu.pipeline_mode<synchronous>, transform_indices = @transform_9, window_bounds = array<i64: 128, 64>}]} {
    %c0 = arith.constant 0 : index
    %c0_0 = arith.constant 0 : index
    %0 = vector.load %arg1[%c0, %c0_0] : memref<128x1xf32, #tpu.memory_space<vmem>>, vector<128x1xf32>
    %c0_1 = arith.constant 0 : index
    %c0_2 = arith.constant 0 : index
    %1 = vector.load %arg2[%c0_1, %c0_2] : memref<1x16xf32, #tpu.memory_space<vmem>>, vector<1x16xf32>
    %2 = vector.broadcast %0 : vector<128x1xf32> to vector<128x16xf32>
    %3 = vector.broadcast %1 : vector<1x16xf32> to vector<128x16xf32>
    %4 = arith.mulf %2, %3 : vector<128x16xf32>
    %c0_3 = arith.constant 0 : index
    %c0_4 = arith.constant 0 : index
    %5 = vector.load %arg3[%c0_3, %c0_4] : memref<1x16xf32, #tpu.memory_space<vmem>>, vector<1x16xf32>
    %6 = vector.broadcast %5 : vector<1x16xf32> to vector<128x16xf32>
    %7 = arith.addf %4, %6 : vector<128x16xf32>
    %cst = arith.constant 0.000000e+00 : f32
    %8 = vector.broadcast %cst : f32 to vector<128x16xf32>
    %9 = arith.maximumf %7, %8 : vector<128x16xf32>
    %c0_5 = arith.constant 0 : index
    %c0_6 = arith.constant 0 : index
    %10 = vector.load %arg4[%c0_5, %c0_6] : memref<16x32xf32, #tpu.memory_space<vmem>>, vector<16x32xf32>
    %cst_7 = arith.constant dense<0.000000e+00> : vector<128x32xf32>
    %11 = tpu.matmul %9, %10, %cst_7 {dimension_numbers = #tpu.dot_dimension_numbers<[1], [0], [0], [1], [0, 0, 1, 1], [], []>} : vector<128x16xf32>, vector<16x32xf32>, vector<128x32xf32> -> vector<128x32xf32>
    %c0_8 = arith.constant 0 : index
    %c0_9 = arith.constant 0 : index
    %12 = vector.load %arg5[%c0_8, %c0_9] : memref<1x32xf32, #tpu.memory_space<vmem>>, vector<1x32xf32>
    %13 = vector.broadcast %12 : vector<1x32xf32> to vector<128x32xf32>
    %14 = arith.addf %11, %13 : vector<128x32xf32>
    %cst_10 = arith.constant 0.000000e+00 : f32
    %15 = vector.broadcast %cst_10 : f32 to vector<128x32xf32>
    %16 = arith.maximumf %14, %15 : vector<128x32xf32>
    %c0_11 = arith.constant 0 : index
    %c0_12 = arith.constant 0 : index
    %17 = vector.load %arg6[%c0_11, %c0_12] : memref<32x64xf32, #tpu.memory_space<vmem>>, vector<32x64xf32>
    %cst_13 = arith.constant dense<0.000000e+00> : vector<128x64xf32>
    %18 = tpu.matmul %16, %17, %cst_13 {dimension_numbers = #tpu.dot_dimension_numbers<[1], [0], [0], [1], [0, 0, 1, 1], [], []>} : vector<128x32xf32>, vector<32x64xf32>, vector<128x64xf32> -> vector<128x64xf32>
    %c0_14 = arith.constant 0 : index
    %c0_15 = arith.constant 0 : index
    %19 = vector.load %arg7[%c0_14, %c0_15] : memref<1x64xf32, #tpu.memory_space<vmem>>, vector<1x64xf32>
    %20 = vector.broadcast %19 : vector<1x64xf32> to vector<128x64xf32>
    %21 = arith.addf %18, %20 : vector<128x64xf32>
    %cst_16 = arith.constant 0.000000e+00 : f32
    %22 = vector.broadcast %cst_16 : f32 to vector<128x64xf32>
    %23 = arith.maximumf %21, %22 : vector<128x64xf32>
    %c0_17 = arith.constant 0 : index
    %c0_18 = arith.constant 0 : index
    %24 = vector.load %arg8[%c0_17, %c0_18] : memref<64x64xf32, #tpu.memory_space<vmem>>, vector<64x64xf32>
    %cst_19 = arith.constant dense<0.000000e+00> : vector<128x64xf32>
    %25 = tpu.matmul %23, %24, %cst_19 {dimension_numbers = #tpu.dot_dimension_numbers<[1], [0], [0], [1], [0, 0, 1, 1], [], []>} : vector<128x64xf32>, vector<64x64xf32>, vector<128x64xf32> -> vector<128x64xf32>
    %c0_20 = arith.constant 0 : index
    %c0_21 = arith.constant 0 : index
    %26 = vector.load %arg9[%c0_20, %c0_21] : memref<1x64xf32, #tpu.memory_space<vmem>>, vector<1x64xf32>
    %27 = vector.broadcast %26 : vector<1x64xf32> to vector<128x64xf32>
    %28 = arith.addf %25, %27 : vector<128x64xf32>
    %cst_22 = arith.constant 0.000000e+00 : f32
    %29 = vector.broadcast %cst_22 : f32 to vector<128x64xf32>
    %30 = arith.maximumf %28, %29 : vector<128x64xf32>
    %c0_23 = arith.constant 0 : index
    %c0_24 = arith.constant 0 : index
    %31 = vector.load %arg10[%c0_23, %c0_24] : memref<128x64xf32, #tpu.memory_space<vmem>>, vector<128x64xf32>
    tpu.vector_store %arg10[%c0_23, %c0_24], %30 {strides = array<i32>} : memref<128x64xf32, #tpu.memory_space<vmem>>, vector<128x64xf32>,
    return
  }
  func.func @transform_0(%arg0: i32) -> (i32, i32) {
    %c0_i32 = arith.constant 0 : i32
    %c0_i32_0 = arith.constant 0 : i32
    %c0_i32_1 = arith.constant 0 : i32
    return %c0_i32, %c0_i32_0 : i32, i32
  }
  func.func @transform_1(%arg0: i32) -> (i32, i32) {
    %c0_i32 = arith.constant 0 : i32
    %c0_i32_0 = arith.constant 0 : i32
    %c0_i32_1 = arith.constant 0 : i32
    return %c0_i32, %c0_i32_0 : i32, i32
  }
  func.func @transform_2(%arg0: i32) -> (i32, i32) {
    %c0_i32 = arith.constant 0 : i32
    %c0_i32_0 = arith.constant 0 : i32
    %c0_i32_1 = arith.constant 0 : i32
    return %c0_i32, %c0_i32_0 : i32, i32
  }
  func.func @transform_3(%arg0: i32) -> (i32, i32) {
    %c0_i32 = arith.constant 0 : i32
    %c0_i32_0 = arith.constant 0 : i32
    %c0_i32_1 = arith.constant 0 : i32
    return %c0_i32, %c0_i32_0 : i32, i32
  }
  func.func @transform_4(%arg0: i32) -> (i32, i32) {
    %c0_i32 = arith.constant 0 : i32
    %c0_i32_0 = arith.constant 0 : i32
    %c0_i32_1 = arith.constant 0 : i32
    return %c0_i32, %c0_i32_0 : i32, i32
  }
  func.func @transform_5(%arg0: i32) -> (i32, i32) {
    %c0_i32 = arith.constant 0 : i32
    %c0_i32_0 = arith.constant 0 : i32
    %c0_i32_1 = arith.constant 0 : i32
    return %c0_i32, %c0_i32_0 : i32, i32
  }
  func.func @transform_6(%arg0: i32) -> (i32, i32) {
    %c0_i32 = arith.constant 0 : i32
    %c0_i32_0 = arith.constant 0 : i32
    %c0_i32_1 = arith.constant 0 : i32
    return %c0_i32, %c0_i32_0 : i32, i32
  }
  func.func @transform_7(%arg0: i32) -> (i32, i32) {
    %c0_i32 = arith.constant 0 : i32
    %c0_i32_0 = arith.constant 0 : i32
    %c0_i32_1 = arith.constant 0 : i32
    return %c0_i32, %c0_i32_0 : i32, i32
  }
  func.func @transform_8(%arg0: i32) -> (i32, i32) {
    %c0_i32 = arith.constant 0 : i32
    %c0_i32_0 = arith.constant 0 : i32
    %c0_i32_1 = arith.constant 0 : i32
    return %c0_i32, %c0_i32_0 : i32, i32
  }
  func.func @transform_9(%arg0: i32) -> (i32, i32) {
    %c0_i32 = arith.constant 0 : i32
    %c0_i32_0 = arith.constant 0 : i32
    %c0_i32_1 = arith.constant 0 : i32
    return %c0_i32, %c0_i32_0 : i32, i32
  }
}

module attributes {stable_mosaic.version = 11 : i64} {
  func.func @linear_relu_kernel(%arg0: i32, %arg1: memref<2x4096xf32, #tpu.memory_space<vmem>>, %arg2: memref<4096x512xbf16, #tpu.memory_space<vmem>>, %arg3: memref<1x512xf32, #tpu.memory_space<vmem>>, %arg4: memref<2x512xf32, #tpu.memory_space<vmem>>) attributes {dimension_semantics = [#tpu.dimension_semantics<parallel>], iteration_bounds = array<i64: 4>, scalar_prefetch = 0 : i64, scratch_operands = 0 : i64, tpu.core_type = #tpu.core_type<tc>, window_params = [{pipeline_mode = #tpu.pipeline_mode<synchronous>, transform_indices = @transform_0, window_bounds = array<i64: 2, 4096>}, {transform_indices = @transform_1, window_bounds = array<i64: 4096, 512>}, {transform_indices = @transform_2, window_bounds = array<i64: 1, 512>}, {transform_indices = @transform_3, window_bounds = array<i64: 2, 512>}]} {
    %c0 = arith.constant 0 : index
    %c0_0 = arith.constant 0 : index
    %0 = vector.load %arg1[%c0, %c0_0] : memref<2x4096xf32, #tpu.memory_space<vmem>>, vector<2x4096xf32>
    %1 = arith.truncf %0 : vector<2x4096xf32> to vector<2x4096xbf16>
    %c0_1 = arith.constant 0 : index
    %c0_2 = arith.constant 0 : index
    %2 = vector.load %arg2[%c0_1, %c0_2] : memref<4096x512xbf16, #tpu.memory_space<vmem>>, vector<4096x512xbf16>
    %cst = arith.constant dense<0.000000e+00> : vector<2x512xf32>
    %3 = tpu.matmul %1, %2, %cst {dimension_numbers = #tpu.dot_dimension_numbers<[1], [0], [0], [1], [0, 0, 1, 1], [], []>} : vector<2x4096xbf16>, vector<4096x512xbf16>, vector<2x512xf32> -> vector<2x512xf32>
    %c0_3 = arith.constant 0 : index
    %c0_4 = arith.constant 0 : index
    %4 = vector.load %arg3[%c0_3, %c0_4] : memref<1x512xf32, #tpu.memory_space<vmem>>, vector<1x512xf32>
    %5 = vector.broadcast %4 : vector<1x512xf32> to vector<2x512xf32>
    %6 = arith.addf %3, %5 : vector<2x512xf32>
    %cst_5 = arith.constant 0.000000e+00 : f32
    %7 = vector.broadcast %cst_5 : f32 to vector<2x512xf32>
    %8 = arith.maximumf %6, %7 : vector<2x512xf32>
    %c0_6 = arith.constant 0 : index
    %c0_7 = arith.constant 0 : index
    %9 = vector.load %arg4[%c0_6, %c0_7] : memref<2x512xf32, #tpu.memory_space<vmem>>, vector<2x512xf32>
    tpu.vector_store %arg4[%c0_6, %c0_7], %8 {strides = array<i32>} : memref<2x512xf32, #tpu.memory_space<vmem>>, vector<2x512xf32>,
    return
  }
  func.func @transform_0(%arg0: i32) -> (i32, i32) {
    %c0_i32 = arith.constant 0 : i32
    %c0_i32_0 = arith.constant 0 : i32
    %c0_i32_1 = arith.constant 0 : i32
    return %c0_i32, %c0_i32_0 : i32, i32
  }
  func.func @transform_1(%arg0: i32) -> (i32, i32) {
    %c0_i32 = arith.constant 0 : i32
    %c0_i32_0 = arith.constant 0 : i32
    return %c0_i32, %arg0 : i32, i32
  }
  func.func @transform_2(%arg0: i32) -> (i32, i32) {
    %c0_i32 = arith.constant 0 : i32
    %c0_i32_0 = arith.constant 0 : i32
    return %c0_i32, %arg0 : i32, i32
  }
  func.func @transform_3(%arg0: i32) -> (i32, i32) {
    %c0_i32 = arith.constant 0 : i32
    %c0_i32_0 = arith.constant 0 : i32
    return %c0_i32, %arg0 : i32, i32
  }
}

module attributes {stable_mosaic.version = 11 : i64} {
  func.func @linear_relu_kernel(%arg0: i32, %arg1: memref<2x2048xf32, #tpu.memory_space<vmem>>, %arg2: memref<2048x512xbf16, #tpu.memory_space<vmem>>, %arg3: memref<1x512xf32, #tpu.memory_space<vmem>>, %arg4: memref<2x512xf32, #tpu.memory_space<vmem>>) attributes {dimension_semantics = [#tpu.dimension_semantics<parallel>], iteration_bounds = array<i64: 2>, scalar_prefetch = 0 : i64, scratch_operands = 0 : i64, tpu.core_type = #tpu.core_type<tc>, window_params = [{pipeline_mode = #tpu.pipeline_mode<synchronous>, transform_indices = @transform_0, window_bounds = array<i64: 2, 2048>}, {transform_indices = @transform_1, window_bounds = array<i64: 2048, 512>}, {transform_indices = @transform_2, window_bounds = array<i64: 1, 512>}, {transform_indices = @transform_3, window_bounds = array<i64: 2, 512>}]} {
    %c0 = arith.constant 0 : index
    %c0_0 = arith.constant 0 : index
    %0 = vector.load %arg1[%c0, %c0_0] : memref<2x2048xf32, #tpu.memory_space<vmem>>, vector<2x2048xf32>
    %1 = arith.truncf %0 : vector<2x2048xf32> to vector<2x2048xbf16>
    %c0_1 = arith.constant 0 : index
    %c0_2 = arith.constant 0 : index
    %2 = vector.load %arg2[%c0_1, %c0_2] : memref<2048x512xbf16, #tpu.memory_space<vmem>>, vector<2048x512xbf16>
    %cst = arith.constant dense<0.000000e+00> : vector<2x512xf32>
    %3 = tpu.matmul %1, %2, %cst {dimension_numbers = #tpu.dot_dimension_numbers<[1], [0], [0], [1], [0, 0, 1, 1], [], []>} : vector<2x2048xbf16>, vector<2048x512xbf16>, vector<2x512xf32> -> vector<2x512xf32>
    %c0_3 = arith.constant 0 : index
    %c0_4 = arith.constant 0 : index
    %4 = vector.load %arg3[%c0_3, %c0_4] : memref<1x512xf32, #tpu.memory_space<vmem>>, vector<1x512xf32>
    %5 = vector.broadcast %4 : vector<1x512xf32> to vector<2x512xf32>
    %6 = arith.addf %3, %5 : vector<2x512xf32>
    %cst_5 = arith.constant 0.000000e+00 : f32
    %7 = vector.broadcast %cst_5 : f32 to vector<2x512xf32>
    %8 = arith.maximumf %6, %7 : vector<2x512xf32>
    %c0_6 = arith.constant 0 : index
    %c0_7 = arith.constant 0 : index
    %9 = vector.load %arg4[%c0_6, %c0_7] : memref<2x512xf32, #tpu.memory_space<vmem>>, vector<2x512xf32>
    tpu.vector_store %arg4[%c0_6, %c0_7], %8 {strides = array<i32>} : memref<2x512xf32, #tpu.memory_space<vmem>>, vector<2x512xf32>,
    return
  }
  func.func @transform_0(%arg0: i32) -> (i32, i32) {
    %c0_i32 = arith.constant 0 : i32
    %c0_i32_0 = arith.constant 0 : i32
    %c0_i32_1 = arith.constant 0 : i32
    return %c0_i32, %c0_i32_0 : i32, i32
  }
  func.func @transform_1(%arg0: i32) -> (i32, i32) {
    %c0_i32 = arith.constant 0 : i32
    %c0_i32_0 = arith.constant 0 : i32
    return %c0_i32, %arg0 : i32, i32
  }
  func.func @transform_2(%arg0: i32) -> (i32, i32) {
    %c0_i32 = arith.constant 0 : i32
    %c0_i32_0 = arith.constant 0 : i32
    return %c0_i32, %arg0 : i32, i32
  }
  func.func @transform_3(%arg0: i32) -> (i32, i32) {
    %c0_i32 = arith.constant 0 : i32
    %c0_i32_0 = arith.constant 0 : i32
    return %c0_i32, %arg0 : i32, i32
  }
}

</mosaic_0001>

<bundles_post_ra>
// kernel: mlp_forward.3
= control target key start
LH: loop header
LB: loop body
LE: loop exit
PB: predicated region body
PF: predicated region fallthrough
CT: control target
= control target key end

     0   :  { %14 = vsyncpa [#allocation3], 0  ;;  %s1789_s0 = inlined_call_operand.vmem [shape: f32[128,1], index: 0, kind: input, shape index: {}]   ;;  %s1790_s1 = inlined_call_operand.hbm [shape: f32[1,16], index: 1, kind: input, shape index: {}]   ;;  %s1791_s2 = inlined_call_operand.hbm [shape: f32[1,16], index: 2, kind: input, shape index: {}]   ;;  %s1792_s3 = inlined_call_operand.hbm [shape: f32[16,32], index: 3, kind: input, shape index: {}]   ;;  %s1793_s4 = inlined_call_operand.hbm [shape: f32[1,32], index: 4, kind: input, shape index: {}]   ;;  %s1794_s5 = inlined_call_operand.hbm [shape: f32[32,64], index: 5, kind: input, shape index: {}]   ;;  %s1795_s6 = inlined_call_operand.hbm [shape: f32[1,64], index: 6, kind: input, shape index: {}]   ;;  %s1796_s7 = inlined_call_operand.hbm [shape: f32[64,64], index: 7, kind: input, shape index: {}]   ;;  %s1797_s8 = inlined_call_operand.hbm [shape: f32[1,64], index: 8, kind: input, shape index: {}]   ;;  %s1798_s9 = inlined_call_operand.vmem [shape: f32[128,64], index: 9, kind: output, shape index: {}]  }
   0x1   :  { %15 = vsyncpa [#allocation5], 0 }
   0x2   :  { %16 = vsyncpa [#allocation8], 0 }
   0x3   :  { %17 = vsyncpa [#allocation11], 0 }
   0x4   :  { %18 = vsyncpa [#allocation14], 0  ;;  %s1423_s30 = smov [#allocation4]   ;;  %s1424_s11 = smov [#allocation7]  }
   0x5   :  { %s37_s10 = sshll.u32 %s1423_s30, 4  ;;  %s59_s12 = sshll.u32 %s1424_s11, 4  ;;  %s38_s10 = int_to_ptr.vmem [resolvable:$true] %s37_s10  ;;  %s60_s12 = int_to_ptr.vmem [resolvable:$true] %s59_s12 }
   0x6   :  { %s1237_s15 = scalar_lea.hbm %s1791_s2, 16 }
   0x7   :  { %p1238_p0 = scmp.ne.s32.totalorder %s1791_s2, %s1237_s15  ;;  %p1241_p1 = scmp.lt.u32.totalorder %s1237_s15, %s1791_s2 }
   0x9   :  { %p1243_p2 = pnand %p1241_p1, %p1238_p0 }
   0xb   :  { %1246 = shalt.err (!%p1243_p2)
}
   0xc   :  { %s1247_s20 = scalar_lea.vmem %s38_s10, 16  ;;  %s1251_s21 = scalar_lea.vmem %s38_s10, 32 }
   0xd   :  { %p1248_p3 = scmp.ne.s32.totalorder %s38_s10, %s1247_s20  ;;  %p1252_p4 = scmp.lt.s32.totalorder %s38_s10, %s38_s10 }
   0xe   :  { %p1253_p5 = scmp.lt.s32.totalorder %s1251_s21, %s1247_s20 }
  0x10   :  { %p1254_p6 = por %p1253_p5, %p1252_p4 }
  0x12   :  { %p1255_p7 = pnand %p1254_p6, %p1248_p3 }
  0x14   :  { %1258 = shalt.err (!%p1255_p7)
}
  0x15   :  { %40 = dma.hbm_to_vmem [thread:$0]  %s1791_s2, 16, %s38_s10, [#allocation5]  }
  0x16   :  { %s1259_s26 = scalar_lea.hbm %s1793_s4, 16 }
  0x17   :  { %p1260_p8 = scmp.ne.s32.totalorder %s1793_s4, %s1259_s26  ;;  %p1263_p9 = scmp.lt.u32.totalorder %s1259_s26, %s1793_s4 }
  0x19   :  { %p1265_p10 = pnand %p1263_p9, %p1260_p8 }
  0x1b   :  { %1268 = shalt.err (!%p1265_p10)
}
  0x1c   :  { %s1269_s11 = scalar_lea.vmem %s60_s12, 16  ;;  %s1273_s13 = scalar_lea.vmem %s60_s12, 32 }
  0x1d   :  { %p1270_p11 = scmp.ne.s32.totalorder %s60_s12, %s1269_s11  ;;  %p1274_p12 = scmp.lt.s32.totalorder %s60_s12, %s60_s12 }
  0x1e   :  { %p1275_p13 = scmp.lt.s32.totalorder %s1273_s13, %s1269_s11 }
  0x20   :  { %p1276_p0 = por %p1275_p13, %p1274_p12 }
  0x22   :  { %p1277_p1 = pnand %p1276_p0, %p1270_p11 }
  0x24   :  { %1280 = shalt.err (!%p1277_p1)
}
  0x25   :  { %62 = dma.hbm_to_vmem [thread:$0]  %s1793_s4, 16, %s60_s12, [#allocation8]  }
  0x26   :  { %s1425_s14 = smov [#allocation10]   ;;  %s1426_s16 = smov [#allocation2]  }
  0x27   :  { %s81_s15 = sshll.u32 %s1425_s14, 4  ;;  %s27_s17 = sshll.u32 %s1426_s16, 4  ;;  %s82_s15 = int_to_ptr.vmem [resolvable:$true] %s81_s15  ;;  %s28_s17 = int_to_ptr.vmem [resolvable:$true] %s27_s17 }
  0x28   :  { %s1281_s20 = scalar_lea.hbm %s1795_s6, 16 }
  0x29   :  { %p1282_p2 = scmp.ne.s32.totalorder %s1795_s6, %s1281_s20  ;;  %p1285_p3 = scmp.lt.u32.totalorder %s1281_s20, %s1795_s6 }
  0x2b   :  { %p1287_p4 = pnand %p1285_p3, %p1282_p2 }
  0x2d   :  { %1290 = shalt.err (!%p1287_p4)
}
  0x2e   :  { %s1291_s4 = scalar_lea.vmem %s82_s15, 16  ;;  %s1295_s12 = scalar_lea.vmem %s82_s15, 32 }
  0x2f   :  { %p1292_p5 = scmp.ne.s32.totalorder %s82_s15, %s1291_s4  ;;  %p1296_p6 = scmp.lt.s32.totalorder %s82_s15, %s82_s15 }
  0x30   :  { %p1297_p7 = scmp.lt.s32.totalorder %s1295_s12, %s1291_s4 }
  0x32   :  { %p1298_p8 = por %p1297_p7, %p1296_p6 }
  0x34   :  { %p1299_p9 = pnand %p1298_p8, %p1292_p5 }
  0x36   :  { %1302 = shalt.err (!%p1299_p9)
}
  0x37   :  { %84 = dma.hbm_to_vmem [thread:$0]  %s1795_s6, 16, %s82_s15, [#allocation11]  }
  0x38   :  { %s1303_s29 = scalar_lea.hbm %s1790_s1, 16 }
  0x39   :  { %p1304_p10 = scmp.ne.s32.totalorder %s1790_s1, %s1303_s29  ;;  %p1307_p11 = scmp.lt.u32.totalorder %s1303_s29, %s1790_s1 }
  0x3b   :  { %p1309_p12 = pnand %p1307_p11, %p1304_p10 }
  0x3d   :  { %1312 = shalt.err (!%p1309_p12)
}
  0x3e   :  { %s1313_s10 = scalar_lea.vmem %s28_s17, 16  ;;  %s1317_s14 = scalar_lea.vmem %s28_s17, 32 }
  0x3f   :  { %p1314_p13 = scmp.ne.s32.totalorder %s28_s17, %s1313_s10  ;;  %p1318_p0 = scmp.lt.s32.totalorder %s28_s17, %s28_s17 }
  0x40   :  { %p1319_p1 = scmp.lt.s32.totalorder %s1317_s14, %s1313_s10 }
  0x42   :  { %p1320_p2 = por %p1319_p1, %p1318_p0 }
  0x44   :  { %p1321_p3 = pnand %p1320_p2, %p1314_p13 }
  0x46   :  { %1324 = shalt.err (!%p1321_p3)
}
  0x47   :  { %30 = dma.hbm_to_vmem [thread:$0]  %s1790_s1, 16, %s28_s17, [#allocation3]  }
  0x48   :  { %s1427_s16 = smov [#allocation6]   ;;  %s1325_s21 = scalar_lea.hbm %s1792_s3, 256 }
  0x49   :  { %s46_s18 = sshll.u32 %s1427_s16, 4  ;;  %p1326_p4 = scmp.ne.s32.totalorder %s1792_s3, %s1325_s21  ;;  %s47_s18 = int_to_ptr.vmem [resolvable:$true] %s46_s18 }
  0x4a   :  { %p1329_p5 = scmp.lt.u32.totalorder %s1325_s21, %s1792_s3 }
  0x4c   :  { %p1331_p6 = pnand %p1329_p5, %p1326_p4 }
  0x4e   :  { %1334 = shalt.err (!%p1331_p6)
}
  0x4f   :  { %s1335_s12 = scalar_lea.vmem %s47_s18, 256  ;;  %p1340_p8 = scmp.lt.s32.totalorder %s47_s18, %s47_s18 }
  0x50   :  { %p1336_p7 = scmp.ne.s32.totalorder %s47_s18, %s1335_s12  ;;  %p1341_p9 = scmp.lt.s32.totalorder %s1335_s12, %s1335_s12 }
  0x52   :  { %p1342_p10 = por %p1341_p9, %p1340_p8 }
  0x54   :  { %p1343_p11 = pnand %p1342_p10, %p1336_p7 }
  0x56   :  { %1346 = shalt.err (!%p1343_p11)
}
  0x57   :  { %s1428_s1 = smov 128   ;;  %s1429_s17 = smov 8  }
  0x58   :  { %52 = dma.hbm_to_vmem [thread:$0]  %s1792_s3, 256, %s47_s18, [#allocation5], %s1428_s1, %s1428_s1, %s1429_s17  }
  0x59   :  { %s1430_s27 = smov [#allocation9]   ;;  %s1431_s29 = smov [#allocation12]  }
  0x5a   :  { %s68_s28 = sshll.u32 %s1430_s27, 4  ;;  %s90_s30 = sshll.u32 %s1431_s29, 4  ;;  %s69_s28 = int_to_ptr.vmem [resolvable:$true] %s68_s28  ;;  %s91_s30 = int_to_ptr.vmem [resolvable:$true] %s90_s30 }
  0x5b   :  { %s1347_s2 = scalar_lea.hbm %s1794_s5, 512 }
  0x5c   :  { %p1348_p12 = scmp.ne.s32.totalorder %s1794_s5, %s1347_s2  ;;  %p1351_p13 = scmp.lt.u32.totalorder %s1347_s2, %s1794_s5 }
  0x5e   :  { %p1353_p0 = pnand %p1351_p13, %p1348_p12 }
  0x60   :  { %1356 = shalt.err (!%p1353_p0)
}
  0x61   :  { %s1357_s3 = scalar_lea.vmem %s69_s28, 512  ;;  %p1362_p2 = scmp.lt.s32.totalorder %s69_s28, %s69_s28 }
  0x62   :  { %p1358_p1 = scmp.ne.s32.totalorder %s69_s28, %s1357_s3  ;;  %p1363_p3 = scmp.lt.s32.totalorder %s1357_s3, %s1357_s3 }
  0x64   :  { %p1364_p4 = por %p1363_p3, %p1362_p2 }
  0x66   :  { %p1365_p5 = pnand %p1364_p4, %p1358_p1 }
  0x68   :  { %1368 = shalt.err (!%p1365_p5)
}
  0x69   :  { %74 = dma.hbm_to_vmem [thread:$0]  %s1794_s5, 512, %s69_s28, [#allocation8], %s1428_s1, %s1428_s1, %s1429_s17  }
  0x6a   :  { %s1369_s21 = scalar_lea.hbm %s1796_s7, 1024 }
  0x6b   :  { %p1370_p6 = scmp.ne.s32.totalorder %s1796_s7, %s1369_s21  ;;  %p1373_p7 = scmp.lt.u32.totalorder %s1369_s21, %s1796_s7 }
  0x6d   :  { %p1375_p8 = pnand %p1373_p7, %p1370_p6 }
  0x6f   :  { %1378 = shalt.err (!%p1375_p8)
}
  0x70   :  { %s1379_s12 = scalar_lea.vmem %s91_s30, 1024  ;;  %p1384_p10 = scmp.lt.s32.totalorder %s91_s30, %s91_s30 }
  0x71   :  { %p1380_p9 = scmp.ne.s32.totalorder %s91_s30, %s1379_s12  ;;  %p1385_p11 = scmp.lt.s32.totalorder %s1379_s12, %s1379_s12 }
  0x73   :  { %p1386_p12 = por %p1385_p11, %p1384_p10 }
  0x75   :  { %p1387_p13 = pnand %p1386_p12, %p1380_p9 }
  0x77   :  { %1390 = shalt.err (!%p1387_p13)
}
  0x78   :  { %96 = dma.hbm_to_vmem [thread:$0]  %s1796_s7, 1024, %s91_s30, [#allocation11], %s1428_s1, %s1428_s1, %s1429_s17  }
  0x79   :  { %s1432_s26 = smov [#allocation13]   ;;  %s1391_s11 = scalar_lea.hbm %s1797_s8, 16 }
  0x7a   :  { %s103_s27 = sshll.u32 %s1432_s26, 4  ;;  %p1392_p0 = scmp.ne.s32.totalorder %s1797_s8, %s1391_s11  ;;  %s104_s27 = int_to_ptr.vmem [resolvable:$true] %s103_s27 }
  0x7b   :  { %p1395_p1 = scmp.lt.u32.totalorder %s1391_s11, %s1797_s8 }
  0x7d   :  { %p1397_p2 = pnand %p1395_p1, %p1392_p0 }
  0x7f   :  { %1400 = shalt.err (!%p1397_p2)
}
  0x80   :  { %s1401_s6 = scalar_lea.vmem %s104_s27, 16  ;;  %s1405_s7 = scalar_lea.vmem %s104_s27, 32 }
  0x81   :  { %p1402_p3 = scmp.ne.s32.totalorder %s104_s27, %s1401_s6  ;;  %p1406_p4 = scmp.lt.s32.totalorder %s104_s27, %s104_s27 }
  0x82   :  { %p1407_p5 = scmp.lt.s32.totalorder %s1405_s7, %s1401_s6 }
  0x84   :  { %p1408_p6 = por %p1407_p5, %p1406_p4 }
  0x86   :  { %p1409_p7 = pnand %p1408_p6, %p1402_p3 }
  0x88   :  { %1412 = shalt.err (!%p1409_p7)
}
  0x89   :  { %106 = dma.hbm_to_vmem [thread:$0]  %s1797_s8, 16, %s104_s27, [#allocation14]  }
  0x8a   :  { %1413 = dma.done.wait [#allocation3], 16  }
  0x8b   :  { %1414 = vsyncadd [#allocation3], 4294967280 }
  0x8c   :  { %1415 = dma.done.wait [#allocation5], 272  }
  0x8d   :  { %1416 = vsyncadd [#allocation5], 4294967024 }
  0x8e   :  { %1417 = dma.done.wait [#allocation8], 528  }
  0x8f   :  { %1418 = vsyncadd [#allocation8], 4294966768 }
  0x90   :  { %1419 = dma.done.wait [#allocation11], 1040  }
  0x91   :  { %1420 = vsyncadd [#allocation11], 4294966256 }
  0x92   :  { %1421 = dma.done.wait [#allocation14], 16  }
  0x93   :  { %1422 = vsyncadd [#allocation14], 4294967280  ;;  %v1433_v0 = vmov 0   ;;  %v133_v1 = vld [vmem:[%s1789_s0 + $0x10] sm:$0xff]  ;;  %v131_v2 = vld [vmem:[%s1789_s0] sm:$0xff]  ;;  %vm298_vm0 = vcmask 130048  }
  0x94   :  { %1236 = vset.pattern.permute.xlu1 %v1433_v0  ;;  %1235 = vset.pattern.permute.xlu0 %v1433_v0  ;;  %v134_v3 = vld [vmem:[%s1789_s0 + $0x18] sm:$0xff]  ;;  %v132_v4 = vld [vmem:[%s1789_s0 + $0x8] sm:$0xff]  ;;  %v135_v6 = vld [vmem:[%s1789_s0 + $0x20] sm:$0xff]  ;;  %vm519_vm1 = vcmask 261120   ;;  %vm744_vm2 = vcmask 523264  }
  0x95   :  { %160 = vperm.xlu1 %1236, %v133_v1   ;;  %150 = vperm.xlu0 %1235, %v131_v2   ;;  %v136_v5 = vld [vmem:[%s1789_s0 + $0x28] sm:$0xff]  ;;  %v290_v8 = vld [vmem:[#allocation6 + $0x8] sm:$0xff]  ;;  %v139_v13 = vld [vmem:[%s1789_s0 + $0x40] sm:$0xff] }
  0x96   :  { %v289_v7 = vld [vmem:[#allocation6] sm:$0xff]  ;;  %v138_v10 = vld [vmem:[%s1789_s0 + $0x38] sm:$0xff]  ;;  %v143_v17 = vld [vmem:[%s1789_s0 + $0x60] sm:$0xff] }
  0x97   :  { %v1194_v9 = vpack.c.bf16 %v290_v8, %v289_v7  ;;  %v137_v11 = vld [vmem:[%s1789_s0 + $0x30] sm:$0xff]  ;;  %v140_v12 = vld [vmem:[%s1789_s0 + $0x48] sm:$0xff]  ;;  %v142_v14 = vld [vmem:[%s1789_s0 + $0x58] sm:$0xff] }
  0x98   :  { %v141_v15 = vld [vmem:[%s1789_s0 + $0x50] sm:$0xff]  ;;  %v144_v16 = vld [vmem:[%s1789_s0 + $0x68] sm:$0xff]  ;;  %v146_v18 = vld [vmem:[%s1789_s0 + $0x78] sm:$0xff] }
  0x99   :  { %165 = vperm.xlu1 %1236, %v134_v3   ;;  %155 = vperm.xlu0 %1235, %v132_v4   ;;  %v145_v19 = vld [vmem:[%s1789_s0 + $0x70] sm:$0xff]  ;;  %v508_v20 = vld [vmem:[#allocation9] sm:$0xff]  ;;  %v509_v21 = vld [vmem:[#allocation9 + $0x8] sm:$0xff] }
  0x9a   :  { %1195 = vmatprep.subr.bf16.mxu0 %v1194_v9  ;;  %1222 = vmatprep.subr.bf16.mxu1 %v1194_v9  ;;  %v1637_v22 = vpack.c.bf16 %v509_v21, %v508_v20  ;;  %v1640_v23 = vld [vmem:[#allocation2] ss:$0 sm:$0xff]  ;;  %v1642_v24 = vld [vmem:[#allocation4] ss:$0 sm:$0xff]  ;;  %v510_v62 = vld [vmem:[#allocation9 + $0x10] sm:$0xff] }
  0x9b   :  { %1197 = vmatpush3.bf16.msra.mxu0 %v1194_v9  ;;  %1223 = vmatpush3.bf16.msra.mxu1 %v1194_v9  ;;  %v511_v63 = vld [vmem:[#allocation9 + $0x18] sm:$0xff] }
  0x9c   :  { %1199 = vmatprep.subr.bf16.mxu1 %v1637_v22  ;;  %v1202_v7 = vpack.c.bf16 %v511_v63, %v510_v62 }
  0x9d   :  { %175 = vperm.xlu1 %1236, %v136_v5   ;;  %170 = vperm.xlu0 %1235, %v135_v6  }
  0xa1   :  { %185 = vperm.xlu1 %1236, %v138_v10   ;;  %180 = vperm.xlu0 %1235, %v137_v11  }
  0xa5   :  { %195 = vperm.xlu1 %1236, %v140_v12   ;;  %190 = vperm.xlu0 %1235, %v139_v13  }
  0xa9   :  { %205 = vperm.xlu1 %1236, %v142_v14   ;;  %200 = vperm.xlu0 %1235, %v141_v15  }
  0xad   :  { %215 = vperm.xlu1 %1236, %v144_v16   ;;  %210 = vperm.xlu0 %1235, %v143_v17  }
  0xb1   :  { %225 = vperm.xlu1 %1236, %v146_v18   ;;  %220 = vperm.xlu0 %1235, %v145_v19  }
 0x114   :  { %v161_v25 = vpop.permute.xlu1 %160  ;;  %v151_v26 = vpop.permute.xlu0 %150 }
 0x115   :  { %v236_v27 = vmul.f32 %v1640_v23, %v161_v25  ;;  %v234_v28 = vmul.f32 %v1640_v23, %v151_v26 }
 0x117   :  { %v257_v29 = vadd.f32 %v1642_v24, %v234_v28  ;;  %v259_v30 = vadd.f32 %v1642_v24, %v236_v27 }
 0x118   :  { %v166_v31 = vpop.permute.xlu1 %165  ;;  %v156_v32 = vpop.permute.xlu0 %155 }
 0x119   :  { %v237_v33 = vmul.f32 %v1640_v23, %v166_v31  ;;  %v235_v34 = vmul.f32 %v1640_v23, %v156_v32  ;;  %v273_v35 = vmax.f32 %v257_v29, 0.0  ;;  %v275_v37 = vmax.f32 %v259_v30, 0.0  ;;  %v729_v30 = vld [vmem:[#allocation12] sm:$0xff]  ;;  %v730_v31 = vld [vmem:[#allocation12 + $0x8] sm:$0xff]  ;;  %v731_v32 = vld [vmem:[#allocation12 + $0x10] sm:$0xff] }
 0x11b   :  { %v258_v36 = vadd.f32 %v1642_v24, %v235_v34  ;;  %1098 = vmatprep.mubr.msk.f32.mxu0 %vm298_vm0, %v273_v35  ;;  %v260_v38 = vadd.f32 %v1642_v24, %v237_v33  ;;  %v1206_v33 = vpack.c.bf16 %v730_v31, %v729_v30  ;;  %v733_v35 = vld [vmem:[#allocation12 + $0x20] sm:$0xff] }
 0x11c   :  { %v176_v39 = vpop.permute.xlu1 %175  ;;  %v171_v40 = vpop.permute.xlu0 %170 }
 0x11d   :  { %v274_v41 = vmax.f32 %v258_v36, 0.0  ;;  %v239_v42 = vmul.f32 %v1640_v23, %v176_v39  ;;  %v238_v43 = vmul.f32 %v1640_v23, %v171_v40  ;;  %v276_v45 = vmax.f32 %v260_v38, 0.0  ;;  %v734_v36 = vld [vmem:[#allocation12 + $0x28] sm:$0xff]  ;;  %1207 = vmatprep.subr.bf16.mxu0 %v1206_v33 }
 0x11f   :  { %v261_v44 = vadd.f32 %v1642_v24, %v238_v43  ;;  %1099 = vmatmul.mubr.msk.f32.vlgmr.msra.gmra.mrb[0].mxu0 %vm298_vm0, %v274_v41  ;;  %v262_v48 = vadd.f32 %v1642_v24, %v239_v42 }
 0x120   :  { %v186_v46 = vpop.permute.xlu1 %185  ;;  %1101 = vmatprep.mubr.msk.f32.mxu0 %vm298_vm0, %v275_v37  ;;  %v181_v47 = vpop.permute.xlu0 %180  ;;  %1209 = vmatpush3.bf16.msra.mxu0 %v1206_v33  ;;  %v981_v37 = vld [vmem:[#allocation7] ss:$0 sm:$0xff] }
 0x121   :  { %v277_v49 = vmax.f32 %v261_v44, 0.0  ;;  %v241_v50 = vmul.f32 %v1640_v23, %v186_v46  ;;  %v240_v51 = vmul.f32 %v1640_v23, %v181_v47  ;;  %v278_v56 = vmax.f32 %v262_v48, 0.0 }
 0x123   :  { %v263_v52 = vadd.f32 %v1642_v24, %v240_v51  ;;  %1102 = vmatmul.mubr.msk.f32.gmra.mrb[2].mxu0 %vm298_vm0, %v276_v45  ;;  %v264_v53 = vadd.f32 %v1642_v24, %v241_v50 }
 0x124   :  { %v196_v54 = vpop.permute.xlu1 %195  ;;  %1104 = vmatprep.mubr.msk.f32.mxu0 %vm298_vm0, %v277_v49  ;;  %v191_v55 = vpop.permute.xlu0 %190 }
 0x125   :  { %v279_v57 = vmax.f32 %v263_v52, 0.0  ;;  %v243_v58 = vmul.f32 %v1640_v23, %v196_v54  ;;  %v242_v59 = vmul.f32 %v1640_v23, %v191_v55  ;;  %v280_v0 = vmax.f32 %v264_v53, 0.0 }
 0x127   :  { %v266_v60 = vadd.f32 %v1642_v24, %v243_v58  ;;  %1105 = vmatmul.mubr.msk.f32.gmra.mrb[4].mxu0 %vm298_vm0, %v278_v56  ;;  %v265_v61 = vadd.f32 %v1642_v24, %v242_v59 }
 0x128   :  { %v206_v1 = vpop.permute.xlu1 %205  ;;  %1107 = vmatprep.mubr.msk.f32.mxu0 %vm298_vm0, %v279_v57  ;;  %v201_v2 = vpop.permute.xlu0 %200 }
 0x129   :  { %v282_v3 = vmax.f32 %v266_v60, 0.0  ;;  %v245_v4 = vmul.f32 %v1640_v23, %v206_v1  ;;  %v244_v5 = vmul.f32 %v1640_v23, %v201_v2  ;;  %v281_v6 = vmax.f32 %v265_v61, 0.0 }
 0x12b   :  { %v268_v8 = vadd.f32 %v1642_v24, %v245_v4  ;;  %v267_v9 = vadd.f32 %v1642_v24, %v244_v5  ;;  %1108 = vmatmul.mubr.msk.f32.gmra.mrb[6].mxu0 %vm298_vm0, %v280_v0  ;;  %1110 = vmatprep.mubr.msk.f32.mxu1 %vm298_vm0, %v281_v6 }
 0x12c   :  { %v216_v10 = vpop.permute.xlu1 %215  ;;  %1111 = vmatmul.mubr.msk.f32.vlgmr.msra.gmra.mrb[0].mxu1 %vm298_vm0, %v282_v3  ;;  %v211_v11 = vpop.permute.xlu0 %210 }
 0x12d   :  { %v284_v12 = vmax.f32 %v268_v8, 0.0  ;;  %v283_v13 = vmax.f32 %v267_v9, 0.0  ;;  %v247_v14 = vmul.f32 %v1640_v23, %v216_v10  ;;  %v246_v15 = vmul.f32 %v1640_v23, %v211_v11  ;;  %1201 = vmatpush3.bf16.msra.mxu1 %v1637_v22 }
 0x12e   :  { %1203 = vmatprep.subr.bf16.mxu1 %v1202_v7 }
 0x12f   :  { %v270_v16 = vadd.f32 %v1642_v24, %v247_v14  ;;  %v269_v17 = vadd.f32 %v1642_v24, %v246_v15  ;;  %1113 = vmatprep.mubr.msk.f32.mxu1 %vm298_vm0, %v283_v13 }
 0x130   :  { %v226_v18 = vpop.permute.xlu1 %225  ;;  %1114 = vmatmul.mubr.msk.f32.gmra.mrb[2].mxu1 %vm298_vm0, %v284_v12  ;;  %v221_v19 = vpop.permute.xlu0 %220 }
 0x131   :  { %v286_v20 = vmax.f32 %v270_v16, 0.0  ;;  %v285_v21 = vmax.f32 %v269_v17, 0.0  ;;  %v249_v25 = vmul.f32 %v1640_v23, %v226_v18  ;;  %v248_v26 = vmul.f32 %v1640_v23, %v221_v19  ;;  %1205 = vmatpush3.bf16.msra.mxu1 %v1202_v7  ;;  %v732_v23 = vld [vmem:[#allocation12 + $0x18] sm:$0xff] }
 0x132   :  { %v1210_v34 = vpack.c.bf16 %v732_v23, %v731_v32 }
 0x133   :  { %v272_v22 = vadd.f32 %v1642_v24, %v249_v25  ;;  %v271_v27 = vadd.f32 %v1642_v24, %v248_v26  ;;  %1116 = vmatprep.mubr.msk.f32.mxu1 %vm298_vm0, %v285_v21  ;;  %v1214_v24 = vpack.c.bf16 %v734_v36, %v733_v35  ;;  %v735_v25 = vld [vmem:[#allocation12 + $0x30] sm:$0xff]  ;;  %v736_v26 = vld [vmem:[#allocation12 + $0x38] sm:$0xff] }
 0x134   :  { %1117 = vmatmul.mubr.msk.f32.gmra.mrb[4].mxu1 %vm298_vm0, %v286_v20  ;;  %1211 = vmatprep.subr.bf16.mxu0 %v1210_v34 }
 0x135   :  { %v288_v28 = vmax.f32 %v272_v22, 0.0  ;;  %v287_v29 = vmax.f32 %v271_v27, 0.0  ;;  %1213 = vmatpush3.bf16.msra.mxu0 %v1210_v34  ;;  %v1218_v22 = vpack.c.bf16 %v736_v26, %v735_v25  ;;  %v998_v27 = vld [vmem:[#allocation10] ss:$0 sm:$0xff] }
 0x136   :  { %1215 = vmatprep.subr.bf16.mxu0 %v1214_v24 }
 0x137   :  { %1119 = vmatprep.mubr.msk.f32.mxu1 %vm298_vm0, %v287_v29 }
 0x138   :  { %1120 = vmatmul.mubr.msk.f32.gmra.mrb[6].mxu1 %vm298_vm0, %v288_v28 }
 0x139   :  { %1217 = vmatpush3.bf16.msra.mxu0 %v1214_v24 }
 0x13a   :  { %1219 = vmatprep.subr.bf16.mxu0 %v1218_v22 }
 0x13d   :  { %1221 = vmatpush3.bf16.msra.mxu0 %v1218_v22 }
 0x1f2   :  { %v1100_v38 = vpop.f32.mrb[0].mxu0 }
 0x1f3   :  { %v419_v39 = vadd.f32 %v1100_v38, %v981_v37  ;;  %v413_v40 = vpop.f32.mrb[1].mxu0 }
 0x1f4   :  { %v414_v41 = vadd.f32 %v981_v37, %v413_v40 }
 0x1f5   :  { %v493_v44 = vmax.f32 %v419_v39, 0.0 }
 0x1f6   :  { %v492_v42 = vmax.f32 %v414_v41, 0.0  ;;  %v1103_v43 = vpop.f32.mrb[2].mxu0 }
 0x1f7   :  { %v429_v45 = vadd.f32 %v1103_v43, %v981_v37  ;;  %v423_v46 = vpop.f32.mrb[3].mxu0 }
 0x1f8   :  { %v424_v47 = vadd.f32 %v981_v37, %v423_v46  ;;  %1130 = vmatprep.mubr.msk.f32.mxu1 %vm519_vm1, %v492_v42 }
 0x1f9   :  { %1131 = vmatmul.mubr.msk.f32.vlgmr.msra.gmra.mrb[8].mxu1 %vm519_vm1, %v493_v44  ;;  %v495_v50 = vmax.f32 %v429_v45, 0.0 }
 0x1fa   :  { %v494_v48 = vmax.f32 %v424_v47, 0.0  ;;  %v1106_v49 = vpop.f32.mrb[4].mxu0 }
 0x1fb   :  { %v439_v51 = vadd.f32 %v1106_v49, %v981_v37  ;;  %v433_v52 = vpop.f32.mrb[5].mxu0 }
 0x1fc   :  { %v434_v53 = vadd.f32 %v981_v37, %v433_v52  ;;  %1133 = vmatprep.mubr.msk.f32.mxu1 %vm519_vm1, %v494_v48 }
 0x1fd   :  { %1134 = vmatmul.mubr.msk.f32.gmra.mrb[10].mxu1 %vm519_vm1, %v495_v50  ;;  %v497_v56 = vmax.f32 %v439_v51, 0.0 }
 0x1fe   :  { %v496_v54 = vmax.f32 %v434_v53, 0.0  ;;  %v1109_v55 = vpop.f32.mrb[6].mxu0 }
 0x1ff   :  { %v449_v57 = vadd.f32 %v1109_v55, %v981_v37  ;;  %v443_v58 = vpop.f32.mrb[7].mxu0  ;;  %v1112_v59 = vpop.f32.mrb[0].mxu1 }
 0x200   :  { %v444_v60 = vadd.f32 %v981_v37, %v443_v58  ;;  %v453_v61 = vpop.f32.mrb[1].mxu1  ;;  %1136 = vmatprep.mubr.msk.f32.mxu1 %vm519_vm1, %v496_v54  ;;  %v459_v1 = vadd.f32 %v1112_v59, %v981_v37 }
 0x201   :  { %v454_v62 = vadd.f32 %v981_v37, %v453_v61  ;;  %1137 = vmatmul.mubr.msk.f32.gmra.mrb[12].mxu1 %vm519_vm1, %v497_v56  ;;  %v499_v0 = vmax.f32 %v449_v57, 0.0 }
 0x202   :  { %v498_v63 = vmax.f32 %v444_v60, 0.0  ;;  %v501_v6 = vmax.f32 %v459_v1, 0.0 }
 0x203   :  { %v500_v2 = vmax.f32 %v454_v62, 0.0  ;;  %v1115_v3 = vpop.f32.mrb[2].mxu1 }
 0x204   :  { %v463_v4 = vpop.f32.mrb[3].mxu1  ;;  %1139 = vmatprep.mubr.msk.f32.mxu1 %vm519_vm1, %v498_v63  ;;  %v469_v7 = vadd.f32 %v1115_v3, %v981_v37 }
 0x205   :  { %v464_v5 = vadd.f32 %v981_v37, %v463_v4  ;;  %1140 = vmatmul.mubr.msk.f32.gmra.mrb[14].mxu1 %vm519_vm1, %v499_v0 }
 0x206   :  { %1142 = vmatprep.mubr.msk.f32.mxu1 %vm519_vm1, %v500_v2  ;;  %v503_v12 = vmax.f32 %v469_v7, 0.0 }
 0x207   :  { %v502_v8 = vmax.f32 %v464_v5, 0.0  ;;  %v1118_v9 = vpop.f32.mrb[4].mxu1 }
 0x208   :  { %v473_v10 = vpop.f32.mrb[5].mxu1  ;;  %v479_v13 = vadd.f32 %v1118_v9, %v981_v37 }
 0x209   :  { %v474_v11 = vadd.f32 %v981_v37, %v473_v10  ;;  %1143 = vmatmul.mubr.msk.f32.gmra.mrb[16].mxu1 %vm519_vm1, %v501_v6  ;;  %v1015_v10 = vld [vmem:[#allocation13] ss:$0 sm:$0xff] }
 0x20a   :  { %1145 = vmatprep.mubr.msk.f32.mxu1 %vm519_vm1, %v502_v8  ;;  %v505_v18 = vmax.f32 %v479_v13, 0.0 }
 0x20b   :  { %v504_v14 = vmax.f32 %v474_v11, 0.0  ;;  %v1121_v15 = vpop.f32.mrb[6].mxu1 }
 0x20c   :  { %v483_v16 = vpop.f32.mrb[7].mxu1  ;;  %v489_v19 = vadd.f32 %v1121_v15, %v981_v37 }
 0x20d   :  { %v484_v17 = vadd.f32 %v981_v37, %v483_v16  ;;  %1146 = vmatmul.mubr.msk.f32.gmra.mrb[18].mxu1 %vm519_vm1, %v503_v12 }
 0x20e   :  { %1148 = vmatprep.mubr.msk.f32.mxu1 %vm519_vm1, %v504_v14  ;;  %v507_v21 = vmax.f32 %v489_v19, 0.0 }
 0x20f   :  { %v506_v20 = vmax.f32 %v484_v17, 0.0 }
 0x211   :  { %1149 = vmatmul.mubr.msk.f32.gmra.mrb[20].mxu1 %vm519_vm1, %v505_v18 }
 0x212   :  { %1151 = vmatprep.mubr.msk.f32.mxu1 %vm519_vm1, %v506_v20 }
 0x215   :  { %1152 = vmatmul.mubr.msk.f32.gmra.mrb[22].mxu1 %vm519_vm1, %v507_v21 }
 0x2cc   :  { %v1132_v28 = vpop.f32.mrb[8].mxu1 }
 0x2cd   :  { %v640_v29 = vadd.f32 %v1132_v28, %v998_v27  ;;  %v634_v30 = vpop.f32.mrb[9].mxu1 }
 0x2ce   :  { %v635_v31 = vadd.f32 %v998_v27, %v634_v30 }
 0x2cf   :  { %v714_v23 = vmax.f32 %v640_v29, 0.0 }
 0x2d0   :  { %v713_v32 = vmax.f32 %v635_v31, 0.0  ;;  %v1135_v33 = vpop.f32.mrb[10].mxu1 }
 0x2d1   :  { %v650_v34 = vadd.f32 %v1135_v33, %v998_v27  ;;  %v644_v35 = vpop.f32.mrb[11].mxu1 }
 0x2d2   :  { %v645_v36 = vadd.f32 %v998_v27, %v644_v35  ;;  %1170 = vmatprep.mubr.msk.f32.mxu0 %vm744_vm2, %v713_v32 }
 0x2d3   :  { %1171 = vmatmul.mubr.msk.f32.vlgmr.msra.gmra.mrb[8].mxu0 %vm744_vm2, %v714_v23  ;;  %v716_v38 = vmax.f32 %v650_v34, 0.0 }
 0x2d4   :  { %v715_v24 = vmax.f32 %v645_v36, 0.0  ;;  %v1138_v37 = vpop.f32.mrb[12].mxu1 }
 0x2d5   :  { %v660_v39 = vadd.f32 %v1138_v37, %v998_v27  ;;  %v654_v40 = vpop.f32.mrb[13].mxu1 }
 0x2d6   :  { %v655_v41 = vadd.f32 %v998_v27, %v654_v40  ;;  %1173 = vmatprep.mubr.msk.f32.mxu0 %vm744_vm2, %v715_v24 }
 0x2d7   :  { %1174 = vmatmul.mubr.msk.f32.gmra.mrb[10].mxu0 %vm744_vm2, %v716_v38  ;;  %v718_v44 = vmax.f32 %v660_v39, 0.0 }
 0x2d8   :  { %v717_v42 = vmax.f32 %v655_v41, 0.0  ;;  %v1141_v43 = vpop.f32.mrb[14].mxu1 }
 0x2d9   :  { %v670_v45 = vadd.f32 %v1141_v43, %v998_v27  ;;  %v664_v46 = vpop.f32.mrb[15].mxu1 }
 0x2da   :  { %v665_v47 = vadd.f32 %v998_v27, %v664_v46  ;;  %1176 = vmatprep.mubr.msk.f32.mxu0 %vm744_vm2, %v717_v42 }
 0x2db   :  { %1177 = vmatmul.mubr.msk.f32.gmra.mrb[12].mxu0 %vm744_vm2, %v718_v44  ;;  %v720_v50 = vmax.f32 %v670_v45, 0.0 }
 0x2dc   :  { %v719_v48 = vmax.f32 %v665_v47, 0.0  ;;  %v1144_v49 = vpop.f32.mrb[16].mxu1 }
 0x2dd   :  { %v680_v51 = vadd.f32 %v1144_v49, %v998_v27  ;;  %v674_v52 = vpop.f32.mrb[17].mxu1 }
 0x2de   :  { %v675_v53 = vadd.f32 %v998_v27, %v674_v52  ;;  %1179 = vmatprep.mubr.msk.f32.mxu0 %vm744_vm2, %v719_v48 }
 0x2df   :  { %1180 = vmatmul.mubr.msk.f32.gmra.mrb[14].mxu0 %vm744_vm2, %v720_v50  ;;  %v722_v56 = vmax.f32 %v680_v51, 0.0 }
 0x2e0   :  { %v721_v54 = vmax.f32 %v675_v53, 0.0  ;;  %v1147_v55 = vpop.f32.mrb[18].mxu1 }
 0x2e1   :  { %v690_v57 = vadd.f32 %v1147_v55, %v998_v27  ;;  %v684_v58 = vpop.f32.mrb[19].mxu1 }
 0x2e2   :  { %v685_v59 = vadd.f32 %v998_v27, %v684_v58  ;;  %1182 = vmatprep.mubr.msk.f32.mxu0 %vm744_vm2, %v721_v54 }
 0x2e3   :  { %1183 = vmatmul.mubr.msk.f32.gmra.mrb[16].mxu0 %vm744_vm2, %v722_v56  ;;  %v724_v62 = vmax.f32 %v690_v57, 0.0 }
 0x2e4   :  { %v723_v60 = vmax.f32 %v685_v59, 0.0  ;;  %v1150_v61 = vpop.f32.mrb[20].mxu1 }
 0x2e5   :  { %v700_v63 = vadd.f32 %v1150_v61, %v998_v27  ;;  %v694_v0 = vpop.f32.mrb[21].mxu1 }
 0x2e6   :  { %v695_v1 = vadd.f32 %v998_v27, %v694_v0  ;;  %1185 = vmatprep.mubr.msk.f32.mxu0 %vm744_vm2, %v723_v60 }
 0x2e7   :  { %1186 = vmatmul.mubr.msk.f32.gmra.mrb[18].mxu0 %vm744_vm2, %v724_v62  ;;  %v726_v4 = vmax.f32 %v700_v63, 0.0 }
 0x2e8   :  { %v725_v2 = vmax.f32 %v695_v1, 0.0  ;;  %v1153_v3 = vpop.f32.mrb[22].mxu1 }
 0x2e9   :  { %v710_v5 = vadd.f32 %v1153_v3, %v998_v27  ;;  %v704_v6 = vpop.f32.mrb[23].mxu1 }
 0x2ea   :  { %v705_v7 = vadd.f32 %v998_v27, %v704_v6  ;;  %1188 = vmatprep.mubr.msk.f32.mxu0 %vm744_vm2, %v725_v2 }
 0x2eb   :  { %1189 = vmatmul.mubr.msk.f32.gmra.mrb[20].mxu0 %vm744_vm2, %v726_v4  ;;  %v728_v9 = vmax.f32 %v710_v5, 0.0 }
 0x2ec   :  { %v727_v8 = vmax.f32 %v705_v7, 0.0 }
 0x2ee   :  { %1191 = vmatprep.mubr.msk.f32.mxu0 %vm744_vm2, %v727_v8 }
 0x2ef   :  { %1192 = vmatmul.mubr.msk.f32.gmra.mrb[22].mxu0 %vm744_vm2, %v728_v9 }
 0x3a6   :  { %v1172_v11 = vpop.f32.mrb[8].mxu0 }
 0x3a7   :  { %v865_v12 = vadd.f32 %v1172_v11, %v1015_v10  ;;  %v859_v13 = vpop.f32.mrb[9].mxu0 }
 0x3a8   :  { %v860_v14 = vadd.f32 %v1015_v10, %v859_v13 }
 0x3a9   :  { %v939_v15 = vmax.f32 %v865_v12, 0.0 }
 0x3aa   :  { %v938_v16 = vmax.f32 %v860_v14, 0.0  ;;  %v1175_v17 = vpop.f32.mrb[10].mxu0 }
 0x3ab   :  { %955 = vst.msk [vmem:[%s1798_s9 + $0x8] sm:$0xff] %vm744_vm2, %v939_v15  ;;  %v875_v18 = vadd.f32 %v1175_v17, %v1015_v10  ;;  %v869_v19 = vpop.f32.mrb[11].mxu0 }
 0x3ac   :  { %954 = vst.msk [vmem:[%s1798_s9] sm:$0xff] %vm744_vm2, %v938_v16  ;;  %v870_v20 = vadd.f32 %v1015_v10, %v869_v19 }
 0x3ad   :  { %v941_v21 = vmax.f32 %v875_v18, 0.0 }
 0x3ae   :  { %v940_v25 = vmax.f32 %v870_v20, 0.0  ;;  %v1178_v26 = vpop.f32.mrb[12].mxu0 }
 0x3af   :  { %957 = vst.msk [vmem:[%s1798_s9 + $0x18] sm:$0xff] %vm744_vm2, %v941_v21  ;;  %v885_v22 = vadd.f32 %v1178_v26, %v1015_v10  ;;  %v879_v27 = vpop.f32.mrb[13].mxu0 }
 0x3b0   :  { %956 = vst.msk [vmem:[%s1798_s9 + $0x10] sm:$0xff] %vm744_vm2, %v940_v25  ;;  %v880_v28 = vadd.f32 %v1015_v10, %v879_v27 }
 0x3b1   :  { %v943_v29 = vmax.f32 %v885_v22, 0.0 }
 0x3b2   :  { %v942_v30 = vmax.f32 %v880_v28, 0.0  ;;  %v1181_v31 = vpop.f32.mrb[14].mxu0 }
 0x3b3   :  { %959 = vst.msk [vmem:[%s1798_s9 + $0x28] sm:$0xff] %vm744_vm2, %v943_v29  ;;  %v895_v32 = vadd.f32 %v1181_v31, %v1015_v10  ;;  %v889_v33 = vpop.f32.mrb[15].mxu0 }
 0x3b4   :  { %958 = vst.msk [vmem:[%s1798_s9 + $0x20] sm:$0xff] %vm744_vm2, %v942_v30  ;;  %v890_v23 = vadd.f32 %v1015_v10, %v889_v33 }
 0x3b5   :  { %v945_v34 = vmax.f32 %v895_v32, 0.0 }
 0x3b6   :  { %v944_v35 = vmax.f32 %v890_v23, 0.0  ;;  %v1184_v36 = vpop.f32.mrb[16].mxu0 }
 0x3b7   :  { %961 = vst.msk [vmem:[%s1798_s9 + $0x38] sm:$0xff] %vm744_vm2, %v945_v34  ;;  %v905_v24 = vadd.f32 %v1184_v36, %v1015_v10  ;;  %v899_v37 = vpop.f32.mrb[17].mxu0 }
 0x3b8   :  { %960 = vst.msk [vmem:[%s1798_s9 + $0x30] sm:$0xff] %vm744_vm2, %v944_v35  ;;  %v900_v38 = vadd.f32 %v1015_v10, %v899_v37 }
 0x3b9   :  { %v947_v39 = vmax.f32 %v905_v24, 0.0 }
 0x3ba   :  { %v946_v40 = vmax.f32 %v900_v38, 0.0  ;;  %v1187_v41 = vpop.f32.mrb[18].mxu0 }
 0x3bb   :  { %963 = vst.msk [vmem:[%s1798_s9 + $0x48] sm:$0xff] %vm744_vm2, %v947_v39  ;;  %v915_v42 = vadd.f32 %v1187_v41, %v1015_v10  ;;  %v909_v43 = vpop.f32.mrb[19].mxu0 }
 0x3bc   :  { %962 = vst.msk [vmem:[%s1798_s9 + $0x40] sm:$0xff] %vm744_vm2, %v946_v40  ;;  %v910_v44 = vadd.f32 %v1015_v10, %v909_v43 }
 0x3bd   :  { %v949_v45 = vmax.f32 %v915_v42, 0.0 }
 0x3be   :  { %v948_v46 = vmax.f32 %v910_v44, 0.0  ;;  %v1190_v47 = vpop.f32.mrb[20].mxu0 }
 0x3bf   :  { %965 = vst.msk [vmem:[%s1798_s9 + $0x58] sm:$0xff] %vm744_vm2, %v949_v45  ;;  %v925_v48 = vadd.f32 %v1190_v47, %v1015_v10  ;;  %v919_v49 = vpop.f32.mrb[21].mxu0 }
 0x3c0   :  { %964 = vst.msk [vmem:[%s1798_s9 + $0x50] sm:$0xff] %vm744_vm2, %v948_v46  ;;  %v920_v50 = vadd.f32 %v1015_v10, %v919_v49 }
 0x3c1   :  { %v951_v51 = vmax.f32 %v925_v48, 0.0 }
 0x3c2   :  { %v950_v52 = vmax.f32 %v920_v50, 0.0  ;;  %v1193_v53 = vpop.f32.mrb[22].mxu0 }
 0x3c3   :  { %967 = vst.msk [vmem:[%s1798_s9 + $0x68] sm:$0xff] %vm744_vm2, %v951_v51  ;;  %v935_v54 = vadd.f32 %v1193_v53, %v1015_v10  ;;  %v929_v55 = vpop.f32.mrb[23].mxu0 }
 0x3c4   :  { %966 = vst.msk [vmem:[%s1798_s9 + $0x60] sm:$0xff] %vm744_vm2, %v950_v52  ;;  %v930_v56 = vadd.f32 %v1015_v10, %v929_v55 }
 0x3c5   :  { %v953_v57 = vmax.f32 %v935_v54, 0.0 }
 0x3c6   :  { %v952_v58 = vmax.f32 %v930_v56, 0.0 }
 0x3c7   :  { %969 = vst.msk [vmem:[%s1798_s9 + $0x78] sm:$0xff] %vm744_vm2, %v953_v57 }
 0x3c8   :  { %968 = vst.msk [vmem:[%s1798_s9 + $0x70] sm:$0xff] %vm744_vm2, %v952_v58 }
 0x3c9   :  { %974 = vsyncpa [#allocation3], 1 }
 0x3ca   :  { %975 = vsyncpa [#allocation5], 1 }
 0x3cb   :  { %976 = vsyncpa [#allocation8], 1 }
 0x3cc   :  { %977 = vsyncpa [#allocation11], 1 }
 0x3cd   :  { %978 = vsyncpa [#allocation14], 1 }

// kernel: mlp_forward.5
= control target key start
LH: loop header
LB: loop body
LE: loop exit
PB: predicated region body
PF: predicated region fallthrough
CT: control target
= control target key end

     0   :  { %8 = vsyncpa [#allocation4], 0  ;;  %s8448_s0 = inlined_call_operand.vmem [shape: f32[2,2048], index: 0, kind: input, shape index: {}]   ;;  %s8449_s1 = inlined_call_operand.vmem [shape: bf16[2048,1024], index: 1, kind: input, shape index: {}]   ;;  %s8450_s2 = inlined_call_operand.vmem [shape: f32[1,1024], index: 2, kind: input, shape index: {}]   ;;  %s8451_s3 = inlined_call_operand.hbm [shape: f32[2,1024], index: 3, kind: output, shape index: {}]  }
   0x1   :  { %10 = vsyncpa [#allocation4 + $0x1], 0  ;;  %s6693_s12 = smov 0   ;;  %s6695_s13 = smov 0  }
   0x2   :  { %s6697_s14 = smov 0   ;;  %s6699_s15 = smov 0  }
   0x3 LB: > { %s6714_s16 = sadd.s32 4294967295, %s6669_s15   ;;  %s5206_s17 = sadd.s32 4294967294, %s6669_s15   ;;  %s6669_s15 = sphi %s6699_s15, %s8457_s15   ;;  %s6665_s14 = sphi %s6697_s14, %s8456_s14   ;;  %s6661_s13 = sphi %s6695_s13, %s8455_s13   ;;  %s6657_s12 = sphi %s6693_s12, %s8454_s12  }
   0x4   : > { %s6718_s18 = sadd.s32 1, %s6669_s15   ;;  %s44_s19 = sadd.s32 1, %s6665_s14 }
   0x5   : > { %s41_s20 = ssub.s32 %s6669_s15, %s6718_s18  ;;  %p51_p0 = scmp.ne.s32.totalorder %s6665_s14, %s6661_s13 }
   0x6   : > { %p42_p1 = scmp.eq.s32.totalorder %s41_s20, 0  ;;  %p52_p2 = scmp.eq.s32.totalorder %s6669_s15, 0 }
   0x7   : > { %p107_p3 = scmp.eq.s32.totalorder %s6714_s16, 1  ;;  %p112_p4 = scmp.ne.s32.totalorder %s6661_s13, %s6657_s12 }
   0x8   : > { %s6730_s21 = scalar_select %p42_p1, %s6665_s14, %s44_s19  }
   0x9   : > { %p53_p5 = por %p52_p2, %p51_p0  ;;  %p6732_p6 = por %p107_p3, %p51_p0 }
   0xa   : > { %p113_p7 = scmp.eq.s32.totalorder %s5206_s17, 1  ;;  %p5208_p9 = scmp.ge.s32.totalorder %s6669_s15, 2 }
   0xc   : > { %p6736_p8 = por %p113_p7, %p112_p4  ;;  %132 = sbr.rel (%p5208_p9) target bundleno = 279 (0x117), region = 20 }
  0x13   : > { %135 = sbr.rel (!%p53_p5) target bundleno = 279 (0x117), region = 24  ;;  %s137_s24 = sand.u32 (%p53_p5), 1, %s6665_s14  }
  0x14   : > { %s5733_s25 = sshll.u32 (%p53_p5), %s6669_s15, 4  ;;  %s5209_s26 = sshll.u32 (%p53_p5), %s137_s24, 12 }
  0x15   : > { %s6748_s29 = scalar_lea.vmem (%p53_p5), %s8449_s1, %s5733_s25  ;;  %s6753_s30 = scalar_lea.vmem (%p53_p5), [#allocation2], %s5209_s26 }
  0x16   : > { %v155_v0 = vld [vmem:[%s6748_s29] sm:$0xff] (%p53_p5)  ;;  %v157_v1 = vld [vmem:[%s6748_s29 + $0x8] sm:$0xff] (%p53_p5) }
  0x17   : > { %v159_v2 = vld [vmem:[%s6748_s29 + $0x20] sm:$0xff] (%p53_p5)  ;;  %156 = vst [vmem:[%s6753_s30] sm:$0xff] (%p53_p5), %v155_v0  ;;  %158 = vst [vmem:[%s6753_s30 + $0x8] sm:$0xff] (%p53_p5), %v157_v1  ;;  %v161_v3 = vld [vmem:[%s6748_s29 + $0x28] sm:$0xff] (%p53_p5) }
  0x18   : > { %160 = vst [vmem:[%s6753_s30 + $0x10] sm:$0xff] (%p53_p5), %v159_v2  ;;  %v163_v4 = vld [vmem:[%s6748_s29 + $0x40] sm:$0xff] (%p53_p5)  ;;  %v165_v5 = vld [vmem:[%s6748_s29 + $0x48] sm:$0xff] (%p53_p5)  ;;  %162 = vst [vmem:[%s6753_s30 + $0x18] sm:$0xff] (%p53_p5), %v161_v3 }
  0x19   : > { %164 = vst [vmem:[%s6753_s30 + $0x20] sm:$0xff] (%p53_p5), %v163_v4  ;;  %166 = vst [vmem:[%s6753_s30 + $0x28] sm:$0xff] (%p53_p5), %v165_v5  ;;  %v167_v6 = vld [vmem:[%s6748_s29 + $0x60] sm:$0xff] (%p53_p5)  ;;  %v169_v7 = vld [vmem:[%s6748_s29 + $0x68] sm:$0xff] (%p53_p5) }
  0x1a   : > { %v171_v8 = vld [vmem:[%s6748_s29 + $0x80] sm:$0xff]  ;;  %168 = vst [vmem:[%s6753_s30 + $0x30] sm:$0xff] %v167_v6  ;;  %170 = vst [vmem:[%s6753_s30 + $0x38] sm:$0xff] %v169_v7  ;;  %v173_v9 = vld [vmem:[%s6748_s29 + $0x88] sm:$0xff] }
  0x1b   : > { %172 = vst [vmem:[%s6753_s30 + $0x40] sm:$0xff] %v171_v8  ;;  %v175_v10 = vld [vmem:[%s6748_s29 + $0xa0] sm:$0xff]  ;;  %v177_v11 = vld [vmem:[%s6748_s29 + $0xa8] sm:$0xff]  ;;  %174 = vst [vmem:[%s6753_s30 + $0x48] sm:$0xff] %v173_v9 }
  0x1c   : > { %176 = vst [vmem:[%s6753_s30 + $0x50] sm:$0xff] %v175_v10  ;;  %178 = vst [vmem:[%s6753_s30 + $0x58] sm:$0xff] %v177_v11  ;;  %v179_v12 = vld [vmem:[%s6748_s29 + $0xc0] sm:$0xff]  ;;  %v181_v13 = vld [vmem:[%s6748_s29 + $0xc8] sm:$0xff] }
  0x1d   : > { %v183_v14 = vld [vmem:[%s6748_s29 + $0xe0] sm:$0xff]  ;;  %180 = vst [vmem:[%s6753_s30 + $0x60] sm:$0xff] %v179_v12  ;;  %182 = vst [vmem:[%s6753_s30 + $0x68] sm:$0xff] %v181_v13  ;;  %v185_v15 = vld [vmem:[%s6748_s29 + $0xe8] sm:$0xff] }
  0x1e   : > { %184 = vst [vmem:[%s6753_s30 + $0x70] sm:$0xff] %v183_v14  ;;  %v187_v16 = vld [vmem:[%s6748_s29 + $0x100] sm:$0xff]  ;;  %v189_v17 = vld [vmem:[%s6748_s29 + $0x108] sm:$0xff]  ;;  %186 = vst [vmem:[%s6753_s30 + $0x78] sm:$0xff] %v185_v15 }
  0x1f   : > { %188 = vst [vmem:[%s6753_s30 + $0x80] sm:$0xff] %v187_v16  ;;  %190 = vst [vmem:[%s6753_s30 + $0x88] sm:$0xff] %v189_v17  ;;  %v191_v18 = vld [vmem:[%s6748_s29 + $0x120] sm:$0xff]  ;;  %v193_v19 = vld [vmem:[%s6748_s29 + $0x128] sm:$0xff] }
  0x20   : > { %v195_v20 = vld [vmem:[%s6748_s29 + $0x140] sm:$0xff]  ;;  %192 = vst [vmem:[%s6753_s30 + $0x90] sm:$0xff] %v191_v18  ;;  %194 = vst [vmem:[%s6753_s30 + $0x98] sm:$0xff] %v193_v19  ;;  %v197_v21 = vld [vmem:[%s6748_s29 + $0x148] sm:$0xff] }
  0x21   : > { %196 = vst [vmem:[%s6753_s30 + $0xa0] sm:$0xff] %v195_v20  ;;  %v199_v22 = vld [vmem:[%s6748_s29 + $0x160] sm:$0xff]  ;;  %v201_v23 = vld [vmem:[%s6748_s29 + $0x168] sm:$0xff]  ;;  %198 = vst [vmem:[%s6753_s30 + $0xa8] sm:$0xff] %v197_v21 }
  0x22   : > { %200 = vst [vmem:[%s6753_s30 + $0xb0] sm:$0xff] %v199_v22  ;;  %202 = vst [vmem:[%s6753_s30 + $0xb8] sm:$0xff] %v201_v23  ;;  %v203_v24 = vld [vmem:[%s6748_s29 + $0x180] sm:$0xff]  ;;  %v205_v25 = vld [vmem:[%s6748_s29 + $0x188] sm:$0xff] }
  0x23   : > { %v207_v26 = vld [vmem:[%s6748_s29 + $0x1a0] sm:$0xff]  ;;  %204 = vst [vmem:[%s6753_s30 + $0xc0] sm:$0xff] %v203_v24  ;;  %206 = vst [vmem:[%s6753_s30 + $0xc8] sm:$0xff] %v205_v25  ;;  %v209_v27 = vld [vmem:[%s6748_s29 + $0x1a8] sm:$0xff] }
  0x24   : > { %208 = vst [vmem:[%s6753_s30 + $0xd0] sm:$0xff] %v207_v26  ;;  %v211_v28 = vld [vmem:[%s6748_s29 + $0x1c0] sm:$0xff]  ;;  %v213_v29 = vld [vmem:[%s6748_s29 + $0x1c8] sm:$0xff]  ;;  %210 = vst [vmem:[%s6753_s30 + $0xd8] sm:$0xff] %v209_v27 }
  0x25   : > { %212 = vst [vmem:[%s6753_s30 + $0xe0] sm:$0xff] %v211_v28  ;;  %214 = vst [vmem:[%s6753_s30 + $0xe8] sm:$0xff] %v213_v29  ;;  %v215_v30 = vld [vmem:[%s6748_s29 + $0x1e0] sm:$0xff]  ;;  %v217_v31 = vld [vmem:[%s6748_s29 + $0x1e8] sm:$0xff] }
  0x26   : > { %v219_v32 = vld [vmem:[%s6748_s29 + $0x200] sm:$0xff]  ;;  %216 = vst [vmem:[%s6753_s30 + $0xf0] sm:$0xff] %v215_v30  ;;  %218 = vst [vmem:[%s6753_s30 + $0xf8] sm:$0xff] %v217_v31  ;;  %v221_v33 = vld [vmem:[%s6748_s29 + $0x208] sm:$0xff] }
  0x27   : > { %220 = vst [vmem:[%s6753_s30 + $0x100] sm:$0xff] %v219_v32  ;;  %v223_v34 = vld [vmem:[%s6748_s29 + $0x220] sm:$0xff]  ;;  %v225_v35 = vld [vmem:[%s6748_s29 + $0x228] sm:$0xff]  ;;  %222 = vst [vmem:[%s6753_s30 + $0x108] sm:$0xff] %v221_v33 }
  0x28   : > { %224 = vst [vmem:[%s6753_s30 + $0x110] sm:$0xff] %v223_v34  ;;  %226 = vst [vmem:[%s6753_s30 + $0x118] sm:$0xff] %v225_v35  ;;  %v227_v36 = vld [vmem:[%s6748_s29 + $0x240] sm:$0xff]  ;;  %v229_v37 = vld [vmem:[%s6748_s29 + $0x248] sm:$0xff] }
  0x29   : > { %v231_v38 = vld [vmem:[%s6748_s29 + $0x260] sm:$0xff]  ;;  %228 = vst [vmem:[%s6753_s30 + $0x120] sm:$0xff] %v227_v36  ;;  %230 = vst [vmem:[%s6753_s30 + $0x128] sm:$0xff] %v229_v37  ;;  %v233_v39 = vld [vmem:[%s6748_s29 + $0x268] sm:$0xff] }
  0x2a   : > { %232 = vst [vmem:[%s6753_s30 + $0x130] sm:$0xff] %v231_v38  ;;  %v235_v40 = vld [vmem:[%s6748_s29 + $0x280] sm:$0xff]  ;;  %v237_v41 = vld [vmem:[%s6748_s29 + $0x288] sm:$0xff]  ;;  %234 = vst [vmem:[%s6753_s30 + $0x138] sm:$0xff] %v233_v39 }
  0x2b   : > { %236 = vst [vmem:[%s6753_s30 + $0x140] sm:$0xff] %v235_v40  ;;  %238 = vst [vmem:[%s6753_s30 + $0x148] sm:$0xff] %v237_v41  ;;  %v239_v42 = vld [vmem:[%s6748_s29 + $0x2a0] sm:$0xff]  ;;  %v241_v43 = vld [vmem:[%s6748_s29 + $0x2a8] sm:$0xff] }
  0x2c   : > { %v243_v44 = vld [vmem:[%s6748_s29 + $0x2c0] sm:$0xff]  ;;  %240 = vst [vmem:[%s6753_s30 + $0x150] sm:$0xff] %v239_v42  ;;  %242 = vst [vmem:[%s6753_s30 + $0x158] sm:$0xff] %v241_v43  ;;  %v245_v45 = vld [vmem:[%s6748_s29 + $0x2c8] sm:$0xff] }
  0x2d   : > { %244 = vst [vmem:[%s6753_s30 + $0x160] sm:$0xff] %v243_v44  ;;  %v247_v46 = vld [vmem:[%s6748_s29 + $0x2e0] sm:$0xff]  ;;  %v249_v47 = vld [vmem:[%s6748_s29 + $0x2e8] sm:$0xff]  ;;  %246 = vst [vmem:[%s6753_s30 + $0x168] sm:$0xff] %v245_v45 }
  0x2e   : > { %248 = vst [vmem:[%s6753_s30 + $0x170] sm:$0xff] %v247_v46  ;;  %250 = vst [vmem:[%s6753_s30 + $0x178] sm:$0xff] %v249_v47  ;;  %v251_v48 = vld [vmem:[%s6748_s29 + $0x300] sm:$0xff]  ;;  %v253_v49 = vld [vmem:[%s6748_s29 + $0x308] sm:$0xff] }
  0x2f   : > { %v255_v50 = vld [vmem:[%s6748_s29 + $0x320] sm:$0xff]  ;;  %252 = vst [vmem:[%s6753_s30 + $0x180] sm:$0xff] %v251_v48  ;;  %254 = vst [vmem:[%s6753_s30 + $0x188] sm:$0xff] %v253_v49  ;;  %v257_v51 = vld [vmem:[%s6748_s29 + $0x328] sm:$0xff] }
  0x30   : > { %256 = vst [vmem:[%s6753_s30 + $0x190] sm:$0xff] %v255_v50  ;;  %v259_v52 = vld [vmem:[%s6748_s29 + $0x340] sm:$0xff]  ;;  %v261_v53 = vld [vmem:[%s6748_s29 + $0x348] sm:$0xff]  ;;  %258 = vst [vmem:[%s6753_s30 + $0x198] sm:$0xff] %v257_v51 }
  0x31   : > { %260 = vst [vmem:[%s6753_s30 + $0x1a0] sm:$0xff] %v259_v52  ;;  %262 = vst [vmem:[%s6753_s30 + $0x1a8] sm:$0xff] %v261_v53  ;;  %v263_v54 = vld [vmem:[%s6748_s29 + $0x360] sm:$0xff]  ;;  %v265_v55 = vld [vmem:[%s6748_s29 + $0x368] sm:$0xff] }
  0x32   : > { %v267_v56 = vld [vmem:[%s6748_s29 + $0x380] sm:$0xff]  ;;  %264 = vst [vmem:[%s6753_s30 + $0x1b0] sm:$0xff] %v263_v54  ;;  %266 = vst [vmem:[%s6753_s30 + $0x1b8] sm:$0xff] %v265_v55  ;;  %v269_v57 = vld [vmem:[%s6748_s29 + $0x388] sm:$0xff] }
  0x33   : > { %268 = vst [vmem:[%s6753_s30 + $0x1c0] sm:$0xff] %v267_v56  ;;  %v271_v58 = vld [vmem:[%s6748_s29 + $0x3a0] sm:$0xff]  ;;  %v273_v59 = vld [vmem:[%s6748_s29 + $0x3a8] sm:$0xff]  ;;  %270 = vst [vmem:[%s6753_s30 + $0x1c8] sm:$0xff] %v269_v57 }
  0x34   : > { %272 = vst [vmem:[%s6753_s30 + $0x1d0] sm:$0xff] %v271_v58  ;;  %274 = vst [vmem:[%s6753_s30 + $0x1d8] sm:$0xff] %v273_v59  ;;  %v275_v60 = vld [vmem:[%s6748_s29 + $0x3c0] sm:$0xff]  ;;  %v277_v61 = vld [vmem:[%s6748_s29 + $0x3c8] sm:$0xff] }
  0x35   : > { %v279_v62 = vld [vmem:[%s6748_s29 + $0x3e0] sm:$0xff]  ;;  %276 = vst [vmem:[%s6753_s30 + $0x1e0] sm:$0xff] %v275_v60  ;;  %278 = vst [vmem:[%s6753_s30 + $0x1e8] sm:$0xff] %v277_v61  ;;  %v281_v63 = vld [vmem:[%s6748_s29 + $0x3e8] sm:$0xff] }
  0x36   : > { %280 = vst [vmem:[%s6753_s30 + $0x1f0] sm:$0xff] %v279_v62  ;;  %v283_v0 = vld [vmem:[%s6748_s29 + $0x400] sm:$0xff]  ;;  %v285_v1 = vld [vmem:[%s6748_s29 + $0x408] sm:$0xff]  ;;  %282 = vst [vmem:[%s6753_s30 + $0x1f8] sm:$0xff] %v281_v63 }
  0x37   : > { %284 = vst [vmem:[%s6753_s30 + $0x200] sm:$0xff] %v283_v0  ;;  %286 = vst [vmem:[%s6753_s30 + $0x208] sm:$0xff] %v285_v1  ;;  %v287_v2 = vld [vmem:[%s6748_s29 + $0x420] sm:$0xff]  ;;  %v289_v3 = vld [vmem:[%s6748_s29 + $0x428] sm:$0xff] }
  0x38   : > { %v291_v4 = vld [vmem:[%s6748_s29 + $0x440] sm:$0xff]  ;;  %288 = vst [vmem:[%s6753_s30 + $0x210] sm:$0xff] %v287_v2  ;;  %290 = vst [vmem:[%s6753_s30 + $0x218] sm:$0xff] %v289_v3  ;;  %v293_v5 = vld [vmem:[%s6748_s29 + $0x448] sm:$0xff] }
  0x39   : > { %292 = vst [vmem:[%s6753_s30 + $0x220] sm:$0xff] %v291_v4  ;;  %v295_v6 = vld [vmem:[%s6748_s29 + $0x460] sm:$0xff]  ;;  %v297_v7 = vld [vmem:[%s6748_s29 + $0x468] sm:$0xff]  ;;  %294 = vst [vmem:[%s6753_s30 + $0x228] sm:$0xff] %v293_v5 }
  0x3a   : > { %296 = vst [vmem:[%s6753_s30 + $0x230] sm:$0xff] %v295_v6  ;;  %298 = vst [vmem:[%s6753_s30 + $0x238] sm:$0xff] %v297_v7  ;;  %v299_v8 = vld [vmem:[%s6748_s29 + $0x480] sm:$0xff]  ;;  %v301_v9 = vld [vmem:[%s6748_s29 + $0x488] sm:$0xff] }
  0x3b   : > { %v303_v10 = vld [vmem:[%s6748_s29 + $0x4a0] sm:$0xff]  ;;  %300 = vst [vmem:[%s6753_s30 + $0x240] sm:$0xff] %v299_v8  ;;  %302 = vst [vmem:[%s6753_s30 + $0x248] sm:$0xff] %v301_v9  ;;  %v305_v11 = vld [vmem:[%s6748_s29 + $0x4a8] sm:$0xff] }
  0x3c   : > { %304 = vst [vmem:[%s6753_s30 + $0x250] sm:$0xff] %v303_v10  ;;  %v307_v12 = vld [vmem:[%s6748_s29 + $0x4c0] sm:$0xff]  ;;  %v309_v13 = vld [vmem:[%s6748_s29 + $0x4c8] sm:$0xff]  ;;  %306 = vst [vmem:[%s6753_s30 + $0x258] sm:$0xff] %v305_v11 }
  0x3d   : > { %308 = vst [vmem:[%s6753_s30 + $0x260] sm:$0xff] %v307_v12  ;;  %310 = vst [vmem:[%s6753_s30 + $0x268] sm:$0xff] %v309_v13  ;;  %v311_v14 = vld [vmem:[%s6748_s29 + $0x4e0] sm:$0xff]  ;;  %v313_v15 = vld [vmem:[%s6748_s29 + $0x4e8] sm:$0xff] }
  0x3e   : > { %v315_v16 = vld [vmem:[%s6748_s29 + $0x500] sm:$0xff]  ;;  %312 = vst [vmem:[%s6753_s30 + $0x270] sm:$0xff] %v311_v14  ;;  %314 = vst [vmem:[%s6753_s30 + $0x278] sm:$0xff] %v313_v15  ;;  %v317_v17 = vld [vmem:[%s6748_s29 + $0x508] sm:$0xff] }
  0x3f   : > { %316 = vst [vmem:[%s6753_s30 + $0x280] sm:$0xff] %v315_v16  ;;  %v319_v18 = vld [vmem:[%s6748_s29 + $0x520] sm:$0xff]  ;;  %v321_v19 = vld [vmem:[%s6748_s29 + $0x528] sm:$0xff]  ;;  %318 = vst [vmem:[%s6753_s30 + $0x288] sm:$0xff] %v317_v17 }
  0x40   : > { %320 = vst [vmem:[%s6753_s30 + $0x290] sm:$0xff] %v319_v18  ;;  %322 = vst [vmem:[%s6753_s30 + $0x298] sm:$0xff] %v321_v19  ;;  %v323_v20 = vld [vmem:[%s6748_s29 + $0x540] sm:$0xff]  ;;  %v325_v21 = vld [vmem:[%s6748_s29 + $0x548] sm:$0xff] }
  0x41   : > { %v327_v22 = vld [vmem:[%s6748_s29 + $0x560] sm:$0xff]  ;;  %324 = vst [vmem:[%s6753_s30 + $0x2a0] sm:$0xff] %v323_v20  ;;  %326 = vst [vmem:[%s6753_s30 + $0x2a8] sm:$0xff] %v325_v21  ;;  %v329_v23 = vld [vmem:[%s6748_s29 + $0x568] sm:$0xff] }
  0x42   : > { %328 = vst [vmem:[%s6753_s30 + $0x2b0] sm:$0xff] %v327_v22  ;;  %v331_v24 = vld [vmem:[%s6748_s29 + $0x580] sm:$0xff]  ;;  %v333_v25 = vld [vmem:[%s6748_s29 + $0x588] sm:$0xff]  ;;  %330 = vst [vmem:[%s6753_s30 + $0x2b8] sm:$0xff] %v329_v23 }
  0x43   : > { %332 = vst [vmem:[%s6753_s30 + $0x2c0] sm:$0xff] %v331_v24  ;;  %334 = vst [vmem:[%s6753_s30 + $0x2c8] sm:$0xff] %v333_v25  ;;  %v335_v26 = vld [vmem:[%s6748_s29 + $0x5a0] sm:$0xff]  ;;  %v337_v27 = vld [vmem:[%s6748_s29 + $0x5a8] sm:$0xff] }
  0x44   : > { %v339_v28 = vld [vmem:[%s6748_s29 + $0x5c0] sm:$0xff]  ;;  %336 = vst [vmem:[%s6753_s30 + $0x2d0] sm:$0xff] %v335_v26  ;;  %338 = vst [vmem:[%s6753_s30 + $0x2d8] sm:$0xff] %v337_v27  ;;  %v341_v29 = vld [vmem:[%s6748_s29 + $0x5c8] sm:$0xff] }
  0x45   : > { %340 = vst [vmem:[%s6753_s30 + $0x2e0] sm:$0xff] %v339_v28  ;;  %v343_v30 = vld [vmem:[%s6748_s29 + $0x5e0] sm:$0xff]  ;;  %v345_v31 = vld [vmem:[%s6748_s29 + $0x5e8] sm:$0xff]  ;;  %342 = vst [vmem:[%s6753_s30 + $0x2e8] sm:$0xff] %v341_v29 }
  0x46   : > { %344 = vst [vmem:[%s6753_s30 + $0x2f0] sm:$0xff] %v343_v30  ;;  %346 = vst [vmem:[%s6753_s30 + $0x2f8] sm:$0xff] %v345_v31  ;;  %v347_v32 = vld [vmem:[%s6748_s29 + $0x600] sm:$0xff]  ;;  %v349_v33 = vld [vmem:[%s6748_s29 + $0x608] sm:$0xff] }
  0x47   : > { %v351_v34 = vld [vmem:[%s6748_s29 + $0x620] sm:$0xff]  ;;  %348 = vst [vmem:[%s6753_s30 + $0x300] sm:$0xff] %v347_v32  ;;  %350 = vst [vmem:[%s6753_s30 + $0x308] sm:$0xff] %v349_v33  ;;  %v353_v35 = vld [vmem:[%s6748_s29 + $0x628] sm:$0xff] }
  0x48   : > { %352 = vst [vmem:[%s6753_s30 + $0x310] sm:$0xff] %v351_v34  ;;  %v355_v36 = vld [vmem:[%s6748_s29 + $0x640] sm:$0xff]  ;;  %v357_v37 = vld [vmem:[%s6748_s29 + $0x648] sm:$0xff]  ;;  %354 = vst [vmem:[%s6753_s30 + $0x318] sm:$0xff] %v353_v35 }
  0x49   : > { %356 = vst [vmem:[%s6753_s30 + $0x320] sm:$0xff] %v355_v36  ;;  %358 = vst [vmem:[%s6753_s30 + $0x328] sm:$0xff] %v357_v37  ;;  %v359_v38 = vld [vmem:[%s6748_s29 + $0x660] sm:$0xff]  ;;  %v361_v39 = vld [vmem:[%s6748_s29 + $0x668] sm:$0xff] }
  0x4a   : > { %v363_v40 = vld [vmem:[%s6748_s29 + $0x680] sm:$0xff]  ;;  %360 = vst [vmem:[%s6753_s30 + $0x330] sm:$0xff] %v359_v38  ;;  %362 = vst [vmem:[%s6753_s30 + $0x338] sm:$0xff] %v361_v39  ;;  %v365_v41 = vld [vmem:[%s6748_s29 + $0x688] sm:$0xff] }
  0x4b   : > { %364 = vst [vmem:[%s6753_s30 + $0x340] sm:$0xff] %v363_v40  ;;  %v367_v42 = vld [vmem:[%s6748_s29 + $0x6a0] sm:$0xff]  ;;  %v369_v43 = vld [vmem:[%s6748_s29 + $0x6a8] sm:$0xff]  ;;  %366 = vst [vmem:[%s6753_s30 + $0x348] sm:$0xff] %v365_v41 }
  0x4c   : > { %368 = vst [vmem:[%s6753_s30 + $0x350] sm:$0xff] %v367_v42  ;;  %370 = vst [vmem:[%s6753_s30 + $0x358] sm:$0xff] %v369_v43  ;;  %v371_v44 = vld [vmem:[%s6748_s29 + $0x6c0] sm:$0xff]  ;;  %v373_v45 = vld [vmem:[%s6748_s29 + $0x6c8] sm:$0xff] }
  0x4d   : > { %v375_v46 = vld [vmem:[%s6748_s29 + $0x6e0] sm:$0xff]  ;;  %372 = vst [vmem:[%s6753_s30 + $0x360] sm:$0xff] %v371_v44  ;;  %374 = vst [vmem:[%s6753_s30 + $0x368] sm:$0xff] %v373_v45  ;;  %v377_v47 = vld [vmem:[%s6748_s29 + $0x6e8] sm:$0xff] }
  0x4e   : > { %376 = vst [vmem:[%s6753_s30 + $0x370] sm:$0xff] %v375_v46  ;;  %v379_v48 = vld [vmem:[%s6748_s29 + $0x700] sm:$0xff]  ;;  %v381_v49 = vld [vmem:[%s6748_s29 + $0x708] sm:$0xff]  ;;  %378 = vst [vmem:[%s6753_s30 + $0x378] sm:$0xff] %v377_v47 }
  0x4f   : > { %380 = vst [vmem:[%s6753_s30 + $0x380] sm:$0xff] %v379_v48  ;;  %382 = vst [vmem:[%s6753_s30 + $0x388] sm:$0xff] %v381_v49  ;;  %v383_v50 = vld [vmem:[%s6748_s29 + $0x720] sm:$0xff]  ;;  %v385_v51 = vld [vmem:[%s6748_s29 + $0x728] sm:$0xff] }
  0x50   : > { %v387_v52 = vld [vmem:[%s6748_s29 + $0x740] sm:$0xff]  ;;  %384 = vst [vmem:[%s6753_s30 + $0x390] sm:$0xff] %v383_v50  ;;  %386 = vst [vmem:[%s6753_s30 + $0x398] sm:$0xff] %v385_v51  ;;  %v389_v53 = vld [vmem:[%s6748_s29 + $0x748] sm:$0xff] }
  0x51   : > { %388 = vst [vmem:[%s6753_s30 + $0x3a0] sm:$0xff] %v387_v52  ;;  %v391_v54 = vld [vmem:[%s6748_s29 + $0x760] sm:$0xff]  ;;  %v393_v55 = vld [vmem:[%s6748_s29 + $0x768] sm:$0xff]  ;;  %390 = vst [vmem:[%s6753_s30 + $0x3a8] sm:$0xff] %v389_v53 }
  0x52   : > { %392 = vst [vmem:[%s6753_s30 + $0x3b0] sm:$0xff] %v391_v54  ;;  %394 = vst [vmem:[%s6753_s30 + $0x3b8] sm:$0xff] %v393_v55  ;;  %v395_v56 = vld [vmem:[%s6748_s29 + $0x780] sm:$0xff]  ;;  %v397_v57 = vld [vmem:[%s6748_s29 + $0x788] sm:$0xff] }
  0x53   : > { %v399_v58 = vld [vmem:[%s6748_s29 + $0x7a0] sm:$0xff]  ;;  %396 = vst [vmem:[%s6753_s30 + $0x3c0] sm:$0xff] %v395_v56  ;;  %398 = vst [vmem:[%s6753_s30 + $0x3c8] sm:$0xff] %v397_v57  ;;  %v401_v59 = vld [vmem:[%s6748_s29 + $0x7a8] sm:$0xff] }
  0x54   : > { %400 = vst [vmem:[%s6753_s30 + $0x3d0] sm:$0xff] %v399_v58  ;;  %v403_v60 = vld [vmem:[%s6748_s29 + $0x7c0] sm:$0xff]  ;;  %v405_v61 = vld [vmem:[%s6748_s29 + $0x7c8] sm:$0xff]  ;;  %402 = vst [vmem:[%s6753_s30 + $0x3d8] sm:$0xff] %v401_v59 }
  0x55   : > { %404 = vst [vmem:[%s6753_s30 + $0x3e0] sm:$0xff] %v403_v60  ;;  %406 = vst [vmem:[%s6753_s30 + $0x3e8] sm:$0xff] %v405_v61  ;;  %v407_v62 = vld [vmem:[%s6748_s29 + $0x7e0] sm:$0xff]  ;;  %v409_v63 = vld [vmem:[%s6748_s29 + $0x7e8] sm:$0xff] }
  0x56   : > { %v411_v0 = vld [vmem:[%s6748_s29 + $0x800] sm:$0xff]  ;;  %408 = vst [vmem:[%s6753_s30 + $0x3f0] sm:$0xff] %v407_v62  ;;  %410 = vst [vmem:[%s6753_s30 + $0x3f8] sm:$0xff] %v409_v63  ;;  %v413_v1 = vld [vmem:[%s6748_s29 + $0x808] sm:$0xff] }
  0x57   : > { %412 = vst [vmem:[%s6753_s30 + $0x400] sm:$0xff] %v411_v0  ;;  %v415_v2 = vld [vmem:[%s6748_s29 + $0x820] sm:$0xff]  ;;  %v417_v3 = vld [vmem:[%s6748_s29 + $0x828] sm:$0xff]  ;;  %414 = vst [vmem:[%s6753_s30 + $0x408] sm:$0xff] %v413_v1 }
  0x58   : > { %416 = vst [vmem:[%s6753_s30 + $0x410] sm:$0xff] %v415_v2  ;;  %418 = vst [vmem:[%s6753_s30 + $0x418] sm:$0xff] %v417_v3  ;;  %v419_v4 = vld [vmem:[%s6748_s29 + $0x840] sm:$0xff]  ;;  %v421_v5 = vld [vmem:[%s6748_s29 + $0x848] sm:$0xff] }
  0x59   : > { %v423_v6 = vld [vmem:[%s6748_s29 + $0x860] sm:$0xff]  ;;  %420 = vst [vmem:[%s6753_s30 + $0x420] sm:$0xff] %v419_v4  ;;  %422 = vst [vmem:[%s6753_s30 + $0x428] sm:$0xff] %v421_v5  ;;  %v425_v7 = vld [vmem:[%s6748_s29 + $0x868] sm:$0xff] }
  0x5a   : > { %424 = vst [vmem:[%s6753_s30 + $0x430] sm:$0xff] %v423_v6  ;;  %v427_v8 = vld [vmem:[%s6748_s29 + $0x880] sm:$0xff]  ;;  %v429_v9 = vld [vmem:[%s6748_s29 + $0x888] sm:$0xff]  ;;  %426 = vst [vmem:[%s6753_s30 + $0x438] sm:$0xff] %v425_v7 }
  0x5b   : > { %428 = vst [vmem:[%s6753_s30 + $0x440] sm:$0xff] %v427_v8  ;;  %430 = vst [vmem:[%s6753_s30 + $0x448] sm:$0xff] %v429_v9  ;;  %v431_v10 = vld [vmem:[%s6748_s29 + $0x8a0] sm:$0xff]  ;;  %v433_v11 = vld [vmem:[%s6748_s29 + $0x8a8] sm:$0xff] }
  0x5c   : > { %v435_v12 = vld [vmem:[%s6748_s29 + $0x8c0] sm:$0xff]  ;;  %432 = vst [vmem:[%s6753_s30 + $0x450] sm:$0xff] %v431_v10  ;;  %434 = vst [vmem:[%s6753_s30 + $0x458] sm:$0xff] %v433_v11  ;;  %v437_v13 = vld [vmem:[%s6748_s29 + $0x8c8] sm:$0xff] }
  0x5d   : > { %436 = vst [vmem:[%s6753_s30 + $0x460] sm:$0xff] %v435_v12  ;;  %v439_v14 = vld [vmem:[%s6748_s29 + $0x8e0] sm:$0xff]  ;;  %v441_v15 = vld [vmem:[%s6748_s29 + $0x8e8] sm:$0xff]  ;;  %438 = vst [vmem:[%s6753_s30 + $0x468] sm:$0xff] %v437_v13 }
  0x5e   : > { %440 = vst [vmem:[%s6753_s30 + $0x470] sm:$0xff] %v439_v14  ;;  %442 = vst [vmem:[%s6753_s30 + $0x478] sm:$0xff] %v441_v15  ;;  %v443_v16 = vld [vmem:[%s6748_s29 + $0x900] sm:$0xff]  ;;  %v445_v17 = vld [vmem:[%s6748_s29 + $0x908] sm:$0xff] }
  0x5f   : > { %v447_v18 = vld [vmem:[%s6748_s29 + $0x920] sm:$0xff]  ;;  %444 = vst [vmem:[%s6753_s30 + $0x480] sm:$0xff] %v443_v16  ;;  %446 = vst [vmem:[%s6753_s30 + $0x488] sm:$0xff] %v445_v17  ;;  %v449_v19 = vld [vmem:[%s6748_s29 + $0x928] sm:$0xff] }
  0x60   : > { %448 = vst [vmem:[%s6753_s30 + $0x490] sm:$0xff] %v447_v18  ;;  %v451_v20 = vld [vmem:[%s6748_s29 + $0x940] sm:$0xff]  ;;  %v453_v21 = vld [vmem:[%s6748_s29 + $0x948] sm:$0xff]  ;;  %450 = vst [vmem:[%s6753_s30 + $0x498] sm:$0xff] %v449_v19 }
  0x61   : > { %452 = vst [vmem:[%s6753_s30 + $0x4a0] sm:$0xff] %v451_v20  ;;  %454 = vst [vmem:[%s6753_s30 + $0x4a8] sm:$0xff] %v453_v21  ;;  %v455_v22 = vld [vmem:[%s6748_s29 + $0x960] sm:$0xff]  ;;  %v457_v23 = vld [vmem:[%s6748_s29 + $0x968] sm:$0xff] }
  0x62   : > { %v459_v24 = vld [vmem:[%s6748_s29 + $0x980] sm:$0xff]  ;;  %456 = vst [vmem:[%s6753_s30 + $0x4b0] sm:$0xff] %v455_v22  ;;  %458 = vst [vmem:[%s6753_s30 + $0x4b8] sm:$0xff] %v457_v23  ;;  %v461_v25 = vld [vmem:[%s6748_s29 + $0x988] sm:$0xff] }
  0x63   : > { %460 = vst [vmem:[%s6753_s30 + $0x4c0] sm:$0xff] %v459_v24  ;;  %v463_v26 = vld [vmem:[%s6748_s29 + $0x9a0] sm:$0xff]  ;;  %v465_v27 = vld [vmem:[%s6748_s29 + $0x9a8] sm:$0xff]  ;;  %462 = vst [vmem:[%s6753_s30 + $0x4c8] sm:$0xff] %v461_v25 }
  0x64   : > { %464 = vst [vmem:[%s6753_s30 + $0x4d0] sm:$0xff] %v463_v26  ;;  %466 = vst [vmem:[%s6753_s30 + $0x4d8] sm:$0xff] %v465_v27  ;;  %v467_v28 = vld [vmem:[%s6748_s29 + $0x9c0] sm:$0xff]  ;;  %v469_v29 = vld [vmem:[%s6748_s29 + $0x9c8] sm:$0xff] }
  0x65   : > { %v471_v30 = vld [vmem:[%s6748_s29 + $0x9e0] sm:$0xff]  ;;  %468 = vst [vmem:[%s6753_s30 + $0x4e0] sm:$0xff] %v467_v28  ;;  %470 = vst [vmem:[%s6753_s30 + $0x4e8] sm:$0xff] %v469_v29  ;;  %v473_v31 = vld [vmem:[%s6748_s29 + $0x9e8] sm:$0xff] }
  0x66   : > { %472 = vst [vmem:[%s6753_s30 + $0x4f0] sm:$0xff] %v471_v30  ;;  %v475_v32 = vld [vmem:[%s6748_s29 + $0xa00] sm:$0xff]  ;;  %v477_v33 = vld [vmem:[%s6748_s29 + $0xa08] sm:$0xff]  ;;  %474 = vst [vmem:[%s6753_s30 + $0x4f8] sm:$0xff] %v473_v31 }
  0x67   : > { %476 = vst [vmem:[%s6753_s30 + $0x500] sm:$0xff] %v475_v32  ;;  %478 = vst [vmem:[%s6753_s30 + $0x508] sm:$0xff] %v477_v33  ;;  %v479_v34 = vld [vmem:[%s6748_s29 + $0xa20] sm:$0xff]  ;;  %v481_v35 = vld [vmem:[%s6748_s29 + $0xa28] sm:$0xff] }
  0x68   : > { %v483_v36 = vld [vmem:[%s6748_s29 + $0xa40] sm:$0xff]  ;;  %480 = vst [vmem:[%s6753_s30 + $0x510] sm:$0xff] %v479_v34  ;;  %482 = vst [vmem:[%s6753_s30 + $0x518] sm:$0xff] %v481_v35  ;;  %v485_v37 = vld [vmem:[%s6748_s29 + $0xa48] sm:$0xff] }
  0x69   : > { %484 = vst [vmem:[%s6753_s30 + $0x520] sm:$0xff] %v483_v36  ;;  %v487_v38 = vld [vmem:[%s6748_s29 + $0xa60] sm:$0xff]  ;;  %v489_v39 = vld [vmem:[%s6748_s29 + $0xa68] sm:$0xff]  ;;  %486 = vst [vmem:[%s6753_s30 + $0x528] sm:$0xff] %v485_v37 }
  0x6a   : > { %488 = vst [vmem:[%s6753_s30 + $0x530] sm:$0xff] %v487_v38  ;;  %490 = vst [vmem:[%s6753_s30 + $0x538] sm:$0xff] %v489_v39  ;;  %v491_v40 = vld [vmem:[%s6748_s29 + $0xa80] sm:$0xff]  ;;  %v493_v41 = vld [vmem:[%s6748_s29 + $0xa88] sm:$0xff] }
  0x6b   : > { %v495_v42 = vld [vmem:[%s6748_s29 + $0xaa0] sm:$0xff]  ;;  %492 = vst [vmem:[%s6753_s30 + $0x540] sm:$0xff] %v491_v40  ;;  %494 = vst [vmem:[%s6753_s30 + $0x548] sm:$0xff] %v493_v41  ;;  %v497_v43 = vld [vmem:[%s6748_s29 + $0xaa8] sm:$0xff] }
  0x6c   : > { %496 = vst [vmem:[%s6753_s30 + $0x550] sm:$0xff] %v495_v42  ;;  %v499_v44 = vld [vmem:[%s6748_s29 + $0xac0] sm:$0xff]  ;;  %v501_v45 = vld [vmem:[%s6748_s29 + $0xac8] sm:$0xff]  ;;  %498 = vst [vmem:[%s6753_s30 + $0x558] sm:$0xff] %v497_v43 }
  0x6d   : > { %500 = vst [vmem:[%s6753_s30 + $0x560] sm:$0xff] %v499_v44  ;;  %502 = vst [vmem:[%s6753_s30 + $0x568] sm:$0xff] %v501_v45  ;;  %v503_v46 = vld [vmem:[%s6748_s29 + $0xae0] sm:$0xff]  ;;  %v505_v47 = vld [vmem:[%s6748_s29 + $0xae8] sm:$0xff] }
  0x6e   : > { %v507_v48 = vld [vmem:[%s6748_s29 + $0xb00] sm:$0xff]  ;;  %504 = vst [vmem:[%s6753_s30 + $0x570] sm:$0xff] %v503_v46  ;;  %506 = vst [vmem:[%s6753_s30 + $0x578] sm:$0xff] %v505_v47  ;;  %v509_v49 = vld [vmem:[%s6748_s29 + $0xb08] sm:$0xff] }
  0x6f   : > { %508 = vst [vmem:[%s6753_s30 + $0x580] sm:$0xff] %v507_v48  ;;  %v511_v50 = vld [vmem:[%s6748_s29 + $0xb20] sm:$0xff]  ;;  %v513_v51 = vld [vmem:[%s6748_s29 + $0xb28] sm:$0xff]  ;;  %510 = vst [vmem:[%s6753_s30 + $0x588] sm:$0xff] %v509_v49 }
  0x70   : > { %512 = vst [vmem:[%s6753_s30 + $0x590] sm:$0xff] %v511_v50  ;;  %514 = vst [vmem:[%s6753_s30 + $0x598] sm:$0xff] %v513_v51  ;;  %v515_v52 = vld [vmem:[%s6748_s29 + $0xb40] sm:$0xff]  ;;  %v517_v53 = vld [vmem:[%s6748_s29 + $0xb48] sm:$0xff] }
  0x71   : > { %v519_v54 = vld [vmem:[%s6748_s29 + $0xb60] sm:$0xff]  ;;  %516 = vst [vmem:[%s6753_s30 + $0x5a0] sm:$0xff] %v515_v52  ;;  %518 = vst [vmem:[%s6753_s30 + $0x5a8] sm:$0xff] %v517_v53  ;;  %v521_v55 = vld [vmem:[%s6748_s29 + $0xb68] sm:$0xff] }
  0x72   : > { %520 = vst [vmem:[%s6753_s30 + $0x5b0] sm:$0xff] %v519_v54  ;;  %v523_v56 = vld [vmem:[%s6748_s29 + $0xb80] sm:$0xff]  ;;  %v525_v57 = vld [vmem:[%s6748_s29 + $0xb88] sm:$0xff]  ;;  %522 = vst [vmem:[%s6753_s30 + $0x5b8] sm:$0xff] %v521_v55 }
  0x73   : > { %524 = vst [vmem:[%s6753_s30 + $0x5c0] sm:$0xff] %v523_v56  ;;  %526 = vst [vmem:[%s6753_s30 + $0x5c8] sm:$0xff] %v525_v57  ;;  %v527_v58 = vld [vmem:[%s6748_s29 + $0xba0] sm:$0xff]  ;;  %v529_v59 = vld [vmem:[%s6748_s29 + $0xba8] sm:$0xff] }
  0x74   : > { %v531_v60 = vld [vmem:[%s6748_s29 + $0xbc0] sm:$0xff]  ;;  %528 = vst [vmem:[%s6753_s30 + $0x5d0] sm:$0xff] %v527_v58  ;;  %530 = vst [vmem:[%s6753_s30 + $0x5d8] sm:$0xff] %v529_v59  ;;  %v533_v61 = vld [vmem:[%s6748_s29 + $0xbc8] sm:$0xff] }
  0x75   : > { %532 = vst [vmem:[%s6753_s30 + $0x5e0] sm:$0xff] %v531_v60  ;;  %v535_v62 = vld [vmem:[%s6748_s29 + $0xbe0] sm:$0xff]  ;;  %v537_v63 = vld [vmem:[%s6748_s29 + $0xbe8] sm:$0xff]  ;;  %534 = vst [vmem:[%s6753_s30 + $0x5e8] sm:$0xff] %v533_v61 }
  0x76   : > { %536 = vst [vmem:[%s6753_s30 + $0x5f0] sm:$0xff] %v535_v62  ;;  %538 = vst [vmem:[%s6753_s30 + $0x5f8] sm:$0xff] %v537_v63  ;;  %v539_v0 = vld [vmem:[%s6748_s29 + $0xc00] sm:$0xff]  ;;  %v541_v1 = vld [vmem:[%s6748_s29 + $0xc08] sm:$0xff] }
  0x77   : > { %v543_v2 = vld [vmem:[%s6748_s29 + $0xc20] sm:$0xff]  ;;  %540 = vst [vmem:[%s6753_s30 + $0x600] sm:$0xff] %v539_v0  ;;  %542 = vst [vmem:[%s6753_s30 + $0x608] sm:$0xff] %v541_v1  ;;  %v545_v3 = vld [vmem:[%s6748_s29 + $0xc28] sm:$0xff] }
  0x78   : > { %544 = vst [vmem:[%s6753_s30 + $0x610] sm:$0xff] %v543_v2  ;;  %v547_v4 = vld [vmem:[%s6748_s29 + $0xc40] sm:$0xff]  ;;  %v549_v5 = vld [vmem:[%s6748_s29 + $0xc48] sm:$0xff]  ;;  %546 = vst [vmem:[%s6753_s30 + $0x618] sm:$0xff] %v545_v3 }
  0x79   : > { %548 = vst [vmem:[%s6753_s30 + $0x620] sm:$0xff] %v547_v4  ;;  %550 = vst [vmem:[%s6753_s30 + $0x628] sm:$0xff] %v549_v5  ;;  %v551_v6 = vld [vmem:[%s6748_s29 + $0xc60] sm:$0xff]  ;;  %v553_v7 = vld [vmem:[%s6748_s29 + $0xc68] sm:$0xff] }
  0x7a   : > { %v555_v8 = vld [vmem:[%s6748_s29 + $0xc80] sm:$0xff]  ;;  %552 = vst [vmem:[%s6753_s30 + $0x630] sm:$0xff] %v551_v6  ;;  %554 = vst [vmem:[%s6753_s30 + $0x638] sm:$0xff] %v553_v7  ;;  %v557_v9 = vld [vmem:[%s6748_s29 + $0xc88] sm:$0xff] }
  0x7b   : > { %556 = vst [vmem:[%s6753_s30 + $0x640] sm:$0xff] %v555_v8  ;;  %v559_v10 = vld [vmem:[%s6748_s29 + $0xca0] sm:$0xff]  ;;  %v561_v11 = vld [vmem:[%s6748_s29 + $0xca8] sm:$0xff]  ;;  %558 = vst [vmem:[%s6753_s30 + $0x648] sm:$0xff] %v557_v9 }
  0x7c   : > { %560 = vst [vmem:[%s6753_s30 + $0x650] sm:$0xff] %v559_v10  ;;  %562 = vst [vmem:[%s6753_s30 + $0x658] sm:$0xff] %v561_v11  ;;  %v563_v12 = vld [vmem:[%s6748_s29 + $0xcc0] sm:$0xff]  ;;  %v565_v13 = vld [vmem:[%s6748_s29 + $0xcc8] sm:$0xff] }
  0x7d   : > { %v567_v14 = vld [vmem:[%s6748_s29 + $0xce0] sm:$0xff]  ;;  %564 = vst [vmem:[%s6753_s30 + $0x660] sm:$0xff] %v563_v12  ;;  %566 = vst [vmem:[%s6753_s30 + $0x668] sm:$0xff] %v565_v13  ;;  %v569_v15 = vld [vmem:[%s6748_s29 + $0xce8] sm:$0xff] }
  0x7e   : > { %568 = vst [vmem:[%s6753_s30 + $0x670] sm:$0xff] %v567_v14  ;;  %v571_v16 = vld [vmem:[%s6748_s29 + $0xd00] sm:$0xff]  ;;  %v573_v17 = vld [vmem:[%s6748_s29 + $0xd08] sm:$0xff]  ;;  %570 = vst [vmem:[%s6753_s30 + $0x678] sm:$0xff] %v569_v15 }
  0x7f   : > { %572 = vst [vmem:[%s6753_s30 + $0x680] sm:$0xff] %v571_v16  ;;  %574 = vst [vmem:[%s6753_s30 + $0x688] sm:$0xff] %v573_v17  ;;  %v575_v18 = vld [vmem:[%s6748_s29 + $0xd20] sm:$0xff]  ;;  %v577_v19 = vld [vmem:[%s6748_s29 + $0xd28] sm:$0xff] }
  0x80   : > { %v579_v20 = vld [vmem:[%s6748_s29 + $0xd40] sm:$0xff]  ;;  %576 = vst [vmem:[%s6753_s30 + $0x690] sm:$0xff] %v575_v18  ;;  %578 = vst [vmem:[%s6753_s30 + $0x698] sm:$0xff] %v577_v19  ;;  %v581_v21 = vld [vmem:[%s6748_s29 + $0xd48] sm:$0xff] }
  0x81   : > { %580 = vst [vmem:[%s6753_s30 + $0x6a0] sm:$0xff] %v579_v20  ;;  %v583_v22 = vld [vmem:[%s6748_s29 + $0xd60] sm:$0xff]  ;;  %v585_v23 = vld [vmem:[%s6748_s29 + $0xd68] sm:$0xff]  ;;  %582 = vst [vmem:[%s6753_s30 + $0x6a8] sm:$0xff] %v581_v21 }
  0x82   : > { %584 = vst [vmem:[%s6753_s30 + $0x6b0] sm:$0xff] %v583_v22  ;;  %586 = vst [vmem:[%s6753_s30 + $0x6b8] sm:$0xff] %v585_v23  ;;  %v587_v24 = vld [vmem:[%s6748_s29 + $0xd80] sm:$0xff]  ;;  %v589_v25 = vld [vmem:[%s6748_s29 + $0xd88] sm:$0xff] }
  0x83   : > { %v591_v26 = vld [vmem:[%s6748_s29 + $0xda0] sm:$0xff]  ;;  %588 = vst [vmem:[%s6753_s30 + $0x6c0] sm:$0xff] %v587_v24  ;;  %590 = vst [vmem:[%s6753_s30 + $0x6c8] sm:$0xff] %v589_v25  ;;  %v593_v27 = vld [vmem:[%s6748_s29 + $0xda8] sm:$0xff] }
  0x84   : > { %592 = vst [vmem:[%s6753_s30 + $0x6d0] sm:$0xff] %v591_v26  ;;  %v595_v28 = vld [vmem:[%s6748_s29 + $0xdc0] sm:$0xff]  ;;  %v597_v29 = vld [vmem:[%s6748_s29 + $0xdc8] sm:$0xff]  ;;  %594 = vst [vmem:[%s6753_s30 + $0x6d8] sm:$0xff] %v593_v27 }
  0x85   : > { %596 = vst [vmem:[%s6753_s30 + $0x6e0] sm:$0xff] %v595_v28  ;;  %598 = vst [vmem:[%s6753_s30 + $0x6e8] sm:$0xff] %v597_v29  ;;  %v599_v30 = vld [vmem:[%s6748_s29 + $0xde0] sm:$0xff]  ;;  %v601_v31 = vld [vmem:[%s6748_s29 + $0xde8] sm:$0xff] }
  0x86   : > { %v603_v32 = vld [vmem:[%s6748_s29 + $0xe00] sm:$0xff]  ;;  %600 = vst [vmem:[%s6753_s30 + $0x6f0] sm:$0xff] %v599_v30  ;;  %602 = vst [vmem:[%s6753_s30 + $0x6f8] sm:$0xff] %v601_v31  ;;  %v605_v33 = vld [vmem:[%s6748_s29 + $0xe08] sm:$0xff] }
  0x87   : > { %604 = vst [vmem:[%s6753_s30 + $0x700] sm:$0xff] %v603_v32  ;;  %v607_v34 = vld [vmem:[%s6748_s29 + $0xe20] sm:$0xff]  ;;  %v609_v35 = vld [vmem:[%s6748_s29 + $0xe28] sm:$0xff]  ;;  %606 = vst [vmem:[%s6753_s30 + $0x708] sm:$0xff] %v605_v33 }
  0x88   : > { %608 = vst [vmem:[%s6753_s30 + $0x710] sm:$0xff] %v607_v34  ;;  %610 = vst [vmem:[%s6753_s30 + $0x718] sm:$0xff] %v609_v35  ;;  %v611_v36 = vld [vmem:[%s6748_s29 + $0xe40] sm:$0xff]  ;;  %v613_v37 = vld [vmem:[%s6748_s29 + $0xe48] sm:$0xff] }
  0x89   : > { %v615_v38 = vld [vmem:[%s6748_s29 + $0xe60] sm:$0xff]  ;;  %612 = vst [vmem:[%s6753_s30 + $0x720] sm:$0xff] %v611_v36  ;;  %614 = vst [vmem:[%s6753_s30 + $0x728] sm:$0xff] %v613_v37  ;;  %v617_v39 = vld [vmem:[%s6748_s29 + $0xe68] sm:$0xff] }
  0x8a   : > { %616 = vst [vmem:[%s6753_s30 + $0x730] sm:$0xff] %v615_v38  ;;  %v619_v40 = vld [vmem:[%s6748_s29 + $0xe80] sm:$0xff]  ;;  %v621_v41 = vld [vmem:[%s6748_s29 + $0xe88] sm:$0xff]  ;;  %618 = vst [vmem:[%s6753_s30 + $0x738] sm:$0xff] %v617_v39 }
  0x8b   : > { %620 = vst [vmem:[%s6753_s30 + $0x740] sm:$0xff] %v619_v40  ;;  %622 = vst [vmem:[%s6753_s30 + $0x748] sm:$0xff] %v621_v41  ;;  %v623_v42 = vld [vmem:[%s6748_s29 + $0xea0] sm:$0xff]  ;;  %v625_v43 = vld [vmem:[%s6748_s29 + $0xea8] sm:$0xff] }
  0x8c   : > { %v627_v44 = vld [vmem:[%s6748_s29 + $0xec0] sm:$0xff]  ;;  %624 = vst [vmem:[%s6753_s30 + $0x750] sm:$0xff] %v623_v42  ;;  %626 = vst [vmem:[%s6753_s30 + $0x758] sm:$0xff] %v625_v43  ;;  %v629_v45 = vld [vmem:[%s6748_s29 + $0xec8] sm:$0xff] }
  0x8d   : > { %628 = vst [vmem:[%s6753_s30 + $0x760] sm:$0xff] %v627_v44  ;;  %v631_v46 = vld [vmem:[%s6748_s29 + $0xee0] sm:$0xff]  ;;  %v633_v47 = vld [vmem:[%s6748_s29 + $0xee8] sm:$0xff]  ;;  %630 = vst [vmem:[%s6753_s30 + $0x768] sm:$0xff] %v629_v45 }
  0x8e   : > { %632 = vst [vmem:[%s6753_s30 + $0x770] sm:$0xff] %v631_v46  ;;  %634 = vst [vmem:[%s6753_s30 + $0x778] sm:$0xff] %v633_v47  ;;  %v635_v48 = vld [vmem:[%s6748_s29 + $0xf00] sm:$0xff]  ;;  %v637_v49 = vld [vmem:[%s6748_s29 + $0xf08] sm:$0xff] }
  0x8f   : > { %v639_v50 = vld [vmem:[%s6748_s29 + $0xf20] sm:$0xff]  ;;  %636 = vst [vmem:[%s6753_s30 + $0x780] sm:$0xff] %v635_v48  ;;  %638 = vst [vmem:[%s6753_s30 + $0x788] sm:$0xff] %v637_v49  ;;  %v641_v51 = vld [vmem:[%s6748_s29 + $0xf28] sm:$0xff] }
  0x90   : > { %640 = vst [vmem:[%s6753_s30 + $0x790] sm:$0xff] %v639_v50  ;;  %v643_v52 = vld [vmem:[%s6748_s29 + $0xf40] sm:$0xff]  ;;  %v645_v53 = vld [vmem:[%s6748_s29 + $0xf48] sm:$0xff]  ;;  %642 = vst [vmem:[%s6753_s30 + $0x798] sm:$0xff] %v641_v51 }
  0x91   : > { %644 = vst [vmem:[%s6753_s30 + $0x7a0] sm:$0xff] %v643_v52  ;;  %646 = vst [vmem:[%s6753_s30 + $0x7a8] sm:$0xff] %v645_v53  ;;  %v647_v54 = vld [vmem:[%s6748_s29 + $0xf60] sm:$0xff]  ;;  %v649_v55 = vld [vmem:[%s6748_s29 + $0xf68] sm:$0xff] }
  0x92   : > { %v651_v56 = vld [vmem:[%s6748_s29 + $0xf80] sm:$0xff]  ;;  %648 = vst [vmem:[%s6753_s30 + $0x7b0] sm:$0xff] %v647_v54  ;;  %650 = vst [vmem:[%s6753_s30 + $0x7b8] sm:$0xff] %v649_v55  ;;  %v653_v57 = vld [vmem:[%s6748_s29 + $0xf88] sm:$0xff] }
  0x93   : > { %652 = vst [vmem:[%s6753_s30 + $0x7c0] sm:$0xff] %v651_v56  ;;  %v655_v58 = vld [vmem:[%s6748_s29 + $0xfa0] sm:$0xff]  ;;  %v657_v59 = vld [vmem:[%s6748_s29 + $0xfa8] sm:$0xff]  ;;  %654 = vst [vmem:[%s6753_s30 + $0x7c8] sm:$0xff] %v653_v57 }
  0x94   : > { %656 = vst [vmem:[%s6753_s30 + $0x7d0] sm:$0xff] %v655_v58  ;;  %658 = vst [vmem:[%s6753_s30 + $0x7d8] sm:$0xff] %v657_v59  ;;  %v659_v60 = vld [vmem:[%s6748_s29 + $0xfc0] sm:$0xff]  ;;  %v661_v61 = vld [vmem:[%s6748_s29 + $0xfc8] sm:$0xff] }
  0x95   : > { %v663_v62 = vld [vmem:[%s6748_s29 + $0xfe0] sm:$0xff]  ;;  %660 = vst [vmem:[%s6753_s30 + $0x7e0] sm:$0xff] %v659_v60  ;;  %662 = vst [vmem:[%s6753_s30 + $0x7e8] sm:$0xff] %v661_v61  ;;  %v665_v63 = vld [vmem:[%s6748_s29 + $0xfe8] sm:$0xff] }
  0x96   : > { %664 = vst [vmem:[%s6753_s30 + $0x7f0] sm:$0xff] %v663_v62  ;;  %v667_v0 = vld [vmem:[%s6748_s29 + $0x1000] sm:$0xff]  ;;  %v669_v1 = vld [vmem:[%s6748_s29 + $0x1008] sm:$0xff]  ;;  %666 = vst [vmem:[%s6753_s30 + $0x7f8] sm:$0xff] %v665_v63 }
  0x97   : > { %668 = vst [vmem:[%s6753_s30 + $0x800] sm:$0xff] %v667_v0  ;;  %670 = vst [vmem:[%s6753_s30 + $0x808] sm:$0xff] %v669_v1  ;;  %v671_v2 = vld [vmem:[%s6748_s29 + $0x1020] sm:$0xff]  ;;  %v673_v3 = vld [vmem:[%s6748_s29 + $0x1028] sm:$0xff] }
  0x98   : > { %v675_v4 = vld [vmem:[%s6748_s29 + $0x1040] sm:$0xff]  ;;  %672 = vst [vmem:[%s6753_s30 + $0x810] sm:$0xff] %v671_v2  ;;  %674 = vst [vmem:[%s6753_s30 + $0x818] sm:$0xff] %v673_v3  ;;  %v677_v5 = vld [vmem:[%s6748_s29 + $0x1048] sm:$0xff] }
  0x99   : > { %676 = vst [vmem:[%s6753_s30 + $0x820] sm:$0xff] %v675_v4  ;;  %v679_v6 = vld [vmem:[%s6748_s29 + $0x1060] sm:$0xff]  ;;  %v681_v7 = vld [vmem:[%s6748_s29 + $0x1068] sm:$0xff]  ;;  %678 = vst [vmem:[%s6753_s30 + $0x828] sm:$0xff] %v677_v5 }
  0x9a   : > { %680 = vst [vmem:[%s6753_s30 + $0x830] sm:$0xff] %v679_v6  ;;  %682 = vst [vmem:[%s6753_s30 + $0x838] sm:$0xff] %v681_v7  ;;  %v683_v8 = vld [vmem:[%s6748_s29 + $0x1080] sm:$0xff]  ;;  %v685_v9 = vld [vmem:[%s6748_s29 + $0x1088] sm:$0xff] }
  0x9b   : > { %v687_v10 = vld [vmem:[%s6748_s29 + $0x10a0] sm:$0xff]  ;;  %684 = vst [vmem:[%s6753_s30 + $0x840] sm:$0xff] %v683_v8  ;;  %686 = vst [vmem:[%s6753_s30 + $0x848] sm:$0xff] %v685_v9  ;;  %v689_v11 = vld [vmem:[%s6748_s29 + $0x10a8] sm:$0xff] }
  0x9c   : > { %688 = vst [vmem:[%s6753_s30 + $0x850] sm:$0xff] %v687_v10  ;;  %v691_v12 = vld [vmem:[%s6748_s29 + $0x10c0] sm:$0xff]  ;;  %v693_v13 = vld [vmem:[%s6748_s29 + $0x10c8] sm:$0xff]  ;;  %690 = vst [vmem:[%s6753_s30 + $0x858] sm:$0xff] %v689_v11 }
  0x9d   : > { %692 = vst [vmem:[%s6753_s30 + $0x860] sm:$0xff] %v691_v12  ;;  %694 = vst [vmem:[%s6753_s30 + $0x868] sm:$0xff] %v693_v13  ;;  %v695_v14 = vld [vmem:[%s6748_s29 + $0x10e0] sm:$0xff]  ;;  %v697_v15 = vld [vmem:[%s6748_s29 + $0x10e8] sm:$0xff] }
  0x9e   : > { %v699_v16 = vld [vmem:[%s6748_s29 + $0x1100] sm:$0xff]  ;;  %696 = vst [vmem:[%s6753_s30 + $0x870] sm:$0xff] %v695_v14  ;;  %698 = vst [vmem:[%s6753_s30 + $0x878] sm:$0xff] %v697_v15  ;;  %v701_v17 = vld [vmem:[%s6748_s29 + $0x1108] sm:$0xff] }
  0x9f   : > { %700 = vst [vmem:[%s6753_s30 + $0x880] sm:$0xff] %v699_v16  ;;  %v703_v18 = vld [vmem:[%s6748_s29 + $0x1120] sm:$0xff]  ;;  %v705_v19 = vld [vmem:[%s6748_s29 + $0x1128] sm:$0xff]  ;;  %702 = vst [vmem:[%s6753_s30 + $0x888] sm:$0xff] %v701_v17 }
  0xa0   : > { %704 = vst [vmem:[%s6753_s30 + $0x890] sm:$0xff] %v703_v18  ;;  %706 = vst [vmem:[%s6753_s30 + $0x898] sm:$0xff] %v705_v19  ;;  %v707_v20 = vld [vmem:[%s6748_s29 + $0x1140] sm:$0xff]  ;;  %v709_v21 = vld [vmem:[%s6748_s29 + $0x1148] sm:$0xff] }
  0xa1   : > { %v711_v22 = vld [vmem:[%s6748_s29 + $0x1160] sm:$0xff]  ;;  %708 = vst [vmem:[%s6753_s30 + $0x8a0] sm:$0xff] %v707_v20  ;;  %710 = vst [vmem:[%s6753_s30 + $0x8a8] sm:$0xff] %v709_v21  ;;  %v713_v23 = vld [vmem:[%s6748_s29 + $0x1168] sm:$0xff] }
  0xa2   : > { %712 = vst [vmem:[%s6753_s30 + $0x8b0] sm:$0xff] %v711_v22  ;;  %v715_v24 = vld [vmem:[%s6748_s29 + $0x1180] sm:$0xff]  ;;  %v717_v25 = vld [vmem:[%s6748_s29 + $0x1188] sm:$0xff]  ;;  %714 = vst [vmem:[%s6753_s30 + $0x8b8] sm:$0xff] %v713_v23 }
  0xa3   : > { %716 = vst [vmem:[%s6753_s30 + $0x8c0] sm:$0xff] %v715_v24  ;;  %718 = vst [vmem:[%s6753_s30 + $0x8c8] sm:$0xff] %v717_v25  ;;  %v719_v26 = vld [vmem:[%s6748_s29 + $0x11a0] sm:$0xff]  ;;  %v721_v27 = vld [vmem:[%s6748_s29 + $0x11a8] sm:$0xff] }
  0xa4   : > { %v723_v28 = vld [vmem:[%s6748_s29 + $0x11c0] sm:$0xff]  ;;  %720 = vst [vmem:[%s6753_s30 + $0x8d0] sm:$0xff] %v719_v26  ;;  %722 = vst [vmem:[%s6753_s30 + $0x8d8] sm:$0xff] %v721_v27  ;;  %v725_v29 = vld [vmem:[%s6748_s29 + $0x11c8] sm:$0xff] }
  0xa5   : > { %724 = vst [vmem:[%s6753_s30 + $0x8e0] sm:$0xff] %v723_v28  ;;  %v727_v30 = vld [vmem:[%s6748_s29 + $0x11e0] sm:$0xff]  ;;  %v729_v31 = vld [vmem:[%s6748_s29 + $0x11e8] sm:$0xff]  ;;  %726 = vst [vmem:[%s6753_s30 + $0x8e8] sm:$0xff] %v725_v29 }
  0xa6   : > { %728 = vst [vmem:[%s6753_s30 + $0x8f0] sm:$0xff] %v727_v30  ;;  %730 = vst [vmem:[%s6753_s30 + $0x8f8] sm:$0xff] %v729_v31  ;;  %v731_v32 = vld [vmem:[%s6748_s29 + $0x1200] sm:$0xff]  ;;  %v733_v33 = vld [vmem:[%s6748_s29 + $0x1208] sm:$0xff] }
  0xa7   : > { %v735_v34 = vld [vmem:[%s6748_s29 + $0x1220] sm:$0xff]  ;;  %732 = vst [vmem:[%s6753_s30 + $0x900] sm:$0xff] %v731_v32  ;;  %734 = vst [vmem:[%s6753_s30 + $0x908] sm:$0xff] %v733_v33  ;;  %v737_v35 = vld [vmem:[%s6748_s29 + $0x1228] sm:$0xff] }
  0xa8   : > { %736 = vst [vmem:[%s6753_s30 + $0x910] sm:$0xff] %v735_v34  ;;  %v739_v36 = vld [vmem:[%s6748_s29 + $0x1240] sm:$0xff]  ;;  %v741_v37 = vld [vmem:[%s6748_s29 + $0x1248] sm:$0xff]  ;;  %738 = vst [vmem:[%s6753_s30 + $0x918] sm:$0xff] %v737_v35 }
  0xa9   : > { %740 = vst [vmem:[%s6753_s30 + $0x920] sm:$0xff] %v739_v36  ;;  %742 = vst [vmem:[%s6753_s30 + $0x928] sm:$0xff] %v741_v37  ;;  %v743_v38 = vld [vmem:[%s6748_s29 + $0x1260] sm:$0xff]  ;;  %v745_v39 = vld [vmem:[%s6748_s29 + $0x1268] sm:$0xff] }
  0xaa   : > { %v747_v40 = vld [vmem:[%s6748_s29 + $0x1280] sm:$0xff]  ;;  %744 = vst [vmem:[%s6753_s30 + $0x930] sm:$0xff] %v743_v38  ;;  %746 = vst [vmem:[%s6753_s30 + $0x938] sm:$0xff] %v745_v39  ;;  %v749_v41 = vld [vmem:[%s6748_s29 + $0x1288] sm:$0xff] }
  0xab   : > { %748 = vst [vmem:[%s6753_s30 + $0x940] sm:$0xff] %v747_v40  ;;  %v751_v42 = vld [vmem:[%s6748_s29 + $0x12a0] sm:$0xff]  ;;  %v753_v43 = vld [vmem:[%s6748_s29 + $0x12a8] sm:$0xff]  ;;  %750 = vst [vmem:[%s6753_s30 + $0x948] sm:$0xff] %v749_v41 }
  0xac   : > { %752 = vst [vmem:[%s6753_s30 + $0x950] sm:$0xff] %v751_v42  ;;  %754 = vst [vmem:[%s6753_s30 + $0x958] sm:$0xff] %v753_v43  ;;  %v755_v44 = vld [vmem:[%s6748_s29 + $0x12c0] sm:$0xff]  ;;  %v757_v45 = vld [vmem:[%s6748_s29 + $0x12c8] sm:$0xff] }
  0xad   : > { %v759_v46 = vld [vmem:[%s6748_s29 + $0x12e0] sm:$0xff]  ;;  %756 = vst [vmem:[%s6753_s30 + $0x960] sm:$0xff] %v755_v44  ;;  %758 = vst [vmem:[%s6753_s30 + $0x968] sm:$0xff] %v757_v45  ;;  %v761_v47 = vld [vmem:[%s6748_s29 + $0x12e8] sm:$0xff] }
  0xae   : > { %760 = vst [vmem:[%s6753_s30 + $0x970] sm:$0xff] %v759_v46  ;;  %v763_v48 = vld [vmem:[%s6748_s29 + $0x1300] sm:$0xff]  ;;  %v765_v49 = vld [vmem:[%s6748_s29 + $0x1308] sm:$0xff]  ;;  %762 = vst [vmem:[%s6753_s30 + $0x978] sm:$0xff] %v761_v47 }
  0xaf   : > { %764 = vst [vmem:[%s6753_s30 + $0x980] sm:$0xff] %v763_v48  ;;  %766 = vst [vmem:[%s6753_s30 + $0x988] sm:$0xff] %v765_v49  ;;  %v767_v50 = vld [vmem:[%s6748_s29 + $0x1320] sm:$0xff]  ;;  %v769_v51 = vld [vmem:[%s6748_s29 + $0x1328] sm:$0xff] }
  0xb0   : > { %v771_v52 = vld [vmem:[%s6748_s29 + $0x1340] sm:$0xff]  ;;  %768 = vst [vmem:[%s6753_s30 + $0x990] sm:$0xff] %v767_v50  ;;  %770 = vst [vmem:[%s6753_s30 + $0x998] sm:$0xff] %v769_v51  ;;  %v773_v53 = vld [vmem:[%s6748_s29 + $0x1348] sm:$0xff] }
  0xb1   : > { %772 = vst [vmem:[%s6753_s30 + $0x9a0] sm:$0xff] %v771_v52  ;;  %v775_v54 = vld [vmem:[%s6748_s29 + $0x1360] sm:$0xff]  ;;  %v777_v55 = vld [vmem:[%s6748_s29 + $0x1368] sm:$0xff]  ;;  %774 = vst [vmem:[%s6753_s30 + $0x9a8] sm:$0xff] %v773_v53 }
  0xb2   : > { %776 = vst [vmem:[%s6753_s30 + $0x9b0] sm:$0xff] %v775_v54  ;;  %778 = vst [vmem:[%s6753_s30 + $0x9b8] sm:$0xff] %v777_v55  ;;  %v779_v56 = vld [vmem:[%s6748_s29 + $0x1380] sm:$0xff]  ;;  %v781_v57 = vld [vmem:[%s6748_s29 + $0x1388] sm:$0xff] }
  0xb3   : > { %v783_v58 = vld [vmem:[%s6748_s29 + $0x13a0] sm:$0xff]  ;;  %780 = vst [vmem:[%s6753_s30 + $0x9c0] sm:$0xff] %v779_v56  ;;  %782 = vst [vmem:[%s6753_s30 + $0x9c8] sm:$0xff] %v781_v57  ;;  %v785_v59 = vld [vmem:[%s6748_s29 + $0x13a8] sm:$0xff] }
  0xb4   : > { %784 = vst [vmem:[%s6753_s30 + $0x9d0] sm:$0xff] %v783_v58  ;;  %v787_v60 = vld [vmem:[%s6748_s29 + $0x13c0] sm:$0xff]  ;;  %v789_v61 = vld [vmem:[%s6748_s29 + $0x13c8] sm:$0xff]  ;;  %786 = vst [vmem:[%s6753_s30 + $0x9d8] sm:$0xff] %v785_v59 }
  0xb5   : > { %788 = vst [vmem:[%s6753_s30 + $0x9e0] sm:$0xff] %v787_v60  ;;  %790 = vst [vmem:[%s6753_s30 + $0x9e8] sm:$0xff] %v789_v61  ;;  %v791_v62 = vld [vmem:[%s6748_s29 + $0x13e0] sm:$0xff]  ;;  %v793_v63 = vld [vmem:[%s6748_s29 + $0x13e8] sm:$0xff] }
  0xb6   : > { %v795_v0 = vld [vmem:[%s6748_s29 + $0x1400] sm:$0xff]  ;;  %792 = vst [vmem:[%s6753_s30 + $0x9f0] sm:$0xff] %v791_v62  ;;  %794 = vst [vmem:[%s6753_s30 + $0x9f8] sm:$0xff] %v793_v63  ;;  %v797_v1 = vld [vmem:[%s6748_s29 + $0x1408] sm:$0xff] }
  0xb7   : > { %796 = vst [vmem:[%s6753_s30 + $0xa00] sm:$0xff] %v795_v0  ;;  %v799_v2 = vld [vmem:[%s6748_s29 + $0x1420] sm:$0xff]  ;;  %v801_v3 = vld [vmem:[%s6748_s29 + $0x1428] sm:$0xff]  ;;  %798 = vst [vmem:[%s6753_s30 + $0xa08] sm:$0xff] %v797_v1 }
  0xb8   : > { %800 = vst [vmem:[%s6753_s30 + $0xa10] sm:$0xff] %v799_v2  ;;  %802 = vst [vmem:[%s6753_s30 + $0xa18] sm:$0xff] %v801_v3  ;;  %v803_v4 = vld [vmem:[%s6748_s29 + $0x1440] sm:$0xff]  ;;  %v805_v5 = vld [vmem:[%s6748_s29 + $0x1448] sm:$0xff] }
  0xb9   : > { %v807_v6 = vld [vmem:[%s6748_s29 + $0x1460] sm:$0xff]  ;;  %804 = vst [vmem:[%s6753_s30 + $0xa20] sm:$0xff] %v803_v4  ;;  %806 = vst [vmem:[%s6753_s30 + $0xa28] sm:$0xff] %v805_v5  ;;  %v809_v7 = vld [vmem:[%s6748_s29 + $0x1468] sm:$0xff] }
  0xba   : > { %808 = vst [vmem:[%s6753_s30 + $0xa30] sm:$0xff] %v807_v6  ;;  %v811_v8 = vld [vmem:[%s6748_s29 + $0x1480] sm:$0xff]  ;;  %v813_v9 = vld [vmem:[%s6748_s29 + $0x1488] sm:$0xff]  ;;  %810 = vst [vmem:[%s6753_s30 + $0xa38] sm:$0xff] %v809_v7 }
  0xbb   : > { %812 = vst [vmem:[%s6753_s30 + $0xa40] sm:$0xff] %v811_v8  ;;  %814 = vst [vmem:[%s6753_s30 + $0xa48] sm:$0xff] %v813_v9  ;;  %v815_v10 = vld [vmem:[%s6748_s29 + $0x14a0] sm:$0xff]  ;;  %v817_v11 = vld [vmem:[%s6748_s29 + $0x14a8] sm:$0xff] }
  0xbc   : > { %v819_v12 = vld [vmem:[%s6748_s29 + $0x14c0] sm:$0xff]  ;;  %816 = vst [vmem:[%s6753_s30 + $0xa50] sm:$0xff] %v815_v10  ;;  %818 = vst [vmem:[%s6753_s30 + $0xa58] sm:$0xff] %v817_v11  ;;  %v821_v13 = vld [vmem:[%s6748_s29 + $0x14c8] sm:$0xff] }
  0xbd   : > { %820 = vst [vmem:[%s6753_s30 + $0xa60] sm:$0xff] %v819_v12  ;;  %v823_v14 = vld [vmem:[%s6748_s29 + $0x14e0] sm:$0xff]  ;;  %v825_v15 = vld [vmem:[%s6748_s29 + $0x14e8] sm:$0xff]  ;;  %822 = vst [vmem:[%s6753_s30 + $0xa68] sm:$0xff] %v821_v13 }
  0xbe   : > { %824 = vst [vmem:[%s6753_s30 + $0xa70] sm:$0xff] %v823_v14  ;;  %826 = vst [vmem:[%s6753_s30 + $0xa78] sm:$0xff] %v825_v15  ;;  %v827_v16 = vld [vmem:[%s6748_s29 + $0x1500] sm:$0xff]  ;;  %v829_v17 = vld [vmem:[%s6748_s29 + $0x1508] sm:$0xff] }
  0xbf   : > { %v831_v18 = vld [vmem:[%s6748_s29 + $0x1520] sm:$0xff]  ;;  %828 = vst [vmem:[%s6753_s30 + $0xa80] sm:$0xff] %v827_v16  ;;  %830 = vst [vmem:[%s6753_s30 + $0xa88] sm:$0xff] %v829_v17  ;;  %v833_v19 = vld [vmem:[%s6748_s29 + $0x1528] sm:$0xff] }
  0xc0   : > { %832 = vst [vmem:[%s6753_s30 + $0xa90] sm:$0xff] %v831_v18  ;;  %v835_v20 = vld [vmem:[%s6748_s29 + $0x1540] sm:$0xff]  ;;  %v837_v21 = vld [vmem:[%s6748_s29 + $0x1548] sm:$0xff]  ;;  %834 = vst [vmem:[%s6753_s30 + $0xa98] sm:$0xff] %v833_v19 }
  0xc1   : > { %836 = vst [vmem:[%s6753_s30 + $0xaa0] sm:$0xff] %v835_v20  ;;  %838 = vst [vmem:[%s6753_s30 + $0xaa8] sm:$0xff] %v837_v21  ;;  %v839_v22 = vld [vmem:[%s6748_s29 + $0x1560] sm:$0xff]  ;;  %v841_v23 = vld [vmem:[%s6748_s29 + $0x1568] sm:$0xff] }
  0xc2   : > { %v843_v24 = vld [vmem:[%s6748_s29 + $0x1580] sm:$0xff]  ;;  %840 = vst [vmem:[%s6753_s30 + $0xab0] sm:$0xff] %v839_v22  ;;  %842 = vst [vmem:[%s6753_s30 + $0xab8] sm:$0xff] %v841_v23  ;;  %v845_v25 = vld [vmem:[%s6748_s29 + $0x1588] sm:$0xff] }
  0xc3   : > { %844 = vst [vmem:[%s6753_s30 + $0xac0] sm:$0xff] %v843_v24  ;;  %v847_v26 = vld [vmem:[%s6748_s29 + $0x15a0] sm:$0xff]  ;;  %v849_v27 = vld [vmem:[%s6748_s29 + $0x15a8] sm:$0xff]  ;;  %846 = vst [vmem:[%s6753_s30 + $0xac8] sm:$0xff] %v845_v25 }
  0xc4   : > { %848 = vst [vmem:[%s6753_s30 + $0xad0] sm:$0xff] %v847_v26  ;;  %850 = vst [vmem:[%s6753_s30 + $0xad8] sm:$0xff] %v849_v27  ;;  %v851_v28 = vld [vmem:[%s6748_s29 + $0x15c0] sm:$0xff]  ;;  %v853_v29 = vld [vmem:[%s6748_s29 + $0x15c8] sm:$0xff] }
  0xc5   : > { %v855_v30 = vld [vmem:[%s6748_s29 + $0x15e0] sm:$0xff]  ;;  %852 = vst [vmem:[%s6753_s30 + $0xae0] sm:$0xff] %v851_v28  ;;  %854 = vst [vmem:[%s6753_s30 + $0xae8] sm:$0xff] %v853_v29  ;;  %v857_v31 = vld [vmem:[%s6748_s29 + $0x15e8] sm:$0xff] }
  0xc6   : > { %856 = vst [vmem:[%s6753_s30 + $0xaf0] sm:$0xff] %v855_v30  ;;  %v859_v32 = vld [vmem:[%s6748_s29 + $0x1600] sm:$0xff]  ;;  %v861_v33 = vld [vmem:[%s6748_s29 + $0x1608] sm:$0xff]  ;;  %858 = vst [vmem:[%s6753_s30 + $0xaf8] sm:$0xff] %v857_v31 }
  0xc7   : > { %860 = vst [vmem:[%s6753_s30 + $0xb00] sm:$0xff] %v859_v32  ;;  %862 = vst [vmem:[%s6753_s30 + $0xb08] sm:$0xff] %v861_v33  ;;  %v863_v34 = vld [vmem:[%s6748_s29 + $0x1620] sm:$0xff]  ;;  %v865_v35 = vld [vmem:[%s6748_s29 + $0x1628] sm:$0xff] }
  0xc8   : > { %v867_v36 = vld [vmem:[%s6748_s29 + $0x1640] sm:$0xff]  ;;  %864 = vst [vmem:[%s6753_s30 + $0xb10] sm:$0xff] %v863_v34  ;;  %866 = vst [vmem:[%s6753_s30 + $0xb18] sm:$0xff] %v865_v35  ;;  %v869_v37 = vld [vmem:[%s6748_s29 + $0x1648] sm:$0xff] }
  0xc9   : > { %868 = vst [vmem:[%s6753_s30 + $0xb20] sm:$0xff] %v867_v36  ;;  %v871_v38 = vld [vmem:[%s6748_s29 + $0x1660] sm:$0xff]  ;;  %v873_v39 = vld [vmem:[%s6748_s29 + $0x1668] sm:$0xff]  ;;  %870 = vst [vmem:[%s6753_s30 + $0xb28] sm:$0xff] %v869_v37 }
  0xca   : > { %872 = vst [vmem:[%s6753_s30 + $0xb30] sm:$0xff] %v871_v38  ;;  %874 = vst [vmem:[%s6753_s30 + $0xb38] sm:$0xff] %v873_v39  ;;  %v875_v40 = vld [vmem:[%s6748_s29 + $0x1680] sm:$0xff]  ;;  %v877_v41 = vld [vmem:[%s6748_s29 + $0x1688] sm:$0xff] }
  0xcb   : > { %v879_v42 = vld [vmem:[%s6748_s29 + $0x16a0] sm:$0xff]  ;;  %876 = vst [vmem:[%s6753_s30 + $0xb40] sm:$0xff] %v875_v40  ;;  %878 = vst [vmem:[%s6753_s30 + $0xb48] sm:$0xff] %v877_v41  ;;  %v881_v43 = vld [vmem:[%s6748_s29 + $0x16a8] sm:$0xff] }
  0xcc   : > { %880 = vst [vmem:[%s6753_s30 + $0xb50] sm:$0xff] %v879_v42  ;;  %v883_v44 = vld [vmem:[%s6748_s29 + $0x16c0] sm:$0xff]  ;;  %v885_v45 = vld [vmem:[%s6748_s29 + $0x16c8] sm:$0xff]  ;;  %882 = vst [vmem:[%s6753_s30 + $0xb58] sm:$0xff] %v881_v43 }
  0xcd   : > { %884 = vst [vmem:[%s6753_s30 + $0xb60] sm:$0xff] %v883_v44  ;;  %886 = vst [vmem:[%s6753_s30 + $0xb68] sm:$0xff] %v885_v45  ;;  %v887_v46 = vld [vmem:[%s6748_s29 + $0x16e0] sm:$0xff]  ;;  %v889_v47 = vld [vmem:[%s6748_s29 + $0x16e8] sm:$0xff] }
  0xce   : > { %v891_v48 = vld [vmem:[%s6748_s29 + $0x1700] sm:$0xff]  ;;  %888 = vst [vmem:[%s6753_s30 + $0xb70] sm:$0xff] %v887_v46  ;;  %890 = vst [vmem:[%s6753_s30 + $0xb78] sm:$0xff] %v889_v47  ;;  %v893_v49 = vld [vmem:[%s6748_s29 + $0x1708] sm:$0xff] }
  0xcf   : > { %892 = vst [vmem:[%s6753_s30 + $0xb80] sm:$0xff] %v891_v48  ;;  %v895_v50 = vld [vmem:[%s6748_s29 + $0x1720] sm:$0xff]  ;;  %v897_v51 = vld [vmem:[%s6748_s29 + $0x1728] sm:$0xff]  ;;  %894 = vst [vmem:[%s6753_s30 + $0xb88] sm:$0xff] %v893_v49 }
  0xd0   : > { %896 = vst [vmem:[%s6753_s30 + $0xb90] sm:$0xff] %v895_v50  ;;  %898 = vst [vmem:[%s6753_s30 + $0xb98] sm:$0xff] %v897_v51  ;;  %v899_v52 = vld [vmem:[%s6748_s29 + $0x1740] sm:$0xff]  ;;  %v901_v53 = vld [vmem:[%s6748_s29 + $0x1748] sm:$0xff] }
  0xd1   : > { %v903_v54 = vld [vmem:[%s6748_s29 + $0x1760] sm:$0xff]  ;;  %900 = vst [vmem:[%s6753_s30 + $0xba0] sm:$0xff] %v899_v52  ;;  %902 = vst [vmem:[%s6753_s30 + $0xba8] sm:$0xff] %v901_v53  ;;  %v905_v55 = vld [vmem:[%s6748_s29 + $0x1768] sm:$0xff] }
  0xd2   : > { %904 = vst [vmem:[%s6753_s30 + $0xbb0] sm:$0xff] %v903_v54  ;;  %v907_v56 = vld [vmem:[%s6748_s29 + $0x1780] sm:$0xff]  ;;  %v909_v57 = vld [vmem:[%s6748_s29 + $0x1788] sm:$0xff]  ;;  %906 = vst [vmem:[%s6753_s30 + $0xbb8] sm:$0xff] %v905_v55 }
  0xd3   : > { %908 = vst [vmem:[%s6753_s30 + $0xbc0] sm:$0xff] %v907_v56  ;;  %910 = vst [vmem:[%s6753_s30 + $0xbc8] sm:$0xff] %v909_v57  ;;  %v911_v58 = vld [vmem:[%s6748_s29 + $0x17a0] sm:$0xff]  ;;  %v913_v59 = vld [vmem:[%s6748_s29 + $0x17a8] sm:$0xff] }
  0xd4   : > { %v915_v60 = vld [vmem:[%s6748_s29 + $0x17c0] sm:$0xff]  ;;  %912 = vst [vmem:[%s6753_s30 + $0xbd0] sm:$0xff] %v911_v58  ;;  %914 = vst [vmem:[%s6753_s30 + $0xbd8] sm:$0xff] %v913_v59  ;;  %v917_v61 = vld [vmem:[%s6748_s29 + $0x17c8] sm:$0xff] }
  0xd5   : > { %916 = vst [vmem:[%s6753_s30 + $0xbe0] sm:$0xff] %v915_v60  ;;  %v919_v62 = vld [vmem:[%s6748_s29 + $0x17e0] sm:$0xff]  ;;  %v921_v63 = vld [vmem:[%s6748_s29 + $0x17e8] sm:$0xff]  ;;  %918 = vst [vmem:[%s6753_s30 + $0xbe8] sm:$0xff] %v917_v61 }
  0xd6   : > { %920 = vst [vmem:[%s6753_s30 + $0xbf0] sm:$0xff] %v919_v62  ;;  %922 = vst [vmem:[%s6753_s30 + $0xbf8] sm:$0xff] %v921_v63  ;;  %v923_v0 = vld [vmem:[%s6748_s29 + $0x1800] sm:$0xff]  ;;  %v925_v1 = vld [vmem:[%s6748_s29 + $0x1808] sm:$0xff] }
  0xd7   : > { %v927_v2 = vld [vmem:[%s6748_s29 + $0x1820] sm:$0xff]  ;;  %924 = vst [vmem:[%s6753_s30 + $0xc00] sm:$0xff] %v923_v0  ;;  %926 = vst [vmem:[%s6753_s30 + $0xc08] sm:$0xff] %v925_v1  ;;  %v929_v3 = vld [vmem:[%s6748_s29 + $0x1828] sm:$0xff] }
  0xd8   : > { %928 = vst [vmem:[%s6753_s30 + $0xc10] sm:$0xff] %v927_v2  ;;  %v931_v4 = vld [vmem:[%s6748_s29 + $0x1840] sm:$0xff]  ;;  %v933_v5 = vld [vmem:[%s6748_s29 + $0x1848] sm:$0xff]  ;;  %930 = vst [vmem:[%s6753_s30 + $0xc18] sm:$0xff] %v929_v3 }
  0xd9   : > { %932 = vst [vmem:[%s6753_s30 + $0xc20] sm:$0xff] %v931_v4  ;;  %934 = vst [vmem:[%s6753_s30 + $0xc28] sm:$0xff] %v933_v5  ;;  %v935_v6 = vld [vmem:[%s6748_s29 + $0x1860] sm:$0xff]  ;;  %v937_v7 = vld [vmem:[%s6748_s29 + $0x1868] sm:$0xff] }
  0xda   : > { %v939_v8 = vld [vmem:[%s6748_s29 + $0x1880] sm:$0xff]  ;;  %936 = vst [vmem:[%s6753_s30 + $0xc30] sm:$0xff] %v935_v6  ;;  %938 = vst [vmem:[%s6753_s30 + $0xc38] sm:$0xff] %v937_v7  ;;  %v941_v9 = vld [vmem:[%s6748_s29 + $0x1888] sm:$0xff] }
  0xdb   : > { %940 = vst [vmem:[%s6753_s30 + $0xc40] sm:$0xff] %v939_v8  ;;  %v943_v10 = vld [vmem:[%s6748_s29 + $0x18a0] sm:$0xff]  ;;  %v945_v11 = vld [vmem:[%s6748_s29 + $0x18a8] sm:$0xff]  ;;  %942 = vst [vmem:[%s6753_s30 + $0xc48] sm:$0xff] %v941_v9 }
  0xdc   : > { %944 = vst [vmem:[%s6753_s30 + $0xc50] sm:$0xff] %v943_v10  ;;  %946 = vst [vmem:[%s6753_s30 + $0xc58] sm:$0xff] %v945_v11  ;;  %v947_v12 = vld [vmem:[%s6748_s29 + $0x18c0] sm:$0xff]  ;;  %v949_v13 = vld [vmem:[%s6748_s29 + $0x18c8] sm:$0xff] }
  0xdd   : > { %v951_v14 = vld [vmem:[%s6748_s29 + $0x18e0] sm:$0xff]  ;;  %948 = vst [vmem:[%s6753_s30 + $0xc60] sm:$0xff] %v947_v12  ;;  %950 = vst [vmem:[%s6753_s30 + $0xc68] sm:$0xff] %v949_v13  ;;  %v953_v15 = vld [vmem:[%s6748_s29 + $0x18e8] sm:$0xff] }
  0xde   : > { %952 = vst [vmem:[%s6753_s30 + $0xc70] sm:$0xff] %v951_v14  ;;  %v955_v16 = vld [vmem:[%s6748_s29 + $0x1900] sm:$0xff]  ;;  %v957_v17 = vld [vmem:[%s6748_s29 + $0x1908] sm:$0xff]  ;;  %954 = vst [vmem:[%s6753_s30 + $0xc78] sm:$0xff] %v953_v15 }
  0xdf   : > { %956 = vst [vmem:[%s6753_s30 + $0xc80] sm:$0xff] %v955_v16  ;;  %958 = vst [vmem:[%s6753_s30 + $0xc88] sm:$0xff] %v957_v17  ;;  %v959_v18 = vld [vmem:[%s6748_s29 + $0x1920] sm:$0xff]  ;;  %v961_v19 = vld [vmem:[%s6748_s29 + $0x1928] sm:$0xff] }
  0xe0   : > { %v963_v20 = vld [vmem:[%s6748_s29 + $0x1940] sm:$0xff]  ;;  %960 = vst [vmem:[%s6753_s30 + $0xc90] sm:$0xff] %v959_v18  ;;  %962 = vst [vmem:[%s6753_s30 + $0xc98] sm:$0xff] %v961_v19  ;;  %v965_v21 = vld [vmem:[%s6748_s29 + $0x1948] sm:$0xff] }
  0xe1   : > { %964 = vst [vmem:[%s6753_s30 + $0xca0] sm:$0xff] %v963_v20  ;;  %v967_v22 = vld [vmem:[%s6748_s29 + $0x1960] sm:$0xff]  ;;  %v969_v23 = vld [vmem:[%s6748_s29 + $0x1968] sm:$0xff]  ;;  %966 = vst [vmem:[%s6753_s30 + $0xca8] sm:$0xff] %v965_v21 }
  0xe2   : > { %968 = vst [vmem:[%s6753_s30 + $0xcb0] sm:$0xff] %v967_v22  ;;  %970 = vst [vmem:[%s6753_s30 + $0xcb8] sm:$0xff] %v969_v23  ;;  %v971_v24 = vld [vmem:[%s6748_s29 + $0x1980] sm:$0xff]  ;;  %v973_v25 = vld [vmem:[%s6748_s29 + $0x1988] sm:$0xff] }
  0xe3   : > { %v975_v26 = vld [vmem:[%s6748_s29 + $0x19a0] sm:$0xff]  ;;  %972 = vst [vmem:[%s6753_s30 + $0xcc0] sm:$0xff] %v971_v24  ;;  %974 = vst [vmem:[%s6753_s30 + $0xcc8] sm:$0xff] %v973_v25  ;;  %v977_v27 = vld [vmem:[%s6748_s29 + $0x19a8] sm:$0xff] }
  0xe4   : > { %976 = vst [vmem:[%s6753_s30 + $0xcd0] sm:$0xff] %v975_v26  ;;  %v979_v28 = vld [vmem:[%s6748_s29 + $0x19c0] sm:$0xff]  ;;  %v981_v29 = vld [vmem:[%s6748_s29 + $0x19c8] sm:$0xff]  ;;  %978 = vst [vmem:[%s6753_s30 + $0xcd8] sm:$0xff] %v977_v27 }
  0xe5   : > { %980 = vst [vmem:[%s6753_s30 + $0xce0] sm:$0xff] %v979_v28  ;;  %982 = vst [vmem:[%s6753_s30 + $0xce8] sm:$0xff] %v981_v29  ;;  %v983_v30 = vld [vmem:[%s6748_s29 + $0x19e0] sm:$0xff]  ;;  %v985_v31 = vld [vmem:[%s6748_s29 + $0x19e8] sm:$0xff] }
  0xe6   : > { %v987_v32 = vld [vmem:[%s6748_s29 + $0x1a00] sm:$0xff]  ;;  %984 = vst [vmem:[%s6753_s30 + $0xcf0] sm:$0xff] %v983_v30  ;;  %986 = vst [vmem:[%s6753_s30 + $0xcf8] sm:$0xff] %v985_v31  ;;  %v989_v33 = vld [vmem:[%s6748_s29 + $0x1a08] sm:$0xff] }
  0xe7   : > { %988 = vst [vmem:[%s6753_s30 + $0xd00] sm:$0xff] %v987_v32  ;;  %v991_v34 = vld [vmem:[%s6748_s29 + $0x1a20] sm:$0xff]  ;;  %v993_v35 = vld [vmem:[%s6748_s29 + $0x1a28] sm:$0xff]  ;;  %990 = vst [vmem:[%s6753_s30 + $0xd08] sm:$0xff] %v989_v33 }
  0xe8   : > { %992 = vst [vmem:[%s6753_s30 + $0xd10] sm:$0xff] %v991_v34  ;;  %994 = vst [vmem:[%s6753_s30 + $0xd18] sm:$0xff] %v993_v35  ;;  %v995_v36 = vld [vmem:[%s6748_s29 + $0x1a40] sm:$0xff]  ;;  %v997_v37 = vld [vmem:[%s6748_s29 + $0x1a48] sm:$0xff] }
  0xe9   : > { %v999_v38 = vld [vmem:[%s6748_s29 + $0x1a60] sm:$0xff]  ;;  %996 = vst [vmem:[%s6753_s30 + $0xd20] sm:$0xff] %v995_v36  ;;  %998 = vst [vmem:[%s6753_s30 + $0xd28] sm:$0xff] %v997_v37  ;;  %v1001_v39 = vld [vmem:[%s6748_s29 + $0x1a68] sm:$0xff] }
  0xea   : > { %1000 = vst [vmem:[%s6753_s30 + $0xd30] sm:$0xff] %v999_v38  ;;  %v1003_v40 = vld [vmem:[%s6748_s29 + $0x1a80] sm:$0xff]  ;;  %v1005_v41 = vld [vmem:[%s6748_s29 + $0x1a88] sm:$0xff]  ;;  %1002 = vst [vmem:[%s6753_s30 + $0xd38] sm:$0xff] %v1001_v39 }
  0xeb   : > { %1004 = vst [vmem:[%s6753_s30 + $0xd40] sm:$0xff] %v1003_v40  ;;  %1006 = vst [vmem:[%s6753_s30 + $0xd48] sm:$0xff] %v1005_v41  ;;  %v1007_v42 = vld [vmem:[%s6748_s29 + $0x1aa0] sm:$0xff]  ;;  %v1009_v43 = vld [vmem:[%s6748_s29 + $0x1aa8] sm:$0xff] }
  0xec   : > { %v1011_v44 = vld [vmem:[%s6748_s29 + $0x1ac0] sm:$0xff]  ;;  %1008 = vst [vmem:[%s6753_s30 + $0xd50] sm:$0xff] %v1007_v42  ;;  %1010 = vst [vmem:[%s6753_s30 + $0xd58] sm:$0xff] %v1009_v43  ;;  %v1013_v45 = vld [vmem:[%s6748_s29 + $0x1ac8] sm:$0xff] }
  0xed   : > { %1012 = vst [vmem:[%s6753_s30 + $0xd60] sm:$0xff] %v1011_v44  ;;  %v1015_v46 = vld [vmem:[%s6748_s29 + $0x1ae0] sm:$0xff]  ;;  %v1017_v47 = vld [vmem:[%s6748_s29 + $0x1ae8] sm:$0xff]  ;;  %1014 = vst [vmem:[%s6753_s30 + $0xd68] sm:$0xff] %v1013_v45 }
  0xee   : > { %1016 = vst [vmem:[%s6753_s30 + $0xd70] sm:$0xff] %v1015_v46  ;;  %1018 = vst [vmem:[%s6753_s30 + $0xd78] sm:$0xff] %v1017_v47  ;;  %v1019_v48 = vld [vmem:[%s6748_s29 + $0x1b00] sm:$0xff]  ;;  %v1021_v49 = vld [vmem:[%s6748_s29 + $0x1b08] sm:$0xff] }
  0xef   : > { %v1023_v50 = vld [vmem:[%s6748_s29 + $0x1b20] sm:$0xff]  ;;  %1020 = vst [vmem:[%s6753_s30 + $0xd80] sm:$0xff] %v1019_v48  ;;  %1022 = vst [vmem:[%s6753_s30 + $0xd88] sm:$0xff] %v1021_v49  ;;  %v1025_v51 = vld [vmem:[%s6748_s29 + $0x1b28] sm:$0xff] }
  0xf0   : > { %1024 = vst [vmem:[%s6753_s30 + $0xd90] sm:$0xff] %v1023_v50  ;;  %v1027_v52 = vld [vmem:[%s6748_s29 + $0x1b40] sm:$0xff]  ;;  %v1029_v53 = vld [vmem:[%s6748_s29 + $0x1b48] sm:$0xff]  ;;  %1026 = vst [vmem:[%s6753_s30 + $0xd98] sm:$0xff] %v1025_v51 }
  0xf1   : > { %1028 = vst [vmem:[%s6753_s30 + $0xda0] sm:$0xff] %v1027_v52  ;;  %1030 = vst [vmem:[%s6753_s30 + $0xda8] sm:$0xff] %v1029_v53  ;;  %v1031_v54 = vld [vmem:[%s6748_s29 + $0x1b60] sm:$0xff]  ;;  %v1033_v55 = vld [vmem:[%s6748_s29 + $0x1b68] sm:$0xff] }
  0xf2   : > { %v1035_v56 = vld [vmem:[%s6748_s29 + $0x1b80] sm:$0xff]  ;;  %1032 = vst [vmem:[%s6753_s30 + $0xdb0] sm:$0xff] %v1031_v54  ;;  %1034 = vst [vmem:[%s6753_s30 + $0xdb8] sm:$0xff] %v1033_v55  ;;  %v1037_v57 = vld [vmem:[%s6748_s29 + $0x1b88] sm:$0xff] }
  0xf3   : > { %1036 = vst [vmem:[%s6753_s30 + $0xdc0] sm:$0xff] %v1035_v56  ;;  %v1039_v58 = vld [vmem:[%s6748_s29 + $0x1ba0] sm:$0xff]  ;;  %v1041_v59 = vld [vmem:[%s6748_s29 + $0x1ba8] sm:$0xff]  ;;  %1038 = vst [vmem:[%s6753_s30 + $0xdc8] sm:$0xff] %v1037_v57 }
  0xf4   : > { %1040 = vst [vmem:[%s6753_s30 + $0xdd0] sm:$0xff] %v1039_v58  ;;  %1042 = vst [vmem:[%s6753_s30 + $0xdd8] sm:$0xff] %v1041_v59  ;;  %v1043_v60 = vld [vmem:[%s6748_s29 + $0x1bc0] sm:$0xff]  ;;  %v1045_v61 = vld [vmem:[%s6748_s29 + $0x1bc8] sm:$0xff] }
  0xf5   : > { %v1047_v62 = vld [vmem:[%s6748_s29 + $0x1be0] sm:$0xff]  ;;  %1044 = vst [vmem:[%s6753_s30 + $0xde0] sm:$0xff] %v1043_v60  ;;  %1046 = vst [vmem:[%s6753_s30 + $0xde8] sm:$0xff] %v1045_v61  ;;  %v1049_v63 = vld [vmem:[%s6748_s29 + $0x1be8] sm:$0xff] }
  0xf6   : > { %1048 = vst [vmem:[%s6753_s30 + $0xdf0] sm:$0xff] %v1047_v62  ;;  %v1051_v0 = vld [vmem:[%s6748_s29 + $0x1c00] sm:$0xff]  ;;  %v1053_v1 = vld [vmem:[%s6748_s29 + $0x1c08] sm:$0xff]  ;;  %1050 = vst [vmem:[%s6753_s30 + $0xdf8] sm:$0xff] %v1049_v63 }
  0xf7   : > { %1052 = vst [vmem:[%s6753_s30 + $0xe00] sm:$0xff] %v1051_v0  ;;  %1054 = vst [vmem:[%s6753_s30 + $0xe08] sm:$0xff] %v1053_v1  ;;  %v1055_v2 = vld [vmem:[%s6748_s29 + $0x1c20] sm:$0xff]  ;;  %v1057_v3 = vld [vmem:[%s6748_s29 + $0x1c28] sm:$0xff] }
  0xf8   : > { %v1059_v4 = vld [vmem:[%s6748_s29 + $0x1c40] sm:$0xff]  ;;  %1056 = vst [vmem:[%s6753_s30 + $0xe10] sm:$0xff] %v1055_v2  ;;  %1058 = vst [vmem:[%s6753_s30 + $0xe18] sm:$0xff] %v1057_v3  ;;  %v1061_v5 = vld [vmem:[%s6748_s29 + $0x1c48] sm:$0xff] }
  0xf9   : > { %1060 = vst [vmem:[%s6753_s30 + $0xe20] sm:$0xff] %v1059_v4  ;;  %v1063_v6 = vld [vmem:[%s6748_s29 + $0x1c60] sm:$0xff]  ;;  %v1065_v7 = vld [vmem:[%s6748_s29 + $0x1c68] sm:$0xff]  ;;  %1062 = vst [vmem:[%s6753_s30 + $0xe28] sm:$0xff] %v1061_v5 }
  0xfa   : > { %1064 = vst [vmem:[%s6753_s30 + $0xe30] sm:$0xff] %v1063_v6  ;;  %1066 = vst [vmem:[%s6753_s30 + $0xe38] sm:$0xff] %v1065_v7  ;;  %v1067_v8 = vld [vmem:[%s6748_s29 + $0x1c80] sm:$0xff]  ;;  %v1069_v9 = vld [vmem:[%s6748_s29 + $0x1c88] sm:$0xff] }
  0xfb   : > { %v1071_v10 = vld [vmem:[%s6748_s29 + $0x1ca0] sm:$0xff]  ;;  %1068 = vst [vmem:[%s6753_s30 + $0xe40] sm:$0xff] %v1067_v8  ;;  %1070 = vst [vmem:[%s6753_s30 + $0xe48] sm:$0xff] %v1069_v9  ;;  %v1073_v11 = vld [vmem:[%s6748_s29 + $0x1ca8] sm:$0xff] }
  0xfc   : > { %1072 = vst [vmem:[%s6753_s30 + $0xe50] sm:$0xff] %v1071_v10  ;;  %v1075_v12 = vld [vmem:[%s6748_s29 + $0x1cc0] sm:$0xff]  ;;  %v1077_v13 = vld [vmem:[%s6748_s29 + $0x1cc8] sm:$0xff]  ;;  %1074 = vst [vmem:[%s6753_s30 + $0xe58] sm:$0xff] %v1073_v11 }
  0xfd   : > { %1076 = vst [vmem:[%s6753_s30 + $0xe60] sm:$0xff] %v1075_v12  ;;  %1078 = vst [vmem:[%s6753_s30 + $0xe68] sm:$0xff] %v1077_v13  ;;  %v1079_v14 = vld [vmem:[%s6748_s29 + $0x1ce0] sm:$0xff]  ;;  %v1081_v15 = vld [vmem:[%s6748_s29 + $0x1ce8] sm:$0xff] }
  0xfe   : > { %v1083_v16 = vld [vmem:[%s6748_s29 + $0x1d00] sm:$0xff]  ;;  %1080 = vst [vmem:[%s6753_s30 + $0xe70] sm:$0xff] %v1079_v14  ;;  %1082 = vst [vmem:[%s6753_s30 + $0xe78] sm:$0xff] %v1081_v15  ;;  %v1085_v17 = vld [vmem:[%s6748_s29 + $0x1d08] sm:$0xff] }
  0xff   : > { %1084 = vst [vmem:[%s6753_s30 + $0xe80] sm:$0xff] %v1083_v16  ;;  %v1087_v18 = vld [vmem:[%s6748_s29 + $0x1d20] sm:$0xff]  ;;  %v1089_v19 = vld [vmem:[%s6748_s29 + $0x1d28] sm:$0xff]  ;;  %1086 = vst [vmem:[%s6753_s30 + $0xe88] sm:$0xff] %v1085_v17 }
 0x100   : > { %1088 = vst [vmem:[%s6753_s30 + $0xe90] sm:$0xff] %v1087_v18  ;;  %1090 = vst [vmem:[%s6753_s30 + $0xe98] sm:$0xff] %v1089_v19  ;;  %v1091_v20 = vld [vmem:[%s6748_s29 + $0x1d40] sm:$0xff]  ;;  %v1093_v21 = vld [vmem:[%s6748_s29 + $0x1d48] sm:$0xff] }
 0x101   : > { %v1095_v22 = vld [vmem:[%s6748_s29 + $0x1d60] sm:$0xff]  ;;  %1092 = vst [vmem:[%s6753_s30 + $0xea0] sm:$0xff] %v1091_v20  ;;  %1094 = vst [vmem:[%s6753_s30 + $0xea8] sm:$0xff] %v1093_v21  ;;  %v1097_v23 = vld [vmem:[%s6748_s29 + $0x1d68] sm:$0xff] }
 0x102   : > { %1096 = vst [vmem:[%s6753_s30 + $0xeb0] sm:$0xff] %v1095_v22  ;;  %v1099_v24 = vld [vmem:[%s6748_s29 + $0x1d80] sm:$0xff]  ;;  %v1101_v25 = vld [vmem:[%s6748_s29 + $0x1d88] sm:$0xff]  ;;  %1098 = vst [vmem:[%s6753_s30 + $0xeb8] sm:$0xff] %v1097_v23 }
 0x103   : > { %1100 = vst [vmem:[%s6753_s30 + $0xec0] sm:$0xff] %v1099_v24  ;;  %1102 = vst [vmem:[%s6753_s30 + $0xec8] sm:$0xff] %v1101_v25  ;;  %v1103_v26 = vld [vmem:[%s6748_s29 + $0x1da0] sm:$0xff]  ;;  %v1105_v27 = vld [vmem:[%s6748_s29 + $0x1da8] sm:$0xff] }
 0x104   : > { %v1107_v28 = vld [vmem:[%s6748_s29 + $0x1dc0] sm:$0xff]  ;;  %1104 = vst [vmem:[%s6753_s30 + $0xed0] sm:$0xff] %v1103_v26  ;;  %1106 = vst [vmem:[%s6753_s30 + $0xed8] sm:$0xff] %v1105_v27  ;;  %v1109_v29 = vld [vmem:[%s6748_s29 + $0x1dc8] sm:$0xff] }
 0x105   : > { %1108 = vst [vmem:[%s6753_s30 + $0xee0] sm:$0xff] %v1107_v28  ;;  %v1111_v30 = vld [vmem:[%s6748_s29 + $0x1de0] sm:$0xff]  ;;  %v1113_v31 = vld [vmem:[%s6748_s29 + $0x1de8] sm:$0xff]  ;;  %1110 = vst [vmem:[%s6753_s30 + $0xee8] sm:$0xff] %v1109_v29 }
 0x106   : > { %1112 = vst [vmem:[%s6753_s30 + $0xef0] sm:$0xff] %v1111_v30  ;;  %1114 = vst [vmem:[%s6753_s30 + $0xef8] sm:$0xff] %v1113_v31  ;;  %v1115_v32 = vld [vmem:[%s6748_s29 + $0x1e00] sm:$0xff]  ;;  %v1117_v33 = vld [vmem:[%s6748_s29 + $0x1e08] sm:$0xff] }
 0x107   : > { %v1119_v34 = vld [vmem:[%s6748_s29 + $0x1e20] sm:$0xff]  ;;  %1116 = vst [vmem:[%s6753_s30 + $0xf00] sm:$0xff] %v1115_v32  ;;  %1118 = vst [vmem:[%s6753_s30 + $0xf08] sm:$0xff] %v1117_v33  ;;  %v1121_v35 = vld [vmem:[%s6748_s29 + $0x1e28] sm:$0xff] }
 0x108   : > { %1120 = vst [vmem:[%s6753_s30 + $0xf10] sm:$0xff] %v1119_v34  ;;  %v1123_v36 = vld [vmem:[%s6748_s29 + $0x1e40] sm:$0xff]  ;;  %v1125_v37 = vld [vmem:[%s6748_s29 + $0x1e48] sm:$0xff]  ;;  %1122 = vst [vmem:[%s6753_s30 + $0xf18] sm:$0xff] %v1121_v35 }
 0x109   : > { %1124 = vst [vmem:[%s6753_s30 + $0xf20] sm:$0xff] %v1123_v36  ;;  %1126 = vst [vmem:[%s6753_s30 + $0xf28] sm:$0xff] %v1125_v37  ;;  %v1127_v38 = vld [vmem:[%s6748_s29 + $0x1e60] sm:$0xff]  ;;  %v1129_v39 = vld [vmem:[%s6748_s29 + $0x1e68] sm:$0xff] }
 0x10a   : > { %v1131_v40 = vld [vmem:[%s6748_s29 + $0x1e80] sm:$0xff]  ;;  %1128 = vst [vmem:[%s6753_s30 + $0xf30] sm:$0xff] %v1127_v38  ;;  %1130 = vst [vmem:[%s6753_s30 + $0xf38] sm:$0xff] %v1129_v39  ;;  %v1133_v41 = vld [vmem:[%s6748_s29 + $0x1e88] sm:$0xff] }
 0x10b   : > { %1132 = vst [vmem:[%s6753_s30 + $0xf40] sm:$0xff] %v1131_v40  ;;  %v1135_v42 = vld [vmem:[%s6748_s29 + $0x1ea0] sm:$0xff]  ;;  %v1137_v43 = vld [vmem:[%s6748_s29 + $0x1ea8] sm:$0xff]  ;;  %1134 = vst [vmem:[%s6753_s30 + $0xf48] sm:$0xff] %v1133_v41 }
 0x10c   : > { %1136 = vst [vmem:[%s6753_s30 + $0xf50] sm:$0xff] %v1135_v42  ;;  %1138 = vst [vmem:[%s6753_s30 + $0xf58] sm:$0xff] %v1137_v43  ;;  %v1139_v44 = vld [vmem:[%s6748_s29 + $0x1ec0] sm:$0xff]  ;;  %v1141_v45 = vld [vmem:[%s6748_s29 + $0x1ec8] sm:$0xff] }
 0x10d   : > { %v1143_v46 = vld [vmem:[%s6748_s29 + $0x1ee0] sm:$0xff]  ;;  %1140 = vst [vmem:[%s6753_s30 + $0xf60] sm:$0xff] %v1139_v44  ;;  %1142 = vst [vmem:[%s6753_s30 + $0xf68] sm:$0xff] %v1141_v45  ;;  %v1145_v47 = vld [vmem:[%s6748_s29 + $0x1ee8] sm:$0xff] }
 0x10e   : > { %1144 = vst [vmem:[%s6753_s30 + $0xf70] sm:$0xff] %v1143_v46  ;;  %v1147_v48 = vld [vmem:[%s6748_s29 + $0x1f00] sm:$0xff]  ;;  %v1149_v49 = vld [vmem:[%s6748_s29 + $0x1f08] sm:$0xff]  ;;  %1146 = vst [vmem:[%s6753_s30 + $0xf78] sm:$0xff] %v1145_v47 }
 0x10f   : > { %1148 = vst [vmem:[%s6753_s30 + $0xf80] sm:$0xff] %v1147_v48  ;;  %1150 = vst [vmem:[%s6753_s30 + $0xf88] sm:$0xff] %v1149_v49  ;;  %v1151_v50 = vld [vmem:[%s6748_s29 + $0x1f20] sm:$0xff]  ;;  %v1153_v51 = vld [vmem:[%s6748_s29 + $0x1f28] sm:$0xff] }
 0x110   : > { %v1155_v52 = vld [vmem:[%s6748_s29 + $0x1f40] sm:$0xff]  ;;  %1152 = vst [vmem:[%s6753_s30 + $0xf90] sm:$0xff] %v1151_v50  ;;  %1154 = vst [vmem:[%s6753_s30 + $0xf98] sm:$0xff] %v1153_v51  ;;  %v1157_v53 = vld [vmem:[%s6748_s29 + $0x1f48] sm:$0xff] }
 0x111   : > { %1156 = vst [vmem:[%s6753_s30 + $0xfa0] sm:$0xff] %v1155_v52  ;;  %v1159_v54 = vld [vmem:[%s6748_s29 + $0x1f60] sm:$0xff]  ;;  %v1161_v55 = vld [vmem:[%s6748_s29 + $0x1f68] sm:$0xff]  ;;  %1158 = vst [vmem:[%s6753_s30 + $0xfa8] sm:$0xff] %v1157_v53 }
 0x112   : > { %1160 = vst [vmem:[%s6753_s30 + $0xfb0] sm:$0xff] %v1159_v54  ;;  %1162 = vst [vmem:[%s6753_s30 + $0xfb8] sm:$0xff] %v1161_v55  ;;  %v1163_v56 = vld [vmem:[%s6748_s29 + $0x1f80] sm:$0xff]  ;;  %v1165_v57 = vld [vmem:[%s6748_s29 + $0x1f88] sm:$0xff] }
 0x113   : > { %v1167_v58 = vld [vmem:[%s6748_s29 + $0x1fa0] sm:$0xff]  ;;  %1164 = vst [vmem:[%s6753_s30 + $0xfc0] sm:$0xff] %v1163_v56  ;;  %1166 = vst [vmem:[%s6753_s30 + $0xfc8] sm:$0xff] %v1165_v57  ;;  %v1169_v59 = vld [vmem:[%s6748_s29 + $0x1fa8] sm:$0xff] }
 0x114   : > { %1168 = vst [vmem:[%s6753_s30 + $0xfd0] sm:$0xff] %v1167_v58  ;;  %v1171_v60 = vld [vmem:[%s6748_s29 + $0x1fc0] sm:$0xff]  ;;  %v1173_v61 = vld [vmem:[%s6748_s29 + $0x1fc8] sm:$0xff]  ;;  %1170 = vst [vmem:[%s6753_s30 + $0xfd8] sm:$0xff] %v1169_v59 }
 0x115   : > { %1172 = vst [vmem:[%s6753_s30 + $0xfe0] sm:$0xff] %v1171_v60  ;;  %1174 = vst [vmem:[%s6753_s30 + $0xfe8] sm:$0xff] %v1173_v61  ;;  %v1175_v62 = vld [vmem:[%s6748_s29 + $0x1fe0] sm:$0xff]  ;;  %v1177_v63 = vld [vmem:[%s6748_s29 + $0x1fe8] sm:$0xff] }
 0x116   : > { %1176 = vst [vmem:[%s6753_s30 + $0xff0] sm:$0xff] %v1175_v62  ;;  %1178 = vst [vmem:[%s6753_s30 + $0xff8] sm:$0xff] %v1177_v63 }
 0x117 PF: > { %p5212_p10 = scmp.ge.s32.totalorder %s6669_s15, 1  ;;  %p1191_p11 = scmp.lt.s32.totalorder %s6669_s15, 3 }
 0x119   : > { %p1192_p12 = pnand %p5212_p10, %p1191_p11 }
 0x11a   : > { %s7779_s4 = sand.u32 (!%p1192_p12), 1, %s6661_s13   ;;  %v1244_v0 = vlaneseq (!%p1192_p12)  ;;  %v6671_v1 = vmov (!%p1192_p12), 1983009808   ;;  %v7785_v3 = vld [vmem:[%s8448_s0] sm:$0xff] (!%p1192_p12)  ;;  %s5215_s24 = sshll.u32 (!%p1192_p12), %s6714_s16, 2 }
 0x11b   : > { %1195 = sbr.rel (%p1192_p12) target bundleno = 1036 (0x40c), region = 51  ;;  %s5213_s5 = sshll.u32 (!%p1192_p12), %s7779_s4, 12  ;;  %v1242_v2 = vunpack.c.l.s4 (!%p1192_p12), %v6671_v1 }
 0x11c   : > { %v7787_v4 = vshrl.u32 (!%p1192_p12), %v1244_v0, 7  ;;  %s7789_s8 = scalar_lea.vmem (!%p1192_p12), [#allocation2], %s5213_s5  ;;  %p1227_p13 = scmp.lt.s32.totalorder (!%p1192_p12), %s5215_s24, 7 }
 0x11d   : > { %v5835_v5 = vld [vmem:[%s7789_s8 + $0x4] ss:$16 sps:$4 sm:$0xff] (!%p1192_p12)   ;;  %v1243_v6 = vunpack.c.0.s8 (!%p1192_p12), %v1242_v2  ;;  %v5837_v7 = vld [vmem:[%s7789_s8 + $0xc] ss:$16 sps:$4 sm:$0xff] (!%p1192_p12)   ;;  %v5839_v8 = vld [vmem:[%s7789_s8] ss:$16 sps:$4 sm:$0xff] (!%p1192_p12)  }
 0x11e   : > { %4434 = vmatprep.subr.bf16.mxu0 (!%p1192_p12), %v5835_v5  ;;  %v5840_v9 = vld [vmem:[%s7789_s8 + $0x8] ss:$16 sps:$4 sm:$0xff] (!%p1192_p12)   ;;  %4762 = vmatprep.subr.bf16.mxu1 (!%p1192_p12), %v5837_v7  ;;  %v5841_v11 = vld [vmem:[%s7789_s8 + $0x24] ss:$16 sps:$4 sm:$0xff] (!%p1192_p12)   ;;  %v5843_v12 = vld [vmem:[%s7789_s8 + $0x2c] ss:$16 sps:$4 sm:$0xff] (!%p1192_p12)  }
 0x11f   : > { %v7796_v10 = vsub.s32 (!%p1192_p12), %v1243_v6, %v7787_v4  ;;  %4435 = vmatpush1.bf16.msra.mxu0 (!%p1192_p12), %v5839_v8  ;;  %4763 = vmatpush1.bf16.msra.mxu1 (!%p1192_p12), %v5840_v9  ;;  %v5845_v13 = vld [vmem:[%s7789_s8 + $0x20] ss:$16 sps:$4 sm:$0xff] (!%p1192_p12)   ;;  %v5846_v15 = vld [vmem:[%s7789_s8 + $0x28] ss:$16 sps:$4 sm:$0xff] (!%p1192_p12)   ;;  %v5847_v16 = vld [vmem:[%s7789_s8 + $0x44] ss:$16 sps:$4 sm:$0xff] (!%p1192_p12)   ;;  %v1240_v6 = vcombine.high (!%p1192_p12), %v7785_v3, %v7785_v3 }
 0x120   : > { %4436 = vmatprep.subr.bf16.mxu0 (!%p1192_p12), %v5841_v11  ;;  %4764 = vmatprep.subr.bf16.mxu1 (!%p1192_p12), %v5843_v12  ;;  %v5849_v18 = vld [vmem:[%s7789_s8 + $0x4c] ss:$16 sps:$4 sm:$0xff] (!%p1192_p12)   ;;  %v5851_v19 = vld [vmem:[%s7789_s8 + $0x40] ss:$16 sps:$4 sm:$0xff] (!%p1192_p12)   ;;  %v5852_v20 = vld [vmem:[%s7789_s8 + $0x48] ss:$16 sps:$4 sm:$0xff] (!%p1192_p12)  }
 0x121   : > { %v7803_v14 = vrot.slane (!%p1192_p12), %v7785_v3, %v7796_v10  ;;  %v5853_v21 = vld [vmem:[%s7789_s8 + $0x64] ss:$16 sps:$4 sm:$0xff] (!%p1192_p12)   ;;  %v5855_v23 = vld [vmem:[%s7789_s8 + $0x6c] ss:$16 sps:$4 sm:$0xff] (!%p1192_p12)   ;;  %v5857_v24 = vld [vmem:[%s7789_s8 + $0x60] ss:$16 sps:$4 sm:$0xff] (!%p1192_p12)   ;;  %v7865_v12 = vrot.slane (!%p1192_p12), %v1240_v6, %v7796_v10 }
 0x122   : > { %v5858_v25 = vld [vmem:[%s7789_s8 + $0x68] ss:$16 sps:$4 sm:$0xff]   ;;  %v5859_v26 = vld [vmem:[%s7789_s8 + $0x84] ss:$16 sps:$4 sm:$0xff]   ;;  %v5861_v27 = vld [vmem:[%s7789_s8 + $0x8c] ss:$16 sps:$4 sm:$0xff]  }
 0x123   : > { %v1255_v17 = vcombine.high %v7803_v14, %v7803_v14  ;;  %4437 = vmatpush1.bf16.msra.mxu0 %v5845_v13  ;;  %4765 = vmatpush1.bf16.msra.mxu1 %v5846_v15  ;;  %v5863_v28 = vld [vmem:[%s7789_s8 + $0x80] ss:$16 sps:$4 sm:$0xff]   ;;  %v5864_v29 = vld [vmem:[%s7789_s8 + $0x88] ss:$16 sps:$4 sm:$0xff]   ;;  %v5865_v30 = vld [vmem:[%s7789_s8 + $0xa4] ss:$16 sps:$4 sm:$0xff]  }
 0x124   : > { %4438 = vmatprep.subr.bf16.mxu0 %v5847_v16  ;;  %4766 = vmatprep.subr.bf16.mxu1 %v5849_v18  ;;  %v5867_v31 = vld [vmem:[%s7789_s8 + $0xac] ss:$16 sps:$4 sm:$0xff]   ;;  %v5869_v32 = vld [vmem:[%s7789_s8 + $0xa0] ss:$16 sps:$4 sm:$0xff]   ;;  %v5870_v33 = vld [vmem:[%s7789_s8 + $0xa8] ss:$16 sps:$4 sm:$0xff]  }
 0x125   : > { %v1325_v22 = vpack.c.bf16 %v1255_v17, %v1255_v17  ;;  %v5871_v34 = vld [vmem:[%s7789_s8 + $0xc4] ss:$16 sps:$4 sm:$0xff]   ;;  %v5873_v35 = vld [vmem:[%s7789_s8 + $0xcc] ss:$16 sps:$4 sm:$0xff]   ;;  %v5875_v36 = vld [vmem:[%s7789_s8 + $0xc0] ss:$16 sps:$4 sm:$0xff]   ;;  %v1256_v17 = vcombine.high %v7865_v12, %v7865_v12 }
 0x126   : > { %v5876_v37 = vld [vmem:[%s7789_s8 + $0xc8] ss:$16 sps:$4 sm:$0xff]   ;;  %v5877_v38 = vld [vmem:[%s7789_s8 + $0xe4] ss:$16 sps:$4 sm:$0xff]   ;;  %v5879_v39 = vld [vmem:[%s7789_s8 + $0xec] ss:$16 sps:$4 sm:$0xff]  }
 0x127   : > { %4466 = vmatprep.mubr.bf16.mxu0 %v1325_v22  ;;  %4794 = vmatprep.mubr.bf16.mxu1 %v1325_v22  ;;  %v5881_v40 = vld [vmem:[%s7789_s8 + $0xe0] ss:$16 sps:$4 sm:$0xff]   ;;  %v5882_v41 = vld [vmem:[%s7789_s8 + $0xe8] ss:$16 sps:$4 sm:$0xff]   ;;  %v5883_v42 = vld [vmem:[%s7789_s8 + $0x104] ss:$16 sps:$4 sm:$0xff]  }
 0x128   : > { %4439 = vmatpush1.bf16.msra.mxu0 %v5851_v19  ;;  %4767 = vmatpush1.bf16.msra.mxu1 %v5852_v20  ;;  %v5885_v43 = vld [vmem:[%s7789_s8 + $0x10c] ss:$16 sps:$4 sm:$0xff]   ;;  %v5887_v44 = vld [vmem:[%s7789_s8 + $0x100] ss:$16 sps:$4 sm:$0xff]   ;;  %v5888_v45 = vld [vmem:[%s7789_s8 + $0x108] ss:$16 sps:$4 sm:$0xff]   ;;  %v1324_v20 = vpack.c.bf16 %v7803_v14, %v7803_v14 }
 0x129   : > { %4440 = vmatprep.subr.bf16.mxu0 %v5853_v21  ;;  %4768 = vmatprep.subr.bf16.mxu1 %v5855_v23  ;;  %v5889_v46 = vld [vmem:[%s7789_s8 + $0x124] ss:$16 sps:$4 sm:$0xff]   ;;  %v5891_v47 = vld [vmem:[%s7789_s8 + $0x12c] ss:$16 sps:$4 sm:$0xff]   ;;  %v5893_v48 = vld [vmem:[%s7789_s8 + $0x120] ss:$16 sps:$4 sm:$0xff]   ;;  %v1327_v23 = vpack.c.bf16 %v1256_v17, %v1256_v17 }
 0x12a   : > { %v5894_v49 = vld [vmem:[%s7789_s8 + $0x128] ss:$16 sps:$4 sm:$0xff]   ;;  %v5895_v50 = vld [vmem:[%s7789_s8 + $0x144] ss:$16 sps:$4 sm:$0xff]   ;;  %v5897_v51 = vld [vmem:[%s7789_s8 + $0x14c] ss:$16 sps:$4 sm:$0xff]  }
 0x12b   : > { %v5899_v52 = vld [vmem:[%s7789_s8 + $0x140] ss:$16 sps:$4 sm:$0xff]   ;;  %v5900_v53 = vld [vmem:[%s7789_s8 + $0x148] ss:$16 sps:$4 sm:$0xff]   ;;  %v5901_v54 = vld [vmem:[%s7789_s8 + $0x164] ss:$16 sps:$4 sm:$0xff]  }
 0x12c   : > { %4441 = vmatpush1.bf16.msra.mxu0 %v5857_v24  ;;  %4769 = vmatpush1.bf16.msra.mxu1 %v5858_v25  ;;  %v5903_v55 = vld [vmem:[%s7789_s8 + $0x16c] ss:$16 sps:$4 sm:$0xff]   ;;  %v5905_v56 = vld [vmem:[%s7789_s8 + $0x160] ss:$16 sps:$4 sm:$0xff]   ;;  %v5906_v57 = vld [vmem:[%s7789_s8 + $0x168] ss:$16 sps:$4 sm:$0xff]  }
 0x12d   : > { %4442 = vmatprep.subr.bf16.mxu0 %v5859_v26  ;;  %4770 = vmatprep.subr.bf16.mxu1 %v5861_v27  ;;  %v5907_v58 = vld [vmem:[%s7789_s8 + $0x184] ss:$16 sps:$4 sm:$0xff]   ;;  %v5909_v59 = vld [vmem:[%s7789_s8 + $0x18c] ss:$16 sps:$4 sm:$0xff]   ;;  %v5911_v60 = vld [vmem:[%s7789_s8 + $0x180] ss:$16 sps:$4 sm:$0xff]  }
 0x12e   : > { %v5912_v61 = vld [vmem:[%s7789_s8 + $0x188] ss:$16 sps:$4 sm:$0xff]   ;;  %v5913_v62 = vld [vmem:[%s7789_s8 + $0x1a4] ss:$16 sps:$4 sm:$0xff]   ;;  %v5915_v63 = vld [vmem:[%s7789_s8 + $0x1ac] ss:$16 sps:$4 sm:$0xff]  }
 0x12f   : > { %v5917_v0 = vld [vmem:[%s7789_s8 + $0x1a0] ss:$16 sps:$4 sm:$0xff]   ;;  %v5918_v1 = vld [vmem:[%s7789_s8 + $0x1a8] ss:$16 sps:$4 sm:$0xff]   ;;  %v5919_v2 = vld [vmem:[%s7789_s8 + $0x1c4] ss:$16 sps:$4 sm:$0xff]  }
 0x130   : > { %4443 = vmatpush1.bf16.msra.mxu0 %v5863_v28  ;;  %4771 = vmatpush1.bf16.msra.mxu1 %v5864_v29  ;;  %v5921_v5 = vld [vmem:[%s7789_s8 + $0x1cc] ss:$16 sps:$4 sm:$0xff]   ;;  %v5923_v7 = vld [vmem:[%s7789_s8 + $0x1c0] ss:$16 sps:$4 sm:$0xff]   ;;  %v5924_v8 = vld [vmem:[%s7789_s8 + $0x1c8] ss:$16 sps:$4 sm:$0xff]  }
 0x131   : > { %4444 = vmatprep.subr.bf16.mxu0 %v5865_v30  ;;  %4772 = vmatprep.subr.bf16.mxu1 %v5867_v31  ;;  %v5925_v9 = vld [vmem:[%s7789_s8 + $0x1e4] ss:$16 sps:$4 sm:$0xff]   ;;  %v5927_v11 = vld [vmem:[%s7789_s8 + $0x1ec] ss:$16 sps:$4 sm:$0xff]   ;;  %v5929_v13 = vld [vmem:[%s7789_s8 + $0x1e0] ss:$16 sps:$4 sm:$0xff]  }
 0x132   : > { %v5930_v15 = vld [vmem:[%s7789_s8 + $0x1e8] ss:$16 sps:$4 sm:$0xff]   ;;  %v5934_v3 = vld [vmem:[%s7789_s8 + $0x204] ss:$16 sps:$4 sm:$0xff]   ;;  %v5937_v16 = vld [vmem:[%s7789_s8 + $0x20c] ss:$16 sps:$4 sm:$0xff]  }
 0x133   : > { %v5932_v18 = vld [vmem:[%s7789_s8 + $0x200] ss:$16 sps:$4 sm:$0xff]   ;;  %v5935_v19 = vld [vmem:[%s7789_s8 + $0x208] ss:$16 sps:$4 sm:$0xff]   ;;  %v5940_v21 = vld [vmem:[%s7789_s8 + $0x224] ss:$16 sps:$4 sm:$0xff]  }
 0x134   : > { %4445 = vmatpush1.bf16.msra.mxu0 %v5869_v32  ;;  %4773 = vmatpush1.bf16.msra.mxu1 %v5870_v33  ;;  %v5943_v22 = vld [vmem:[%s7789_s8 + $0x22c] ss:$16 sps:$4 sm:$0xff]   ;;  %v5938_v24 = vld [vmem:[%s7789_s8 + $0x220] ss:$16 sps:$4 sm:$0xff]   ;;  %v5941_v25 = vld [vmem:[%s7789_s8 + $0x228] ss:$16 sps:$4 sm:$0xff]  }
 0x135   : > { %4446 = vmatprep.subr.bf16.mxu0 %v5871_v34  ;;  %4774 = vmatprep.subr.bf16.mxu1 %v5873_v35  ;;  %v5946_v14 = vld [vmem:[%s7789_s8 + $0x244] ss:$16 sps:$4 sm:$0xff]   ;;  %v5949_v26 = vld [vmem:[%s7789_s8 + $0x24c] ss:$16 sps:$4 sm:$0xff]   ;;  %v5944_v27 = vld [vmem:[%s7789_s8 + $0x240] ss:$16 sps:$4 sm:$0xff]  }
 0x136   : > { %v5947_v28 = vld [vmem:[%s7789_s8 + $0x248] ss:$16 sps:$4 sm:$0xff]   ;;  %v5952_v29 = vld [vmem:[%s7789_s8 + $0x264] ss:$16 sps:$4 sm:$0xff]   ;;  %v5955_v30 = vld [vmem:[%s7789_s8 + $0x26c] ss:$16 sps:$4 sm:$0xff]  }
 0x137   : > { %v5950_v31 = vld [vmem:[%s7789_s8 + $0x260] ss:$16 sps:$4 sm:$0xff]   ;;  %v5953_v32 = vld [vmem:[%s7789_s8 + $0x268] ss:$16 sps:$4 sm:$0xff]   ;;  %v5958_v33 = vld [vmem:[%s7789_s8 + $0x284] ss:$16 sps:$4 sm:$0xff]  }
 0x138   : > { %4447 = vmatpush1.bf16.msra.mxu0 %v5875_v36  ;;  %4775 = vmatpush1.bf16.msra.mxu1 %v5876_v37  ;;  %v5961_v34 = vld [vmem:[%s7789_s8 + $0x28c] ss:$16 sps:$4 sm:$0xff]   ;;  %v5956_v35 = vld [vmem:[%s7789_s8 + $0x280] ss:$16 sps:$4 sm:$0xff]   ;;  %v5959_v36 = vld [vmem:[%s7789_s8 + $0x288] ss:$16 sps:$4 sm:$0xff]  }
 0x139   : > { %4448 = vmatprep.subr.bf16.mxu0 %v5877_v38  ;;  %4776 = vmatprep.subr.bf16.mxu1 %v5879_v39  ;;  %v5964_v37 = vld [vmem:[%s7789_s8 + $0x2a4] ss:$16 sps:$4 sm:$0xff]   ;;  %v5967_v38 = vld [vmem:[%s7789_s8 + $0x2ac] ss:$16 sps:$4 sm:$0xff]   ;;  %v5962_v39 = vld [vmem:[%s7789_s8 + $0x2a0] ss:$16 sps:$4 sm:$0xff]  }
 0x13a   : > { %v6007_v6 = vld [vmem:[%s7789_s8 + $0x388] ss:$16 sps:$4 sm:$0xff]   ;;  %v6024_v17 = vld [vmem:[%s7789_s8 + $0x3e4] ss:$16 sps:$4 sm:$0xff]   ;;  %s8459_s24 = smov (!%p1227_p13, %s5215_s24), 7  ;;  %s5214_s28 = sshll.u32 %s7779_s4, 3 }
 0x13b   : > { %s1229_s27 = scalar_lea.vmem %s8450_s2, %s8459_s24  ;;  %s5734_s29 = sshll.u32 %s6714_s16, 7 }
 0x13c   : > { %4449 = vmatpush1.bf16.msra.mxu0 %v5881_v40  ;;  %4777 = vmatpush1.bf16.msra.mxu1 %v5882_v41  ;;  %v5965_v40 = vld [vmem:[%s7789_s8 + $0x2a8] ss:$16 sps:$4 sm:$0xff]   ;;  %v5970_v41 = vld [vmem:[%s7789_s8 + $0x2c4] ss:$16 sps:$4 sm:$0xff]   ;;  %s1224_s30 = scalar_lea.vmem [#allocation3], %s5214_s28  ;;  %s5118_s9 = scalar_lea.sflag [#allocation4], %s7779_s4 }
 0x13d   : > { %4450 = vmatprep.subr.bf16.mxu0 %v5883_v42  ;;  %4778 = vmatprep.subr.bf16.mxu1 %v5885_v43  ;;  %v5973_v42 = vld [vmem:[%s7789_s8 + $0x2cc] ss:$16 sps:$4 sm:$0xff]   ;;  %v5968_v43 = vld [vmem:[%s7789_s8 + $0x2c0] ss:$16 sps:$4 sm:$0xff]   ;;  %s5132_s5 = sshll.u32 %s1224_s30, 4  ;;  %s6672_s10 = smov [#allocation3]   ;;  %s8406_s5 = int_to_ptr.vmem [resolvable:$true] %s5132_s5 }
 0x13e   : > { %s6607_s16 = scalar_lea.vmem %s8406_s5, 128  ;;  %s6611_s11 = sshll.u32 %s6672_s10, 4  ;;  %s6612_s11 = int_to_ptr.vmem [resolvable:$false] %s6611_s11 }
 0x13f   : > { %p6608_p0 = scmp.ne.s32.totalorder %s8406_s5, %s6607_s16  ;;  %s6613_s17 = scalar_lea.vmem %s6612_s11, 256 }
 0x140   : > { %4451 = vmatpush1.bf16.msra.mxu0 %v5887_v44  ;;  %4779 = vmatpush1.bf16.msra.mxu1 %v5888_v45  ;;  %v5971_v44 = vld [vmem:[%s7789_s8 + $0x2c8] ss:$16 sps:$4 sm:$0xff]   ;;  %v5976_v45 = vld [vmem:[%s7789_s8 + $0x2e4] ss:$16 sps:$4 sm:$0xff]   ;;  %p6614_p3 = scmp.lt.s32.totalorder %s8406_s5, %s6612_s11  ;;  %p6615_p4 = scmp.lt.s32.totalorder %s6613_s17, %s6607_s16 }
 0x141   : > { %4452 = vmatprep.subr.bf16.mxu0 %v5889_v46  ;;  %4780 = vmatprep.subr.bf16.mxu1 %v5891_v47  ;;  %v5979_v46 = vld [vmem:[%s7789_s8 + $0x2ec] ss:$16 sps:$4 sm:$0xff]   ;;  %v5974_v47 = vld [vmem:[%s7789_s8 + $0x2e0] ss:$16 sps:$4 sm:$0xff]   ;;  %p6609_p1 = pnand %p6608_p0, %p6732_p6 }
 0x142   : > { %p6616_p5 = por %p6615_p4, %p6614_p3 }
 0x143   : > { %p6610_p2 = pneg %p6609_p1 }
 0x144   : > { %4453 = vmatpush1.bf16.msra.mxu0 %v5893_v48  ;;  %4781 = vmatpush1.bf16.msra.mxu1 %v5894_v49  ;;  %v5977_v48 = vld [vmem:[%s7789_s8 + $0x2e8] ss:$16 sps:$4 sm:$0xff]   ;;  %v5982_v49 = vld [vmem:[%s7789_s8 + $0x304] ss:$16 sps:$4 sm:$0xff]  }
 0x145   : > { %4454 = vmatprep.subr.bf16.mxu0 %v5895_v50  ;;  %4782 = vmatprep.subr.bf16.mxu1 %v5897_v51  ;;  %v5985_v50 = vld [vmem:[%s7789_s8 + $0x30c] ss:$16 sps:$4 sm:$0xff]   ;;  %v5980_v51 = vld [vmem:[%s7789_s8 + $0x300] ss:$16 sps:$4 sm:$0xff]   ;;  %p6617_p7 = pnand %p6616_p5, %p6610_p2 }
 0x148   : > { %4455 = vmatpush1.bf16.msra.mxu0 %v5899_v52  ;;  %4783 = vmatpush1.bf16.msra.mxu1 %v5900_v53  ;;  %v5983_v52 = vld [vmem:[%s7789_s8 + $0x308] ss:$16 sps:$4 sm:$0xff]   ;;  %v5988_v53 = vld [vmem:[%s7789_s8 + $0x324] ss:$16 sps:$4 sm:$0xff]  }
 0x149   : > { %4456 = vmatprep.subr.bf16.mxu0 %v5901_v54  ;;  %4784 = vmatprep.subr.bf16.mxu1 %v5903_v55  ;;  %v5991_v54 = vld [vmem:[%s7789_s8 + $0x32c] ss:$16 sps:$4 sm:$0xff]   ;;  %v5986_v55 = vld [vmem:[%s7789_s8 + $0x320] ss:$16 sps:$4 sm:$0xff]  }
 0x14c   : > { %4457 = vmatpush1.bf16.msra.mxu0 %v5905_v56  ;;  %4785 = vmatpush1.bf16.msra.mxu1 %v5906_v57  ;;  %v5989_v56 = vld [vmem:[%s7789_s8 + $0x328] ss:$16 sps:$4 sm:$0xff]   ;;  %v5994_v57 = vld [vmem:[%s7789_s8 + $0x344] ss:$16 sps:$4 sm:$0xff]  }
 0x14d   : > { %4458 = vmatprep.subr.bf16.mxu0 %v5907_v58  ;;  %4786 = vmatprep.subr.bf16.mxu1 %v5909_v59  ;;  %v5997_v58 = vld [vmem:[%s7789_s8 + $0x34c] ss:$16 sps:$4 sm:$0xff]   ;;  %v5992_v59 = vld [vmem:[%s7789_s8 + $0x340] ss:$16 sps:$4 sm:$0xff]  }
 0x150   : > { %4459 = vmatpush1.bf16.msra.mxu0 %v5911_v60  ;;  %4787 = vmatpush1.bf16.msra.mxu1 %v5912_v61  ;;  %v5995_v60 = vld [vmem:[%s7789_s8 + $0x348] ss:$16 sps:$4 sm:$0xff]   ;;  %v6000_v61 = vld [vmem:[%s7789_s8 + $0x364] ss:$16 sps:$4 sm:$0xff]  }
 0x151   : > { %4460 = vmatprep.subr.bf16.mxu0 %v5913_v62  ;;  %4788 = vmatprep.subr.bf16.mxu1 %v5915_v63  ;;  %v6003_v62 = vld [vmem:[%s7789_s8 + $0x36c] ss:$16 sps:$4 sm:$0xff]   ;;  %v5998_v63 = vld [vmem:[%s7789_s8 + $0x360] ss:$16 sps:$4 sm:$0xff]  }
 0x154   : > { %4461 = vmatpush1.bf16.msra.mxu0 %v5917_v0  ;;  %4789 = vmatpush1.bf16.msra.mxu1 %v5918_v1  ;;  %v6001_v0 = vld [vmem:[%s7789_s8 + $0x368] ss:$16 sps:$4 sm:$0xff]   ;;  %v6006_v1 = vld [vmem:[%s7789_s8 + $0x384] ss:$16 sps:$4 sm:$0xff]  }
 0x155   : > { %4462 = vmatprep.subr.bf16.mxu0 %v5919_v2  ;;  %4790 = vmatprep.subr.bf16.mxu1 %v5921_v5  ;;  %v6009_v2 = vld [vmem:[%s7789_s8 + $0x38c] ss:$16 sps:$4 sm:$0xff]   ;;  %v6004_v5 = vld [vmem:[%s7789_s8 + $0x380] ss:$16 sps:$4 sm:$0xff]  }
 0x158   : > { %4463 = vmatpush1.bf16.msra.mxu0 %v5923_v7  ;;  %4791 = vmatpush1.bf16.msra.mxu1 %v5924_v8  ;;  %v6012_v7 = vld [vmem:[%s7789_s8 + $0x3a4] ss:$16 sps:$4 sm:$0xff]   ;;  %v6015_v8 = vld [vmem:[%s7789_s8 + $0x3ac] ss:$16 sps:$4 sm:$0xff]  }
 0x159   : > { %4464 = vmatprep.subr.bf16.mxu0 %v5925_v9  ;;  %4792 = vmatprep.subr.bf16.mxu1 %v5927_v11  ;;  %v6010_v9 = vld [vmem:[%s7789_s8 + $0x3a0] ss:$16 sps:$4 sm:$0xff]   ;;  %v6013_v11 = vld [vmem:[%s7789_s8 + $0x3a8] ss:$16 sps:$4 sm:$0xff]  }
 0x15c   : > { %4465 = vmatpush1.bf16.msra.mxu0 %v5929_v13  ;;  %4793 = vmatpush1.bf16.msra.mxu1 %v5930_v15  ;;  %v6018_v13 = vld [vmem:[%s7789_s8 + $0x3c4] ss:$16 sps:$4 sm:$0xff]   ;;  %v6021_v15 = vld [vmem:[%s7789_s8 + $0x3cc] ss:$16 sps:$4 sm:$0xff]  }
 0x15d   : > { %4475 = vmatprep.subr.bf16.mxu0 %v5934_v3  ;;  %4803 = vmatprep.subr.bf16.mxu1 %v5937_v16  ;;  %v6016_v3 = vld [vmem:[%s7789_s8 + $0x3c0] ss:$16 sps:$4 sm:$0xff]   ;;  %v6019_v16 = vld [vmem:[%s7789_s8 + $0x3c8] ss:$16 sps:$4 sm:$0xff]  }
 0x15f   : > { %4467 = vmatmul.mubr.bf16.vlgmr.msra.gmra.mrb[0].mxu0 %v1324_v20  ;;  %4795 = vmatmul.mubr.bf16.vlgmr.msra.gmra.mrb[0].mxu1 %v1324_v20  ;;  %v6025_v20 = vld [vmem:[%s7789_s8 + $0x3e8] ss:$16 sps:$4 sm:$0xff]  }
 0x160   : > { %4476 = vmatpush1.bf16.msra.mxu0 %v5932_v18  ;;  %4804 = vmatpush1.bf16.msra.mxu1 %v5935_v19  ;;  %v6027_v18 = vld [vmem:[%s7789_s8 + $0x3ec] ss:$16 sps:$4 sm:$0xff]   ;;  %v6022_v19 = vld [vmem:[%s7789_s8 + $0x3e0] ss:$16 sps:$4 sm:$0xff]  }
 0x161   : > { %4477 = vmatprep.subr.bf16.mxu0 %v5940_v21  ;;  %4805 = vmatprep.subr.bf16.mxu1 %v5943_v22  ;;  %v6030_v21 = vld [vmem:[%s7789_s8 + $0x404] ss:$16 sps:$4 sm:$0xff]   ;;  %v6033_v22 = vld [vmem:[%s7789_s8 + $0x40c] ss:$16 sps:$4 sm:$0xff]  }
 0x162   : > { %4507 = vmatprep.mubr.bf16.mxu0 %v1327_v23  ;;  %4835 = vmatprep.mubr.bf16.mxu1 %v1327_v23  ;;  %v6028_v23 = vld [vmem:[%s7789_s8 + $0x400] ss:$16 sps:$4 sm:$0xff]  }
 0x164   : > { %4478 = vmatpush1.bf16.msra.mxu0 %v5938_v24  ;;  %4806 = vmatpush1.bf16.msra.mxu1 %v5941_v25  ;;  %v6031_v24 = vld [vmem:[%s7789_s8 + $0x408] ss:$16 sps:$4 sm:$0xff]   ;;  %v1326_v25 = vpack.c.bf16 %v7865_v12, %v7865_v12  ;;  %v6034_v12 = vld [vmem:[%s7789_s8 + $0x420] ss:$16 sps:$4 sm:$0xff]  }
 0x165   : > { %4479 = vmatprep.subr.bf16.mxu0 %v5946_v14  ;;  %4807 = vmatprep.subr.bf16.mxu1 %v5949_v26  ;;  %v7946_v14 = vld [vmem:[%s8448_s0 + $0x8] sm:$0xff] }
 0x166   : > { %v6036_v26 = vld [vmem:[%s7789_s8 + $0x424] ss:$16 sps:$4 sm:$0xff]  }
 0x168   : > { %4480 = vmatpush1.bf16.msra.mxu0 %v5944_v27  ;;  %4808 = vmatpush1.bf16.msra.mxu1 %v5947_v28  ;;  %v6039_v27 = vld [vmem:[%s7789_s8 + $0x42c] ss:$16 sps:$4 sm:$0xff]   ;;  %v7952_v28 = vrot.slane %v7946_v14, %v7796_v10 }
 0x169   : > { %4481 = vmatprep.subr.bf16.mxu0 %v5952_v29  ;;  %4809 = vmatprep.subr.bf16.mxu1 %v5955_v30  ;;  %v6037_v30 = vld [vmem:[%s7789_s8 + $0x428] ss:$16 sps:$4 sm:$0xff]  }
 0x16a   : > { %v1272_v29 = vcombine.high %v7952_v28, %v7952_v28 }
 0x16c   : > { %4482 = vmatpush1.bf16.msra.mxu0 %v5950_v31  ;;  %4810 = vmatpush1.bf16.msra.mxu1 %v5953_v32  ;;  %v6042_v31 = vld [vmem:[%s7789_s8 + $0x444] ss:$16 sps:$4 sm:$0xff]   ;;  %v6045_v32 = vld [vmem:[%s7789_s8 + $0x44c] ss:$16 sps:$4 sm:$0xff]  }
 0x16d   : > { %4483 = vmatprep.subr.bf16.mxu0 %v5958_v33  ;;  %4811 = vmatprep.subr.bf16.mxu1 %v5961_v34  ;;  %v1329_v33 = vpack.c.bf16 %v1272_v29, %v1272_v29  ;;  %v6040_v34 = vld [vmem:[%s7789_s8 + $0x440] ss:$16 sps:$4 sm:$0xff]   ;;  %v6126_v29 = vld [vmem:[%s7789_s8 + $0x604] ss:$16 sps:$4 sm:$0xff]  }
 0x170   : > { %4484 = vmatpush1.bf16.msra.mxu0 %v5956_v35  ;;  %4812 = vmatpush1.bf16.msra.mxu1 %v5959_v36  ;;  %v6043_v35 = vld [vmem:[%s7789_s8 + $0x448] ss:$16 sps:$4 sm:$0xff]   ;;  %v6048_v36 = vld [vmem:[%s7789_s8 + $0x464] ss:$16 sps:$4 sm:$0xff]  }
 0x171   : > { %4485 = vmatprep.subr.bf16.mxu0 %v5964_v37  ;;  %4813 = vmatprep.subr.bf16.mxu1 %v5967_v38  ;;  %v6051_v37 = vld [vmem:[%s7789_s8 + $0x46c] ss:$16 sps:$4 sm:$0xff]   ;;  %v6046_v38 = vld [vmem:[%s7789_s8 + $0x460] ss:$16 sps:$4 sm:$0xff]  }
 0x174   : > { %4486 = vmatpush1.bf16.msra.mxu0 %v5962_v39  ;;  %4814 = vmatpush1.bf16.msra.mxu1 %v5965_v40  ;;  %v6049_v39 = vld [vmem:[%s7789_s8 + $0x468] ss:$16 sps:$4 sm:$0xff]   ;;  %v6054_v40 = vld [vmem:[%s7789_s8 + $0x484] ss:$16 sps:$4 sm:$0xff]  }
 0x175   : > { %4487 = vmatprep.subr.bf16.mxu0 %v5970_v41  ;;  %4815 = vmatprep.subr.bf16.mxu1 %v5973_v42  ;;  %v6057_v41 = vld [vmem:[%s7789_s8 + $0x48c] ss:$16 sps:$4 sm:$0xff]   ;;  %v6052_v42 = vld [vmem:[%s7789_s8 + $0x480] ss:$16 sps:$4 sm:$0xff]  }
 0x178   : > { %4488 = vmatpush1.bf16.msra.mxu0 %v5968_v43  ;;  %4816 = vmatpush1.bf16.msra.mxu1 %v5971_v44  ;;  %v6055_v43 = vld [vmem:[%s7789_s8 + $0x488] ss:$16 sps:$4 sm:$0xff]   ;;  %v6060_v44 = vld [vmem:[%s7789_s8 + $0x4a4] ss:$16 sps:$4 sm:$0xff]  }
 0x179   : > { %4489 = vmatprep.subr.bf16.mxu0 %v5976_v45  ;;  %4817 = vmatprep.subr.bf16.mxu1 %v5979_v46  ;;  %v6063_v45 = vld [vmem:[%s7789_s8 + $0x4ac] ss:$16 sps:$4 sm:$0xff]   ;;  %v6058_v46 = vld [vmem:[%s7789_s8 + $0x4a0] ss:$16 sps:$4 sm:$0xff]  }
 0x17c   : > { %4490 = vmatpush1.bf16.msra.mxu0 %v5974_v47  ;;  %4818 = vmatpush1.bf16.msra.mxu1 %v5977_v48  ;;  %v6061_v47 = vld [vmem:[%s7789_s8 + $0x4a8] ss:$16 sps:$4 sm:$0xff]   ;;  %v6066_v48 = vld [vmem:[%s7789_s8 + $0x4c4] ss:$16 sps:$4 sm:$0xff]  }
 0x17d   : > { %4491 = vmatprep.subr.bf16.mxu0 %v5982_v49  ;;  %4819 = vmatprep.subr.bf16.mxu1 %v5985_v50  ;;  %v6069_v49 = vld [vmem:[%s7789_s8 + $0x4cc] ss:$16 sps:$4 sm:$0xff]   ;;  %v6064_v50 = vld [vmem:[%s7789_s8 + $0x4c0] ss:$16 sps:$4 sm:$0xff]  }
 0x180   : > { %4492 = vmatpush1.bf16.msra.mxu0 %v5980_v51  ;;  %4820 = vmatpush1.bf16.msra.mxu1 %v5983_v52  ;;  %v6067_v51 = vld [vmem:[%s7789_s8 + $0x4c8] ss:$16 sps:$4 sm:$0xff]   ;;  %v6072_v52 = vld [vmem:[%s7789_s8 + $0x4e4] ss:$16 sps:$4 sm:$0xff]  }
 0x181   : > { %4493 = vmatprep.subr.bf16.mxu0 %v5988_v53  ;;  %4821 = vmatprep.subr.bf16.mxu1 %v5991_v54  ;;  %v6075_v53 = vld [vmem:[%s7789_s8 + $0x4ec] ss:$16 sps:$4 sm:$0xff]   ;;  %v6070_v54 = vld [vmem:[%s7789_s8 + $0x4e0] ss:$16 sps:$4 sm:$0xff]  }
 0x184   : > { %4494 = vmatpush1.bf16.msra.mxu0 %v5986_v55  ;;  %4822 = vmatpush1.bf16.msra.mxu1 %v5989_v56  ;;  %v6073_v55 = vld [vmem:[%s7789_s8 + $0x4e8] ss:$16 sps:$4 sm:$0xff]   ;;  %v6078_v56 = vld [vmem:[%s7789_s8 + $0x504] ss:$16 sps:$4 sm:$0xff]  }
 0x185   : > { %4495 = vmatprep.subr.bf16.mxu0 %v5994_v57  ;;  %4823 = vmatprep.subr.bf16.mxu1 %v5997_v58  ;;  %v6081_v57 = vld [vmem:[%s7789_s8 + $0x50c] ss:$16 sps:$4 sm:$0xff]   ;;  %v6076_v58 = vld [vmem:[%s7789_s8 + $0x500] ss:$16 sps:$4 sm:$0xff]  }
 0x188   : > { %4496 = vmatpush1.bf16.msra.mxu0 %v5992_v59  ;;  %4824 = vmatpush1.bf16.msra.mxu1 %v5995_v60  ;;  %v6079_v59 = vld [vmem:[%s7789_s8 + $0x508] ss:$16 sps:$4 sm:$0xff]   ;;  %v6084_v60 = vld [vmem:[%s7789_s8 + $0x524] ss:$16 sps:$4 sm:$0xff]  }
 0x189   : > { %4497 = vmatprep.subr.bf16.mxu0 %v6000_v61  ;;  %4825 = vmatprep.subr.bf16.mxu1 %v6003_v62  ;;  %v6087_v61 = vld [vmem:[%s7789_s8 + $0x52c] ss:$16 sps:$4 sm:$0xff]   ;;  %v6082_v62 = vld [vmem:[%s7789_s8 + $0x520] ss:$16 sps:$4 sm:$0xff]  }
 0x18c   : > { %4498 = vmatpush1.bf16.msra.mxu0 %v5998_v63  ;;  %4826 = vmatpush1.bf16.msra.mxu1 %v6001_v0  ;;  %v6085_v63 = vld [vmem:[%s7789_s8 + $0x528] ss:$16 sps:$4 sm:$0xff]   ;;  %v6090_v0 = vld [vmem:[%s7789_s8 + $0x544] ss:$16 sps:$4 sm:$0xff]  }
 0x18d   : > { %4499 = vmatprep.subr.bf16.mxu0 %v6006_v1  ;;  %4827 = vmatprep.subr.bf16.mxu1 %v6009_v2  ;;  %v6093_v1 = vld [vmem:[%s7789_s8 + $0x54c] ss:$16 sps:$4 sm:$0xff]   ;;  %v6088_v2 = vld [vmem:[%s7789_s8 + $0x540] ss:$16 sps:$4 sm:$0xff]  }
 0x190   : > { %4500 = vmatpush1.bf16.msra.mxu0 %v6004_v5  ;;  %4828 = vmatpush1.bf16.msra.mxu1 %v6007_v6  ;;  %v6091_v5 = vld [vmem:[%s7789_s8 + $0x548] ss:$16 sps:$4 sm:$0xff]   ;;  %v6096_v6 = vld [vmem:[%s7789_s8 + $0x564] ss:$16 sps:$4 sm:$0xff]  }
 0x191   : > { %4501 = vmatprep.subr.bf16.mxu0 %v6012_v7  ;;  %4829 = vmatprep.subr.bf16.mxu1 %v6015_v8  ;;  %v6099_v7 = vld [vmem:[%s7789_s8 + $0x56c] ss:$16 sps:$4 sm:$0xff]   ;;  %v6094_v8 = vld [vmem:[%s7789_s8 + $0x560] ss:$16 sps:$4 sm:$0xff]  }
 0x194   : > { %4502 = vmatpush1.bf16.msra.mxu0 %v6010_v9  ;;  %4830 = vmatpush1.bf16.msra.mxu1 %v6013_v11  ;;  %v6097_v9 = vld [vmem:[%s7789_s8 + $0x568] ss:$16 sps:$4 sm:$0xff]   ;;  %v6102_v11 = vld [vmem:[%s7789_s8 + $0x584] ss:$16 sps:$4 sm:$0xff]  }
 0x195   : > { %4503 = vmatprep.subr.bf16.mxu0 %v6018_v13  ;;  %4831 = vmatprep.subr.bf16.mxu1 %v6021_v15  ;;  %v6105_v13 = vld [vmem:[%s7789_s8 + $0x58c] ss:$16 sps:$4 sm:$0xff]   ;;  %v6100_v15 = vld [vmem:[%s7789_s8 + $0x580] ss:$16 sps:$4 sm:$0xff]  }
 0x198   : > { %4504 = vmatpush1.bf16.msra.mxu0 %v6016_v3  ;;  %4832 = vmatpush1.bf16.msra.mxu1 %v6019_v16  ;;  %v6103_v3 = vld [vmem:[%s7789_s8 + $0x588] ss:$16 sps:$4 sm:$0xff]   ;;  %v6108_v16 = vld [vmem:[%s7789_s8 + $0x5a4] ss:$16 sps:$4 sm:$0xff]  }
 0x199   : > { %4505 = vmatprep.subr.bf16.mxu0 %v6024_v17  ;;  %4833 = vmatprep.subr.bf16.mxu1 %v6027_v18  ;;  %v6111_v17 = vld [vmem:[%s7789_s8 + $0x5ac] ss:$16 sps:$4 sm:$0xff]   ;;  %v6106_v18 = vld [vmem:[%s7789_s8 + $0x5a0] ss:$16 sps:$4 sm:$0xff]  }
 0x19c   : > { %4506 = vmatpush1.bf16.msra.mxu0 %v6022_v19  ;;  %4834 = vmatpush1.bf16.msra.mxu1 %v6025_v20  ;;  %v6109_v19 = vld [vmem:[%s7789_s8 + $0x5a8] ss:$16 sps:$4 sm:$0xff]   ;;  %v6114_v20 = vld [vmem:[%s7789_s8 + $0x5c4] ss:$16 sps:$4 sm:$0xff]  }
 0x19d   : > { %4516 = vmatprep.subr.bf16.mxu0 %v6030_v21  ;;  %4844 = vmatprep.subr.bf16.mxu1 %v6033_v22  ;;  %v6117_v21 = vld [vmem:[%s7789_s8 + $0x5cc] ss:$16 sps:$4 sm:$0xff]   ;;  %v1257_v22 = vcombine.high %v7946_v14, %v7946_v14  ;;  %v6121_v14 = vld [vmem:[%s7789_s8 + $0x5e8] ss:$16 sps:$4 sm:$0xff]  }
 0x19f   : > { %4508 = vmatmul.mubr.bf16.vlgmr.msra.gmra.mrb[0].mxu0 %v1326_v25  ;;  %4836 = vmatmul.mubr.bf16.vlgmr.msra.gmra.mrb[0].mxu1 %v1326_v25  ;;  %v6120_v25 = vld [vmem:[%s7789_s8 + $0x5e4] ss:$16 sps:$4 sm:$0xff]  }
 0x1a0   : > { %4517 = vmatpush1.bf16.msra.mxu0 %v6028_v23  ;;  %4845 = vmatpush1.bf16.msra.mxu1 %v6031_v24  ;;  %v6112_v23 = vld [vmem:[%s7789_s8 + $0x5c0] ss:$16 sps:$4 sm:$0xff]   ;;  %v6115_v24 = vld [vmem:[%s7789_s8 + $0x5c8] ss:$16 sps:$4 sm:$0xff]  }
 0x1a1   : > { %4518 = vmatprep.subr.bf16.mxu0 %v6036_v26  ;;  %4846 = vmatprep.subr.bf16.mxu1 %v6039_v27  ;;  %v6123_v26 = vld [vmem:[%s7789_s8 + $0x5ec] ss:$16 sps:$4 sm:$0xff]   ;;  %v8015_v27 = vrot.slane %v1257_v22, %v7796_v10  ;;  %v6199_v22 = vld [vmem:[%s7789_s8 + $0x788] ss:$16 sps:$4 sm:$0xff]  }
 0x1a2   : > { %4548 = vmatprep.mubr.bf16.mxu0 %v1329_v33  ;;  %4876 = vmatprep.mubr.bf16.mxu1 %v1329_v33  ;;  %v1328_v33 = vpack.c.bf16 %v7952_v28, %v7952_v28  ;;  %v6133_v28 = vld [vmem:[%s7789_s8 + $0x628] ss:$16 sps:$4 sm:$0xff]  }
 0x1a4   : > { %4519 = vmatpush1.bf16.msra.mxu0 %v6034_v12  ;;  %4847 = vmatpush1.bf16.msra.mxu1 %v6037_v30  ;;  %v6118_v12 = vld [vmem:[%s7789_s8 + $0x5e0] ss:$16 sps:$4 sm:$0xff]   ;;  %v6129_v30 = vld [vmem:[%s7789_s8 + $0x60c] ss:$16 sps:$4 sm:$0xff]  }
 0x1a5   : > { %4520 = vmatprep.subr.bf16.mxu0 %v6042_v31  ;;  %4848 = vmatprep.subr.bf16.mxu1 %v6045_v32  ;;  %v1273_v31 = vcombine.high %v8015_v27, %v8015_v27  ;;  %v6124_v32 = vld [vmem:[%s7789_s8 + $0x600] ss:$16 sps:$4 sm:$0xff]  }
 0x1a8   : > { %4521 = vmatpush1.bf16.msra.mxu0 %v6040_v34  ;;  %4849 = vmatpush1.bf16.msra.mxu1 %v6043_v35  ;;  %v6127_v34 = vld [vmem:[%s7789_s8 + $0x608] ss:$16 sps:$4 sm:$0xff]   ;;  %v6132_v35 = vld [vmem:[%s7789_s8 + $0x624] ss:$16 sps:$4 sm:$0xff]  }
 0x1a9   : > { %4522 = vmatprep.subr.bf16.mxu0 %v6048_v36  ;;  %4850 = vmatprep.subr.bf16.mxu1 %v6051_v37  ;;  %v6135_v36 = vld [vmem:[%s7789_s8 + $0x62c] ss:$16 sps:$4 sm:$0xff]   ;;  %v1331_v37 = vpack.c.bf16 %v1273_v31, %v1273_v31  ;;  %v6211_v31 = vld [vmem:[%s7789_s8 + $0x7c8] ss:$16 sps:$4 sm:$0xff]  }
 0x1ac   : > { %4523 = vmatpush1.bf16.msra.mxu0 %v6046_v38  ;;  %4851 = vmatpush1.bf16.msra.mxu1 %v6049_v39  ;;  %v6130_v38 = vld [vmem:[%s7789_s8 + $0x620] ss:$16 sps:$4 sm:$0xff]   ;;  %v6138_v39 = vld [vmem:[%s7789_s8 + $0x644] ss:$16 sps:$4 sm:$0xff]  }
 0x1ad   : > { %4524 = vmatprep.subr.bf16.mxu0 %v6054_v40  ;;  %4852 = vmatprep.subr.bf16.mxu1 %v6057_v41  ;;  %v6141_v40 = vld [vmem:[%s7789_s8 + $0x64c] ss:$16 sps:$4 sm:$0xff]   ;;  %v6136_v41 = vld [vmem:[%s7789_s8 + $0x640] ss:$16 sps:$4 sm:$0xff]  }
 0x1b0   : > { %4525 = vmatpush1.bf16.msra.mxu0 %v6052_v42  ;;  %4853 = vmatpush1.bf16.msra.mxu1 %v6055_v43  ;;  %v6139_v42 = vld [vmem:[%s7789_s8 + $0x648] ss:$16 sps:$4 sm:$0xff]   ;;  %v6144_v43 = vld [vmem:[%s7789_s8 + $0x664] ss:$16 sps:$4 sm:$0xff]  }
 0x1b1   : > { %4526 = vmatprep.subr.bf16.mxu0 %v6060_v44  ;;  %4854 = vmatprep.subr.bf16.mxu1 %v6063_v45  ;;  %v6147_v44 = vld [vmem:[%s7789_s8 + $0x66c] ss:$16 sps:$4 sm:$0xff]   ;;  %v6142_v45 = vld [vmem:[%s7789_s8 + $0x660] ss:$16 sps:$4 sm:$0xff]  }
 0x1b4   : > { %4527 = vmatpush1.bf16.msra.mxu0 %v6058_v46  ;;  %4855 = vmatpush1.bf16.msra.mxu1 %v6061_v47  ;;  %v6145_v46 = vld [vmem:[%s7789_s8 + $0x668] ss:$16 sps:$4 sm:$0xff]   ;;  %v6150_v47 = vld [vmem:[%s7789_s8 + $0x684] ss:$16 sps:$4 sm:$0xff]  }
 0x1b5   : > { %4528 = vmatprep.subr.bf16.mxu0 %v6066_v48  ;;  %4856 = vmatprep.subr.bf16.mxu1 %v6069_v49  ;;  %v6153_v48 = vld [vmem:[%s7789_s8 + $0x68c] ss:$16 sps:$4 sm:$0xff]   ;;  %v6148_v49 = vld [vmem:[%s7789_s8 + $0x680] ss:$16 sps:$4 sm:$0xff]  }
 0x1b8   : > { %4529 = vmatpush1.bf16.msra.mxu0 %v6064_v50  ;;  %4857 = vmatpush1.bf16.msra.mxu1 %v6067_v51  ;;  %v6151_v50 = vld [vmem:[%s7789_s8 + $0x688] ss:$16 sps:$4 sm:$0xff]   ;;  %v6156_v51 = vld [vmem:[%s7789_s8 + $0x6a4] ss:$16 sps:$4 sm:$0xff]  }
 0x1b9   : > { %4530 = vmatprep.subr.bf16.mxu0 %v6072_v52  ;;  %4858 = vmatprep.subr.bf16.mxu1 %v6075_v53  ;;  %v6159_v52 = vld [vmem:[%s7789_s8 + $0x6ac] ss:$16 sps:$4 sm:$0xff]   ;;  %v6154_v53 = vld [vmem:[%s7789_s8 + $0x6a0] ss:$16 sps:$4 sm:$0xff]  }
 0x1bc   : > { %4531 = vmatpush1.bf16.msra.mxu0 %v6070_v54  ;;  %4859 = vmatpush1.bf16.msra.mxu1 %v6073_v55  ;;  %v6157_v54 = vld [vmem:[%s7789_s8 + $0x6a8] ss:$16 sps:$4 sm:$0xff]   ;;  %v6162_v55 = vld [vmem:[%s7789_s8 + $0x6c4] ss:$16 sps:$4 sm:$0xff]  }
 0x1bd   : > { %4532 = vmatprep.subr.bf16.mxu0 %v6078_v56  ;;  %4860 = vmatprep.subr.bf16.mxu1 %v6081_v57  ;;  %v6165_v56 = vld [vmem:[%s7789_s8 + $0x6cc] ss:$16 sps:$4 sm:$0xff]   ;;  %v6160_v57 = vld [vmem:[%s7789_s8 + $0x6c0] ss:$16 sps:$4 sm:$0xff]  }
 0x1c0   : > { %4533 = vmatpush1.bf16.msra.mxu0 %v6076_v58  ;;  %4861 = vmatpush1.bf16.msra.mxu1 %v6079_v59  ;;  %v6163_v58 = vld [vmem:[%s7789_s8 + $0x6c8] ss:$16 sps:$4 sm:$0xff]   ;;  %v6168_v59 = vld [vmem:[%s7789_s8 + $0x6e4] ss:$16 sps:$4 sm:$0xff]  }
 0x1c1   : > { %4534 = vmatprep.subr.bf16.mxu0 %v6084_v60  ;;  %4862 = vmatprep.subr.bf16.mxu1 %v6087_v61  ;;  %v6171_v60 = vld [vmem:[%s7789_s8 + $0x6ec] ss:$16 sps:$4 sm:$0xff]   ;;  %v6166_v61 = vld [vmem:[%s7789_s8 + $0x6e0] ss:$16 sps:$4 sm:$0xff]  }
 0x1c4   : > { %4535 = vmatpush1.bf16.msra.mxu0 %v6082_v62  ;;  %4863 = vmatpush1.bf16.msra.mxu1 %v6085_v63  ;;  %v6169_v62 = vld [vmem:[%s7789_s8 + $0x6e8] ss:$16 sps:$4 sm:$0xff]   ;;  %v6174_v63 = vld [vmem:[%s7789_s8 + $0x704] ss:$16 sps:$4 sm:$0xff]  }
 0x1c5   : > { %4536 = vmatprep.subr.bf16.mxu0 %v6090_v0  ;;  %4864 = vmatprep.subr.bf16.mxu1 %v6093_v1  ;;  %v6177_v0 = vld [vmem:[%s7789_s8 + $0x70c] ss:$16 sps:$4 sm:$0xff]   ;;  %v6172_v1 = vld [vmem:[%s7789_s8 + $0x700] ss:$16 sps:$4 sm:$0xff]  }
 0x1c8   : > { %4537 = vmatpush1.bf16.msra.mxu0 %v6088_v2  ;;  %4865 = vmatpush1.bf16.msra.mxu1 %v6091_v5  ;;  %v6175_v2 = vld [vmem:[%s7789_s8 + $0x708] ss:$16 sps:$4 sm:$0xff]   ;;  %v6180_v5 = vld [vmem:[%s7789_s8 + $0x724] ss:$16 sps:$4 sm:$0xff]  }
 0x1c9   : > { %4538 = vmatprep.subr.bf16.mxu0 %v6096_v6  ;;  %4866 = vmatprep.subr.bf16.mxu1 %v6099_v7  ;;  %v6183_v6 = vld [vmem:[%s7789_s8 + $0x72c] ss:$16 sps:$4 sm:$0xff]   ;;  %v6178_v7 = vld [vmem:[%s7789_s8 + $0x720] ss:$16 sps:$4 sm:$0xff]  }
 0x1cc   : > { %4539 = vmatpush1.bf16.msra.mxu0 %v6094_v8  ;;  %4867 = vmatpush1.bf16.msra.mxu1 %v6097_v9  ;;  %v6181_v8 = vld [vmem:[%s7789_s8 + $0x728] ss:$16 sps:$4 sm:$0xff]   ;;  %v6186_v9 = vld [vmem:[%s7789_s8 + $0x744] ss:$16 sps:$4 sm:$0xff]  }
 0x1cd   : > { %4540 = vmatprep.subr.bf16.mxu0 %v6102_v11  ;;  %4868 = vmatprep.subr.bf16.mxu1 %v6105_v13  ;;  %v6189_v11 = vld [vmem:[%s7789_s8 + $0x74c] ss:$16 sps:$4 sm:$0xff]   ;;  %v6184_v13 = vld [vmem:[%s7789_s8 + $0x740] ss:$16 sps:$4 sm:$0xff]  }
 0x1d0   : > { %4541 = vmatpush1.bf16.msra.mxu0 %v6100_v15  ;;  %4869 = vmatpush1.bf16.msra.mxu1 %v6103_v3  ;;  %v6187_v15 = vld [vmem:[%s7789_s8 + $0x748] ss:$16 sps:$4 sm:$0xff]   ;;  %v6192_v3 = vld [vmem:[%s7789_s8 + $0x764] ss:$16 sps:$4 sm:$0xff]  }
 0x1d1   : > { %4542 = vmatprep.subr.bf16.mxu0 %v6108_v16  ;;  %4870 = vmatprep.subr.bf16.mxu1 %v6111_v17  ;;  %v6195_v16 = vld [vmem:[%s7789_s8 + $0x76c] ss:$16 sps:$4 sm:$0xff]   ;;  %v6190_v17 = vld [vmem:[%s7789_s8 + $0x760] ss:$16 sps:$4 sm:$0xff]  }
 0x1d4   : > { %4543 = vmatpush1.bf16.msra.mxu0 %v6106_v18  ;;  %4871 = vmatpush1.bf16.msra.mxu1 %v6109_v19  ;;  %v6193_v18 = vld [vmem:[%s7789_s8 + $0x768] ss:$16 sps:$4 sm:$0xff]   ;;  %v6198_v19 = vld [vmem:[%s7789_s8 + $0x784] ss:$16 sps:$4 sm:$0xff]  }
 0x1d5   : > { %4544 = vmatprep.subr.bf16.mxu0 %v6114_v20  ;;  %4872 = vmatprep.subr.bf16.mxu1 %v6117_v21  ;;  %v6201_v20 = vld [vmem:[%s7789_s8 + $0x78c] ss:$16 sps:$4 sm:$0xff]   ;;  %v6196_v21 = vld [vmem:[%s7789_s8 + $0x780] ss:$16 sps:$4 sm:$0xff]  }
 0x1d8   : > { %4545 = vmatpush1.bf16.msra.mxu0 %v6112_v23  ;;  %4873 = vmatpush1.bf16.msra.mxu1 %v6115_v24  ;;  %v6204_v23 = vld [vmem:[%s7789_s8 + $0x7a4] ss:$16 sps:$4 sm:$0xff]   ;;  %v6207_v24 = vld [vmem:[%s7789_s8 + $0x7ac] ss:$16 sps:$4 sm:$0xff]  }
 0x1d9   : > { %4546 = vmatprep.subr.bf16.mxu0 %v6120_v25  ;;  %4874 = vmatprep.subr.bf16.mxu1 %v6123_v26  ;;  %v6202_v25 = vld [vmem:[%s7789_s8 + $0x7a0] ss:$16 sps:$4 sm:$0xff]   ;;  %v6205_v26 = vld [vmem:[%s7789_s8 + $0x7a8] ss:$16 sps:$4 sm:$0xff]  }
 0x1dc   : > { %4547 = vmatpush1.bf16.msra.mxu0 %v6118_v12  ;;  %4875 = vmatpush1.bf16.msra.mxu1 %v6121_v14  ;;  %v6210_v12 = vld [vmem:[%s7789_s8 + $0x7c4] ss:$16 sps:$4 sm:$0xff]   ;;  %v6213_v14 = vld [vmem:[%s7789_s8 + $0x7cc] ss:$16 sps:$4 sm:$0xff]  }
 0x1dd   : > { %4557 = vmatprep.subr.bf16.mxu0 %v6126_v29  ;;  %4885 = vmatprep.subr.bf16.mxu1 %v6129_v30  ;;  %v8084_v29 = vld [vmem:[%s8448_s0 + $0x10] sm:$0xff]  ;;  %v6208_v30 = vld [vmem:[%s7789_s8 + $0x7c0] ss:$16 sps:$4 sm:$0xff]  }
 0x1df   : > { %4549 = vmatmul.mubr.bf16.vlgmr.msra.gmra.mrb[0].mxu0 %v1328_v33  ;;  %4877 = vmatmul.mubr.bf16.vlgmr.msra.gmra.mrb[0].mxu1 %v1328_v33  ;;  %v6219_v33 = vld [vmem:[%s7789_s8 + $0x7ec] ss:$16 sps:$4 sm:$0xff]  }
 0x1e0   : > { %4558 = vmatpush1.bf16.msra.mxu0 %v6124_v32  ;;  %4886 = vmatpush1.bf16.msra.mxu1 %v6127_v34  ;;  %v6216_v32 = vld [vmem:[%s7789_s8 + $0x7e4] ss:$16 sps:$4 sm:$0xff]   ;;  %v8092_v34 = vrot.slane %v8084_v29, %v7796_v10 }
 0x1e1   : > { %4559 = vmatprep.subr.bf16.mxu0 %v6132_v35  ;;  %4887 = vmatprep.subr.bf16.mxu1 %v6135_v36  ;;  %v6214_v35 = vld [vmem:[%s7789_s8 + $0x7e0] ss:$16 sps:$4 sm:$0xff]   ;;  %v6217_v36 = vld [vmem:[%s7789_s8 + $0x7e8] ss:$16 sps:$4 sm:$0xff]  }
 0x1e2   : > { %4589 = vmatprep.mubr.bf16.mxu0 %v1331_v37  ;;  %4917 = vmatprep.mubr.bf16.mxu1 %v1331_v37  ;;  %v6223_v37 = vld [vmem:[%s7789_s8 + $0x804] ss:$16 sps:$4 sm:$0xff]  }
 0x1e4   : > { %4560 = vmatpush1.bf16.msra.mxu0 %v6130_v38  ;;  %4888 = vmatpush1.bf16.msra.mxu1 %v6133_v28  ;;  %v6226_v38 = vld [vmem:[%s7789_s8 + $0x80c] ss:$16 sps:$4 sm:$0xff]   ;;  %v1289_v28 = vcombine.high %v8092_v34, %v8092_v34 }
 0x1e5   : > { %4561 = vmatprep.subr.bf16.mxu0 %v6138_v39  ;;  %4889 = vmatprep.subr.bf16.mxu1 %v6141_v40  ;;  %v1330_v39 = vpack.c.bf16 %v8015_v27, %v8015_v27  ;;  %v6221_v40 = vld [vmem:[%s7789_s8 + $0x800] ss:$16 sps:$4 sm:$0xff]  }
 0x1e6   : > { %v6227_v27 = vld [vmem:[%s7789_s8 + $0x820] ss:$16 sps:$4 sm:$0xff]  }
 0x1e8   : > { %4562 = vmatpush1.bf16.msra.mxu0 %v6136_v41  ;;  %4890 = vmatpush1.bf16.msra.mxu1 %v6139_v42  ;;  %v6224_v41 = vld [vmem:[%s7789_s8 + $0x808] ss:$16 sps:$4 sm:$0xff]   ;;  %v6229_v42 = vld [vmem:[%s7789_s8 + $0x824] ss:$16 sps:$4 sm:$0xff]  }
 0x1e9   : > { %4563 = vmatprep.subr.bf16.mxu0 %v6144_v43  ;;  %4891 = vmatprep.subr.bf16.mxu1 %v6147_v44  ;;  %v6232_v43 = vld [vmem:[%s7789_s8 + $0x82c] ss:$16 sps:$4 sm:$0xff]   ;;  %v1333_v44 = vpack.c.bf16 %v1289_v28, %v1289_v28  ;;  %v6305_v28 = vld [vmem:[%s7789_s8 + $0x9c0] ss:$16 sps:$4 sm:$0xff]  }
 0x1ec   : > { %4564 = vmatpush1.bf16.msra.mxu0 %v6142_v45  ;;  %4892 = vmatpush1.bf16.msra.mxu1 %v6145_v46  ;;  %v6230_v45 = vld [vmem:[%s7789_s8 + $0x828] ss:$16 sps:$4 sm:$0xff]   ;;  %v6235_v46 = vld [vmem:[%s7789_s8 + $0x844] ss:$16 sps:$4 sm:$0xff]  }
 0x1ed   : > { %4565 = vmatprep.subr.bf16.mxu0 %v6150_v47  ;;  %4893 = vmatprep.subr.bf16.mxu1 %v6153_v48  ;;  %v6238_v47 = vld [vmem:[%s7789_s8 + $0x84c] ss:$16 sps:$4 sm:$0xff]   ;;  %v6233_v48 = vld [vmem:[%s7789_s8 + $0x840] ss:$16 sps:$4 sm:$0xff]  }
 0x1f0   : > { %4566 = vmatpush1.bf16.msra.mxu0 %v6148_v49  ;;  %4894 = vmatpush1.bf16.msra.mxu1 %v6151_v50  ;;  %v6236_v49 = vld [vmem:[%s7789_s8 + $0x848] ss:$16 sps:$4 sm:$0xff]   ;;  %v6241_v50 = vld [vmem:[%s7789_s8 + $0x864] ss:$16 sps:$4 sm:$0xff]  }
 0x1f1   : > { %4567 = vmatprep.subr.bf16.mxu0 %v6156_v51  ;;  %4895 = vmatprep.subr.bf16.mxu1 %v6159_v52  ;;  %v6244_v51 = vld [vmem:[%s7789_s8 + $0x86c] ss:$16 sps:$4 sm:$0xff]   ;;  %v6239_v52 = vld [vmem:[%s7789_s8 + $0x860] ss:$16 sps:$4 sm:$0xff]  }
 0x1f4   : > { %4568 = vmatpush1.bf16.msra.mxu0 %v6154_v53  ;;  %4896 = vmatpush1.bf16.msra.mxu1 %v6157_v54  ;;  %v6242_v53 = vld [vmem:[%s7789_s8 + $0x868] ss:$16 sps:$4 sm:$0xff]   ;;  %v6247_v54 = vld [vmem:[%s7789_s8 + $0x884] ss:$16 sps:$4 sm:$0xff]  }
 0x1f5   : > { %4569 = vmatprep.subr.bf16.mxu0 %v6162_v55  ;;  %4897 = vmatprep.subr.bf16.mxu1 %v6165_v56  ;;  %v6250_v55 = vld [vmem:[%s7789_s8 + $0x88c] ss:$16 sps:$4 sm:$0xff]   ;;  %v6245_v56 = vld [vmem:[%s7789_s8 + $0x880] ss:$16 sps:$4 sm:$0xff]  }
 0x1f8   : > { %4570 = vmatpush1.bf16.msra.mxu0 %v6160_v57  ;;  %4898 = vmatpush1.bf16.msra.mxu1 %v6163_v58  ;;  %v6248_v57 = vld [vmem:[%s7789_s8 + $0x888] ss:$16 sps:$4 sm:$0xff]   ;;  %v6253_v58 = vld [vmem:[%s7789_s8 + $0x8a4] ss:$16 sps:$4 sm:$0xff]  }
 0x1f9   : > { %4571 = vmatprep.subr.bf16.mxu0 %v6168_v59  ;;  %4899 = vmatprep.subr.bf16.mxu1 %v6171_v60  ;;  %v6256_v59 = vld [vmem:[%s7789_s8 + $0x8ac] ss:$16 sps:$4 sm:$0xff]   ;;  %v6251_v60 = vld [vmem:[%s7789_s8 + $0x8a0] ss:$16 sps:$4 sm:$0xff]  }
 0x1fc   : > { %4572 = vmatpush1.bf16.msra.mxu0 %v6166_v61  ;;  %4900 = vmatpush1.bf16.msra.mxu1 %v6169_v62  ;;  %v6254_v61 = vld [vmem:[%s7789_s8 + $0x8a8] ss:$16 sps:$4 sm:$0xff]   ;;  %v6259_v62 = vld [vmem:[%s7789_s8 + $0x8c4] ss:$16 sps:$4 sm:$0xff]  }
 0x1fd   : > { %4573 = vmatprep.subr.bf16.mxu0 %v6174_v63  ;;  %4901 = vmatprep.subr.bf16.mxu1 %v6177_v0  ;;  %v6262_v63 = vld [vmem:[%s7789_s8 + $0x8cc] ss:$16 sps:$4 sm:$0xff]   ;;  %v6257_v0 = vld [vmem:[%s7789_s8 + $0x8c0] ss:$16 sps:$4 sm:$0xff]  }
 0x200   : > { %4574 = vmatpush1.bf16.msra.mxu0 %v6172_v1  ;;  %4902 = vmatpush1.bf16.msra.mxu1 %v6175_v2  ;;  %v6260_v1 = vld [vmem:[%s7789_s8 + $0x8c8] ss:$16 sps:$4 sm:$0xff]   ;;  %v6265_v2 = vld [vmem:[%s7789_s8 + $0x8e4] ss:$16 sps:$4 sm:$0xff]  }
 0x201   : > { %4575 = vmatprep.subr.bf16.mxu0 %v6180_v5  ;;  %4903 = vmatprep.subr.bf16.mxu1 %v6183_v6  ;;  %v6268_v5 = vld [vmem:[%s7789_s8 + $0x8ec] ss:$16 sps:$4 sm:$0xff]   ;;  %v6263_v6 = vld [vmem:[%s7789_s8 + $0x8e0] ss:$16 sps:$4 sm:$0xff]  }
 0x204   : > { %4576 = vmatpush1.bf16.msra.mxu0 %v6178_v7  ;;  %4904 = vmatpush1.bf16.msra.mxu1 %v6181_v8  ;;  %v6266_v7 = vld [vmem:[%s7789_s8 + $0x8e8] ss:$16 sps:$4 sm:$0xff]   ;;  %v6271_v8 = vld [vmem:[%s7789_s8 + $0x904] ss:$16 sps:$4 sm:$0xff]  }
 0x205   : > { %4577 = vmatprep.subr.bf16.mxu0 %v6186_v9  ;;  %4905 = vmatprep.subr.bf16.mxu1 %v6189_v11  ;;  %v6274_v9 = vld [vmem:[%s7789_s8 + $0x90c] ss:$16 sps:$4 sm:$0xff]   ;;  %v6269_v11 = vld [vmem:[%s7789_s8 + $0x900] ss:$16 sps:$4 sm:$0xff]  }
 0x208   : > { %4578 = vmatpush1.bf16.msra.mxu0 %v6184_v13  ;;  %4906 = vmatpush1.bf16.msra.mxu1 %v6187_v15  ;;  %v6272_v13 = vld [vmem:[%s7789_s8 + $0x908] ss:$16 sps:$4 sm:$0xff]   ;;  %v6277_v15 = vld [vmem:[%s7789_s8 + $0x924] ss:$16 sps:$4 sm:$0xff]  }
 0x209   : > { %4579 = vmatprep.subr.bf16.mxu0 %v6192_v3  ;;  %4907 = vmatprep.subr.bf16.mxu1 %v6195_v16  ;;  %v6280_v3 = vld [vmem:[%s7789_s8 + $0x92c] ss:$16 sps:$4 sm:$0xff]   ;;  %v6275_v16 = vld [vmem:[%s7789_s8 + $0x920] ss:$16 sps:$4 sm:$0xff]  }
 0x20c   : > { %4580 = vmatpush1.bf16.msra.mxu0 %v6190_v17  ;;  %4908 = vmatpush1.bf16.msra.mxu1 %v6193_v18  ;;  %v6278_v17 = vld [vmem:[%s7789_s8 + $0x928] ss:$16 sps:$4 sm:$0xff]   ;;  %v6283_v18 = vld [vmem:[%s7789_s8 + $0x944] ss:$16 sps:$4 sm:$0xff]  }
 0x20d   : > { %4581 = vmatprep.subr.bf16.mxu0 %v6198_v19  ;;  %4909 = vmatprep.subr.bf16.mxu1 %v6201_v20  ;;  %v6286_v19 = vld [vmem:[%s7789_s8 + $0x94c] ss:$16 sps:$4 sm:$0xff]   ;;  %v6281_v20 = vld [vmem:[%s7789_s8 + $0x940] ss:$16 sps:$4 sm:$0xff]  }
 0x210   : > { %4582 = vmatpush1.bf16.msra.mxu0 %v6196_v21  ;;  %4910 = vmatpush1.bf16.msra.mxu1 %v6199_v22  ;;  %v6284_v21 = vld [vmem:[%s7789_s8 + $0x948] ss:$16 sps:$4 sm:$0xff]   ;;  %v6289_v22 = vld [vmem:[%s7789_s8 + $0x964] ss:$16 sps:$4 sm:$0xff]  }
 0x211   : > { %4583 = vmatprep.subr.bf16.mxu0 %v6204_v23  ;;  %4911 = vmatprep.subr.bf16.mxu1 %v6207_v24  ;;  %v6292_v23 = vld [vmem:[%s7789_s8 + $0x96c] ss:$16 sps:$4 sm:$0xff]   ;;  %v6287_v24 = vld [vmem:[%s7789_s8 + $0x960] ss:$16 sps:$4 sm:$0xff]  }
 0x214   : > { %4584 = vmatpush1.bf16.msra.mxu0 %v6202_v25  ;;  %4912 = vmatpush1.bf16.msra.mxu1 %v6205_v26  ;;  %v6290_v25 = vld [vmem:[%s7789_s8 + $0x968] ss:$16 sps:$4 sm:$0xff]   ;;  %v6295_v26 = vld [vmem:[%s7789_s8 + $0x984] ss:$16 sps:$4 sm:$0xff]  }
 0x215   : > { %4585 = vmatprep.subr.bf16.mxu0 %v6210_v12  ;;  %4913 = vmatprep.subr.bf16.mxu1 %v6213_v14  ;;  %v6298_v12 = vld [vmem:[%s7789_s8 + $0x98c] ss:$16 sps:$4 sm:$0xff]   ;;  %v6293_v14 = vld [vmem:[%s7789_s8 + $0x980] ss:$16 sps:$4 sm:$0xff]  }
 0x218   : > { %4586 = vmatpush1.bf16.msra.mxu0 %v6208_v30  ;;  %4914 = vmatpush1.bf16.msra.mxu1 %v6211_v31  ;;  %v6296_v30 = vld [vmem:[%s7789_s8 + $0x988] ss:$16 sps:$4 sm:$0xff]   ;;  %v6301_v31 = vld [vmem:[%s7789_s8 + $0x9a4] ss:$16 sps:$4 sm:$0xff]  }
 0x219   : > { %4587 = vmatprep.subr.bf16.mxu0 %v6216_v32  ;;  %4915 = vmatprep.subr.bf16.mxu1 %v6219_v33  ;;  %v6304_v32 = vld [vmem:[%s7789_s8 + $0x9ac] ss:$16 sps:$4 sm:$0xff]   ;;  %v6299_v33 = vld [vmem:[%s7789_s8 + $0x9a0] ss:$16 sps:$4 sm:$0xff]  }
 0x21c   : > { %4588 = vmatpush1.bf16.msra.mxu0 %v6214_v35  ;;  %4916 = vmatpush1.bf16.msra.mxu1 %v6217_v36  ;;  %v6302_v35 = vld [vmem:[%s7789_s8 + $0x9a8] ss:$16 sps:$4 sm:$0xff]   ;;  %v6307_v36 = vld [vmem:[%s7789_s8 + $0x9c4] ss:$16 sps:$4 sm:$0xff]  }
 0x21d   : > { %4598 = vmatprep.subr.bf16.mxu0 %v6223_v37  ;;  %4926 = vmatprep.subr.bf16.mxu1 %v6226_v38  ;;  %v6310_v37 = vld [vmem:[%s7789_s8 + $0x9cc] ss:$16 sps:$4 sm:$0xff]   ;;  %v1274_v38 = vcombine.high %v8084_v29, %v8084_v29  ;;  %v6311_v29 = vld [vmem:[%s7789_s8 + $0x9e0] ss:$16 sps:$4 sm:$0xff]  }
 0x21f   : > { %4590 = vmatmul.mubr.bf16.vlgmr.msra.gmra.mrb[0].mxu0 %v1330_v39  ;;  %4918 = vmatmul.mubr.bf16.vlgmr.msra.gmra.mrb[0].mxu1 %v1330_v39  ;;  %v6308_v39 = vld [vmem:[%s7789_s8 + $0x9c8] ss:$16 sps:$4 sm:$0xff]  }
 0x220   : > { %4599 = vmatpush1.bf16.msra.mxu0 %v6221_v40  ;;  %4927 = vmatpush1.bf16.msra.mxu1 %v6224_v41  ;;  %v6313_v40 = vld [vmem:[%s7789_s8 + $0x9e4] ss:$16 sps:$4 sm:$0xff]   ;;  %v6316_v41 = vld [vmem:[%s7789_s8 + $0x9ec] ss:$16 sps:$4 sm:$0xff]  }
 0x221   : > { %4600 = vmatprep.subr.bf16.mxu0 %v6229_v42  ;;  %4928 = vmatprep.subr.bf16.mxu1 %v6232_v43  ;;  %v8165_v42 = vrot.slane %v1274_v38, %v7796_v10  ;;  %v6314_v43 = vld [vmem:[%s7789_s8 + $0x9e8] ss:$16 sps:$4 sm:$0xff]  }
 0x222   : > { %4630 = vmatprep.mubr.bf16.mxu0 %v1333_v44  ;;  %4958 = vmatprep.mubr.bf16.mxu1 %v1333_v44  ;;  %v6319_v44 = vld [vmem:[%s7789_s8 + $0xa04] ss:$16 sps:$4 sm:$0xff]   ;;  %v6392_v38 = vld [vmem:[%s7789_s8 + $0xb88] ss:$16 sps:$4 sm:$0xff]  }
 0x224   : > { %4601 = vmatpush1.bf16.msra.mxu0 %v6227_v27  ;;  %4929 = vmatpush1.bf16.msra.mxu1 %v6230_v45  ;;  %v6322_v27 = vld [vmem:[%s7789_s8 + $0xa0c] ss:$16 sps:$4 sm:$0xff]   ;;  %v1290_v45 = vcombine.high %v8165_v42, %v8165_v42 }
 0x225   : > { %4602 = vmatprep.subr.bf16.mxu0 %v6235_v46  ;;  %4930 = vmatprep.subr.bf16.mxu1 %v6238_v47  ;;  %v1332_v46 = vpack.c.bf16 %v8092_v34, %v8092_v34  ;;  %v6317_v47 = vld [vmem:[%s7789_s8 + $0xa00] ss:$16 sps:$4 sm:$0xff]  }
 0x226   : > { %v6323_v34 = vld [vmem:[%s7789_s8 + $0xa20] ss:$16 sps:$4 sm:$0xff]  }
 0x228   : > { %4603 = vmatpush1.bf16.msra.mxu0 %v6233_v48  ;;  %4931 = vmatpush1.bf16.msra.mxu1 %v6236_v49  ;;  %v6320_v48 = vld [vmem:[%s7789_s8 + $0xa08] ss:$16 sps:$4 sm:$0xff]   ;;  %v6325_v49 = vld [vmem:[%s7789_s8 + $0xa24] ss:$16 sps:$4 sm:$0xff]  }
 0x229   : > { %4604 = vmatprep.subr.bf16.mxu0 %v6241_v50  ;;  %4932 = vmatprep.subr.bf16.mxu1 %v6244_v51  ;;  %v6328_v50 = vld [vmem:[%s7789_s8 + $0xa2c] ss:$16 sps:$4 sm:$0xff]   ;;  %v1335_v51 = vpack.c.bf16 %v1290_v45, %v1290_v45  ;;  %v6404_v45 = vld [vmem:[%s7789_s8 + $0xbc8] ss:$16 sps:$4 sm:$0xff]  }
 0x22c   : > { %4605 = vmatpush1.bf16.msra.mxu0 %v6239_v52  ;;  %4933 = vmatpush1.bf16.msra.mxu1 %v6242_v53  ;;  %v6326_v52 = vld [vmem:[%s7789_s8 + $0xa28] ss:$16 sps:$4 sm:$0xff]   ;;  %v6331_v53 = vld [vmem:[%s7789_s8 + $0xa44] ss:$16 sps:$4 sm:$0xff]  }
 0x22d   : > { %4606 = vmatprep.subr.bf16.mxu0 %v6247_v54  ;;  %4934 = vmatprep.subr.bf16.mxu1 %v6250_v55  ;;  %v6334_v54 = vld [vmem:[%s7789_s8 + $0xa4c] ss:$16 sps:$4 sm:$0xff]   ;;  %v6329_v55 = vld [vmem:[%s7789_s8 + $0xa40] ss:$16 sps:$4 sm:$0xff]  }
 0x230   : > { %4607 = vmatpush1.bf16.msra.mxu0 %v6245_v56  ;;  %4935 = vmatpush1.bf16.msra.mxu1 %v6248_v57  ;;  %v6332_v56 = vld [vmem:[%s7789_s8 + $0xa48] ss:$16 sps:$4 sm:$0xff]   ;;  %v6337_v57 = vld [vmem:[%s7789_s8 + $0xa64] ss:$16 sps:$4 sm:$0xff]  }
 0x231   : > { %4608 = vmatprep.subr.bf16.mxu0 %v6253_v58  ;;  %4936 = vmatprep.subr.bf16.mxu1 %v6256_v59  ;;  %v6340_v58 = vld [vmem:[%s7789_s8 + $0xa6c] ss:$16 sps:$4 sm:$0xff]   ;;  %v6335_v59 = vld [vmem:[%s7789_s8 + $0xa60] ss:$16 sps:$4 sm:$0xff]  }
 0x234   : > { %4609 = vmatpush1.bf16.msra.mxu0 %v6251_v60  ;;  %4937 = vmatpush1.bf16.msra.mxu1 %v6254_v61  ;;  %v6338_v60 = vld [vmem:[%s7789_s8 + $0xa68] ss:$16 sps:$4 sm:$0xff]   ;;  %v6343_v61 = vld [vmem:[%s7789_s8 + $0xa84] ss:$16 sps:$4 sm:$0xff]  }
 0x235   : > { %4610 = vmatprep.subr.bf16.mxu0 %v6259_v62  ;;  %4938 = vmatprep.subr.bf16.mxu1 %v6262_v63  ;;  %v6346_v62 = vld [vmem:[%s7789_s8 + $0xa8c] ss:$16 sps:$4 sm:$0xff]   ;;  %v6341_v63 = vld [vmem:[%s7789_s8 + $0xa80] ss:$16 sps:$4 sm:$0xff]  }
 0x238   : > { %4611 = vmatpush1.bf16.msra.mxu0 %v6257_v0  ;;  %4939 = vmatpush1.bf16.msra.mxu1 %v6260_v1  ;;  %v6344_v0 = vld [vmem:[%s7789_s8 + $0xa88] ss:$16 sps:$4 sm:$0xff]   ;;  %v6349_v1 = vld [vmem:[%s7789_s8 + $0xaa4] ss:$16 sps:$4 sm:$0xff]  }
 0x239   : > { %4612 = vmatprep.subr.bf16.mxu0 %v6265_v2  ;;  %4940 = vmatprep.subr.bf16.mxu1 %v6268_v5  ;;  %v6352_v2 = vld [vmem:[%s7789_s8 + $0xaac] ss:$16 sps:$4 sm:$0xff]   ;;  %v6347_v5 = vld [vmem:[%s7789_s8 + $0xaa0] ss:$16 sps:$4 sm:$0xff]  }
 0x23c   : > { %4613 = vmatpush1.bf16.msra.mxu0 %v6263_v6  ;;  %4941 = vmatpush1.bf16.msra.mxu1 %v6266_v7  ;;  %v6350_v6 = vld [vmem:[%s7789_s8 + $0xaa8] ss:$16 sps:$4 sm:$0xff]   ;;  %v6355_v7 = vld [vmem:[%s7789_s8 + $0xac4] ss:$16 sps:$4 sm:$0xff]  }
 0x23d   : > { %4614 = vmatprep.subr.bf16.mxu0 %v6271_v8  ;;  %4942 = vmatprep.subr.bf16.mxu1 %v6274_v9  ;;  %v6358_v8 = vld [vmem:[%s7789_s8 + $0xacc] ss:$16 sps:$4 sm:$0xff]   ;;  %v6353_v9 = vld [vmem:[%s7789_s8 + $0xac0] ss:$16 sps:$4 sm:$0xff]  }
 0x240   : > { %4615 = vmatpush1.bf16.msra.mxu0 %v6269_v11  ;;  %4943 = vmatpush1.bf16.msra.mxu1 %v6272_v13  ;;  %v6356_v11 = vld [vmem:[%s7789_s8 + $0xac8] ss:$16 sps:$4 sm:$0xff]   ;;  %v6361_v13 = vld [vmem:[%s7789_s8 + $0xae4] ss:$16 sps:$4 sm:$0xff]  }
 0x241   : > { %4616 = vmatprep.subr.bf16.mxu0 %v6277_v15  ;;  %4944 = vmatprep.subr.bf16.mxu1 %v6280_v3  ;;  %v6364_v15 = vld [vmem:[%s7789_s8 + $0xaec] ss:$16 sps:$4 sm:$0xff]   ;;  %v6359_v3 = vld [vmem:[%s7789_s8 + $0xae0] ss:$16 sps:$4 sm:$0xff]  }
 0x244   : > { %4617 = vmatpush1.bf16.msra.mxu0 %v6275_v16  ;;  %4945 = vmatpush1.bf16.msra.mxu1 %v6278_v17  ;;  %v6362_v16 = vld [vmem:[%s7789_s8 + $0xae8] ss:$16 sps:$4 sm:$0xff]   ;;  %v6367_v17 = vld [vmem:[%s7789_s8 + $0xb04] ss:$16 sps:$4 sm:$0xff]  }
 0x245   : > { %4618 = vmatprep.subr.bf16.mxu0 %v6283_v18  ;;  %4946 = vmatprep.subr.bf16.mxu1 %v6286_v19  ;;  %v6370_v18 = vld [vmem:[%s7789_s8 + $0xb0c] ss:$16 sps:$4 sm:$0xff]   ;;  %v6365_v19 = vld [vmem:[%s7789_s8 + $0xb00] ss:$16 sps:$4 sm:$0xff]  }
 0x248   : > { %4619 = vmatpush1.bf16.msra.mxu0 %v6281_v20  ;;  %4947 = vmatpush1.bf16.msra.mxu1 %v6284_v21  ;;  %v6368_v20 = vld [vmem:[%s7789_s8 + $0xb08] ss:$16 sps:$4 sm:$0xff]   ;;  %v6373_v21 = vld [vmem:[%s7789_s8 + $0xb24] ss:$16 sps:$4 sm:$0xff]  }
 0x249   : > { %4620 = vmatprep.subr.bf16.mxu0 %v6289_v22  ;;  %4948 = vmatprep.subr.bf16.mxu1 %v6292_v23  ;;  %v6376_v22 = vld [vmem:[%s7789_s8 + $0xb2c] ss:$16 sps:$4 sm:$0xff]   ;;  %v6371_v23 = vld [vmem:[%s7789_s8 + $0xb20] ss:$16 sps:$4 sm:$0xff]  }
 0x24c   : > { %4621 = vmatpush1.bf16.msra.mxu0 %v6287_v24  ;;  %4949 = vmatpush1.bf16.msra.mxu1 %v6290_v25  ;;  %v6374_v24 = vld [vmem:[%s7789_s8 + $0xb28] ss:$16 sps:$4 sm:$0xff]   ;;  %v6379_v25 = vld [vmem:[%s7789_s8 + $0xb44] ss:$16 sps:$4 sm:$0xff]  }
 0x24d   : > { %4622 = vmatprep.subr.bf16.mxu0 %v6295_v26  ;;  %4950 = vmatprep.subr.bf16.mxu1 %v6298_v12  ;;  %v6382_v26 = vld [vmem:[%s7789_s8 + $0xb4c] ss:$16 sps:$4 sm:$0xff]   ;;  %v6377_v12 = vld [vmem:[%s7789_s8 + $0xb40] ss:$16 sps:$4 sm:$0xff]  }
 0x250   : > { %4623 = vmatpush1.bf16.msra.mxu0 %v6293_v14  ;;  %4951 = vmatpush1.bf16.msra.mxu1 %v6296_v30  ;;  %v6380_v14 = vld [vmem:[%s7789_s8 + $0xb48] ss:$16 sps:$4 sm:$0xff]   ;;  %v6385_v30 = vld [vmem:[%s7789_s8 + $0xb64] ss:$16 sps:$4 sm:$0xff]  }
 0x251   : > { %4624 = vmatprep.subr.bf16.mxu0 %v6301_v31  ;;  %4952 = vmatprep.subr.bf16.mxu1 %v6304_v32  ;;  %v6388_v31 = vld [vmem:[%s7789_s8 + $0xb6c] ss:$16 sps:$4 sm:$0xff]   ;;  %v6383_v32 = vld [vmem:[%s7789_s8 + $0xb60] ss:$16 sps:$4 sm:$0xff]  }
 0x254   : > { %4625 = vmatpush1.bf16.msra.mxu0 %v6299_v33  ;;  %4953 = vmatpush1.bf16.msra.mxu1 %v6302_v35  ;;  %v6386_v33 = vld [vmem:[%s7789_s8 + $0xb68] ss:$16 sps:$4 sm:$0xff]   ;;  %v6391_v35 = vld [vmem:[%s7789_s8 + $0xb84] ss:$16 sps:$4 sm:$0xff]  }
 0x255   : > { %4626 = vmatprep.subr.bf16.mxu0 %v6307_v36  ;;  %4954 = vmatprep.subr.bf16.mxu1 %v6310_v37  ;;  %v6394_v36 = vld [vmem:[%s7789_s8 + $0xb8c] ss:$16 sps:$4 sm:$0xff]   ;;  %v6389_v37 = vld [vmem:[%s7789_s8 + $0xb80] ss:$16 sps:$4 sm:$0xff]  }
 0x258   : > { %4627 = vmatpush1.bf16.msra.mxu0 %v6305_v28  ;;  %4955 = vmatpush1.bf16.msra.mxu1 %v6308_v39  ;;  %v6397_v28 = vld [vmem:[%s7789_s8 + $0xba4] ss:$16 sps:$4 sm:$0xff]   ;;  %v6400_v39 = vld [vmem:[%s7789_s8 + $0xbac] ss:$16 sps:$4 sm:$0xff]  }
 0x259   : > { %4628 = vmatprep.subr.bf16.mxu0 %v6313_v40  ;;  %4956 = vmatprep.subr.bf16.mxu1 %v6316_v41  ;;  %v6395_v40 = vld [vmem:[%s7789_s8 + $0xba0] ss:$16 sps:$4 sm:$0xff]   ;;  %v6398_v41 = vld [vmem:[%s7789_s8 + $0xba8] ss:$16 sps:$4 sm:$0xff]  }
 0x25c   : > { %4629 = vmatpush1.bf16.msra.mxu0 %v6311_v29  ;;  %4957 = vmatpush1.bf16.msra.mxu1 %v6314_v43  ;;  %v6403_v29 = vld [vmem:[%s7789_s8 + $0xbc4] ss:$16 sps:$4 sm:$0xff]   ;;  %v6406_v43 = vld [vmem:[%s7789_s8 + $0xbcc] ss:$16 sps:$4 sm:$0xff]  }
 0x25d   : > { %4639 = vmatprep.subr.bf16.mxu0 %v6319_v44  ;;  %4967 = vmatprep.subr.bf16.mxu1 %v6322_v27  ;;  %v8234_v44 = vld [vmem:[%s8448_s0 + $0x18] sm:$0xff] }
 0x25e   : > { %v6401_v27 = vld [vmem:[%s7789_s8 + $0xbc0] ss:$16 sps:$4 sm:$0xff]  }
 0x25f   : > { %4631 = vmatmul.mubr.bf16.vlgmr.msra.gmra.mrb[0].mxu0 %v1332_v46  ;;  %4959 = vmatmul.mubr.bf16.vlgmr.msra.gmra.mrb[0].mxu1 %v1332_v46  ;;  %v6409_v46 = vld [vmem:[%s7789_s8 + $0xbe4] ss:$16 sps:$4 sm:$0xff]  }
 0x260   : > { %4640 = vmatpush1.bf16.msra.mxu0 %v6317_v47  ;;  %4968 = vmatpush1.bf16.msra.mxu1 %v6320_v48  ;;  %v6412_v47 = vld [vmem:[%s7789_s8 + $0xbec] ss:$16 sps:$4 sm:$0xff]   ;;  %v8242_v48 = vrot.slane %v8234_v44, %v7796_v10 }
 0x261   : > { %4641 = vmatprep.subr.bf16.mxu0 %v6325_v49  ;;  %4969 = vmatprep.subr.bf16.mxu1 %v6328_v50  ;;  %v6407_v49 = vld [vmem:[%s7789_s8 + $0xbe0] ss:$16 sps:$4 sm:$0xff]   ;;  %v6410_v50 = vld [vmem:[%s7789_s8 + $0xbe8] ss:$16 sps:$4 sm:$0xff]  }
 0x262   : > { %4671 = vmatprep.mubr.bf16.mxu0 %v1335_v51  ;;  %4999 = vmatprep.mubr.bf16.mxu1 %v1335_v51  ;;  %v6416_v51 = vld [vmem:[%s7789_s8 + $0xc04] ss:$16 sps:$4 sm:$0xff]  }
 0x264   : > { %4642 = vmatpush1.bf16.msra.mxu0 %v6323_v34  ;;  %4970 = vmatpush1.bf16.msra.mxu1 %v6326_v52  ;;  %v6419_v34 = vld [vmem:[%s7789_s8 + $0xc0c] ss:$16 sps:$4 sm:$0xff]   ;;  %v1306_v52 = vcombine.high %v8242_v48, %v8242_v48 }
 0x265   : > { %4643 = vmatprep.subr.bf16.mxu0 %v6331_v53  ;;  %4971 = vmatprep.subr.bf16.mxu1 %v6334_v54  ;;  %v1334_v53 = vpack.c.bf16 %v8165_v42, %v8165_v42  ;;  %v6414_v54 = vld [vmem:[%s7789_s8 + $0xc00] ss:$16 sps:$4 sm:$0xff]  }
 0x266   : > { %v6420_v42 = vld [vmem:[%s7789_s8 + $0xc20] ss:$16 sps:$4 sm:$0xff]  }
 0x268   : > { %4644 = vmatpush1.bf16.msra.mxu0 %v6329_v55  ;;  %4972 = vmatpush1.bf16.msra.mxu1 %v6332_v56  ;;  %v6417_v55 = vld [vmem:[%s7789_s8 + $0xc08] ss:$16 sps:$4 sm:$0xff]   ;;  %v6422_v56 = vld [vmem:[%s7789_s8 + $0xc24] ss:$16 sps:$4 sm:$0xff]  }
 0x269   : > { %4645 = vmatprep.subr.bf16.mxu0 %v6337_v57  ;;  %4973 = vmatprep.subr.bf16.mxu1 %v6340_v58  ;;  %v6425_v57 = vld [vmem:[%s7789_s8 + $0xc2c] ss:$16 sps:$4 sm:$0xff]   ;;  %v1337_v58 = vpack.c.bf16 %v1306_v52, %v1306_v52  ;;  %v6498_v52 = vld [vmem:[%s7789_s8 + $0xdc0] ss:$16 sps:$4 sm:$0xff]  }
 0x26c   : > { %4646 = vmatpush1.bf16.msra.mxu0 %v6335_v59  ;;  %4974 = vmatpush1.bf16.msra.mxu1 %v6338_v60  ;;  %v6423_v59 = vld [vmem:[%s7789_s8 + $0xc28] ss:$16 sps:$4 sm:$0xff]   ;;  %v6428_v60 = vld [vmem:[%s7789_s8 + $0xc44] ss:$16 sps:$4 sm:$0xff]  }
 0x26d   : > { %4647 = vmatprep.subr.bf16.mxu0 %v6343_v61  ;;  %4975 = vmatprep.subr.bf16.mxu1 %v6346_v62  ;;  %v6431_v61 = vld [vmem:[%s7789_s8 + $0xc4c] ss:$16 sps:$4 sm:$0xff]   ;;  %v6426_v62 = vld [vmem:[%s7789_s8 + $0xc40] ss:$16 sps:$4 sm:$0xff]  }
 0x270   : > { %4648 = vmatpush1.bf16.msra.mxu0 %v6341_v63  ;;  %4976 = vmatpush1.bf16.msra.mxu1 %v6344_v0  ;;  %v6429_v63 = vld [vmem:[%s7789_s8 + $0xc48] ss:$16 sps:$4 sm:$0xff]   ;;  %v6434_v0 = vld [vmem:[%s7789_s8 + $0xc64] ss:$16 sps:$4 sm:$0xff]  }
 0x271   : > { %4649 = vmatprep.subr.bf16.mxu0 %v6349_v1  ;;  %4977 = vmatprep.subr.bf16.mxu1 %v6352_v2  ;;  %v6437_v1 = vld [vmem:[%s7789_s8 + $0xc6c] ss:$16 sps:$4 sm:$0xff]   ;;  %v6432_v2 = vld [vmem:[%s7789_s8 + $0xc60] ss:$16 sps:$4 sm:$0xff]  }
 0x274   : > { %4650 = vmatpush1.bf16.msra.mxu0 %v6347_v5  ;;  %4978 = vmatpush1.bf16.msra.mxu1 %v6350_v6  ;;  %v6435_v5 = vld [vmem:[%s7789_s8 + $0xc68] ss:$16 sps:$4 sm:$0xff]   ;;  %v6440_v6 = vld [vmem:[%s7789_s8 + $0xc84] ss:$16 sps:$4 sm:$0xff]  }
 0x275   : > { %4651 = vmatprep.subr.bf16.mxu0 %v6355_v7  ;;  %4979 = vmatprep.subr.bf16.mxu1 %v6358_v8  ;;  %v6443_v7 = vld [vmem:[%s7789_s8 + $0xc8c] ss:$16 sps:$4 sm:$0xff]   ;;  %v6438_v8 = vld [vmem:[%s7789_s8 + $0xc80] ss:$16 sps:$4 sm:$0xff]  }
 0x278   : > { %4652 = vmatpush1.bf16.msra.mxu0 %v6353_v9  ;;  %4980 = vmatpush1.bf16.msra.mxu1 %v6356_v11  ;;  %v6441_v9 = vld [vmem:[%s7789_s8 + $0xc88] ss:$16 sps:$4 sm:$0xff]   ;;  %v6446_v11 = vld [vmem:[%s7789_s8 + $0xca4] ss:$16 sps:$4 sm:$0xff]  }
 0x279   : > { %4653 = vmatprep.subr.bf16.mxu0 %v6361_v13  ;;  %4981 = vmatprep.subr.bf16.mxu1 %v6364_v15  ;;  %v6449_v13 = vld [vmem:[%s7789_s8 + $0xcac] ss:$16 sps:$4 sm:$0xff]   ;;  %v6444_v15 = vld [vmem:[%s7789_s8 + $0xca0] ss:$16 sps:$4 sm:$0xff]  }
 0x27c   : > { %4654 = vmatpush1.bf16.msra.mxu0 %v6359_v3  ;;  %4982 = vmatpush1.bf16.msra.mxu1 %v6362_v16  ;;  %v6447_v3 = vld [vmem:[%s7789_s8 + $0xca8] ss:$16 sps:$4 sm:$0xff]   ;;  %v6452_v16 = vld [vmem:[%s7789_s8 + $0xcc4] ss:$16 sps:$4 sm:$0xff]  }
 0x27d   : > { %4655 = vmatprep.subr.bf16.mxu0 %v6367_v17  ;;  %4983 = vmatprep.subr.bf16.mxu1 %v6370_v18  ;;  %v6455_v17 = vld [vmem:[%s7789_s8 + $0xccc] ss:$16 sps:$4 sm:$0xff]   ;;  %v6450_v18 = vld [vmem:[%s7789_s8 + $0xcc0] ss:$16 sps:$4 sm:$0xff]  }
 0x280   : > { %4656 = vmatpush1.bf16.msra.mxu0 %v6365_v19  ;;  %4984 = vmatpush1.bf16.msra.mxu1 %v6368_v20  ;;  %v6453_v19 = vld [vmem:[%s7789_s8 + $0xcc8] ss:$16 sps:$4 sm:$0xff]   ;;  %v6458_v20 = vld [vmem:[%s7789_s8 + $0xce4] ss:$16 sps:$4 sm:$0xff]  }
 0x281   : > { %4657 = vmatprep.subr.bf16.mxu0 %v6373_v21  ;;  %4985 = vmatprep.subr.bf16.mxu1 %v6376_v22  ;;  %v6461_v21 = vld [vmem:[%s7789_s8 + $0xcec] ss:$16 sps:$4 sm:$0xff]   ;;  %v6456_v22 = vld [vmem:[%s7789_s8 + $0xce0] ss:$16 sps:$4 sm:$0xff]  }
 0x284   : > { %4658 = vmatpush1.bf16.msra.mxu0 %v6371_v23  ;;  %4986 = vmatpush1.bf16.msra.mxu1 %v6374_v24  ;;  %v6459_v23 = vld [vmem:[%s7789_s8 + $0xce8] ss:$16 sps:$4 sm:$0xff]   ;;  %v6464_v24 = vld [vmem:[%s7789_s8 + $0xd04] ss:$16 sps:$4 sm:$0xff]  }
 0x285   : > { %4659 = vmatprep.subr.bf16.mxu0 %v6379_v25  ;;  %4987 = vmatprep.subr.bf16.mxu1 %v6382_v26  ;;  %v6467_v25 = vld [vmem:[%s7789_s8 + $0xd0c] ss:$16 sps:$4 sm:$0xff]   ;;  %v6462_v26 = vld [vmem:[%s7789_s8 + $0xd00] ss:$16 sps:$4 sm:$0xff]  }
 0x288   : > { %4660 = vmatpush1.bf16.msra.mxu0 %v6377_v12  ;;  %4988 = vmatpush1.bf16.msra.mxu1 %v6380_v14  ;;  %v6465_v12 = vld [vmem:[%s7789_s8 + $0xd08] ss:$16 sps:$4 sm:$0xff]   ;;  %v6470_v14 = vld [vmem:[%s7789_s8 + $0xd24] ss:$16 sps:$4 sm:$0xff]  }
 0x289   : > { %4661 = vmatprep.subr.bf16.mxu0 %v6385_v30  ;;  %4989 = vmatprep.subr.bf16.mxu1 %v6388_v31  ;;  %v6473_v30 = vld [vmem:[%s7789_s8 + $0xd2c] ss:$16 sps:$4 sm:$0xff]   ;;  %v6468_v31 = vld [vmem:[%s7789_s8 + $0xd20] ss:$16 sps:$4 sm:$0xff]  }
 0x28c   : > { %4662 = vmatpush1.bf16.msra.mxu0 %v6383_v32  ;;  %4990 = vmatpush1.bf16.msra.mxu1 %v6386_v33  ;;  %v6471_v32 = vld [vmem:[%s7789_s8 + $0xd28] ss:$16 sps:$4 sm:$0xff]   ;;  %v6476_v33 = vld [vmem:[%s7789_s8 + $0xd44] ss:$16 sps:$4 sm:$0xff]  }
 0x28d   : > { %4663 = vmatprep.subr.bf16.mxu0 %v6391_v35  ;;  %4991 = vmatprep.subr.bf16.mxu1 %v6394_v36  ;;  %v6479_v35 = vld [vmem:[%s7789_s8 + $0xd4c] ss:$16 sps:$4 sm:$0xff]   ;;  %v6474_v36 = vld [vmem:[%s7789_s8 + $0xd40] ss:$16 sps:$4 sm:$0xff]  }
 0x290   : > { %4664 = vmatpush1.bf16.msra.mxu0 %v6389_v37  ;;  %4992 = vmatpush1.bf16.msra.mxu1 %v6392_v38  ;;  %v6477_v37 = vld [vmem:[%s7789_s8 + $0xd48] ss:$16 sps:$4 sm:$0xff]   ;;  %v6482_v38 = vld [vmem:[%s7789_s8 + $0xd64] ss:$16 sps:$4 sm:$0xff]  }
 0x291   : > { %4665 = vmatprep.subr.bf16.mxu0 %v6397_v28  ;;  %4993 = vmatprep.subr.bf16.mxu1 %v6400_v39  ;;  %v6485_v28 = vld [vmem:[%s7789_s8 + $0xd6c] ss:$16 sps:$4 sm:$0xff]   ;;  %v6480_v39 = vld [vmem:[%s7789_s8 + $0xd60] ss:$16 sps:$4 sm:$0xff]  }
 0x294   : > { %4666 = vmatpush1.bf16.msra.mxu0 %v6395_v40  ;;  %4994 = vmatpush1.bf16.msra.mxu1 %v6398_v41  ;;  %v6483_v40 = vld [vmem:[%s7789_s8 + $0xd68] ss:$16 sps:$4 sm:$0xff]   ;;  %v6488_v41 = vld [vmem:[%s7789_s8 + $0xd84] ss:$16 sps:$4 sm:$0xff]  }
 0x295   : > { %4667 = vmatprep.subr.bf16.mxu0 %v6403_v29  ;;  %4995 = vmatprep.subr.bf16.mxu1 %v6406_v43  ;;  %v6491_v29 = vld [vmem:[%s7789_s8 + $0xd8c] ss:$16 sps:$4 sm:$0xff]   ;;  %v6486_v43 = vld [vmem:[%s7789_s8 + $0xd80] ss:$16 sps:$4 sm:$0xff]  }
 0x298   : > { %4668 = vmatpush1.bf16.msra.mxu0 %v6401_v27  ;;  %4996 = vmatpush1.bf16.msra.mxu1 %v6404_v45  ;;  %v6489_v27 = vld [vmem:[%s7789_s8 + $0xd88] ss:$16 sps:$4 sm:$0xff]   ;;  %v6494_v45 = vld [vmem:[%s7789_s8 + $0xda4] ss:$16 sps:$4 sm:$0xff]  }
 0x299   : > { %4669 = vmatprep.subr.bf16.mxu0 %v6409_v46  ;;  %4997 = vmatprep.subr.bf16.mxu1 %v6412_v47  ;;  %v6497_v46 = vld [vmem:[%s7789_s8 + $0xdac] ss:$16 sps:$4 sm:$0xff]   ;;  %v6492_v47 = vld [vmem:[%s7789_s8 + $0xda0] ss:$16 sps:$4 sm:$0xff]  }
 0x29c   : > { %4670 = vmatpush1.bf16.msra.mxu0 %v6407_v49  ;;  %4998 = vmatpush1.bf16.msra.mxu1 %v6410_v50  ;;  %v6495_v49 = vld [vmem:[%s7789_s8 + $0xda8] ss:$16 sps:$4 sm:$0xff]   ;;  %v6500_v50 = vld [vmem:[%s7789_s8 + $0xdc4] ss:$16 sps:$4 sm:$0xff]  }
 0x29d   : > { %4680 = vmatprep.subr.bf16.mxu0 %v6416_v51  ;;  %5008 = vmatprep.subr.bf16.mxu1 %v6419_v34  ;;  %v6503_v51 = vld [vmem:[%s7789_s8 + $0xdcc] ss:$16 sps:$4 sm:$0xff]   ;;  %v1291_v34 = vcombine.high %v8234_v44, %v8234_v44  ;;  %v6504_v44 = vld [vmem:[%s7789_s8 + $0xde0] ss:$16 sps:$4 sm:$0xff]  }
 0x29f   : > { %4672 = vmatmul.mubr.bf16.vlgmr.msra.gmra.mrb[0].mxu0 %v1334_v53  ;;  %5000 = vmatmul.mubr.bf16.vlgmr.msra.gmra.mrb[0].mxu1 %v1334_v53  ;;  %v6501_v53 = vld [vmem:[%s7789_s8 + $0xdc8] ss:$16 sps:$4 sm:$0xff]  }
 0x2a0   : > { %4681 = vmatpush1.bf16.msra.mxu0 %v6414_v54  ;;  %5009 = vmatpush1.bf16.msra.mxu1 %v6417_v55  ;;  %v6506_v54 = vld [vmem:[%s7789_s8 + $0xde4] ss:$16 sps:$4 sm:$0xff]   ;;  %v6509_v55 = vld [vmem:[%s7789_s8 + $0xdec] ss:$16 sps:$4 sm:$0xff]  }
 0x2a1   : > { %4682 = vmatprep.subr.bf16.mxu0 %v6422_v56  ;;  %5010 = vmatprep.subr.bf16.mxu1 %v6425_v57  ;;  %v8315_v56 = vrot.slane %v1291_v34, %v7796_v10  ;;  %v6507_v57 = vld [vmem:[%s7789_s8 + $0xde8] ss:$16 sps:$4 sm:$0xff]  }
 0x2a2   : > { %4712 = vmatprep.mubr.bf16.mxu0 %v1337_v58  ;;  %5040 = vmatprep.mubr.bf16.mxu1 %v1337_v58  ;;  %v6512_v58 = vld [vmem:[%s7789_s8 + $0xe04] ss:$16 sps:$4 sm:$0xff]   ;;  %v6585_v34 = vld [vmem:[%s7789_s8 + $0xf88] ss:$16 sps:$4 sm:$0xff]  }
 0x2a4   : > { %4683 = vmatpush1.bf16.msra.mxu0 %v6420_v42  ;;  %5011 = vmatpush1.bf16.msra.mxu1 %v6423_v59  ;;  %v6515_v42 = vld [vmem:[%s7789_s8 + $0xe0c] ss:$16 sps:$4 sm:$0xff]   ;;  %v1307_v59 = vcombine.high %v8315_v56, %v8315_v56 }
 0x2a5   : > { %4684 = vmatprep.subr.bf16.mxu0 %v6428_v60  ;;  %5012 = vmatprep.subr.bf16.mxu1 %v6431_v61  ;;  %v1336_v60 = vpack.c.bf16 %v8242_v48, %v8242_v48  ;;  %v6510_v61 = vld [vmem:[%s7789_s8 + $0xe00] ss:$16 sps:$4 sm:$0xff]  }
 0x2a6   : > { %v6516_v48 = vld [vmem:[%s7789_s8 + $0xe20] ss:$16 sps:$4 sm:$0xff]  }
 0x2a8   : > { %4685 = vmatpush1.bf16.msra.mxu0 %v6426_v62  ;;  %5013 = vmatpush1.bf16.msra.mxu1 %v6429_v63  ;;  %v6513_v62 = vld [vmem:[%s7789_s8 + $0xe08] ss:$16 sps:$4 sm:$0xff]   ;;  %v6518_v63 = vld [vmem:[%s7789_s8 + $0xe24] ss:$16 sps:$4 sm:$0xff]  }
 0x2a9   : > { %4686 = vmatprep.subr.bf16.mxu0 %v6434_v0  ;;  %5014 = vmatprep.subr.bf16.mxu1 %v6437_v1  ;;  %v6521_v0 = vld [vmem:[%s7789_s8 + $0xe2c] ss:$16 sps:$4 sm:$0xff]   ;;  %v1339_v1 = vpack.c.bf16 %v1307_v59, %v1307_v59  ;;  %v6602_v59 = vld [vmem:[%s7789_s8 + $0xfe4] ss:$16 sps:$4 sm:$0xff]  }
 0x2ac   : > { %4687 = vmatpush1.bf16.msra.mxu0 %v6432_v2  ;;  %5015 = vmatpush1.bf16.msra.mxu1 %v6435_v5  ;;  %v6519_v2 = vld [vmem:[%s7789_s8 + $0xe28] ss:$16 sps:$4 sm:$0xff]   ;;  %v6524_v5 = vld [vmem:[%s7789_s8 + $0xe44] ss:$16 sps:$4 sm:$0xff]  }
 0x2ad   : > { %4688 = vmatprep.subr.bf16.mxu0 %v6440_v6  ;;  %5016 = vmatprep.subr.bf16.mxu1 %v6443_v7  ;;  %v6527_v6 = vld [vmem:[%s7789_s8 + $0xe4c] ss:$16 sps:$4 sm:$0xff]   ;;  %v6522_v7 = vld [vmem:[%s7789_s8 + $0xe40] ss:$16 sps:$4 sm:$0xff]  }
 0x2b0   : > { %4689 = vmatpush1.bf16.msra.mxu0 %v6438_v8  ;;  %5017 = vmatpush1.bf16.msra.mxu1 %v6441_v9  ;;  %v6525_v8 = vld [vmem:[%s7789_s8 + $0xe48] ss:$16 sps:$4 sm:$0xff]   ;;  %v6530_v9 = vld [vmem:[%s7789_s8 + $0xe64] ss:$16 sps:$4 sm:$0xff]  }
 0x2b1   : > { %4690 = vmatprep.subr.bf16.mxu0 %v6446_v11  ;;  %5018 = vmatprep.subr.bf16.mxu1 %v6449_v13  ;;  %v6533_v11 = vld [vmem:[%s7789_s8 + $0xe6c] ss:$16 sps:$4 sm:$0xff]   ;;  %v6528_v13 = vld [vmem:[%s7789_s8 + $0xe60] ss:$16 sps:$4 sm:$0xff]  }
 0x2b4   : > { %4691 = vmatpush1.bf16.msra.mxu0 %v6444_v15  ;;  %5019 = vmatpush1.bf16.msra.mxu1 %v6447_v3  ;;  %v6531_v15 = vld [vmem:[%s7789_s8 + $0xe68] ss:$16 sps:$4 sm:$0xff]   ;;  %v6536_v3 = vld [vmem:[%s7789_s8 + $0xe84] ss:$16 sps:$4 sm:$0xff]  }
 0x2b5   : > { %4692 = vmatprep.subr.bf16.mxu0 %v6452_v16  ;;  %5020 = vmatprep.subr.bf16.mxu1 %v6455_v17  ;;  %v6539_v16 = vld [vmem:[%s7789_s8 + $0xe8c] ss:$16 sps:$4 sm:$0xff]   ;;  %v6534_v17 = vld [vmem:[%s7789_s8 + $0xe80] ss:$16 sps:$4 sm:$0xff]  }
 0x2b8   : > { %4693 = vmatpush1.bf16.msra.mxu0 %v6450_v18  ;;  %5021 = vmatpush1.bf16.msra.mxu1 %v6453_v19  ;;  %v6537_v18 = vld [vmem:[%s7789_s8 + $0xe88] ss:$16 sps:$4 sm:$0xff]   ;;  %v6542_v19 = vld [vmem:[%s7789_s8 + $0xea4] ss:$16 sps:$4 sm:$0xff]  }
 0x2b9   : > { %4694 = vmatprep.subr.bf16.mxu0 %v6458_v20  ;;  %5022 = vmatprep.subr.bf16.mxu1 %v6461_v21  ;;  %v6545_v20 = vld [vmem:[%s7789_s8 + $0xeac] ss:$16 sps:$4 sm:$0xff]   ;;  %v6540_v21 = vld [vmem:[%s7789_s8 + $0xea0] ss:$16 sps:$4 sm:$0xff]  }
 0x2bc   : > { %4695 = vmatpush1.bf16.msra.mxu0 %v6456_v22  ;;  %5023 = vmatpush1.bf16.msra.mxu1 %v6459_v23  ;;  %v6543_v22 = vld [vmem:[%s7789_s8 + $0xea8] ss:$16 sps:$4 sm:$0xff]   ;;  %v6548_v23 = vld [vmem:[%s7789_s8 + $0xec4] ss:$16 sps:$4 sm:$0xff]  }
 0x2bd   : > { %4696 = vmatprep.subr.bf16.mxu0 %v6464_v24  ;;  %5024 = vmatprep.subr.bf16.mxu1 %v6467_v25  ;;  %v6551_v24 = vld [vmem:[%s7789_s8 + $0xecc] ss:$16 sps:$4 sm:$0xff]   ;;  %v6546_v25 = vld [vmem:[%s7789_s8 + $0xec0] ss:$16 sps:$4 sm:$0xff]  }
 0x2c0   : > { %4697 = vmatpush1.bf16.msra.mxu0 %v6462_v26  ;;  %5025 = vmatpush1.bf16.msra.mxu1 %v6465_v12  ;;  %v6549_v26 = vld [vmem:[%s7789_s8 + $0xec8] ss:$16 sps:$4 sm:$0xff]   ;;  %v6554_v12 = vld [vmem:[%s7789_s8 + $0xee4] ss:$16 sps:$4 sm:$0xff]  }
 0x2c1   : > { %4698 = vmatprep.subr.bf16.mxu0 %v6470_v14  ;;  %5026 = vmatprep.subr.bf16.mxu1 %v6473_v30  ;;  %v6557_v14 = vld [vmem:[%s7789_s8 + $0xeec] ss:$16 sps:$4 sm:$0xff]   ;;  %v6552_v30 = vld [vmem:[%s7789_s8 + $0xee0] ss:$16 sps:$4 sm:$0xff]  }
 0x2c4   : > { %4699 = vmatpush1.bf16.msra.mxu0 %v6468_v31  ;;  %5027 = vmatpush1.bf16.msra.mxu1 %v6471_v32  ;;  %v6555_v31 = vld [vmem:[%s7789_s8 + $0xee8] ss:$16 sps:$4 sm:$0xff]   ;;  %v6560_v32 = vld [vmem:[%s7789_s8 + $0xf04] ss:$16 sps:$4 sm:$0xff]  }
 0x2c5   : > { %4700 = vmatprep.subr.bf16.mxu0 %v6476_v33  ;;  %5028 = vmatprep.subr.bf16.mxu1 %v6479_v35  ;;  %v6563_v33 = vld [vmem:[%s7789_s8 + $0xf0c] ss:$16 sps:$4 sm:$0xff]   ;;  %v6558_v35 = vld [vmem:[%s7789_s8 + $0xf00] ss:$16 sps:$4 sm:$0xff]  }
 0x2c8   : > { %4701 = vmatpush1.bf16.msra.mxu0 %v6474_v36  ;;  %5029 = vmatpush1.bf16.msra.mxu1 %v6477_v37  ;;  %v6561_v36 = vld [vmem:[%s7789_s8 + $0xf08] ss:$16 sps:$4 sm:$0xff]   ;;  %v6566_v37 = vld [vmem:[%s7789_s8 + $0xf24] ss:$16 sps:$4 sm:$0xff]  }
 0x2c9   : > { %4702 = vmatprep.subr.bf16.mxu0 %v6482_v38  ;;  %5030 = vmatprep.subr.bf16.mxu1 %v6485_v28  ;;  %v6569_v38 = vld [vmem:[%s7789_s8 + $0xf2c] ss:$16 sps:$4 sm:$0xff]   ;;  %v6564_v28 = vld [vmem:[%s7789_s8 + $0xf20] ss:$16 sps:$4 sm:$0xff]  }
 0x2cc   : > { %4703 = vmatpush1.bf16.msra.mxu0 %v6480_v39  ;;  %5031 = vmatpush1.bf16.msra.mxu1 %v6483_v40  ;;  %v6567_v39 = vld [vmem:[%s7789_s8 + $0xf28] ss:$16 sps:$4 sm:$0xff]   ;;  %v6572_v40 = vld [vmem:[%s7789_s8 + $0xf44] ss:$16 sps:$4 sm:$0xff]  }
 0x2cd   : > { %4704 = vmatprep.subr.bf16.mxu0 %v6488_v41  ;;  %5032 = vmatprep.subr.bf16.mxu1 %v6491_v29  ;;  %v6575_v41 = vld [vmem:[%s7789_s8 + $0xf4c] ss:$16 sps:$4 sm:$0xff]   ;;  %v6570_v29 = vld [vmem:[%s7789_s8 + $0xf40] ss:$16 sps:$4 sm:$0xff]  }
 0x2d0   : > { %4705 = vmatpush1.bf16.msra.mxu0 %v6486_v43  ;;  %5033 = vmatpush1.bf16.msra.mxu1 %v6489_v27  ;;  %v6573_v43 = vld [vmem:[%s7789_s8 + $0xf48] ss:$16 sps:$4 sm:$0xff]   ;;  %v6578_v27 = vld [vmem:[%s7789_s8 + $0xf64] ss:$16 sps:$4 sm:$0xff]  }
 0x2d1   : > { %4706 = vmatprep.subr.bf16.mxu0 %v6494_v45  ;;  %5034 = vmatprep.subr.bf16.mxu1 %v6497_v46  ;;  %v6581_v45 = vld [vmem:[%s7789_s8 + $0xf6c] ss:$16 sps:$4 sm:$0xff]   ;;  %v6576_v46 = vld [vmem:[%s7789_s8 + $0xf60] ss:$16 sps:$4 sm:$0xff]  }
 0x2d4   : > { %4707 = vmatpush1.bf16.msra.mxu0 %v6492_v47  ;;  %5035 = vmatpush1.bf16.msra.mxu1 %v6495_v49  ;;  %v6579_v47 = vld [vmem:[%s7789_s8 + $0xf68] ss:$16 sps:$4 sm:$0xff]   ;;  %v6584_v49 = vld [vmem:[%s7789_s8 + $0xf84] ss:$16 sps:$4 sm:$0xff]  }
 0x2d5   : > { %4708 = vmatprep.subr.bf16.mxu0 %v6500_v50  ;;  %5036 = vmatprep.subr.bf16.mxu1 %v6503_v51  ;;  %v6587_v50 = vld [vmem:[%s7789_s8 + $0xf8c] ss:$16 sps:$4 sm:$0xff]   ;;  %v6582_v51 = vld [vmem:[%s7789_s8 + $0xf80] ss:$16 sps:$4 sm:$0xff]  }
 0x2d8   : > { %4709 = vmatpush1.bf16.msra.mxu0 %v6498_v52  ;;  %5037 = vmatpush1.bf16.msra.mxu1 %v6501_v53  ;;  %v6590_v52 = vld [vmem:[%s7789_s8 + $0xfa4] ss:$16 sps:$4 sm:$0xff]   ;;  %v6593_v53 = vld [vmem:[%s7789_s8 + $0xfac] ss:$16 sps:$4 sm:$0xff]  }
 0x2d9   : > { %4710 = vmatprep.subr.bf16.mxu0 %v6506_v54  ;;  %5038 = vmatprep.subr.bf16.mxu1 %v6509_v55  ;;  %v6588_v54 = vld [vmem:[%s7789_s8 + $0xfa0] ss:$16 sps:$4 sm:$0xff]   ;;  %v6591_v55 = vld [vmem:[%s7789_s8 + $0xfa8] ss:$16 sps:$4 sm:$0xff]  }
 0x2dc   : > { %4711 = vmatpush1.bf16.msra.mxu0 %v6504_v44  ;;  %5039 = vmatpush1.bf16.msra.mxu1 %v6507_v57  ;;  %v6596_v44 = vld [vmem:[%s7789_s8 + $0xfc4] ss:$16 sps:$4 sm:$0xff]   ;;  %v6599_v57 = vld [vmem:[%s7789_s8 + $0xfcc] ss:$16 sps:$4 sm:$0xff]  }
 0x2dd   : > { %4721 = vmatprep.subr.bf16.mxu0 %v6512_v58  ;;  %5049 = vmatprep.subr.bf16.mxu1 %v6515_v42  ;;  %v6594_v58 = vld [vmem:[%s7789_s8 + $0xfc0] ss:$16 sps:$4 sm:$0xff]   ;;  %v6597_v42 = vld [vmem:[%s7789_s8 + $0xfc8] ss:$16 sps:$4 sm:$0xff]  }
 0x2df   : > { %4713 = vmatmul.mubr.bf16.vlgmr.msra.gmra.mrb[0].mxu0 %v1336_v60  ;;  %5041 = vmatmul.mubr.bf16.vlgmr.msra.gmra.mrb[0].mxu1 %v1336_v60  ;;  %v6605_v60 = vld [vmem:[%s7789_s8 + $0xfec] ss:$16 sps:$4 sm:$0xff]  }
 0x2e0   : > { %4722 = vmatpush1.bf16.msra.mxu0 %v6510_v61  ;;  %5050 = vmatpush1.bf16.msra.mxu1 %v6513_v62  ;;  %v6600_v61 = vld [vmem:[%s7789_s8 + $0xfe0] ss:$16 sps:$4 sm:$0xff]   ;;  %v6603_v62 = vld [vmem:[%s7789_s8 + $0xfe8] ss:$16 sps:$4 sm:$0xff]   ;;  %s8404_s8 = scalar_lea.hbm %s8451_s3, %s5734_s29 }
 0x2e1   : > { %4723 = vmatprep.subr.bf16.mxu0 %v6518_v63  ;;  %5051 = vmatprep.subr.bf16.mxu1 %v6521_v0  ;;  %v1338_v63 = vpack.c.bf16 %v8315_v56, %v8315_v56  ;;  %v1856_v0 = vsub.s32 0, %v7787_v4  ;;  %v1868_v56 = vsub.s32 3, %v7787_v4 }
 0x2e2   : > { %4753 = vmatprep.mubr.bf16.mxu0 %v1339_v1  ;;  %5081 = vmatprep.mubr.bf16.mxu1 %v1339_v1  ;;  %v1864_v1 = vsub.s32 2, %v7787_v4 }
 0x2e4   : > { %4724 = vmatpush1.bf16.msra.mxu0 %v6516_v48  ;;  %5052 = vmatpush1.bf16.msra.mxu1 %v6519_v2  ;;  %v1852_v48 = vld [vmem:[%s1229_s27] sm:$0xf]  ;;  %v1860_v2 = vsub.s32 1, %v7787_v4 }
 0x2e5   : > { %4725 = vmatprep.subr.bf16.mxu0 %v6524_v5  ;;  %5053 = vmatprep.subr.bf16.mxu1 %v6527_v6  ;;  %v1857_v5 = vrot.slane %v1852_v48, %v1856_v0  ;;  %v1865_v6 = vrot.slane %v1852_v48, %v1864_v1 }
 0x2e8   : > { %4726 = vmatpush1.bf16.msra.mxu0 %v6522_v7  ;;  %5054 = vmatpush1.bf16.msra.mxu1 %v6525_v8  ;;  %v1861_v7 = vrot.slane %v1852_v48, %v1860_v2  ;;  %v1869_v8 = vrot.slane %v1852_v48, %v1868_v56 }
 0x2e9   : > { %4727 = vmatprep.subr.bf16.mxu0 %v6530_v9  ;;  %5055 = vmatprep.subr.bf16.mxu1 %v6533_v11 }
 0x2ec   : > { %4728 = vmatpush1.bf16.msra.mxu0 %v6528_v13  ;;  %5056 = vmatpush1.bf16.msra.mxu1 %v6531_v15 }
 0x2ed   : > { %4729 = vmatprep.subr.bf16.mxu0 %v6536_v3  ;;  %5057 = vmatprep.subr.bf16.mxu1 %v6539_v16 }
 0x2f0   : > { %4730 = vmatpush1.bf16.msra.mxu0 %v6534_v17  ;;  %5058 = vmatpush1.bf16.msra.mxu1 %v6537_v18 }
 0x2f1   : > { %4731 = vmatprep.subr.bf16.mxu0 %v6542_v19  ;;  %5059 = vmatprep.subr.bf16.mxu1 %v6545_v20 }
 0x2f4   : > { %4732 = vmatpush1.bf16.msra.mxu0 %v6540_v21  ;;  %5060 = vmatpush1.bf16.msra.mxu1 %v6543_v22 }
 0x2f5   : > { %4733 = vmatprep.subr.bf16.mxu0 %v6548_v23  ;;  %5061 = vmatprep.subr.bf16.mxu1 %v6551_v24 }
 0x2f8   : > { %4734 = vmatpush1.bf16.msra.mxu0 %v6546_v25  ;;  %5062 = vmatpush1.bf16.msra.mxu1 %v6549_v26 }
 0x2f9   : > { %4735 = vmatprep.subr.bf16.mxu0 %v6554_v12  ;;  %5063 = vmatprep.subr.bf16.mxu1 %v6557_v14 }
 0x2fc   : > { %4736 = vmatpush1.bf16.msra.mxu0 %v6552_v30  ;;  %5064 = vmatpush1.bf16.msra.mxu1 %v6555_v31 }
 0x2fd   : > { %4737 = vmatprep.subr.bf16.mxu0 %v6560_v32  ;;  %5065 = vmatprep.subr.bf16.mxu1 %v6563_v33 }
 0x300   : > { %4738 = vmatpush1.bf16.msra.mxu0 %v6558_v35  ;;  %5066 = vmatpush1.bf16.msra.mxu1 %v6561_v36 }
 0x301   : > { %4739 = vmatprep.subr.bf16.mxu0 %v6566_v37  ;;  %5067 = vmatprep.subr.bf16.mxu1 %v6569_v38 }
 0x304   : > { %4740 = vmatpush1.bf16.msra.mxu0 %v6564_v28  ;;  %5068 = vmatpush1.bf16.msra.mxu1 %v6567_v39 }
 0x305   : > { %4741 = vmatprep.subr.bf16.mxu0 %v6572_v40  ;;  %5069 = vmatprep.subr.bf16.mxu1 %v6575_v41 }
 0x308   : > { %4742 = vmatpush1.bf16.msra.mxu0 %v6570_v29  ;;  %5070 = vmatpush1.bf16.msra.mxu1 %v6573_v43 }
 0x309   : > { %4743 = vmatprep.subr.bf16.mxu0 %v6578_v27  ;;  %5071 = vmatprep.subr.bf16.mxu1 %v6581_v45 }
 0x30c   : > { %4744 = vmatpush1.bf16.msra.mxu0 %v6576_v46  ;;  %5072 = vmatpush1.bf16.msra.mxu1 %v6579_v47 }
 0x30d   : > { %4745 = vmatprep.subr.bf16.mxu0 %v6584_v49  ;;  %5073 = vmatprep.subr.bf16.mxu1 %v6587_v50 }
 0x310   : > { %4746 = vmatpush1.bf16.msra.mxu0 %v6582_v51  ;;  %5074 = vmatpush1.bf16.msra.mxu1 %v6585_v34 }
 0x311   : > { %4747 = vmatprep.subr.bf16.mxu0 %v6590_v52  ;;  %5075 = vmatprep.subr.bf16.mxu1 %v6593_v53 }
 0x314   : > { %4748 = vmatpush1.bf16.msra.mxu0 %v6588_v54  ;;  %5076 = vmatpush1.bf16.msra.mxu1 %v6591_v55 }
 0x315   : > { %4749 = vmatprep.subr.bf16.mxu0 %v6596_v44  ;;  %5077 = vmatprep.subr.bf16.mxu1 %v6599_v57 }
 0x318   : > { %4750 = vmatpush1.bf16.msra.mxu0 %v6594_v58  ;;  %5078 = vmatpush1.bf16.msra.mxu1 %v6597_v42 }
 0x319   : > { %4751 = vmatprep.subr.bf16.mxu0 %v6602_v59  ;;  %5079 = vmatprep.subr.bf16.mxu1 %v6605_v60 }
 0x31c   : > { %4752 = vmatpush1.bf16.msra.mxu0 %v6600_v61  ;;  %5080 = vmatpush1.bf16.msra.mxu1 %v6603_v62 }
 0x31f   : > { %4754 = vmatmul.mubr.bf16.vlgmr.msra.gmra.mrb[0].mxu0 %v1338_v63  ;;  %5082 = vmatmul.mubr.bf16.vlgmr.msra.gmra.mrb[0].mxu1 %v1338_v63 }
 0x3f2   : > { %v4755_v9 = vpop.f32.mrb[0].mxu0  ;;  %v5083_v11 = vpop.f32.mrb[0].mxu1 }
 0x3f3   : > { %v5735_v13 = vadd.f32 %v4755_v9, %v1857_v5  ;;  %v5737_v15 = vadd.f32 %v5083_v11, %v1865_v6  ;;  %v4757_v3 = vpop.f32.mrb[1].mxu0  ;;  %v5085_v16 = vpop.f32.mrb[1].mxu1 }
 0x3f4   : > { %v5736_v17 = vadd.f32 %v4757_v3, %v1861_v7  ;;  %v5738_v18 = vadd.f32 %v5085_v16, %v1869_v8  ;;  %v4759_v19 = vpop.f32.mrb[2].mxu0  ;;  %v5087_v20 = vpop.f32.mrb[2].mxu1 }
 0x3f5   : > { %v5090_v21 = vmax.f32 %v5735_v13, 0.0  ;;  %v5092_v22 = vmax.f32 %v5737_v15, 0.0  ;;  %v4760_v4 = vpop.f32.mrb[3].mxu0  ;;  %v5088_v23 = vpop.f32.mrb[3].mxu1 }
 0x3f6   : > { %v5091_v24 = vmax.f32 %v5736_v17, 0.0  ;;  %v5093_v25 = vmax.f32 %v5738_v18, 0.0 }
 0x3f8   : > { %v5098_v26 = vcombine.low %v5090_v21, %v5091_v24  ;;  %v5099_v12 = vcombine.low %v5092_v22, %v5093_v25 }
 0x3fa   : > { %v5106_v14 = vrot.slane %v5098_v26, %v7796_v10  ;;  %v5113_v30 = vrot.slane %v5099_v12, %v7796_v10 }
 0x3fc   : > { %v5114_v31 = vcombine.low %v5106_v14, %v5113_v30 }
 0x3fe   : > { %5116 = vst [vmem:[%s1224_s30] sm:$0xff] %v5114_v31 }
 0x3ff   : > { %6620 = shalt.err (!%p6617_p7)
}
 0x400   : > { %s6621_s4 = scalar_lea.hbm %s8404_s8, 128  ;;  %s6625_s24 = scalar_lea.hbm %s8451_s3, 256 }
 0x401   : > { %p6622_p10 = scmp.ne.s32.totalorder %s8404_s8, %s6621_s4  ;;  %p6626_p13 = scmp.lt.u32.totalorder %s8404_s8, %s8451_s3 }
 0x402   : > { %p6627_p0 = scmp.lt.u32.totalorder %s6625_s24, %s6621_s4  ;;  %p6629_p2 = scmp.lt.u32.totalorder %s6621_s4, %s8404_s8 }
 0x403   : > { %p6623_p11 = pnand %p6622_p10, %p6732_p6 }
 0x404   : > { %p6628_p1 = por %p6627_p0, %p6626_p13 }
 0x405   : > { %p6624_p12 = pneg %p6623_p11 }
 0x406   : > { %p6630_p3 = por %p6629_p2, %p6628_p1 }
 0x408   : > { %p6631_p4 = pnand %p6630_p3, %p6624_p12 }
 0x40a   : > { %6634 = shalt.err (!%p6631_p4)
}
 0x40b   : > { %5795 = dma.vmem_to_hbm [thread:$0]  (%p6732_p6), %s8406_s5, 128, %s8404_s8, %s5118_s9  }
 0x40c PF: > { %s5144_s27 = sand.u32 1, %s6657_s12   ;;  %p5798_p5 = pnand %p5208_p9, %p6736_p8 }
 0x40d   : > { %s5145_s28 = scalar_lea.sflag [#allocation4], %s5144_s27 }
 0x40e   : > { %6652 = dma.done.wait (!%p5798_p5), %s5145_s28, 128  }
 0x40f   : > { %6654 = vsyncadd (!%p5798_p5), %s5145_s28, 4294967168  ;;  %p13_p7 = scmp.ge.s32.totalorder %s6718_s18, 4   ;;  %s8454_s12 = smov %s6661_s13 }
 0x410   : > { %s8455_s13 = smov %s6665_s14  ;;  %s8456_s14 = smov %s6730_s21 }
 0x411   : > { %s8457_s15 = smov %s6718_s18  ;;  %15 = sbr.rel (!%p13_p7) target bundleno = 3 (0x3), region = 98 }
 0x418   :  { %5150 = vsyncpa [#allocation4], 1 }
 0x419   :  { %5152 = vsyncpa [#allocation4 + $0x1], 1 }

// kernel: mlp_forward.4
= control target key start
LH: loop header
LB: loop body
LE: loop exit
PB: predicated region body
PF: predicated region fallthrough
CT: control target
= control target key end

     0   :  { %8 = vsyncpa [#allocation3], 0  ;;  %s12278_s0 = inlined_call_operand.vmem [shape: f32[2,4096], index: 0, kind: input, shape index: {}]   ;;  %s12279_s1 = inlined_call_operand.hbm [shape: bf16[4096,2048], index: 1, kind: input, shape index: {}]   ;;  %s12280_s2 = inlined_call_operand.hbm [shape: f32[1,2048], index: 2, kind: input, shape index: {}]   ;;  %s12281_s3 = inlined_call_operand.vmem [shape: f32[2,2048], index: 3, kind: output, shape index: {}]  }
   0x1   :  { %10 = vsyncpa [#allocation3 + $0x1], 0 }
   0x2   :  { %11 = vsyncpa [#allocation5], 0 }
   0x3   :  { %13 = vsyncpa [#allocation5 + $0x1], 0  ;;  %s10928_s12 = smov 0   ;;  %s10930_s13 = smov 0  }
   0x4   :  { %s10932_s14 = smov 0   ;;  %s10934_s15 = smov 0  }
   0x5 LB: > { %s8043_s16 = sadd.s32 4294967295, %s10900_s15   ;;  %s10948_s17 = sadd.s32 1, %s10900_s15   ;;  %s10900_s15 = sphi %s10934_s15, %s12291_s15   ;;  %s10896_s14 = sphi %s10932_s14, %s12290_s14   ;;  %s10892_s13 = sphi %s10930_s13, %s12289_s13   ;;  %s10888_s12 = sphi %s10928_s12, %s12288_s12  }
   0x6   : > { %s44_s18 = ssub.s32 %s10900_s15, %s10948_s17  ;;  %s47_s19 = sadd.s32 1, %s10896_s14 }
   0x7   : > { %p45_p0 = scmp.eq.s32.totalorder %s44_s18, 0  ;;  %p54_p1 = scmp.ne.s32.totalorder %s10896_s14, %s10892_s13 }
   0x8   : > { %p55_p2 = scmp.eq.s32.totalorder %s10900_s15, 0  ;;  %p60_p3 = scmp.ne.s32.totalorder %s10892_s13, %s10888_s12 }
   0x9   : > { %s10958_s20 = scalar_select %p45_p0, %s10896_s14, %s47_s19  }
   0xa   : > { %p56_p4 = por %p55_p2, %p54_p1  ;;  %p61_p5 = scmp.eq.s32.totalorder %s8043_s16, 0 }
   0xb   : > { %p9221_p6 = scmp.lt.s32.totalorder %s10900_s15, 4  ;;  %s10968_s22 = sand.u32 1, %s10896_s14  }
   0xc   : > { %p10963_p7 = por %p61_p5, %p60_p3  ;;  %s8047_s23 = sshll.u32 %s10968_s22, 13 }
   0xd   : > { %s9084_s24 = sshll.u32 %s10900_s15, 8  ;;  %s143_s28 = scalar_lea.vmem [#allocation2], %s8047_s23 }
   0xe   : > { %s12283_s21 = scalar_select %p10963_p7, 1, 0 }
   0xf   : > { %s10975_s27 = scalar_lea.hbm %s12279_s1, %s9084_s24  ;;  %s150_s29 = sshll.u32 %s143_s28, 4  ;;  %s10977_s29 = int_to_ptr.vmem [resolvable:$true] %s150_s29 }
  0x10   : > { %p10979_p8 = pnand %p9221_p6, %p56_p4  ;;  %s140_s4 = scalar_lea.sflag [#allocation3], %s10968_s22 }
  0x11   : > { %s10802_s5 = scalar_lea.hbm %s10975_s27, 131072  ;;  %s10807_s8 = scalar_lea.hbm %s12279_s1, 524288 }
  0x12   : > { %p10803_p9 = scmp.ne.s32.totalorder %s10975_s27, %s10802_s5  ;;  %p10804_p10 = pneg %p10979_p8 }
  0x13   : > { %p10808_p13 = scmp.lt.u32.totalorder %s10975_s27, %s12279_s1  ;;  %p10809_p0 = scmp.lt.u32.totalorder %s10807_s8, %s10802_s5 }
  0x14   : > { %p10805_p11 = pnand %p10804_p10, %p10803_p9  ;;  %p10811_p2 = scmp.lt.u32.totalorder %s10802_s5, %s10975_s27 }
  0x15   : > { %p10810_p1 = por %p10809_p0, %p10808_p13 }
  0x16   : > { %p10806_p12 = pneg %p10805_p11 }
  0x17   : > { %p10812_p3 = por %p10811_p2, %p10810_p1 }
  0x19   : > { %p10813_p4 = pnand %p10812_p3, %p10806_p12 }
  0x1b   : > { %10816 = shalt.err (!%p10813_p4)
}
  0x1c   : > { %s10817_s11 = scalar_lea.vmem %s10977_s29, 131072  ;;  %s10902_s12 = smov [#allocation2]  }
  0x1d   : > { %p10818_p5 = scmp.ne.s32.totalorder %s10977_s29, %s10817_s11  ;;  %s10822_s18 = sshll.u32 %s10902_s12, 4  ;;  %s10823_s18 = int_to_ptr.vmem [resolvable:$false] %s10822_s18 }
  0x1e   : > { %s10824_s19 = scalar_lea.vmem %s10823_s18, 262144  ;;  %p10825_p11 = scmp.lt.s32.totalorder %s10977_s29, %s10823_s18 }
  0x1f   : > { %p10820_p6 = pnand %p10818_p5, %p10804_p10  ;;  %p10826_p13 = scmp.lt.s32.totalorder %s10824_s19, %s10817_s11 }
  0x21   : > { %p10821_p9 = pneg %p10820_p6  ;;  %p10827_p0 = por %p10826_p13, %p10825_p11 }
  0x23   : > { %p10828_p1 = pnand %p10827_p0, %p10821_p9 }
  0x25   : > { %10831 = shalt.err (!%p10828_p1)
}
  0x26   : > { %s10903_s23 = smov 1024   ;;  %s10904_s24 = smov 256  }
  0x27   : > { %s10905_s25 = smov 16   ;;  %p8053_p12 = scmp.ge.s32.totalorder %s10900_s15, 1 }
  0x28   : > { %9217 = dma.hbm_to_vmem [thread:$0]  (!%p10979_p8), %s10975_s27, 131072, %s10977_s29, %s140_s4, %s10903_s23, %s10904_s24, %s10905_s25  }
  0x29   : > { %p177_p2 = scmp.lt.s32.totalorder %s10900_s15, 5  ;;  %s8050_s26 = sshll.u32 %s10968_s22, 2 }
  0x2a   : > { %s9085_s5 = sshll.u32 %s10900_s15, 6  ;;  %s164_s6 = scalar_lea.vmem [#allocation4], %s8050_s26 }
  0x2b   : > { %p11014_p3 = pnand %p8053_p12, %p177_p2  ;;  %s172_s7 = sshll.u32 %s164_s6, 4  ;;  %s173_s7 = int_to_ptr.vmem [resolvable:$true] %s172_s7 }
  0x2c   : > { %s11022_s10 = scalar_lea.hbm %s12280_s2, %s9085_s5  ;;  %s161_s27 = scalar_lea.sflag [#allocation5], %s10968_s22 }
  0x2d   : > { %s12285_s28 = scalar_select %p11014_p3, 1, 0 }
  0x2e   : > { %s10832_s29 = scalar_lea.hbm %s11022_s10, 64  ;;  %s10837_s12 = scalar_lea.hbm %s12280_s2, 256 }
  0x2f   : > { %p10833_p4 = scmp.ne.s32.totalorder %s11022_s10, %s10832_s29  ;;  %p10838_p9 = scmp.lt.u32.totalorder %s11022_s10, %s12280_s2 }
  0x30   : > { %p10839_p11 = scmp.lt.u32.totalorder %s10837_s12, %s10832_s29  ;;  %p10841_p0 = scmp.lt.u32.totalorder %s10832_s29, %s11022_s10 }
  0x31   : > { %p10835_p5 = pnand %p10833_p4, %p10804_p10 }
  0x32   : > { %p10840_p13 = por %p10839_p11, %p10838_p9 }
  0x33   : > { %p10836_p6 = pneg %p10835_p5 }
  0x34   : > { %p10842_p1 = por %p10841_p0, %p10840_p13 }
  0x36   : > { %p10843_p12 = pnand %p10842_p1, %p10836_p6 }
  0x38   : > { %10846 = shalt.err (!%p10843_p12)
}
  0x39   : > { %s10847_s22 = scalar_lea.vmem %s173_s7, 64  ;;  %s10906_s23 = smov [#allocation4]  }
  0x3a   : > { %p10848_p2 = scmp.ne.s32.totalorder %s173_s7, %s10847_s22  ;;  %s10852_s24 = sshll.u32 %s10906_s23, 4  ;;  %s10853_s24 = int_to_ptr.vmem [resolvable:$false] %s10852_s24 }
  0x3b   : > { %s10854_s25 = scalar_lea.vmem %s10853_s24, 128  ;;  %p10855_p7 = scmp.lt.s32.totalorder %s173_s7, %s10853_s24 }
  0x3c   : > { %p10850_p4 = pnand %p10848_p2, %p10804_p10  ;;  %p10856_p3 = scmp.lt.s32.totalorder %s10854_s25, %s10847_s22 }
  0x3e   : > { %p10851_p5 = pneg %p10850_p4  ;;  %p10857_p9 = por %p10856_p3, %p10855_p7 }
  0x40   : > { %p10858_p11 = pnand %p10857_p9, %p10851_p5 }
  0x42   : > { %10861 = shalt.err (!%p10858_p11)
}
  0x43   : > { %9220 = dma.hbm_to_vmem [thread:$0]  (!%p10979_p8), %s11022_s10, 64, %s173_s7, %s161_s27  }
  0x44   : > { %p12286_p6 = scmp.ne.s32.totalorder %s12285_s28, 0 }
  0x45   : > { %s183_s26 = sand.u32 (!%p12286_p6), 1, %s10892_s13   ;;  %p12287_p10 = scmp.ne.s32.totalorder (!%p12286_p6), %s12283_s21, 0 }
  0x46   : > { %181 = sbr.rel (%p12286_p6) target bundleno = 1330 (0x532), region = 32  ;;  %s8054_s5 = sshll.u32 (!%p12286_p6), %s183_s26, 13 }
  0x47   : > { %s184_s6 = scalar_lea.sflag (!%p12286_p6), [#allocation3], %s183_s26  ;;  %s11047_s8 = scalar_lea.vmem (!%p12286_p6), [#allocation2], %s8054_s5 }
  0x4d   : > { %10879 = dma.done.wait (%p12287_p10), %s184_s6, 131072  }
  0x4e   : > { %10881 = vsyncadd (%p12287_p10), %s184_s6, 4294836224  ;;  %s8055_s9 = sshll.u32 %s183_s26, 2  ;;  %s193_s30 = scalar_lea.sflag [#allocation5], %s183_s26 }
  0x4f   : > { %s11053_s29 = scalar_lea.vmem [#allocation4], %s8055_s9 }
  0x50   : > { %10883 = dma.done.wait (%p12287_p10), %s193_s30, 64  }
  0x51   : > { %10885 = vsyncadd (%p12287_p10), %s193_s30, 4294967232  ;;  %v9258_v0 = vld [vmem:[%s11047_s8 + $0x4] ss:$16 sps:$4 sm:$0xff]   ;;  %v9260_v1 = vld [vmem:[%s11047_s8 + $0xc] ss:$16 sps:$4 sm:$0xff]   ;;  %v252_v38 = vlaneseq  ;;  %s8056_s6 = sshll.u32 %s8043_s16, 2 }
  0x52   : > { %6614 = vmatprep.subr.bf16.mxu0 %v9258_v0  ;;  %v9262_v2 = vld [vmem:[%s11047_s8] ss:$16 sps:$4 sm:$0xff]   ;;  %v9263_v3 = vld [vmem:[%s11047_s8 + $0x8] ss:$16 sps:$4 sm:$0xff]   ;;  %7270 = vmatprep.subr.bf16.mxu1 %v9260_v1  ;;  %v9264_v4 = vld [vmem:[%s11047_s8 + $0x24] ss:$16 sps:$4 sm:$0xff]  }
  0x53   : > { %6615 = vmatpush1.bf16.msra.mxu0 %v9262_v2  ;;  %7271 = vmatpush1.bf16.msra.mxu1 %v9263_v3  ;;  %v9266_v5 = vld [vmem:[%s11047_s8 + $0x2c] ss:$16 sps:$4 sm:$0xff]   ;;  %v9268_v6 = vld [vmem:[%s11047_s8 + $0x20] ss:$16 sps:$4 sm:$0xff]   ;;  %v9269_v7 = vld [vmem:[%s11047_s8 + $0x28] ss:$16 sps:$4 sm:$0xff]  }
  0x54   : > { %6616 = vmatprep.subr.bf16.mxu0 %v9264_v4  ;;  %7272 = vmatprep.subr.bf16.mxu1 %v9266_v5  ;;  %v9270_v8 = vld [vmem:[%s11047_s8 + $0x44] ss:$16 sps:$4 sm:$0xff]   ;;  %v9272_v9 = vld [vmem:[%s11047_s8 + $0x4c] ss:$16 sps:$4 sm:$0xff]   ;;  %v9274_v10 = vld [vmem:[%s11047_s8 + $0x40] ss:$16 sps:$4 sm:$0xff]  }
  0x55   : > { %v9275_v11 = vld [vmem:[%s11047_s8 + $0x48] ss:$16 sps:$4 sm:$0xff]   ;;  %v9276_v12 = vld [vmem:[%s11047_s8 + $0x64] ss:$16 sps:$4 sm:$0xff]   ;;  %v9278_v13 = vld [vmem:[%s11047_s8 + $0x6c] ss:$16 sps:$4 sm:$0xff]  }
  0x56   : > { %v9280_v14 = vld [vmem:[%s11047_s8 + $0x60] ss:$16 sps:$4 sm:$0xff]   ;;  %v9281_v15 = vld [vmem:[%s11047_s8 + $0x68] ss:$16 sps:$4 sm:$0xff]   ;;  %v9282_v16 = vld [vmem:[%s11047_s8 + $0x84] ss:$16 sps:$4 sm:$0xff]  }
  0x57   : > { %6617 = vmatpush1.bf16.msra.mxu0 %v9268_v6  ;;  %7273 = vmatpush1.bf16.msra.mxu1 %v9269_v7  ;;  %v9284_v17 = vld [vmem:[%s11047_s8 + $0x8c] ss:$16 sps:$4 sm:$0xff]   ;;  %v9286_v18 = vld [vmem:[%s11047_s8 + $0x80] ss:$16 sps:$4 sm:$0xff]   ;;  %v9287_v19 = vld [vmem:[%s11047_s8 + $0x88] ss:$16 sps:$4 sm:$0xff]  }
  0x58   : > { %6618 = vmatprep.subr.bf16.mxu0 %v9270_v8  ;;  %7274 = vmatprep.subr.bf16.mxu1 %v9272_v9  ;;  %v9288_v20 = vld [vmem:[%s11047_s8 + $0xa4] ss:$16 sps:$4 sm:$0xff]   ;;  %v9290_v21 = vld [vmem:[%s11047_s8 + $0xac] ss:$16 sps:$4 sm:$0xff]   ;;  %v9292_v22 = vld [vmem:[%s11047_s8 + $0xa0] ss:$16 sps:$4 sm:$0xff]  }
  0x59   : > { %v9293_v23 = vld [vmem:[%s11047_s8 + $0xa8] ss:$16 sps:$4 sm:$0xff]   ;;  %v9294_v24 = vld [vmem:[%s11047_s8 + $0xc4] ss:$16 sps:$4 sm:$0xff]   ;;  %v9296_v25 = vld [vmem:[%s11047_s8 + $0xcc] ss:$16 sps:$4 sm:$0xff]  }
  0x5a   : > { %v9298_v26 = vld [vmem:[%s11047_s8 + $0xc0] ss:$16 sps:$4 sm:$0xff]   ;;  %v9299_v27 = vld [vmem:[%s11047_s8 + $0xc8] ss:$16 sps:$4 sm:$0xff]   ;;  %v9300_v28 = vld [vmem:[%s11047_s8 + $0xe4] ss:$16 sps:$4 sm:$0xff]  }
  0x5b   : > { %6619 = vmatpush1.bf16.msra.mxu0 %v9274_v10  ;;  %7275 = vmatpush1.bf16.msra.mxu1 %v9275_v11  ;;  %v9302_v29 = vld [vmem:[%s11047_s8 + $0xec] ss:$16 sps:$4 sm:$0xff]   ;;  %v9304_v30 = vld [vmem:[%s11047_s8 + $0xe0] ss:$16 sps:$4 sm:$0xff]   ;;  %v9305_v31 = vld [vmem:[%s11047_s8 + $0xe8] ss:$16 sps:$4 sm:$0xff]  }
  0x5c   : > { %6620 = vmatprep.subr.bf16.mxu0 %v9276_v12  ;;  %7276 = vmatprep.subr.bf16.mxu1 %v9278_v13  ;;  %v9306_v32 = vld [vmem:[%s11047_s8 + $0x104] ss:$16 sps:$4 sm:$0xff]   ;;  %v9308_v33 = vld [vmem:[%s11047_s8 + $0x10c] ss:$16 sps:$4 sm:$0xff]   ;;  %v9310_v34 = vld [vmem:[%s11047_s8 + $0x100] ss:$16 sps:$4 sm:$0xff]  }
  0x5d   : > { %v9311_v35 = vld [vmem:[%s11047_s8 + $0x108] ss:$16 sps:$4 sm:$0xff]   ;;  %v10907_v36 = vmov 1983009808   ;;  %v9312_v39 = vld [vmem:[%s11047_s8 + $0x124] ss:$16 sps:$4 sm:$0xff]  }
  0x5e   : > { %v250_v37 = vunpack.c.l.s4 %v10907_v36  ;;  %v9314_v40 = vld [vmem:[%s11047_s8 + $0x12c] ss:$16 sps:$4 sm:$0xff]   ;;  %v9316_v41 = vld [vmem:[%s11047_s8 + $0x120] ss:$16 sps:$4 sm:$0xff]   ;;  %v11098_v43 = vshrl.u32 %v252_v38, 7  ;;  %p227_p7 = scmp.lt.s32.totalorder %s8056_s6, 15 }
  0x5f   : > { %6621 = vmatpush1.bf16.msra.mxu0 %v9280_v14  ;;  %7277 = vmatpush1.bf16.msra.mxu1 %v9281_v15  ;;  %v9317_v44 = vld [vmem:[%s11047_s8 + $0x128] ss:$16 sps:$4 sm:$0xff]   ;;  %v9318_v45 = vld [vmem:[%s11047_s8 + $0x144] ss:$16 sps:$4 sm:$0xff]   ;;  %v9320_v46 = vld [vmem:[%s11047_s8 + $0x14c] ss:$16 sps:$4 sm:$0xff]  }
  0x60   : > { %6622 = vmatprep.subr.bf16.mxu0 %v9282_v16  ;;  %7278 = vmatprep.subr.bf16.mxu1 %v9284_v17  ;;  %v251_v42 = vunpack.c.0.s8 %v250_v37  ;;  %v9322_v47 = vld [vmem:[%s11047_s8 + $0x140] ss:$16 sps:$4 sm:$0xff]   ;;  %v9323_v48 = vld [vmem:[%s11047_s8 + $0x148] ss:$16 sps:$4 sm:$0xff]   ;;  %v9324_v50 = vld [vmem:[%s11047_s8 + $0x164] ss:$16 sps:$4 sm:$0xff]  }
  0x61   : > { %v9326_v51 = vld [vmem:[%s11047_s8 + $0x16c] ss:$16 sps:$4 sm:$0xff]   ;;  %v9328_v53 = vld [vmem:[%s11047_s8 + $0x160] ss:$16 sps:$4 sm:$0xff]   ;;  %v9329_v55 = vld [vmem:[%s11047_s8 + $0x168] ss:$16 sps:$4 sm:$0xff]  }
  0x62   : > { %v11106_v49 = vsub.s32 %v251_v42, %v11098_v43  ;;  %v232_v52 = vld [vmem:[%s12278_s0] sm:$0xff]  ;;  %v9330_v56 = vld [vmem:[%s11047_s8 + $0x184] ss:$16 sps:$4 sm:$0xff]   ;;  %v9334_v59 = vld [vmem:[%s11047_s8 + $0x180] ss:$16 sps:$4 sm:$0xff]   ;;  %s12293_s6 = smov (!%p227_p7, %s8056_s6), 15 }
  0x63   : > { %6623 = vmatpush1.bf16.msra.mxu0 %v9286_v18  ;;  %7279 = vmatpush1.bf16.msra.mxu1 %v9287_v19  ;;  %v9332_v57 = vld [vmem:[%s11047_s8 + $0x18c] ss:$16 sps:$4 sm:$0xff]   ;;  %v9335_v61 = vld [vmem:[%s11047_s8 + $0x188] ss:$16 sps:$4 sm:$0xff]   ;;  %v9336_v62 = vld [vmem:[%s11047_s8 + $0x1a4] ss:$16 sps:$4 sm:$0xff]   ;;  %v248_v4 = vcombine.high %v232_v52, %v232_v52 }
  0x64   : > { %6624 = vmatprep.subr.bf16.mxu0 %v9288_v20  ;;  %7280 = vmatprep.subr.bf16.mxu1 %v9290_v21  ;;  %v255_v54 = vrot.slane %v232_v52, %v11106_v49  ;;  %v9338_v63 = vld [vmem:[%s11047_s8 + $0x1ac] ss:$16 sps:$4 sm:$0xff]   ;;  %v9340_v0 = vld [vmem:[%s11047_s8 + $0x1a0] ss:$16 sps:$4 sm:$0xff]   ;;  %v9341_v1 = vld [vmem:[%s11047_s8 + $0x1a8] ss:$16 sps:$4 sm:$0xff]  }
  0x65   : > { %v9342_v2 = vld [vmem:[%s11047_s8 + $0x1c4] ss:$16 sps:$4 sm:$0xff]   ;;  %v9344_v3 = vld [vmem:[%s11047_s8 + $0x1cc] ss:$16 sps:$4 sm:$0xff]   ;;  %v9346_v5 = vld [vmem:[%s11047_s8 + $0x1c0] ss:$16 sps:$4 sm:$0xff]   ;;  %v11131_v9 = vrot.slane %v248_v4, %v11106_v49 }
  0x66   : > { %v263_v58 = vcombine.high %v255_v54, %v255_v54  ;;  %v9347_v6 = vld [vmem:[%s11047_s8 + $0x1c8] ss:$16 sps:$4 sm:$0xff]   ;;  %v9348_v7 = vld [vmem:[%s11047_s8 + $0x1e4] ss:$16 sps:$4 sm:$0xff]   ;;  %v9350_v8 = vld [vmem:[%s11047_s8 + $0x1ec] ss:$16 sps:$4 sm:$0xff]   ;;  %v416_v16 = vpack.c.bf16 %v255_v54, %v255_v54 }
  0x67   : > { %6625 = vmatpush1.bf16.msra.mxu0 %v9292_v22  ;;  %7281 = vmatpush1.bf16.msra.mxu1 %v9293_v23  ;;  %v9352_v10 = vld [vmem:[%s11047_s8 + $0x1e0] ss:$16 sps:$4 sm:$0xff]   ;;  %v9353_v11 = vld [vmem:[%s11047_s8 + $0x1e8] ss:$16 sps:$4 sm:$0xff]   ;;  %v9357_v12 = vld [vmem:[%s11047_s8 + $0x204] ss:$16 sps:$4 sm:$0xff]   ;;  %v264_v14 = vcombine.high %v11131_v9, %v11131_v9 }
  0x68   : > { %6626 = vmatprep.subr.bf16.mxu0 %v9294_v24  ;;  %7282 = vmatprep.subr.bf16.mxu1 %v9296_v25  ;;  %v417_v60 = vpack.c.bf16 %v263_v58, %v263_v58  ;;  %v9360_v13 = vld [vmem:[%s11047_s8 + $0x20c] ss:$16 sps:$4 sm:$0xff]   ;;  %v9355_v15 = vld [vmem:[%s11047_s8 + $0x200] ss:$16 sps:$4 sm:$0xff]   ;;  %v9358_v17 = vld [vmem:[%s11047_s8 + $0x208] ss:$16 sps:$4 sm:$0xff]  }
  0x69   : > { %v9363_v18 = vld [vmem:[%s11047_s8 + $0x224] ss:$16 sps:$4 sm:$0xff]   ;;  %v9366_v19 = vld [vmem:[%s11047_s8 + $0x22c] ss:$16 sps:$4 sm:$0xff]   ;;  %v419_v20 = vpack.c.bf16 %v264_v14, %v264_v14  ;;  %v9361_v21 = vld [vmem:[%s11047_s8 + $0x220] ss:$16 sps:$4 sm:$0xff]  }
  0x6a   : > { %6646 = vmatprep.mubr.bf16.mxu0 %v417_v60  ;;  %7302 = vmatprep.mubr.bf16.mxu1 %v417_v60  ;;  %v9364_v22 = vld [vmem:[%s11047_s8 + $0x228] ss:$16 sps:$4 sm:$0xff]   ;;  %v9369_v23 = vld [vmem:[%s11047_s8 + $0x244] ss:$16 sps:$4 sm:$0xff]   ;;  %v9372_v24 = vld [vmem:[%s11047_s8 + $0x24c] ss:$16 sps:$4 sm:$0xff]  }
  0x6b   : > { %6627 = vmatpush1.bf16.msra.mxu0 %v9298_v26  ;;  %7283 = vmatpush1.bf16.msra.mxu1 %v9299_v27  ;;  %v9367_v25 = vld [vmem:[%s11047_s8 + $0x240] ss:$16 sps:$4 sm:$0xff]   ;;  %v9370_v26 = vld [vmem:[%s11047_s8 + $0x248] ss:$16 sps:$4 sm:$0xff]   ;;  %v9375_v27 = vld [vmem:[%s11047_s8 + $0x264] ss:$16 sps:$4 sm:$0xff]  }
  0x6c   : > { %6628 = vmatprep.subr.bf16.mxu0 %v9300_v28  ;;  %7284 = vmatprep.subr.bf16.mxu1 %v9302_v29  ;;  %v9378_v28 = vld [vmem:[%s11047_s8 + $0x26c] ss:$16 sps:$4 sm:$0xff]   ;;  %v9373_v29 = vld [vmem:[%s11047_s8 + $0x260] ss:$16 sps:$4 sm:$0xff]   ;;  %v9388_v38 = vld [vmem:[%s11047_s8 + $0x2a8] ss:$16 sps:$4 sm:$0xff]  }
  0x6d   : > { %v9390_v36 = vld [vmem:[%s11047_s8 + $0x2ac] ss:$16 sps:$4 sm:$0xff]   ;;  %v9385_v37 = vld [vmem:[%s11047_s8 + $0x2a0] ss:$16 sps:$4 sm:$0xff]   ;;  %v9394_v42 = vld [vmem:[%s11047_s8 + $0x2c8] ss:$16 sps:$4 sm:$0xff]  }
  0x6e   : > { %v9406_v52 = vld [vmem:[%s11047_s8 + $0x308] ss:$16 sps:$4 sm:$0xff]   ;;  %v9414_v54 = vld [vmem:[%s11047_s8 + $0x32c] ss:$16 sps:$4 sm:$0xff]   ;;  %v9447_v14 = vld [vmem:[%s11047_s8 + $0x3e4] ss:$16 sps:$4 sm:$0xff]  }
  0x6f   : > { %6629 = vmatpush1.bf16.msra.mxu0 %v9304_v30  ;;  %7285 = vmatpush1.bf16.msra.mxu1 %v9305_v31  ;;  %v9376_v30 = vld [vmem:[%s11047_s8 + $0x268] ss:$16 sps:$4 sm:$0xff]   ;;  %v9381_v31 = vld [vmem:[%s11047_s8 + $0x284] ss:$16 sps:$4 sm:$0xff]   ;;  %v9420_v58 = vld [vmem:[%s11047_s8 + $0x34c] ss:$16 sps:$4 sm:$0xff]  }
  0x70   : > { %6630 = vmatprep.subr.bf16.mxu0 %v9306_v32  ;;  %7286 = vmatprep.subr.bf16.mxu1 %v9308_v33  ;;  %v9384_v32 = vld [vmem:[%s11047_s8 + $0x28c] ss:$16 sps:$4 sm:$0xff]   ;;  %v9379_v33 = vld [vmem:[%s11047_s8 + $0x280] ss:$16 sps:$4 sm:$0xff]   ;;  %v9418_v60 = vld [vmem:[%s11047_s8 + $0x348] ss:$16 sps:$4 sm:$0xff]  }
  0x71   : > { %v9430_v4 = vld [vmem:[%s11047_s8 + $0x388] ss:$16 sps:$4 sm:$0xff]   ;;  %s8057_s15 = sshll.u32 %s12293_s6, 1 }
  0x72   : > { %s230_s9 = scalar_lea.vmem %s12281_s3, %s8057_s15 }
  0x73   : > { %6631 = vmatpush1.bf16.msra.mxu0 %v9310_v34  ;;  %7287 = vmatpush1.bf16.msra.mxu1 %v9311_v35  ;;  %v9382_v34 = vld [vmem:[%s11047_s8 + $0x288] ss:$16 sps:$4 sm:$0xff]   ;;  %v9387_v35 = vld [vmem:[%s11047_s8 + $0x2a4] ss:$16 sps:$4 sm:$0xff]  }
  0x74   : > { %6632 = vmatprep.subr.bf16.mxu0 %v9312_v39  ;;  %7288 = vmatprep.subr.bf16.mxu1 %v9314_v40  ;;  %v9393_v39 = vld [vmem:[%s11047_s8 + $0x2c4] ss:$16 sps:$4 sm:$0xff]   ;;  %v9396_v40 = vld [vmem:[%s11047_s8 + $0x2cc] ss:$16 sps:$4 sm:$0xff]  }
  0x77   : > { %6633 = vmatpush1.bf16.msra.mxu0 %v9316_v41  ;;  %7289 = vmatpush1.bf16.msra.mxu1 %v9317_v44  ;;  %v9391_v41 = vld [vmem:[%s11047_s8 + $0x2c0] ss:$16 sps:$4 sm:$0xff]   ;;  %v9399_v44 = vld [vmem:[%s11047_s8 + $0x2e4] ss:$16 sps:$4 sm:$0xff]  }
  0x78   : > { %6634 = vmatprep.subr.bf16.mxu0 %v9318_v45  ;;  %7290 = vmatprep.subr.bf16.mxu1 %v9320_v46  ;;  %v9402_v45 = vld [vmem:[%s11047_s8 + $0x2ec] ss:$16 sps:$4 sm:$0xff]   ;;  %v9397_v46 = vld [vmem:[%s11047_s8 + $0x2e0] ss:$16 sps:$4 sm:$0xff]  }
  0x7b   : > { %6635 = vmatpush1.bf16.msra.mxu0 %v9322_v47  ;;  %7291 = vmatpush1.bf16.msra.mxu1 %v9323_v48  ;;  %v9400_v47 = vld [vmem:[%s11047_s8 + $0x2e8] ss:$16 sps:$4 sm:$0xff]   ;;  %v9405_v48 = vld [vmem:[%s11047_s8 + $0x304] ss:$16 sps:$4 sm:$0xff]  }
  0x7c   : > { %6636 = vmatprep.subr.bf16.mxu0 %v9324_v50  ;;  %7292 = vmatprep.subr.bf16.mxu1 %v9326_v51  ;;  %v9408_v50 = vld [vmem:[%s11047_s8 + $0x30c] ss:$16 sps:$4 sm:$0xff]   ;;  %v9403_v51 = vld [vmem:[%s11047_s8 + $0x300] ss:$16 sps:$4 sm:$0xff]  }
  0x7f   : > { %6637 = vmatpush1.bf16.msra.mxu0 %v9328_v53  ;;  %7293 = vmatpush1.bf16.msra.mxu1 %v9329_v55  ;;  %v9411_v53 = vld [vmem:[%s11047_s8 + $0x324] ss:$16 sps:$4 sm:$0xff]   ;;  %v9409_v55 = vld [vmem:[%s11047_s8 + $0x320] ss:$16 sps:$4 sm:$0xff]  }
  0x80   : > { %6638 = vmatprep.subr.bf16.mxu0 %v9330_v56  ;;  %7294 = vmatprep.subr.bf16.mxu1 %v9332_v57  ;;  %v9412_v56 = vld [vmem:[%s11047_s8 + $0x328] ss:$16 sps:$4 sm:$0xff]   ;;  %v9417_v57 = vld [vmem:[%s11047_s8 + $0x344] ss:$16 sps:$4 sm:$0xff]  }
  0x83   : > { %6639 = vmatpush1.bf16.msra.mxu0 %v9334_v59  ;;  %7295 = vmatpush1.bf16.msra.mxu1 %v9335_v61  ;;  %v9415_v59 = vld [vmem:[%s11047_s8 + $0x340] ss:$16 sps:$4 sm:$0xff]   ;;  %v9423_v61 = vld [vmem:[%s11047_s8 + $0x364] ss:$16 sps:$4 sm:$0xff]  }
  0x84   : > { %6640 = vmatprep.subr.bf16.mxu0 %v9336_v62  ;;  %7296 = vmatprep.subr.bf16.mxu1 %v9338_v63  ;;  %v9426_v62 = vld [vmem:[%s11047_s8 + $0x36c] ss:$16 sps:$4 sm:$0xff]   ;;  %v9421_v63 = vld [vmem:[%s11047_s8 + $0x360] ss:$16 sps:$4 sm:$0xff]  }
  0x87   : > { %6641 = vmatpush1.bf16.msra.mxu0 %v9340_v0  ;;  %7297 = vmatpush1.bf16.msra.mxu1 %v9341_v1  ;;  %v9424_v0 = vld [vmem:[%s11047_s8 + $0x368] ss:$16 sps:$4 sm:$0xff]   ;;  %v9429_v1 = vld [vmem:[%s11047_s8 + $0x384] ss:$16 sps:$4 sm:$0xff]  }
  0x88   : > { %6642 = vmatprep.subr.bf16.mxu0 %v9342_v2  ;;  %7298 = vmatprep.subr.bf16.mxu1 %v9344_v3  ;;  %v9432_v2 = vld [vmem:[%s11047_s8 + $0x38c] ss:$16 sps:$4 sm:$0xff]   ;;  %v9427_v3 = vld [vmem:[%s11047_s8 + $0x380] ss:$16 sps:$4 sm:$0xff]  }
  0x8b   : > { %6643 = vmatpush1.bf16.msra.mxu0 %v9346_v5  ;;  %7299 = vmatpush1.bf16.msra.mxu1 %v9347_v6  ;;  %v9435_v5 = vld [vmem:[%s11047_s8 + $0x3a4] ss:$16 sps:$4 sm:$0xff]   ;;  %v9438_v6 = vld [vmem:[%s11047_s8 + $0x3ac] ss:$16 sps:$4 sm:$0xff]  }
  0x8c   : > { %6644 = vmatprep.subr.bf16.mxu0 %v9348_v7  ;;  %7300 = vmatprep.subr.bf16.mxu1 %v9350_v8  ;;  %v9433_v7 = vld [vmem:[%s11047_s8 + $0x3a0] ss:$16 sps:$4 sm:$0xff]   ;;  %v9436_v8 = vld [vmem:[%s11047_s8 + $0x3a8] ss:$16 sps:$4 sm:$0xff]  }
  0x8f   : > { %6645 = vmatpush1.bf16.msra.mxu0 %v9352_v10  ;;  %7301 = vmatpush1.bf16.msra.mxu1 %v9353_v11  ;;  %v9441_v10 = vld [vmem:[%s11047_s8 + $0x3c4] ss:$16 sps:$4 sm:$0xff]   ;;  %v9444_v11 = vld [vmem:[%s11047_s8 + $0x3cc] ss:$16 sps:$4 sm:$0xff]  }
  0x90   : > { %6655 = vmatprep.subr.bf16.mxu0 %v9357_v12  ;;  %7311 = vmatprep.subr.bf16.mxu1 %v9360_v13  ;;  %v9439_v12 = vld [vmem:[%s11047_s8 + $0x3c0] ss:$16 sps:$4 sm:$0xff]   ;;  %v9442_v13 = vld [vmem:[%s11047_s8 + $0x3c8] ss:$16 sps:$4 sm:$0xff]  }
  0x92   : > { %6647 = vmatmul.mubr.bf16.vlgmr.msra.gmra.mrb[0].mxu0 %v416_v16  ;;  %7303 = vmatmul.mubr.bf16.vlgmr.msra.gmra.mrb[0].mxu1 %v416_v16  ;;  %v9445_v16 = vld [vmem:[%s11047_s8 + $0x3e0] ss:$16 sps:$4 sm:$0xff]  }
  0x93   : > { %6656 = vmatpush1.bf16.msra.mxu0 %v9355_v15  ;;  %7312 = vmatpush1.bf16.msra.mxu1 %v9358_v17  ;;  %v9450_v15 = vld [vmem:[%s11047_s8 + $0x3ec] ss:$16 sps:$4 sm:$0xff]   ;;  %v9448_v17 = vld [vmem:[%s11047_s8 + $0x3e8] ss:$16 sps:$4 sm:$0xff]  }
  0x94   : > { %6657 = vmatprep.subr.bf16.mxu0 %v9363_v18  ;;  %7313 = vmatprep.subr.bf16.mxu1 %v9366_v19  ;;  %v9453_v18 = vld [vmem:[%s11047_s8 + $0x404] ss:$16 sps:$4 sm:$0xff]   ;;  %v9456_v19 = vld [vmem:[%s11047_s8 + $0x40c] ss:$16 sps:$4 sm:$0xff]  }
  0x95   : > { %6687 = vmatprep.mubr.bf16.mxu0 %v419_v20  ;;  %7343 = vmatprep.mubr.bf16.mxu1 %v419_v20  ;;  %v9451_v20 = vld [vmem:[%s11047_s8 + $0x400] ss:$16 sps:$4 sm:$0xff]  }
  0x97   : > { %6658 = vmatpush1.bf16.msra.mxu0 %v9361_v21  ;;  %7314 = vmatpush1.bf16.msra.mxu1 %v9364_v22  ;;  %v418_v21 = vpack.c.bf16 %v11131_v9, %v11131_v9  ;;  %v9454_v22 = vld [vmem:[%s11047_s8 + $0x408] ss:$16 sps:$4 sm:$0xff]  }
  0x98   : > { %6659 = vmatprep.subr.bf16.mxu0 %v9369_v23  ;;  %7315 = vmatprep.subr.bf16.mxu1 %v9372_v24  ;;  %v11210_v23 = vld [vmem:[%s12278_s0 + $0x8] sm:$0xff] }
  0x99   : > { %v9459_v24 = vld [vmem:[%s11047_s8 + $0x424] ss:$16 sps:$4 sm:$0xff]  }
  0x9b   : > { %6660 = vmatpush1.bf16.msra.mxu0 %v9367_v25  ;;  %7316 = vmatpush1.bf16.msra.mxu1 %v9370_v26  ;;  %v9462_v25 = vld [vmem:[%s11047_s8 + $0x42c] ss:$16 sps:$4 sm:$0xff]   ;;  %v11216_v26 = vrot.slane %v11210_v23, %v11106_v49 }
  0x9c   : > { %6661 = vmatprep.subr.bf16.mxu0 %v9375_v27  ;;  %7317 = vmatprep.subr.bf16.mxu1 %v9378_v28  ;;  %v9457_v27 = vld [vmem:[%s11047_s8 + $0x420] ss:$16 sps:$4 sm:$0xff]   ;;  %v9460_v28 = vld [vmem:[%s11047_s8 + $0x428] ss:$16 sps:$4 sm:$0xff]  }
  0x9d   : > { %v280_v9 = vcombine.high %v11216_v26, %v11216_v26 }
  0x9f   : > { %6662 = vmatpush1.bf16.msra.mxu0 %v9373_v29  ;;  %7318 = vmatpush1.bf16.msra.mxu1 %v9376_v30  ;;  %v9465_v29 = vld [vmem:[%s11047_s8 + $0x444] ss:$16 sps:$4 sm:$0xff]   ;;  %v9468_v30 = vld [vmem:[%s11047_s8 + $0x44c] ss:$16 sps:$4 sm:$0xff]  }
  0xa0   : > { %6663 = vmatprep.subr.bf16.mxu0 %v9381_v31  ;;  %7319 = vmatprep.subr.bf16.mxu1 %v9384_v32  ;;  %v421_v31 = vpack.c.bf16 %v280_v9, %v280_v9  ;;  %v9463_v32 = vld [vmem:[%s11047_s8 + $0x440] ss:$16 sps:$4 sm:$0xff]   ;;  %v9544_v9 = vld [vmem:[%s11047_s8 + $0x5e8] ss:$16 sps:$4 sm:$0xff]  }
  0xa3   : > { %6664 = vmatpush1.bf16.msra.mxu0 %v9379_v33  ;;  %7320 = vmatpush1.bf16.msra.mxu1 %v9382_v34  ;;  %v9466_v33 = vld [vmem:[%s11047_s8 + $0x448] ss:$16 sps:$4 sm:$0xff]   ;;  %v9471_v34 = vld [vmem:[%s11047_s8 + $0x464] ss:$16 sps:$4 sm:$0xff]  }
  0xa4   : > { %6665 = vmatprep.subr.bf16.mxu0 %v9387_v35  ;;  %7321 = vmatprep.subr.bf16.mxu1 %v9390_v36  ;;  %v9474_v35 = vld [vmem:[%s11047_s8 + $0x46c] ss:$16 sps:$4 sm:$0xff]   ;;  %v9469_v36 = vld [vmem:[%s11047_s8 + $0x460] ss:$16 sps:$4 sm:$0xff]  }
  0xa7   : > { %6666 = vmatpush1.bf16.msra.mxu0 %v9385_v37  ;;  %7322 = vmatpush1.bf16.msra.mxu1 %v9388_v38  ;;  %v9472_v37 = vld [vmem:[%s11047_s8 + $0x468] ss:$16 sps:$4 sm:$0xff]   ;;  %v9477_v38 = vld [vmem:[%s11047_s8 + $0x484] ss:$16 sps:$4 sm:$0xff]  }
  0xa8   : > { %6667 = vmatprep.subr.bf16.mxu0 %v9393_v39  ;;  %7323 = vmatprep.subr.bf16.mxu1 %v9396_v40  ;;  %v9480_v39 = vld [vmem:[%s11047_s8 + $0x48c] ss:$16 sps:$4 sm:$0xff]   ;;  %v9475_v40 = vld [vmem:[%s11047_s8 + $0x480] ss:$16 sps:$4 sm:$0xff]  }
  0xab   : > { %6668 = vmatpush1.bf16.msra.mxu0 %v9391_v41  ;;  %7324 = vmatpush1.bf16.msra.mxu1 %v9394_v42  ;;  %v9478_v41 = vld [vmem:[%s11047_s8 + $0x488] ss:$16 sps:$4 sm:$0xff]   ;;  %v9483_v42 = vld [vmem:[%s11047_s8 + $0x4a4] ss:$16 sps:$4 sm:$0xff]  }
  0xac   : > { %6669 = vmatprep.subr.bf16.mxu0 %v9399_v44  ;;  %7325 = vmatprep.subr.bf16.mxu1 %v9402_v45  ;;  %v9486_v44 = vld [vmem:[%s11047_s8 + $0x4ac] ss:$16 sps:$4 sm:$0xff]   ;;  %v9481_v45 = vld [vmem:[%s11047_s8 + $0x4a0] ss:$16 sps:$4 sm:$0xff]  }
  0xaf   : > { %6670 = vmatpush1.bf16.msra.mxu0 %v9397_v46  ;;  %7326 = vmatpush1.bf16.msra.mxu1 %v9400_v47  ;;  %v9484_v46 = vld [vmem:[%s11047_s8 + $0x4a8] ss:$16 sps:$4 sm:$0xff]   ;;  %v9489_v47 = vld [vmem:[%s11047_s8 + $0x4c4] ss:$16 sps:$4 sm:$0xff]  }
  0xb0   : > { %6671 = vmatprep.subr.bf16.mxu0 %v9405_v48  ;;  %7327 = vmatprep.subr.bf16.mxu1 %v9408_v50  ;;  %v9492_v48 = vld [vmem:[%s11047_s8 + $0x4cc] ss:$16 sps:$4 sm:$0xff]   ;;  %v9487_v50 = vld [vmem:[%s11047_s8 + $0x4c0] ss:$16 sps:$4 sm:$0xff]  }
  0xb3   : > { %6672 = vmatpush1.bf16.msra.mxu0 %v9403_v51  ;;  %7328 = vmatpush1.bf16.msra.mxu1 %v9406_v52  ;;  %v9490_v51 = vld [vmem:[%s11047_s8 + $0x4c8] ss:$16 sps:$4 sm:$0xff]   ;;  %v9495_v52 = vld [vmem:[%s11047_s8 + $0x4e4] ss:$16 sps:$4 sm:$0xff]  }
  0xb4   : > { %6673 = vmatprep.subr.bf16.mxu0 %v9411_v53  ;;  %7329 = vmatprep.subr.bf16.mxu1 %v9414_v54  ;;  %v9498_v53 = vld [vmem:[%s11047_s8 + $0x4ec] ss:$16 sps:$4 sm:$0xff]   ;;  %v9493_v54 = vld [vmem:[%s11047_s8 + $0x4e0] ss:$16 sps:$4 sm:$0xff]  }
  0xb7   : > { %6674 = vmatpush1.bf16.msra.mxu0 %v9409_v55  ;;  %7330 = vmatpush1.bf16.msra.mxu1 %v9412_v56  ;;  %v9496_v55 = vld [vmem:[%s11047_s8 + $0x4e8] ss:$16 sps:$4 sm:$0xff]   ;;  %v9501_v56 = vld [vmem:[%s11047_s8 + $0x504] ss:$16 sps:$4 sm:$0xff]  }
  0xb8   : > { %6675 = vmatprep.subr.bf16.mxu0 %v9417_v57  ;;  %7331 = vmatprep.subr.bf16.mxu1 %v9420_v58  ;;  %v9504_v57 = vld [vmem:[%s11047_s8 + $0x50c] ss:$16 sps:$4 sm:$0xff]   ;;  %v9499_v58 = vld [vmem:[%s11047_s8 + $0x500] ss:$16 sps:$4 sm:$0xff]  }
  0xbb   : > { %6676 = vmatpush1.bf16.msra.mxu0 %v9415_v59  ;;  %7332 = vmatpush1.bf16.msra.mxu1 %v9418_v60  ;;  %v9502_v59 = vld [vmem:[%s11047_s8 + $0x508] ss:$16 sps:$4 sm:$0xff]   ;;  %v9507_v60 = vld [vmem:[%s11047_s8 + $0x524] ss:$16 sps:$4 sm:$0xff]  }
  0xbc   : > { %6677 = vmatprep.subr.bf16.mxu0 %v9423_v61  ;;  %7333 = vmatprep.subr.bf16.mxu1 %v9426_v62  ;;  %v9510_v61 = vld [vmem:[%s11047_s8 + $0x52c] ss:$16 sps:$4 sm:$0xff]   ;;  %v9505_v62 = vld [vmem:[%s11047_s8 + $0x520] ss:$16 sps:$4 sm:$0xff]  }
  0xbf   : > { %6678 = vmatpush1.bf16.msra.mxu0 %v9421_v63  ;;  %7334 = vmatpush1.bf16.msra.mxu1 %v9424_v0  ;;  %v9508_v63 = vld [vmem:[%s11047_s8 + $0x528] ss:$16 sps:$4 sm:$0xff]   ;;  %v9513_v0 = vld [vmem:[%s11047_s8 + $0x544] ss:$16 sps:$4 sm:$0xff]  }
  0xc0   : > { %6679 = vmatprep.subr.bf16.mxu0 %v9429_v1  ;;  %7335 = vmatprep.subr.bf16.mxu1 %v9432_v2  ;;  %v9516_v1 = vld [vmem:[%s11047_s8 + $0x54c] ss:$16 sps:$4 sm:$0xff]   ;;  %v9511_v2 = vld [vmem:[%s11047_s8 + $0x540] ss:$16 sps:$4 sm:$0xff]  }
  0xc3   : > { %6680 = vmatpush1.bf16.msra.mxu0 %v9427_v3  ;;  %7336 = vmatpush1.bf16.msra.mxu1 %v9430_v4  ;;  %v9514_v3 = vld [vmem:[%s11047_s8 + $0x548] ss:$16 sps:$4 sm:$0xff]   ;;  %v9519_v4 = vld [vmem:[%s11047_s8 + $0x564] ss:$16 sps:$4 sm:$0xff]  }
  0xc4   : > { %6681 = vmatprep.subr.bf16.mxu0 %v9435_v5  ;;  %7337 = vmatprep.subr.bf16.mxu1 %v9438_v6  ;;  %v9522_v5 = vld [vmem:[%s11047_s8 + $0x56c] ss:$16 sps:$4 sm:$0xff]   ;;  %v9517_v6 = vld [vmem:[%s11047_s8 + $0x560] ss:$16 sps:$4 sm:$0xff]  }
  0xc7   : > { %6682 = vmatpush1.bf16.msra.mxu0 %v9433_v7  ;;  %7338 = vmatpush1.bf16.msra.mxu1 %v9436_v8  ;;  %v9520_v7 = vld [vmem:[%s11047_s8 + $0x568] ss:$16 sps:$4 sm:$0xff]   ;;  %v9525_v8 = vld [vmem:[%s11047_s8 + $0x584] ss:$16 sps:$4 sm:$0xff]  }
  0xc8   : > { %6683 = vmatprep.subr.bf16.mxu0 %v9441_v10  ;;  %7339 = vmatprep.subr.bf16.mxu1 %v9444_v11  ;;  %v9528_v10 = vld [vmem:[%s11047_s8 + $0x58c] ss:$16 sps:$4 sm:$0xff]   ;;  %v9523_v11 = vld [vmem:[%s11047_s8 + $0x580] ss:$16 sps:$4 sm:$0xff]  }
  0xcb   : > { %6684 = vmatpush1.bf16.msra.mxu0 %v9439_v12  ;;  %7340 = vmatpush1.bf16.msra.mxu1 %v9442_v13  ;;  %v9526_v12 = vld [vmem:[%s11047_s8 + $0x588] ss:$16 sps:$4 sm:$0xff]   ;;  %v9531_v13 = vld [vmem:[%s11047_s8 + $0x5a4] ss:$16 sps:$4 sm:$0xff]  }
  0xcc   : > { %6685 = vmatprep.subr.bf16.mxu0 %v9447_v14  ;;  %7341 = vmatprep.subr.bf16.mxu1 %v9450_v15  ;;  %v9534_v14 = vld [vmem:[%s11047_s8 + $0x5ac] ss:$16 sps:$4 sm:$0xff]   ;;  %v9529_v15 = vld [vmem:[%s11047_s8 + $0x5a0] ss:$16 sps:$4 sm:$0xff]  }
  0xcf   : > { %6686 = vmatpush1.bf16.msra.mxu0 %v9445_v16  ;;  %7342 = vmatpush1.bf16.msra.mxu1 %v9448_v17  ;;  %v9532_v16 = vld [vmem:[%s11047_s8 + $0x5a8] ss:$16 sps:$4 sm:$0xff]   ;;  %v9537_v17 = vld [vmem:[%s11047_s8 + $0x5c4] ss:$16 sps:$4 sm:$0xff]  }
  0xd0   : > { %6696 = vmatprep.subr.bf16.mxu0 %v9453_v18  ;;  %7352 = vmatprep.subr.bf16.mxu1 %v9456_v19  ;;  %v9540_v18 = vld [vmem:[%s11047_s8 + $0x5cc] ss:$16 sps:$4 sm:$0xff]   ;;  %v265_v19 = vcombine.high %v11210_v23, %v11210_v23  ;;  %v9541_v23 = vld [vmem:[%s11047_s8 + $0x5e0] ss:$16 sps:$4 sm:$0xff]  }
  0xd2   : > { %6688 = vmatmul.mubr.bf16.vlgmr.msra.gmra.mrb[0].mxu0 %v418_v21  ;;  %7344 = vmatmul.mubr.bf16.vlgmr.msra.gmra.mrb[0].mxu1 %v418_v21  ;;  %v9538_v21 = vld [vmem:[%s11047_s8 + $0x5c8] ss:$16 sps:$4 sm:$0xff]  }
  0xd3   : > { %6697 = vmatpush1.bf16.msra.mxu0 %v9451_v20  ;;  %7353 = vmatpush1.bf16.msra.mxu1 %v9454_v22  ;;  %v9535_v20 = vld [vmem:[%s11047_s8 + $0x5c0] ss:$16 sps:$4 sm:$0xff]   ;;  %v9543_v22 = vld [vmem:[%s11047_s8 + $0x5e4] ss:$16 sps:$4 sm:$0xff]  }
  0xd4   : > { %6698 = vmatprep.subr.bf16.mxu0 %v9459_v24  ;;  %7354 = vmatprep.subr.bf16.mxu1 %v9462_v25  ;;  %v9546_v24 = vld [vmem:[%s11047_s8 + $0x5ec] ss:$16 sps:$4 sm:$0xff]   ;;  %v11279_v25 = vrot.slane %v265_v19, %v11106_v49  ;;  %v9622_v19 = vld [vmem:[%s11047_s8 + $0x788] ss:$16 sps:$4 sm:$0xff]  }
  0xd5   : > { %6728 = vmatprep.mubr.bf16.mxu0 %v421_v31  ;;  %7384 = vmatprep.mubr.bf16.mxu1 %v421_v31  ;;  %v9547_v31 = vld [vmem:[%s11047_s8 + $0x600] ss:$16 sps:$4 sm:$0xff]  }
  0xd7   : > { %6699 = vmatpush1.bf16.msra.mxu0 %v9457_v27  ;;  %7355 = vmatpush1.bf16.msra.mxu1 %v9460_v28  ;;  %v9549_v27 = vld [vmem:[%s11047_s8 + $0x604] ss:$16 sps:$4 sm:$0xff]   ;;  %v9552_v28 = vld [vmem:[%s11047_s8 + $0x60c] ss:$16 sps:$4 sm:$0xff]  }
  0xd8   : > { %6700 = vmatprep.subr.bf16.mxu0 %v9465_v29  ;;  %7356 = vmatprep.subr.bf16.mxu1 %v9468_v30  ;;  %v281_v29 = vcombine.high %v11279_v25, %v11279_v25  ;;  %v420_v30 = vpack.c.bf16 %v11216_v26, %v11216_v26  ;;  %v9553_v26 = vld [vmem:[%s11047_s8 + $0x620] ss:$16 sps:$4 sm:$0xff]  }
  0xdb   : > { %6701 = vmatpush1.bf16.msra.mxu0 %v9463_v32  ;;  %7357 = vmatpush1.bf16.msra.mxu1 %v9466_v33  ;;  %v9550_v32 = vld [vmem:[%s11047_s8 + $0x608] ss:$16 sps:$4 sm:$0xff]   ;;  %v9555_v33 = vld [vmem:[%s11047_s8 + $0x624] ss:$16 sps:$4 sm:$0xff]  }
  0xdc   : > { %6702 = vmatprep.subr.bf16.mxu0 %v9471_v34  ;;  %7358 = vmatprep.subr.bf16.mxu1 %v9474_v35  ;;  %v9558_v34 = vld [vmem:[%s11047_s8 + $0x62c] ss:$16 sps:$4 sm:$0xff]   ;;  %v423_v35 = vpack.c.bf16 %v281_v29, %v281_v29  ;;  %v9634_v29 = vld [vmem:[%s11047_s8 + $0x7c8] ss:$16 sps:$4 sm:$0xff]  }
  0xdf   : > { %6703 = vmatpush1.bf16.msra.mxu0 %v9469_v36  ;;  %7359 = vmatpush1.bf16.msra.mxu1 %v9472_v37  ;;  %v9556_v36 = vld [vmem:[%s11047_s8 + $0x628] ss:$16 sps:$4 sm:$0xff]   ;;  %v9561_v37 = vld [vmem:[%s11047_s8 + $0x644] ss:$16 sps:$4 sm:$0xff]  }
  0xe0   : > { %6704 = vmatprep.subr.bf16.mxu0 %v9477_v38  ;;  %7360 = vmatprep.subr.bf16.mxu1 %v9480_v39  ;;  %v9564_v38 = vld [vmem:[%s11047_s8 + $0x64c] ss:$16 sps:$4 sm:$0xff]   ;;  %v9559_v39 = vld [vmem:[%s11047_s8 + $0x640] ss:$16 sps:$4 sm:$0xff]  }
  0xe3   : > { %6705 = vmatpush1.bf16.msra.mxu0 %v9475_v40  ;;  %7361 = vmatpush1.bf16.msra.mxu1 %v9478_v41  ;;  %v9562_v40 = vld [vmem:[%s11047_s8 + $0x648] ss:$16 sps:$4 sm:$0xff]   ;;  %v9567_v41 = vld [vmem:[%s11047_s8 + $0x664] ss:$16 sps:$4 sm:$0xff]  }
  0xe4   : > { %6706 = vmatprep.subr.bf16.mxu0 %v9483_v42  ;;  %7362 = vmatprep.subr.bf16.mxu1 %v9486_v44  ;;  %v9570_v42 = vld [vmem:[%s11047_s8 + $0x66c] ss:$16 sps:$4 sm:$0xff]   ;;  %v9565_v44 = vld [vmem:[%s11047_s8 + $0x660] ss:$16 sps:$4 sm:$0xff]  }
  0xe7   : > { %6707 = vmatpush1.bf16.msra.mxu0 %v9481_v45  ;;  %7363 = vmatpush1.bf16.msra.mxu1 %v9484_v46  ;;  %v9568_v45 = vld [vmem:[%s11047_s8 + $0x668] ss:$16 sps:$4 sm:$0xff]   ;;  %v9573_v46 = vld [vmem:[%s11047_s8 + $0x684] ss:$16 sps:$4 sm:$0xff]  }
  0xe8   : > { %6708 = vmatprep.subr.bf16.mxu0 %v9489_v47  ;;  %7364 = vmatprep.subr.bf16.mxu1 %v9492_v48  ;;  %v9576_v47 = vld [vmem:[%s11047_s8 + $0x68c] ss:$16 sps:$4 sm:$0xff]   ;;  %v9571_v48 = vld [vmem:[%s11047_s8 + $0x680] ss:$16 sps:$4 sm:$0xff]  }
  0xeb   : > { %6709 = vmatpush1.bf16.msra.mxu0 %v9487_v50  ;;  %7365 = vmatpush1.bf16.msra.mxu1 %v9490_v51  ;;  %v9574_v50 = vld [vmem:[%s11047_s8 + $0x688] ss:$16 sps:$4 sm:$0xff]   ;;  %v9579_v51 = vld [vmem:[%s11047_s8 + $0x6a4] ss:$16 sps:$4 sm:$0xff]  }
  0xec   : > { %6710 = vmatprep.subr.bf16.mxu0 %v9495_v52  ;;  %7366 = vmatprep.subr.bf16.mxu1 %v9498_v53  ;;  %v9582_v52 = vld [vmem:[%s11047_s8 + $0x6ac] ss:$16 sps:$4 sm:$0xff]   ;;  %v9577_v53 = vld [vmem:[%s11047_s8 + $0x6a0] ss:$16 sps:$4 sm:$0xff]  }
  0xef   : > { %6711 = vmatpush1.bf16.msra.mxu0 %v9493_v54  ;;  %7367 = vmatpush1.bf16.msra.mxu1 %v9496_v55  ;;  %v9580_v54 = vld [vmem:[%s11047_s8 + $0x6a8] ss:$16 sps:$4 sm:$0xff]   ;;  %v9585_v55 = vld [vmem:[%s11047_s8 + $0x6c4] ss:$16 sps:$4 sm:$0xff]  }
  0xf0   : > { %6712 = vmatprep.subr.bf16.mxu0 %v9501_v56  ;;  %7368 = vmatprep.subr.bf16.mxu1 %v9504_v57  ;;  %v9588_v56 = vld [vmem:[%s11047_s8 + $0x6cc] ss:$16 sps:$4 sm:$0xff]   ;;  %v9583_v57 = vld [vmem:[%s11047_s8 + $0x6c0] ss:$16 sps:$4 sm:$0xff]  }
  0xf3   : > { %6713 = vmatpush1.bf16.msra.mxu0 %v9499_v58  ;;  %7369 = vmatpush1.bf16.msra.mxu1 %v9502_v59  ;;  %v9586_v58 = vld [vmem:[%s11047_s8 + $0x6c8] ss:$16 sps:$4 sm:$0xff]   ;;  %v9591_v59 = vld [vmem:[%s11047_s8 + $0x6e4] ss:$16 sps:$4 sm:$0xff]  }
  0xf4   : > { %6714 = vmatprep.subr.bf16.mxu0 %v9507_v60  ;;  %7370 = vmatprep.subr.bf16.mxu1 %v9510_v61  ;;  %v9594_v60 = vld [vmem:[%s11047_s8 + $0x6ec] ss:$16 sps:$4 sm:$0xff]   ;;  %v9589_v61 = vld [vmem:[%s11047_s8 + $0x6e0] ss:$16 sps:$4 sm:$0xff]  }
  0xf7   : > { %6715 = vmatpush1.bf16.msra.mxu0 %v9505_v62  ;;  %7371 = vmatpush1.bf16.msra.mxu1 %v9508_v63  ;;  %v9592_v62 = vld [vmem:[%s11047_s8 + $0x6e8] ss:$16 sps:$4 sm:$0xff]   ;;  %v9597_v63 = vld [vmem:[%s11047_s8 + $0x704] ss:$16 sps:$4 sm:$0xff]  }
  0xf8   : > { %6716 = vmatprep.subr.bf16.mxu0 %v9513_v0  ;;  %7372 = vmatprep.subr.bf16.mxu1 %v9516_v1  ;;  %v9600_v0 = vld [vmem:[%s11047_s8 + $0x70c] ss:$16 sps:$4 sm:$0xff]   ;;  %v9595_v1 = vld [vmem:[%s11047_s8 + $0x700] ss:$16 sps:$4 sm:$0xff]  }
  0xfb   : > { %6717 = vmatpush1.bf16.msra.mxu0 %v9511_v2  ;;  %7373 = vmatpush1.bf16.msra.mxu1 %v9514_v3  ;;  %v9598_v2 = vld [vmem:[%s11047_s8 + $0x708] ss:$16 sps:$4 sm:$0xff]   ;;  %v9603_v3 = vld [vmem:[%s11047_s8 + $0x724] ss:$16 sps:$4 sm:$0xff]  }
  0xfc   : > { %6718 = vmatprep.subr.bf16.mxu0 %v9519_v4  ;;  %7374 = vmatprep.subr.bf16.mxu1 %v9522_v5  ;;  %v9606_v4 = vld [vmem:[%s11047_s8 + $0x72c] ss:$16 sps:$4 sm:$0xff]   ;;  %v9601_v5 = vld [vmem:[%s11047_s8 + $0x720] ss:$16 sps:$4 sm:$0xff]  }
  0xff   : > { %6719 = vmatpush1.bf16.msra.mxu0 %v9517_v6  ;;  %7375 = vmatpush1.bf16.msra.mxu1 %v9520_v7  ;;  %v9604_v6 = vld [vmem:[%s11047_s8 + $0x728] ss:$16 sps:$4 sm:$0xff]   ;;  %v9609_v7 = vld [vmem:[%s11047_s8 + $0x744] ss:$16 sps:$4 sm:$0xff]  }
 0x100   : > { %6720 = vmatprep.subr.bf16.mxu0 %v9525_v8  ;;  %7376 = vmatprep.subr.bf16.mxu1 %v9528_v10  ;;  %v9612_v8 = vld [vmem:[%s11047_s8 + $0x74c] ss:$16 sps:$4 sm:$0xff]   ;;  %v9607_v10 = vld [vmem:[%s11047_s8 + $0x740] ss:$16 sps:$4 sm:$0xff]  }
 0x103   : > { %6721 = vmatpush1.bf16.msra.mxu0 %v9523_v11  ;;  %7377 = vmatpush1.bf16.msra.mxu1 %v9526_v12  ;;  %v9610_v11 = vld [vmem:[%s11047_s8 + $0x748] ss:$16 sps:$4 sm:$0xff]   ;;  %v9615_v12 = vld [vmem:[%s11047_s8 + $0x764] ss:$16 sps:$4 sm:$0xff]  }
 0x104   : > { %6722 = vmatprep.subr.bf16.mxu0 %v9531_v13  ;;  %7378 = vmatprep.subr.bf16.mxu1 %v9534_v14  ;;  %v9618_v13 = vld [vmem:[%s11047_s8 + $0x76c] ss:$16 sps:$4 sm:$0xff]   ;;  %v9613_v14 = vld [vmem:[%s11047_s8 + $0x760] ss:$16 sps:$4 sm:$0xff]  }
 0x107   : > { %6723 = vmatpush1.bf16.msra.mxu0 %v9529_v15  ;;  %7379 = vmatpush1.bf16.msra.mxu1 %v9532_v16  ;;  %v9616_v15 = vld [vmem:[%s11047_s8 + $0x768] ss:$16 sps:$4 sm:$0xff]   ;;  %v9621_v16 = vld [vmem:[%s11047_s8 + $0x784] ss:$16 sps:$4 sm:$0xff]  }
 0x108   : > { %6724 = vmatprep.subr.bf16.mxu0 %v9537_v17  ;;  %7380 = vmatprep.subr.bf16.mxu1 %v9540_v18  ;;  %v9624_v17 = vld [vmem:[%s11047_s8 + $0x78c] ss:$16 sps:$4 sm:$0xff]   ;;  %v9619_v18 = vld [vmem:[%s11047_s8 + $0x780] ss:$16 sps:$4 sm:$0xff]  }
 0x10b   : > { %6725 = vmatpush1.bf16.msra.mxu0 %v9535_v20  ;;  %7381 = vmatpush1.bf16.msra.mxu1 %v9538_v21  ;;  %v9627_v20 = vld [vmem:[%s11047_s8 + $0x7a4] ss:$16 sps:$4 sm:$0xff]   ;;  %v9630_v21 = vld [vmem:[%s11047_s8 + $0x7ac] ss:$16 sps:$4 sm:$0xff]  }
 0x10c   : > { %6726 = vmatprep.subr.bf16.mxu0 %v9543_v22  ;;  %7382 = vmatprep.subr.bf16.mxu1 %v9546_v24  ;;  %v9625_v22 = vld [vmem:[%s11047_s8 + $0x7a0] ss:$16 sps:$4 sm:$0xff]   ;;  %v9628_v24 = vld [vmem:[%s11047_s8 + $0x7a8] ss:$16 sps:$4 sm:$0xff]  }
 0x10f   : > { %6727 = vmatpush1.bf16.msra.mxu0 %v9541_v23  ;;  %7383 = vmatpush1.bf16.msra.mxu1 %v9544_v9  ;;  %v9633_v23 = vld [vmem:[%s11047_s8 + $0x7c4] ss:$16 sps:$4 sm:$0xff]   ;;  %v9636_v9 = vld [vmem:[%s11047_s8 + $0x7cc] ss:$16 sps:$4 sm:$0xff]  }
 0x110   : > { %6737 = vmatprep.subr.bf16.mxu0 %v9549_v27  ;;  %7393 = vmatprep.subr.bf16.mxu1 %v9552_v28  ;;  %v9631_v27 = vld [vmem:[%s11047_s8 + $0x7c0] ss:$16 sps:$4 sm:$0xff]   ;;  %v11349_v28 = vld [vmem:[%s12278_s0 + $0x10] sm:$0xff] }
 0x112   : > { %6729 = vmatmul.mubr.bf16.vlgmr.msra.gmra.mrb[0].mxu0 %v420_v30  ;;  %7385 = vmatmul.mubr.bf16.vlgmr.msra.gmra.mrb[0].mxu1 %v420_v30  ;;  %v9639_v30 = vld [vmem:[%s11047_s8 + $0x7e4] ss:$16 sps:$4 sm:$0xff]  }
 0x113   : > { %6738 = vmatpush1.bf16.msra.mxu0 %v9547_v31  ;;  %7394 = vmatpush1.bf16.msra.mxu1 %v9550_v32  ;;  %v9642_v31 = vld [vmem:[%s11047_s8 + $0x7ec] ss:$16 sps:$4 sm:$0xff]   ;;  %v11356_v32 = vrot.slane %v11349_v28, %v11106_v49 }
 0x114   : > { %6739 = vmatprep.subr.bf16.mxu0 %v9555_v33  ;;  %7395 = vmatprep.subr.bf16.mxu1 %v9558_v34  ;;  %v9637_v33 = vld [vmem:[%s11047_s8 + $0x7e0] ss:$16 sps:$4 sm:$0xff]   ;;  %v9640_v34 = vld [vmem:[%s11047_s8 + $0x7e8] ss:$16 sps:$4 sm:$0xff]  }
 0x115   : > { %6769 = vmatprep.mubr.bf16.mxu0 %v423_v35  ;;  %7425 = vmatprep.mubr.bf16.mxu1 %v423_v35  ;;  %v9646_v35 = vld [vmem:[%s11047_s8 + $0x804] ss:$16 sps:$4 sm:$0xff]  }
 0x117   : > { %6740 = vmatpush1.bf16.msra.mxu0 %v9553_v26  ;;  %7396 = vmatpush1.bf16.msra.mxu1 %v9556_v36  ;;  %v9649_v26 = vld [vmem:[%s11047_s8 + $0x80c] ss:$16 sps:$4 sm:$0xff]   ;;  %v297_v36 = vcombine.high %v11356_v32, %v11356_v32 }
 0x118   : > { %6741 = vmatprep.subr.bf16.mxu0 %v9561_v37  ;;  %7397 = vmatprep.subr.bf16.mxu1 %v9564_v38  ;;  %v9644_v37 = vld [vmem:[%s11047_s8 + $0x800] ss:$16 sps:$4 sm:$0xff]   ;;  %v422_v38 = vpack.c.bf16 %v11279_v25, %v11279_v25  ;;  %v9658_v25 = vld [vmem:[%s11047_s8 + $0x844] ss:$16 sps:$4 sm:$0xff]  }
 0x11b   : > { %6742 = vmatpush1.bf16.msra.mxu0 %v9559_v39  ;;  %7398 = vmatpush1.bf16.msra.mxu1 %v9562_v40  ;;  %v9647_v39 = vld [vmem:[%s11047_s8 + $0x808] ss:$16 sps:$4 sm:$0xff]   ;;  %v9652_v40 = vld [vmem:[%s11047_s8 + $0x824] ss:$16 sps:$4 sm:$0xff]  }
 0x11c   : > { %6743 = vmatprep.subr.bf16.mxu0 %v9567_v41  ;;  %7399 = vmatprep.subr.bf16.mxu1 %v9570_v42  ;;  %v9655_v41 = vld [vmem:[%s11047_s8 + $0x82c] ss:$16 sps:$4 sm:$0xff]   ;;  %v425_v42 = vpack.c.bf16 %v297_v36, %v297_v36  ;;  %v9728_v36 = vld [vmem:[%s11047_s8 + $0x9c0] ss:$16 sps:$4 sm:$0xff]  }
 0x11f   : > { %6744 = vmatpush1.bf16.msra.mxu0 %v9565_v44  ;;  %7400 = vmatpush1.bf16.msra.mxu1 %v9568_v45  ;;  %v9650_v44 = vld [vmem:[%s11047_s8 + $0x820] ss:$16 sps:$4 sm:$0xff]   ;;  %v9653_v45 = vld [vmem:[%s11047_s8 + $0x828] ss:$16 sps:$4 sm:$0xff]  }
 0x120   : > { %6745 = vmatprep.subr.bf16.mxu0 %v9573_v46  ;;  %7401 = vmatprep.subr.bf16.mxu1 %v9576_v47  ;;  %v9661_v46 = vld [vmem:[%s11047_s8 + $0x84c] ss:$16 sps:$4 sm:$0xff]   ;;  %v9656_v47 = vld [vmem:[%s11047_s8 + $0x840] ss:$16 sps:$4 sm:$0xff]  }
 0x123   : > { %6746 = vmatpush1.bf16.msra.mxu0 %v9571_v48  ;;  %7402 = vmatpush1.bf16.msra.mxu1 %v9574_v50  ;;  %v9659_v48 = vld [vmem:[%s11047_s8 + $0x848] ss:$16 sps:$4 sm:$0xff]   ;;  %v9664_v50 = vld [vmem:[%s11047_s8 + $0x864] ss:$16 sps:$4 sm:$0xff]  }
 0x124   : > { %6747 = vmatprep.subr.bf16.mxu0 %v9579_v51  ;;  %7403 = vmatprep.subr.bf16.mxu1 %v9582_v52  ;;  %v9667_v51 = vld [vmem:[%s11047_s8 + $0x86c] ss:$16 sps:$4 sm:$0xff]   ;;  %v9662_v52 = vld [vmem:[%s11047_s8 + $0x860] ss:$16 sps:$4 sm:$0xff]  }
 0x127   : > { %6748 = vmatpush1.bf16.msra.mxu0 %v9577_v53  ;;  %7404 = vmatpush1.bf16.msra.mxu1 %v9580_v54  ;;  %v9665_v53 = vld [vmem:[%s11047_s8 + $0x868] ss:$16 sps:$4 sm:$0xff]   ;;  %v9670_v54 = vld [vmem:[%s11047_s8 + $0x884] ss:$16 sps:$4 sm:$0xff]  }
 0x128   : > { %6749 = vmatprep.subr.bf16.mxu0 %v9585_v55  ;;  %7405 = vmatprep.subr.bf16.mxu1 %v9588_v56  ;;  %v9673_v55 = vld [vmem:[%s11047_s8 + $0x88c] ss:$16 sps:$4 sm:$0xff]   ;;  %v9668_v56 = vld [vmem:[%s11047_s8 + $0x880] ss:$16 sps:$4 sm:$0xff]  }
 0x12b   : > { %6750 = vmatpush1.bf16.msra.mxu0 %v9583_v57  ;;  %7406 = vmatpush1.bf16.msra.mxu1 %v9586_v58  ;;  %v9671_v57 = vld [vmem:[%s11047_s8 + $0x888] ss:$16 sps:$4 sm:$0xff]   ;;  %v9676_v58 = vld [vmem:[%s11047_s8 + $0x8a4] ss:$16 sps:$4 sm:$0xff]  }
 0x12c   : > { %6751 = vmatprep.subr.bf16.mxu0 %v9591_v59  ;;  %7407 = vmatprep.subr.bf16.mxu1 %v9594_v60  ;;  %v9679_v59 = vld [vmem:[%s11047_s8 + $0x8ac] ss:$16 sps:$4 sm:$0xff]   ;;  %v9674_v60 = vld [vmem:[%s11047_s8 + $0x8a0] ss:$16 sps:$4 sm:$0xff]  }
 0x12f   : > { %6752 = vmatpush1.bf16.msra.mxu0 %v9589_v61  ;;  %7408 = vmatpush1.bf16.msra.mxu1 %v9592_v62  ;;  %v9677_v61 = vld [vmem:[%s11047_s8 + $0x8a8] ss:$16 sps:$4 sm:$0xff]   ;;  %v9682_v62 = vld [vmem:[%s11047_s8 + $0x8c4] ss:$16 sps:$4 sm:$0xff]  }
 0x130   : > { %6753 = vmatprep.subr.bf16.mxu0 %v9597_v63  ;;  %7409 = vmatprep.subr.bf16.mxu1 %v9600_v0  ;;  %v9685_v63 = vld [vmem:[%s11047_s8 + $0x8cc] ss:$16 sps:$4 sm:$0xff]   ;;  %v9680_v0 = vld [vmem:[%s11047_s8 + $0x8c0] ss:$16 sps:$4 sm:$0xff]  }
 0x133   : > { %6754 = vmatpush1.bf16.msra.mxu0 %v9595_v1  ;;  %7410 = vmatpush1.bf16.msra.mxu1 %v9598_v2  ;;  %v9683_v1 = vld [vmem:[%s11047_s8 + $0x8c8] ss:$16 sps:$4 sm:$0xff]   ;;  %v9688_v2 = vld [vmem:[%s11047_s8 + $0x8e4] ss:$16 sps:$4 sm:$0xff]  }
 0x134   : > { %6755 = vmatprep.subr.bf16.mxu0 %v9603_v3  ;;  %7411 = vmatprep.subr.bf16.mxu1 %v9606_v4  ;;  %v9691_v3 = vld [vmem:[%s11047_s8 + $0x8ec] ss:$16 sps:$4 sm:$0xff]   ;;  %v9686_v4 = vld [vmem:[%s11047_s8 + $0x8e0] ss:$16 sps:$4 sm:$0xff]  }
 0x137   : > { %6756 = vmatpush1.bf16.msra.mxu0 %v9601_v5  ;;  %7412 = vmatpush1.bf16.msra.mxu1 %v9604_v6  ;;  %v9689_v5 = vld [vmem:[%s11047_s8 + $0x8e8] ss:$16 sps:$4 sm:$0xff]   ;;  %v9694_v6 = vld [vmem:[%s11047_s8 + $0x904] ss:$16 sps:$4 sm:$0xff]  }
 0x138   : > { %6757 = vmatprep.subr.bf16.mxu0 %v9609_v7  ;;  %7413 = vmatprep.subr.bf16.mxu1 %v9612_v8  ;;  %v9697_v7 = vld [vmem:[%s11047_s8 + $0x90c] ss:$16 sps:$4 sm:$0xff]   ;;  %v9692_v8 = vld [vmem:[%s11047_s8 + $0x900] ss:$16 sps:$4 sm:$0xff]  }
 0x13b   : > { %6758 = vmatpush1.bf16.msra.mxu0 %v9607_v10  ;;  %7414 = vmatpush1.bf16.msra.mxu1 %v9610_v11  ;;  %v9695_v10 = vld [vmem:[%s11047_s8 + $0x908] ss:$16 sps:$4 sm:$0xff]   ;;  %v9700_v11 = vld [vmem:[%s11047_s8 + $0x924] ss:$16 sps:$4 sm:$0xff]  }
 0x13c   : > { %6759 = vmatprep.subr.bf16.mxu0 %v9615_v12  ;;  %7415 = vmatprep.subr.bf16.mxu1 %v9618_v13  ;;  %v9703_v12 = vld [vmem:[%s11047_s8 + $0x92c] ss:$16 sps:$4 sm:$0xff]   ;;  %v9698_v13 = vld [vmem:[%s11047_s8 + $0x920] ss:$16 sps:$4 sm:$0xff]  }
 0x13f   : > { %6760 = vmatpush1.bf16.msra.mxu0 %v9613_v14  ;;  %7416 = vmatpush1.bf16.msra.mxu1 %v9616_v15  ;;  %v9701_v14 = vld [vmem:[%s11047_s8 + $0x928] ss:$16 sps:$4 sm:$0xff]   ;;  %v9706_v15 = vld [vmem:[%s11047_s8 + $0x944] ss:$16 sps:$4 sm:$0xff]  }
 0x140   : > { %6761 = vmatprep.subr.bf16.mxu0 %v9621_v16  ;;  %7417 = vmatprep.subr.bf16.mxu1 %v9624_v17  ;;  %v9709_v16 = vld [vmem:[%s11047_s8 + $0x94c] ss:$16 sps:$4 sm:$0xff]   ;;  %v9704_v17 = vld [vmem:[%s11047_s8 + $0x940] ss:$16 sps:$4 sm:$0xff]  }
 0x143   : > { %6762 = vmatpush1.bf16.msra.mxu0 %v9619_v18  ;;  %7418 = vmatpush1.bf16.msra.mxu1 %v9622_v19  ;;  %v9707_v18 = vld [vmem:[%s11047_s8 + $0x948] ss:$16 sps:$4 sm:$0xff]   ;;  %v9712_v19 = vld [vmem:[%s11047_s8 + $0x964] ss:$16 sps:$4 sm:$0xff]  }
 0x144   : > { %6763 = vmatprep.subr.bf16.mxu0 %v9627_v20  ;;  %7419 = vmatprep.subr.bf16.mxu1 %v9630_v21  ;;  %v9715_v20 = vld [vmem:[%s11047_s8 + $0x96c] ss:$16 sps:$4 sm:$0xff]   ;;  %v9710_v21 = vld [vmem:[%s11047_s8 + $0x960] ss:$16 sps:$4 sm:$0xff]  }
 0x147   : > { %6764 = vmatpush1.bf16.msra.mxu0 %v9625_v22  ;;  %7420 = vmatpush1.bf16.msra.mxu1 %v9628_v24  ;;  %v9713_v22 = vld [vmem:[%s11047_s8 + $0x968] ss:$16 sps:$4 sm:$0xff]   ;;  %v9718_v24 = vld [vmem:[%s11047_s8 + $0x984] ss:$16 sps:$4 sm:$0xff]  }
 0x148   : > { %6765 = vmatprep.subr.bf16.mxu0 %v9633_v23  ;;  %7421 = vmatprep.subr.bf16.mxu1 %v9636_v9  ;;  %v9721_v23 = vld [vmem:[%s11047_s8 + $0x98c] ss:$16 sps:$4 sm:$0xff]   ;;  %v9716_v9 = vld [vmem:[%s11047_s8 + $0x980] ss:$16 sps:$4 sm:$0xff]  }
 0x14b   : > { %6766 = vmatpush1.bf16.msra.mxu0 %v9631_v27  ;;  %7422 = vmatpush1.bf16.msra.mxu1 %v9634_v29  ;;  %v9719_v27 = vld [vmem:[%s11047_s8 + $0x988] ss:$16 sps:$4 sm:$0xff]   ;;  %v9724_v29 = vld [vmem:[%s11047_s8 + $0x9a4] ss:$16 sps:$4 sm:$0xff]  }
 0x14c   : > { %6767 = vmatprep.subr.bf16.mxu0 %v9639_v30  ;;  %7423 = vmatprep.subr.bf16.mxu1 %v9642_v31  ;;  %v9727_v30 = vld [vmem:[%s11047_s8 + $0x9ac] ss:$16 sps:$4 sm:$0xff]   ;;  %v9722_v31 = vld [vmem:[%s11047_s8 + $0x9a0] ss:$16 sps:$4 sm:$0xff]  }
 0x14f   : > { %6768 = vmatpush1.bf16.msra.mxu0 %v9637_v33  ;;  %7424 = vmatpush1.bf16.msra.mxu1 %v9640_v34  ;;  %v9725_v33 = vld [vmem:[%s11047_s8 + $0x9a8] ss:$16 sps:$4 sm:$0xff]   ;;  %v9730_v34 = vld [vmem:[%s11047_s8 + $0x9c4] ss:$16 sps:$4 sm:$0xff]  }
 0x150   : > { %6778 = vmatprep.subr.bf16.mxu0 %v9646_v35  ;;  %7434 = vmatprep.subr.bf16.mxu1 %v9649_v26  ;;  %v9733_v35 = vld [vmem:[%s11047_s8 + $0x9cc] ss:$16 sps:$4 sm:$0xff]   ;;  %v282_v26 = vcombine.high %v11349_v28, %v11349_v28  ;;  %v9734_v28 = vld [vmem:[%s11047_s8 + $0x9e0] ss:$16 sps:$4 sm:$0xff]  }
 0x152   : > { %6770 = vmatmul.mubr.bf16.vlgmr.msra.gmra.mrb[0].mxu0 %v422_v38  ;;  %7426 = vmatmul.mubr.bf16.vlgmr.msra.gmra.mrb[0].mxu1 %v422_v38  ;;  %v9736_v38 = vld [vmem:[%s11047_s8 + $0x9e4] ss:$16 sps:$4 sm:$0xff]  }
 0x153   : > { %6779 = vmatpush1.bf16.msra.mxu0 %v9644_v37  ;;  %7435 = vmatpush1.bf16.msra.mxu1 %v9647_v39  ;;  %v9731_v37 = vld [vmem:[%s11047_s8 + $0x9c8] ss:$16 sps:$4 sm:$0xff]   ;;  %v9739_v39 = vld [vmem:[%s11047_s8 + $0x9ec] ss:$16 sps:$4 sm:$0xff]  }
 0x154   : > { %6780 = vmatprep.subr.bf16.mxu0 %v9652_v40  ;;  %7436 = vmatprep.subr.bf16.mxu1 %v9655_v41  ;;  %v11429_v40 = vrot.slane %v282_v26, %v11106_v49  ;;  %v9737_v41 = vld [vmem:[%s11047_s8 + $0x9e8] ss:$16 sps:$4 sm:$0xff]  }
 0x155   : > { %6810 = vmatprep.mubr.bf16.mxu0 %v425_v42  ;;  %7466 = vmatprep.mubr.bf16.mxu1 %v425_v42  ;;  %v9742_v42 = vld [vmem:[%s11047_s8 + $0xa04] ss:$16 sps:$4 sm:$0xff]   ;;  %v9815_v26 = vld [vmem:[%s11047_s8 + $0xb88] ss:$16 sps:$4 sm:$0xff]  }
 0x157   : > { %6781 = vmatpush1.bf16.msra.mxu0 %v9650_v44  ;;  %7437 = vmatpush1.bf16.msra.mxu1 %v9653_v45  ;;  %v9745_v44 = vld [vmem:[%s11047_s8 + $0xa0c] ss:$16 sps:$4 sm:$0xff]   ;;  %v298_v45 = vcombine.high %v11429_v40, %v11429_v40 }
 0x158   : > { %6782 = vmatprep.subr.bf16.mxu0 %v9658_v25  ;;  %7438 = vmatprep.subr.bf16.mxu1 %v9661_v46  ;;  %v424_v25 = vpack.c.bf16 %v11356_v32, %v11356_v32  ;;  %v9740_v46 = vld [vmem:[%s11047_s8 + $0xa00] ss:$16 sps:$4 sm:$0xff]  }
 0x159   : > { %v9746_v32 = vld [vmem:[%s11047_s8 + $0xa20] ss:$16 sps:$4 sm:$0xff]  }
 0x15b   : > { %6783 = vmatpush1.bf16.msra.mxu0 %v9656_v47  ;;  %7439 = vmatpush1.bf16.msra.mxu1 %v9659_v48  ;;  %v9743_v47 = vld [vmem:[%s11047_s8 + $0xa08] ss:$16 sps:$4 sm:$0xff]   ;;  %v9748_v48 = vld [vmem:[%s11047_s8 + $0xa24] ss:$16 sps:$4 sm:$0xff]  }
 0x15c   : > { %6784 = vmatprep.subr.bf16.mxu0 %v9664_v50  ;;  %7440 = vmatprep.subr.bf16.mxu1 %v9667_v51  ;;  %v9751_v50 = vld [vmem:[%s11047_s8 + $0xa2c] ss:$16 sps:$4 sm:$0xff]   ;;  %v427_v51 = vpack.c.bf16 %v298_v45, %v298_v45  ;;  %v9827_v45 = vld [vmem:[%s11047_s8 + $0xbc8] ss:$16 sps:$4 sm:$0xff]  }
 0x15f   : > { %6785 = vmatpush1.bf16.msra.mxu0 %v9662_v52  ;;  %7441 = vmatpush1.bf16.msra.mxu1 %v9665_v53  ;;  %v9749_v52 = vld [vmem:[%s11047_s8 + $0xa28] ss:$16 sps:$4 sm:$0xff]   ;;  %v9754_v53 = vld [vmem:[%s11047_s8 + $0xa44] ss:$16 sps:$4 sm:$0xff]  }
 0x160   : > { %6786 = vmatprep.subr.bf16.mxu0 %v9670_v54  ;;  %7442 = vmatprep.subr.bf16.mxu1 %v9673_v55  ;;  %v9757_v54 = vld [vmem:[%s11047_s8 + $0xa4c] ss:$16 sps:$4 sm:$0xff]   ;;  %v9752_v55 = vld [vmem:[%s11047_s8 + $0xa40] ss:$16 sps:$4 sm:$0xff]  }
 0x163   : > { %6787 = vmatpush1.bf16.msra.mxu0 %v9668_v56  ;;  %7443 = vmatpush1.bf16.msra.mxu1 %v9671_v57  ;;  %v9755_v56 = vld [vmem:[%s11047_s8 + $0xa48] ss:$16 sps:$4 sm:$0xff]   ;;  %v9760_v57 = vld [vmem:[%s11047_s8 + $0xa64] ss:$16 sps:$4 sm:$0xff]  }
 0x164   : > { %6788 = vmatprep.subr.bf16.mxu0 %v9676_v58  ;;  %7444 = vmatprep.subr.bf16.mxu1 %v9679_v59  ;;  %v9763_v58 = vld [vmem:[%s11047_s8 + $0xa6c] ss:$16 sps:$4 sm:$0xff]   ;;  %v9758_v59 = vld [vmem:[%s11047_s8 + $0xa60] ss:$16 sps:$4 sm:$0xff]  }
 0x167   : > { %6789 = vmatpush1.bf16.msra.mxu0 %v9674_v60  ;;  %7445 = vmatpush1.bf16.msra.mxu1 %v9677_v61  ;;  %v9761_v60 = vld [vmem:[%s11047_s8 + $0xa68] ss:$16 sps:$4 sm:$0xff]   ;;  %v9766_v61 = vld [vmem:[%s11047_s8 + $0xa84] ss:$16 sps:$4 sm:$0xff]  }
 0x168   : > { %6790 = vmatprep.subr.bf16.mxu0 %v9682_v62  ;;  %7446 = vmatprep.subr.bf16.mxu1 %v9685_v63  ;;  %v9769_v62 = vld [vmem:[%s11047_s8 + $0xa8c] ss:$16 sps:$4 sm:$0xff]   ;;  %v9764_v63 = vld [vmem:[%s11047_s8 + $0xa80] ss:$16 sps:$4 sm:$0xff]  }
 0x16b   : > { %6791 = vmatpush1.bf16.msra.mxu0 %v9680_v0  ;;  %7447 = vmatpush1.bf16.msra.mxu1 %v9683_v1  ;;  %v9767_v0 = vld [vmem:[%s11047_s8 + $0xa88] ss:$16 sps:$4 sm:$0xff]   ;;  %v9772_v1 = vld [vmem:[%s11047_s8 + $0xaa4] ss:$16 sps:$4 sm:$0xff]  }
 0x16c   : > { %6792 = vmatprep.subr.bf16.mxu0 %v9688_v2  ;;  %7448 = vmatprep.subr.bf16.mxu1 %v9691_v3  ;;  %v9775_v2 = vld [vmem:[%s11047_s8 + $0xaac] ss:$16 sps:$4 sm:$0xff]   ;;  %v9770_v3 = vld [vmem:[%s11047_s8 + $0xaa0] ss:$16 sps:$4 sm:$0xff]  }
 0x16f   : > { %6793 = vmatpush1.bf16.msra.mxu0 %v9686_v4  ;;  %7449 = vmatpush1.bf16.msra.mxu1 %v9689_v5  ;;  %v9773_v4 = vld [vmem:[%s11047_s8 + $0xaa8] ss:$16 sps:$4 sm:$0xff]   ;;  %v9778_v5 = vld [vmem:[%s11047_s8 + $0xac4] ss:$16 sps:$4 sm:$0xff]  }
 0x170   : > { %6794 = vmatprep.subr.bf16.mxu0 %v9694_v6  ;;  %7450 = vmatprep.subr.bf16.mxu1 %v9697_v7  ;;  %v9781_v6 = vld [vmem:[%s11047_s8 + $0xacc] ss:$16 sps:$4 sm:$0xff]   ;;  %v9776_v7 = vld [vmem:[%s11047_s8 + $0xac0] ss:$16 sps:$4 sm:$0xff]  }
 0x173   : > { %6795 = vmatpush1.bf16.msra.mxu0 %v9692_v8  ;;  %7451 = vmatpush1.bf16.msra.mxu1 %v9695_v10  ;;  %v9779_v8 = vld [vmem:[%s11047_s8 + $0xac8] ss:$16 sps:$4 sm:$0xff]   ;;  %v9784_v10 = vld [vmem:[%s11047_s8 + $0xae4] ss:$16 sps:$4 sm:$0xff]  }
 0x174   : > { %6796 = vmatprep.subr.bf16.mxu0 %v9700_v11  ;;  %7452 = vmatprep.subr.bf16.mxu1 %v9703_v12  ;;  %v9787_v11 = vld [vmem:[%s11047_s8 + $0xaec] ss:$16 sps:$4 sm:$0xff]   ;;  %v9782_v12 = vld [vmem:[%s11047_s8 + $0xae0] ss:$16 sps:$4 sm:$0xff]  }
 0x177   : > { %6797 = vmatpush1.bf16.msra.mxu0 %v9698_v13  ;;  %7453 = vmatpush1.bf16.msra.mxu1 %v9701_v14  ;;  %v9785_v13 = vld [vmem:[%s11047_s8 + $0xae8] ss:$16 sps:$4 sm:$0xff]   ;;  %v9790_v14 = vld [vmem:[%s11047_s8 + $0xb04] ss:$16 sps:$4 sm:$0xff]  }
 0x178   : > { %6798 = vmatprep.subr.bf16.mxu0 %v9706_v15  ;;  %7454 = vmatprep.subr.bf16.mxu1 %v9709_v16  ;;  %v9793_v15 = vld [vmem:[%s11047_s8 + $0xb0c] ss:$16 sps:$4 sm:$0xff]   ;;  %v9788_v16 = vld [vmem:[%s11047_s8 + $0xb00] ss:$16 sps:$4 sm:$0xff]  }
 0x17b   : > { %6799 = vmatpush1.bf16.msra.mxu0 %v9704_v17  ;;  %7455 = vmatpush1.bf16.msra.mxu1 %v9707_v18  ;;  %v9791_v17 = vld [vmem:[%s11047_s8 + $0xb08] ss:$16 sps:$4 sm:$0xff]   ;;  %v9796_v18 = vld [vmem:[%s11047_s8 + $0xb24] ss:$16 sps:$4 sm:$0xff]  }
 0x17c   : > { %6800 = vmatprep.subr.bf16.mxu0 %v9712_v19  ;;  %7456 = vmatprep.subr.bf16.mxu1 %v9715_v20  ;;  %v9799_v19 = vld [vmem:[%s11047_s8 + $0xb2c] ss:$16 sps:$4 sm:$0xff]   ;;  %v9794_v20 = vld [vmem:[%s11047_s8 + $0xb20] ss:$16 sps:$4 sm:$0xff]  }
 0x17f   : > { %6801 = vmatpush1.bf16.msra.mxu0 %v9710_v21  ;;  %7457 = vmatpush1.bf16.msra.mxu1 %v9713_v22  ;;  %v9797_v21 = vld [vmem:[%s11047_s8 + $0xb28] ss:$16 sps:$4 sm:$0xff]   ;;  %v9802_v22 = vld [vmem:[%s11047_s8 + $0xb44] ss:$16 sps:$4 sm:$0xff]  }
 0x180   : > { %6802 = vmatprep.subr.bf16.mxu0 %v9718_v24  ;;  %7458 = vmatprep.subr.bf16.mxu1 %v9721_v23  ;;  %v9805_v24 = vld [vmem:[%s11047_s8 + $0xb4c] ss:$16 sps:$4 sm:$0xff]   ;;  %v9800_v23 = vld [vmem:[%s11047_s8 + $0xb40] ss:$16 sps:$4 sm:$0xff]  }
 0x183   : > { %6803 = vmatpush1.bf16.msra.mxu0 %v9716_v9  ;;  %7459 = vmatpush1.bf16.msra.mxu1 %v9719_v27  ;;  %v9803_v9 = vld [vmem:[%s11047_s8 + $0xb48] ss:$16 sps:$4 sm:$0xff]   ;;  %v9808_v27 = vld [vmem:[%s11047_s8 + $0xb64] ss:$16 sps:$4 sm:$0xff]  }
 0x184   : > { %6804 = vmatprep.subr.bf16.mxu0 %v9724_v29  ;;  %7460 = vmatprep.subr.bf16.mxu1 %v9727_v30  ;;  %v9811_v29 = vld [vmem:[%s11047_s8 + $0xb6c] ss:$16 sps:$4 sm:$0xff]   ;;  %v9806_v30 = vld [vmem:[%s11047_s8 + $0xb60] ss:$16 sps:$4 sm:$0xff]  }
 0x187   : > { %6805 = vmatpush1.bf16.msra.mxu0 %v9722_v31  ;;  %7461 = vmatpush1.bf16.msra.mxu1 %v9725_v33  ;;  %v9809_v31 = vld [vmem:[%s11047_s8 + $0xb68] ss:$16 sps:$4 sm:$0xff]   ;;  %v9814_v33 = vld [vmem:[%s11047_s8 + $0xb84] ss:$16 sps:$4 sm:$0xff]  }
 0x188   : > { %6806 = vmatprep.subr.bf16.mxu0 %v9730_v34  ;;  %7462 = vmatprep.subr.bf16.mxu1 %v9733_v35  ;;  %v9817_v34 = vld [vmem:[%s11047_s8 + $0xb8c] ss:$16 sps:$4 sm:$0xff]   ;;  %v9812_v35 = vld [vmem:[%s11047_s8 + $0xb80] ss:$16 sps:$4 sm:$0xff]  }
 0x18b   : > { %6807 = vmatpush1.bf16.msra.mxu0 %v9728_v36  ;;  %7463 = vmatpush1.bf16.msra.mxu1 %v9731_v37  ;;  %v9820_v36 = vld [vmem:[%s11047_s8 + $0xba4] ss:$16 sps:$4 sm:$0xff]   ;;  %v9823_v37 = vld [vmem:[%s11047_s8 + $0xbac] ss:$16 sps:$4 sm:$0xff]  }
 0x18c   : > { %6808 = vmatprep.subr.bf16.mxu0 %v9736_v38  ;;  %7464 = vmatprep.subr.bf16.mxu1 %v9739_v39  ;;  %v9818_v38 = vld [vmem:[%s11047_s8 + $0xba0] ss:$16 sps:$4 sm:$0xff]   ;;  %v9821_v39 = vld [vmem:[%s11047_s8 + $0xba8] ss:$16 sps:$4 sm:$0xff]  }
 0x18f   : > { %6809 = vmatpush1.bf16.msra.mxu0 %v9734_v28  ;;  %7465 = vmatpush1.bf16.msra.mxu1 %v9737_v41  ;;  %v9826_v28 = vld [vmem:[%s11047_s8 + $0xbc4] ss:$16 sps:$4 sm:$0xff]   ;;  %v9829_v41 = vld [vmem:[%s11047_s8 + $0xbcc] ss:$16 sps:$4 sm:$0xff]  }
 0x190   : > { %6819 = vmatprep.subr.bf16.mxu0 %v9742_v42  ;;  %7475 = vmatprep.subr.bf16.mxu1 %v9745_v44  ;;  %v11498_v42 = vld [vmem:[%s12278_s0 + $0x18] sm:$0xff] }
 0x191   : > { %v9824_v44 = vld [vmem:[%s11047_s8 + $0xbc0] ss:$16 sps:$4 sm:$0xff]  }
 0x192   : > { %6811 = vmatmul.mubr.bf16.vlgmr.msra.gmra.mrb[0].mxu0 %v424_v25  ;;  %7467 = vmatmul.mubr.bf16.vlgmr.msra.gmra.mrb[0].mxu1 %v424_v25  ;;  %v9832_v25 = vld [vmem:[%s11047_s8 + $0xbe4] ss:$16 sps:$4 sm:$0xff]  }
 0x193   : > { %6820 = vmatpush1.bf16.msra.mxu0 %v9740_v46  ;;  %7476 = vmatpush1.bf16.msra.mxu1 %v9743_v47  ;;  %v9835_v46 = vld [vmem:[%s11047_s8 + $0xbec] ss:$16 sps:$4 sm:$0xff]   ;;  %v11506_v47 = vrot.slane %v11498_v42, %v11106_v49 }
 0x194   : > { %6821 = vmatprep.subr.bf16.mxu0 %v9748_v48  ;;  %7477 = vmatprep.subr.bf16.mxu1 %v9751_v50  ;;  %v9830_v48 = vld [vmem:[%s11047_s8 + $0xbe0] ss:$16 sps:$4 sm:$0xff]   ;;  %v9833_v50 = vld [vmem:[%s11047_s8 + $0xbe8] ss:$16 sps:$4 sm:$0xff]  }
 0x195   : > { %6851 = vmatprep.mubr.bf16.mxu0 %v427_v51  ;;  %7507 = vmatprep.mubr.bf16.mxu1 %v427_v51  ;;  %v9839_v51 = vld [vmem:[%s11047_s8 + $0xc04] ss:$16 sps:$4 sm:$0xff]  }
 0x197   : > { %6822 = vmatpush1.bf16.msra.mxu0 %v9746_v32  ;;  %7478 = vmatpush1.bf16.msra.mxu1 %v9749_v52  ;;  %v9842_v32 = vld [vmem:[%s11047_s8 + $0xc0c] ss:$16 sps:$4 sm:$0xff]   ;;  %v314_v52 = vcombine.high %v11506_v47, %v11506_v47 }
 0x198   : > { %6823 = vmatprep.subr.bf16.mxu0 %v9754_v53  ;;  %7479 = vmatprep.subr.bf16.mxu1 %v9757_v54  ;;  %v426_v53 = vpack.c.bf16 %v11429_v40, %v11429_v40  ;;  %v9837_v54 = vld [vmem:[%s11047_s8 + $0xc00] ss:$16 sps:$4 sm:$0xff]  }
 0x199   : > { %v9843_v40 = vld [vmem:[%s11047_s8 + $0xc20] ss:$16 sps:$4 sm:$0xff]  }
 0x19b   : > { %6824 = vmatpush1.bf16.msra.mxu0 %v9752_v55  ;;  %7480 = vmatpush1.bf16.msra.mxu1 %v9755_v56  ;;  %v9840_v55 = vld [vmem:[%s11047_s8 + $0xc08] ss:$16 sps:$4 sm:$0xff]   ;;  %v9845_v56 = vld [vmem:[%s11047_s8 + $0xc24] ss:$16 sps:$4 sm:$0xff]  }
 0x19c   : > { %6825 = vmatprep.subr.bf16.mxu0 %v9760_v57  ;;  %7481 = vmatprep.subr.bf16.mxu1 %v9763_v58  ;;  %v9848_v57 = vld [vmem:[%s11047_s8 + $0xc2c] ss:$16 sps:$4 sm:$0xff]   ;;  %v429_v58 = vpack.c.bf16 %v314_v52, %v314_v52  ;;  %v9921_v52 = vld [vmem:[%s11047_s8 + $0xdc0] ss:$16 sps:$4 sm:$0xff]  }
 0x19f   : > { %6826 = vmatpush1.bf16.msra.mxu0 %v9758_v59  ;;  %7482 = vmatpush1.bf16.msra.mxu1 %v9761_v60  ;;  %v9846_v59 = vld [vmem:[%s11047_s8 + $0xc28] ss:$16 sps:$4 sm:$0xff]   ;;  %v9851_v60 = vld [vmem:[%s11047_s8 + $0xc44] ss:$16 sps:$4 sm:$0xff]  }
 0x1a0   : > { %6827 = vmatprep.subr.bf16.mxu0 %v9766_v61  ;;  %7483 = vmatprep.subr.bf16.mxu1 %v9769_v62  ;;  %v9854_v61 = vld [vmem:[%s11047_s8 + $0xc4c] ss:$16 sps:$4 sm:$0xff]   ;;  %v9849_v62 = vld [vmem:[%s11047_s8 + $0xc40] ss:$16 sps:$4 sm:$0xff]  }
 0x1a3   : > { %6828 = vmatpush1.bf16.msra.mxu0 %v9764_v63  ;;  %7484 = vmatpush1.bf16.msra.mxu1 %v9767_v0  ;;  %v9852_v63 = vld [vmem:[%s11047_s8 + $0xc48] ss:$16 sps:$4 sm:$0xff]   ;;  %v9857_v0 = vld [vmem:[%s11047_s8 + $0xc64] ss:$16 sps:$4 sm:$0xff]  }
 0x1a4   : > { %6829 = vmatprep.subr.bf16.mxu0 %v9772_v1  ;;  %7485 = vmatprep.subr.bf16.mxu1 %v9775_v2  ;;  %v9860_v1 = vld [vmem:[%s11047_s8 + $0xc6c] ss:$16 sps:$4 sm:$0xff]   ;;  %v9855_v2 = vld [vmem:[%s11047_s8 + $0xc60] ss:$16 sps:$4 sm:$0xff]  }
 0x1a7   : > { %6830 = vmatpush1.bf16.msra.mxu0 %v9770_v3  ;;  %7486 = vmatpush1.bf16.msra.mxu1 %v9773_v4  ;;  %v9858_v3 = vld [vmem:[%s11047_s8 + $0xc68] ss:$16 sps:$4 sm:$0xff]   ;;  %v9863_v4 = vld [vmem:[%s11047_s8 + $0xc84] ss:$16 sps:$4 sm:$0xff]  }
 0x1a8   : > { %6831 = vmatprep.subr.bf16.mxu0 %v9778_v5  ;;  %7487 = vmatprep.subr.bf16.mxu1 %v9781_v6  ;;  %v9866_v5 = vld [vmem:[%s11047_s8 + $0xc8c] ss:$16 sps:$4 sm:$0xff]   ;;  %v9861_v6 = vld [vmem:[%s11047_s8 + $0xc80] ss:$16 sps:$4 sm:$0xff]  }
 0x1ab   : > { %6832 = vmatpush1.bf16.msra.mxu0 %v9776_v7  ;;  %7488 = vmatpush1.bf16.msra.mxu1 %v9779_v8  ;;  %v9864_v7 = vld [vmem:[%s11047_s8 + $0xc88] ss:$16 sps:$4 sm:$0xff]   ;;  %v9869_v8 = vld [vmem:[%s11047_s8 + $0xca4] ss:$16 sps:$4 sm:$0xff]  }
 0x1ac   : > { %6833 = vmatprep.subr.bf16.mxu0 %v9784_v10  ;;  %7489 = vmatprep.subr.bf16.mxu1 %v9787_v11  ;;  %v9872_v10 = vld [vmem:[%s11047_s8 + $0xcac] ss:$16 sps:$4 sm:$0xff]   ;;  %v9867_v11 = vld [vmem:[%s11047_s8 + $0xca0] ss:$16 sps:$4 sm:$0xff]  }
 0x1af   : > { %6834 = vmatpush1.bf16.msra.mxu0 %v9782_v12  ;;  %7490 = vmatpush1.bf16.msra.mxu1 %v9785_v13  ;;  %v9870_v12 = vld [vmem:[%s11047_s8 + $0xca8] ss:$16 sps:$4 sm:$0xff]   ;;  %v9875_v13 = vld [vmem:[%s11047_s8 + $0xcc4] ss:$16 sps:$4 sm:$0xff]  }
 0x1b0   : > { %6835 = vmatprep.subr.bf16.mxu0 %v9790_v14  ;;  %7491 = vmatprep.subr.bf16.mxu1 %v9793_v15  ;;  %v9878_v14 = vld [vmem:[%s11047_s8 + $0xccc] ss:$16 sps:$4 sm:$0xff]   ;;  %v9873_v15 = vld [vmem:[%s11047_s8 + $0xcc0] ss:$16 sps:$4 sm:$0xff]  }
 0x1b3   : > { %6836 = vmatpush1.bf16.msra.mxu0 %v9788_v16  ;;  %7492 = vmatpush1.bf16.msra.mxu1 %v9791_v17  ;;  %v9876_v16 = vld [vmem:[%s11047_s8 + $0xcc8] ss:$16 sps:$4 sm:$0xff]   ;;  %v9881_v17 = vld [vmem:[%s11047_s8 + $0xce4] ss:$16 sps:$4 sm:$0xff]  }
 0x1b4   : > { %6837 = vmatprep.subr.bf16.mxu0 %v9796_v18  ;;  %7493 = vmatprep.subr.bf16.mxu1 %v9799_v19  ;;  %v9884_v18 = vld [vmem:[%s11047_s8 + $0xcec] ss:$16 sps:$4 sm:$0xff]   ;;  %v9879_v19 = vld [vmem:[%s11047_s8 + $0xce0] ss:$16 sps:$4 sm:$0xff]  }
 0x1b7   : > { %6838 = vmatpush1.bf16.msra.mxu0 %v9794_v20  ;;  %7494 = vmatpush1.bf16.msra.mxu1 %v9797_v21  ;;  %v9882_v20 = vld [vmem:[%s11047_s8 + $0xce8] ss:$16 sps:$4 sm:$0xff]   ;;  %v9887_v21 = vld [vmem:[%s11047_s8 + $0xd04] ss:$16 sps:$4 sm:$0xff]  }
 0x1b8   : > { %6839 = vmatprep.subr.bf16.mxu0 %v9802_v22  ;;  %7495 = vmatprep.subr.bf16.mxu1 %v9805_v24  ;;  %v9890_v22 = vld [vmem:[%s11047_s8 + $0xd0c] ss:$16 sps:$4 sm:$0xff]   ;;  %v9885_v24 = vld [vmem:[%s11047_s8 + $0xd00] ss:$16 sps:$4 sm:$0xff]  }
 0x1bb   : > { %6840 = vmatpush1.bf16.msra.mxu0 %v9800_v23  ;;  %7496 = vmatpush1.bf16.msra.mxu1 %v9803_v9  ;;  %v9888_v23 = vld [vmem:[%s11047_s8 + $0xd08] ss:$16 sps:$4 sm:$0xff]   ;;  %v9893_v9 = vld [vmem:[%s11047_s8 + $0xd24] ss:$16 sps:$4 sm:$0xff]  }
 0x1bc   : > { %6841 = vmatprep.subr.bf16.mxu0 %v9808_v27  ;;  %7497 = vmatprep.subr.bf16.mxu1 %v9811_v29  ;;  %v9896_v27 = vld [vmem:[%s11047_s8 + $0xd2c] ss:$16 sps:$4 sm:$0xff]   ;;  %v9891_v29 = vld [vmem:[%s11047_s8 + $0xd20] ss:$16 sps:$4 sm:$0xff]  }
 0x1bf   : > { %6842 = vmatpush1.bf16.msra.mxu0 %v9806_v30  ;;  %7498 = vmatpush1.bf16.msra.mxu1 %v9809_v31  ;;  %v9894_v30 = vld [vmem:[%s11047_s8 + $0xd28] ss:$16 sps:$4 sm:$0xff]   ;;  %v9899_v31 = vld [vmem:[%s11047_s8 + $0xd44] ss:$16 sps:$4 sm:$0xff]  }
 0x1c0   : > { %6843 = vmatprep.subr.bf16.mxu0 %v9814_v33  ;;  %7499 = vmatprep.subr.bf16.mxu1 %v9817_v34  ;;  %v9902_v33 = vld [vmem:[%s11047_s8 + $0xd4c] ss:$16 sps:$4 sm:$0xff]   ;;  %v9897_v34 = vld [vmem:[%s11047_s8 + $0xd40] ss:$16 sps:$4 sm:$0xff]  }
 0x1c3   : > { %6844 = vmatpush1.bf16.msra.mxu0 %v9812_v35  ;;  %7500 = vmatpush1.bf16.msra.mxu1 %v9815_v26  ;;  %v9900_v35 = vld [vmem:[%s11047_s8 + $0xd48] ss:$16 sps:$4 sm:$0xff]   ;;  %v9905_v26 = vld [vmem:[%s11047_s8 + $0xd64] ss:$16 sps:$4 sm:$0xff]  }
 0x1c4   : > { %6845 = vmatprep.subr.bf16.mxu0 %v9820_v36  ;;  %7501 = vmatprep.subr.bf16.mxu1 %v9823_v37  ;;  %v9908_v36 = vld [vmem:[%s11047_s8 + $0xd6c] ss:$16 sps:$4 sm:$0xff]   ;;  %v9903_v37 = vld [vmem:[%s11047_s8 + $0xd60] ss:$16 sps:$4 sm:$0xff]  }
 0x1c7   : > { %6846 = vmatpush1.bf16.msra.mxu0 %v9818_v38  ;;  %7502 = vmatpush1.bf16.msra.mxu1 %v9821_v39  ;;  %v9906_v38 = vld [vmem:[%s11047_s8 + $0xd68] ss:$16 sps:$4 sm:$0xff]   ;;  %v9911_v39 = vld [vmem:[%s11047_s8 + $0xd84] ss:$16 sps:$4 sm:$0xff]  }
 0x1c8   : > { %6847 = vmatprep.subr.bf16.mxu0 %v9826_v28  ;;  %7503 = vmatprep.subr.bf16.mxu1 %v9829_v41  ;;  %v9914_v28 = vld [vmem:[%s11047_s8 + $0xd8c] ss:$16 sps:$4 sm:$0xff]   ;;  %v9909_v41 = vld [vmem:[%s11047_s8 + $0xd80] ss:$16 sps:$4 sm:$0xff]  }
 0x1cb   : > { %6848 = vmatpush1.bf16.msra.mxu0 %v9824_v44  ;;  %7504 = vmatpush1.bf16.msra.mxu1 %v9827_v45  ;;  %v9912_v44 = vld [vmem:[%s11047_s8 + $0xd88] ss:$16 sps:$4 sm:$0xff]   ;;  %v9917_v45 = vld [vmem:[%s11047_s8 + $0xda4] ss:$16 sps:$4 sm:$0xff]  }
 0x1cc   : > { %6849 = vmatprep.subr.bf16.mxu0 %v9832_v25  ;;  %7505 = vmatprep.subr.bf16.mxu1 %v9835_v46  ;;  %v9920_v25 = vld [vmem:[%s11047_s8 + $0xdac] ss:$16 sps:$4 sm:$0xff]   ;;  %v9915_v46 = vld [vmem:[%s11047_s8 + $0xda0] ss:$16 sps:$4 sm:$0xff]  }
 0x1cf   : > { %6850 = vmatpush1.bf16.msra.mxu0 %v9830_v48  ;;  %7506 = vmatpush1.bf16.msra.mxu1 %v9833_v50  ;;  %v9918_v48 = vld [vmem:[%s11047_s8 + $0xda8] ss:$16 sps:$4 sm:$0xff]   ;;  %v9923_v50 = vld [vmem:[%s11047_s8 + $0xdc4] ss:$16 sps:$4 sm:$0xff]  }
 0x1d0   : > { %6860 = vmatprep.subr.bf16.mxu0 %v9839_v51  ;;  %7516 = vmatprep.subr.bf16.mxu1 %v9842_v32  ;;  %v9926_v51 = vld [vmem:[%s11047_s8 + $0xdcc] ss:$16 sps:$4 sm:$0xff]   ;;  %v299_v32 = vcombine.high %v11498_v42, %v11498_v42  ;;  %v9927_v42 = vld [vmem:[%s11047_s8 + $0xde0] ss:$16 sps:$4 sm:$0xff]  }
 0x1d2   : > { %6852 = vmatmul.mubr.bf16.vlgmr.msra.gmra.mrb[0].mxu0 %v426_v53  ;;  %7508 = vmatmul.mubr.bf16.vlgmr.msra.gmra.mrb[0].mxu1 %v426_v53  ;;  %v9924_v53 = vld [vmem:[%s11047_s8 + $0xdc8] ss:$16 sps:$4 sm:$0xff]  }
 0x1d3   : > { %6861 = vmatpush1.bf16.msra.mxu0 %v9837_v54  ;;  %7517 = vmatpush1.bf16.msra.mxu1 %v9840_v55  ;;  %v9929_v54 = vld [vmem:[%s11047_s8 + $0xde4] ss:$16 sps:$4 sm:$0xff]   ;;  %v9932_v55 = vld [vmem:[%s11047_s8 + $0xdec] ss:$16 sps:$4 sm:$0xff]  }
 0x1d4   : > { %6862 = vmatprep.subr.bf16.mxu0 %v9845_v56  ;;  %7518 = vmatprep.subr.bf16.mxu1 %v9848_v57  ;;  %v11579_v56 = vrot.slane %v299_v32, %v11106_v49  ;;  %v9930_v57 = vld [vmem:[%s11047_s8 + $0xde8] ss:$16 sps:$4 sm:$0xff]  }
 0x1d5   : > { %6892 = vmatprep.mubr.bf16.mxu0 %v429_v58  ;;  %7548 = vmatprep.mubr.bf16.mxu1 %v429_v58  ;;  %v9935_v58 = vld [vmem:[%s11047_s8 + $0xe04] ss:$16 sps:$4 sm:$0xff]   ;;  %v10008_v32 = vld [vmem:[%s11047_s8 + $0xf88] ss:$16 sps:$4 sm:$0xff]  }
 0x1d7   : > { %6863 = vmatpush1.bf16.msra.mxu0 %v9843_v40  ;;  %7519 = vmatpush1.bf16.msra.mxu1 %v9846_v59  ;;  %v9938_v40 = vld [vmem:[%s11047_s8 + $0xe0c] ss:$16 sps:$4 sm:$0xff]   ;;  %v315_v59 = vcombine.high %v11579_v56, %v11579_v56 }
 0x1d8   : > { %6864 = vmatprep.subr.bf16.mxu0 %v9851_v60  ;;  %7520 = vmatprep.subr.bf16.mxu1 %v9854_v61  ;;  %v428_v60 = vpack.c.bf16 %v11506_v47, %v11506_v47  ;;  %v9933_v61 = vld [vmem:[%s11047_s8 + $0xe00] ss:$16 sps:$4 sm:$0xff]  }
 0x1d9   : > { %v9939_v47 = vld [vmem:[%s11047_s8 + $0xe20] ss:$16 sps:$4 sm:$0xff]  }
 0x1db   : > { %6865 = vmatpush1.bf16.msra.mxu0 %v9849_v62  ;;  %7521 = vmatpush1.bf16.msra.mxu1 %v9852_v63  ;;  %v9936_v62 = vld [vmem:[%s11047_s8 + $0xe08] ss:$16 sps:$4 sm:$0xff]   ;;  %v9941_v63 = vld [vmem:[%s11047_s8 + $0xe24] ss:$16 sps:$4 sm:$0xff]  }
 0x1dc   : > { %6866 = vmatprep.subr.bf16.mxu0 %v9857_v0  ;;  %7522 = vmatprep.subr.bf16.mxu1 %v9860_v1  ;;  %v9944_v0 = vld [vmem:[%s11047_s8 + $0xe2c] ss:$16 sps:$4 sm:$0xff]   ;;  %v431_v1 = vpack.c.bf16 %v315_v59, %v315_v59  ;;  %v10020_v59 = vld [vmem:[%s11047_s8 + $0xfc8] ss:$16 sps:$4 sm:$0xff]  }
 0x1df   : > { %6867 = vmatpush1.bf16.msra.mxu0 %v9855_v2  ;;  %7523 = vmatpush1.bf16.msra.mxu1 %v9858_v3  ;;  %v9942_v2 = vld [vmem:[%s11047_s8 + $0xe28] ss:$16 sps:$4 sm:$0xff]   ;;  %v9947_v3 = vld [vmem:[%s11047_s8 + $0xe44] ss:$16 sps:$4 sm:$0xff]  }
 0x1e0   : > { %6868 = vmatprep.subr.bf16.mxu0 %v9863_v4  ;;  %7524 = vmatprep.subr.bf16.mxu1 %v9866_v5  ;;  %v9950_v4 = vld [vmem:[%s11047_s8 + $0xe4c] ss:$16 sps:$4 sm:$0xff]   ;;  %v9945_v5 = vld [vmem:[%s11047_s8 + $0xe40] ss:$16 sps:$4 sm:$0xff]  }
 0x1e3   : > { %6869 = vmatpush1.bf16.msra.mxu0 %v9861_v6  ;;  %7525 = vmatpush1.bf16.msra.mxu1 %v9864_v7  ;;  %v9948_v6 = vld [vmem:[%s11047_s8 + $0xe48] ss:$16 sps:$4 sm:$0xff]   ;;  %v9953_v7 = vld [vmem:[%s11047_s8 + $0xe64] ss:$16 sps:$4 sm:$0xff]  }
 0x1e4   : > { %6870 = vmatprep.subr.bf16.mxu0 %v9869_v8  ;;  %7526 = vmatprep.subr.bf16.mxu1 %v9872_v10  ;;  %v9956_v8 = vld [vmem:[%s11047_s8 + $0xe6c] ss:$16 sps:$4 sm:$0xff]   ;;  %v9951_v10 = vld [vmem:[%s11047_s8 + $0xe60] ss:$16 sps:$4 sm:$0xff]  }
 0x1e7   : > { %6871 = vmatpush1.bf16.msra.mxu0 %v9867_v11  ;;  %7527 = vmatpush1.bf16.msra.mxu1 %v9870_v12  ;;  %v9954_v11 = vld [vmem:[%s11047_s8 + $0xe68] ss:$16 sps:$4 sm:$0xff]   ;;  %v9959_v12 = vld [vmem:[%s11047_s8 + $0xe84] ss:$16 sps:$4 sm:$0xff]  }
 0x1e8   : > { %6872 = vmatprep.subr.bf16.mxu0 %v9875_v13  ;;  %7528 = vmatprep.subr.bf16.mxu1 %v9878_v14  ;;  %v9962_v13 = vld [vmem:[%s11047_s8 + $0xe8c] ss:$16 sps:$4 sm:$0xff]   ;;  %v9957_v14 = vld [vmem:[%s11047_s8 + $0xe80] ss:$16 sps:$4 sm:$0xff]  }
 0x1eb   : > { %6873 = vmatpush1.bf16.msra.mxu0 %v9873_v15  ;;  %7529 = vmatpush1.bf16.msra.mxu1 %v9876_v16  ;;  %v9960_v15 = vld [vmem:[%s11047_s8 + $0xe88] ss:$16 sps:$4 sm:$0xff]   ;;  %v9965_v16 = vld [vmem:[%s11047_s8 + $0xea4] ss:$16 sps:$4 sm:$0xff]  }
 0x1ec   : > { %6874 = vmatprep.subr.bf16.mxu0 %v9881_v17  ;;  %7530 = vmatprep.subr.bf16.mxu1 %v9884_v18  ;;  %v9968_v17 = vld [vmem:[%s11047_s8 + $0xeac] ss:$16 sps:$4 sm:$0xff]   ;;  %v9963_v18 = vld [vmem:[%s11047_s8 + $0xea0] ss:$16 sps:$4 sm:$0xff]  }
 0x1ef   : > { %6875 = vmatpush1.bf16.msra.mxu0 %v9879_v19  ;;  %7531 = vmatpush1.bf16.msra.mxu1 %v9882_v20  ;;  %v9966_v19 = vld [vmem:[%s11047_s8 + $0xea8] ss:$16 sps:$4 sm:$0xff]   ;;  %v9971_v20 = vld [vmem:[%s11047_s8 + $0xec4] ss:$16 sps:$4 sm:$0xff]  }
 0x1f0   : > { %6876 = vmatprep.subr.bf16.mxu0 %v9887_v21  ;;  %7532 = vmatprep.subr.bf16.mxu1 %v9890_v22  ;;  %v9974_v21 = vld [vmem:[%s11047_s8 + $0xecc] ss:$16 sps:$4 sm:$0xff]   ;;  %v9969_v22 = vld [vmem:[%s11047_s8 + $0xec0] ss:$16 sps:$4 sm:$0xff]  }
 0x1f3   : > { %6877 = vmatpush1.bf16.msra.mxu0 %v9885_v24  ;;  %7533 = vmatpush1.bf16.msra.mxu1 %v9888_v23  ;;  %v9972_v24 = vld [vmem:[%s11047_s8 + $0xec8] ss:$16 sps:$4 sm:$0xff]   ;;  %v9977_v23 = vld [vmem:[%s11047_s8 + $0xee4] ss:$16 sps:$4 sm:$0xff]  }
 0x1f4   : > { %6878 = vmatprep.subr.bf16.mxu0 %v9893_v9  ;;  %7534 = vmatprep.subr.bf16.mxu1 %v9896_v27  ;;  %v9980_v9 = vld [vmem:[%s11047_s8 + $0xeec] ss:$16 sps:$4 sm:$0xff]   ;;  %v9975_v27 = vld [vmem:[%s11047_s8 + $0xee0] ss:$16 sps:$4 sm:$0xff]  }
 0x1f7   : > { %6879 = vmatpush1.bf16.msra.mxu0 %v9891_v29  ;;  %7535 = vmatpush1.bf16.msra.mxu1 %v9894_v30  ;;  %v9978_v29 = vld [vmem:[%s11047_s8 + $0xee8] ss:$16 sps:$4 sm:$0xff]   ;;  %v9983_v30 = vld [vmem:[%s11047_s8 + $0xf04] ss:$16 sps:$4 sm:$0xff]  }
 0x1f8   : > { %6880 = vmatprep.subr.bf16.mxu0 %v9899_v31  ;;  %7536 = vmatprep.subr.bf16.mxu1 %v9902_v33  ;;  %v9986_v31 = vld [vmem:[%s11047_s8 + $0xf0c] ss:$16 sps:$4 sm:$0xff]   ;;  %v9981_v33 = vld [vmem:[%s11047_s8 + $0xf00] ss:$16 sps:$4 sm:$0xff]  }
 0x1fb   : > { %6881 = vmatpush1.bf16.msra.mxu0 %v9897_v34  ;;  %7537 = vmatpush1.bf16.msra.mxu1 %v9900_v35  ;;  %v9984_v34 = vld [vmem:[%s11047_s8 + $0xf08] ss:$16 sps:$4 sm:$0xff]   ;;  %v9989_v35 = vld [vmem:[%s11047_s8 + $0xf24] ss:$16 sps:$4 sm:$0xff]  }
 0x1fc   : > { %6882 = vmatprep.subr.bf16.mxu0 %v9905_v26  ;;  %7538 = vmatprep.subr.bf16.mxu1 %v9908_v36  ;;  %v9992_v26 = vld [vmem:[%s11047_s8 + $0xf2c] ss:$16 sps:$4 sm:$0xff]   ;;  %v9987_v36 = vld [vmem:[%s11047_s8 + $0xf20] ss:$16 sps:$4 sm:$0xff]  }
 0x1ff   : > { %6883 = vmatpush1.bf16.msra.mxu0 %v9903_v37  ;;  %7539 = vmatpush1.bf16.msra.mxu1 %v9906_v38  ;;  %v9990_v37 = vld [vmem:[%s11047_s8 + $0xf28] ss:$16 sps:$4 sm:$0xff]   ;;  %v9995_v38 = vld [vmem:[%s11047_s8 + $0xf44] ss:$16 sps:$4 sm:$0xff]  }
 0x200   : > { %6884 = vmatprep.subr.bf16.mxu0 %v9911_v39  ;;  %7540 = vmatprep.subr.bf16.mxu1 %v9914_v28  ;;  %v9998_v39 = vld [vmem:[%s11047_s8 + $0xf4c] ss:$16 sps:$4 sm:$0xff]   ;;  %v9993_v28 = vld [vmem:[%s11047_s8 + $0xf40] ss:$16 sps:$4 sm:$0xff]  }
 0x203   : > { %6885 = vmatpush1.bf16.msra.mxu0 %v9909_v41  ;;  %7541 = vmatpush1.bf16.msra.mxu1 %v9912_v44  ;;  %v9996_v41 = vld [vmem:[%s11047_s8 + $0xf48] ss:$16 sps:$4 sm:$0xff]   ;;  %v10001_v44 = vld [vmem:[%s11047_s8 + $0xf64] ss:$16 sps:$4 sm:$0xff]  }
 0x204   : > { %6886 = vmatprep.subr.bf16.mxu0 %v9917_v45  ;;  %7542 = vmatprep.subr.bf16.mxu1 %v9920_v25  ;;  %v10004_v45 = vld [vmem:[%s11047_s8 + $0xf6c] ss:$16 sps:$4 sm:$0xff]   ;;  %v9999_v25 = vld [vmem:[%s11047_s8 + $0xf60] ss:$16 sps:$4 sm:$0xff]  }
 0x207   : > { %6887 = vmatpush1.bf16.msra.mxu0 %v9915_v46  ;;  %7543 = vmatpush1.bf16.msra.mxu1 %v9918_v48  ;;  %v10002_v46 = vld [vmem:[%s11047_s8 + $0xf68] ss:$16 sps:$4 sm:$0xff]   ;;  %v10007_v48 = vld [vmem:[%s11047_s8 + $0xf84] ss:$16 sps:$4 sm:$0xff]  }
 0x208   : > { %6888 = vmatprep.subr.bf16.mxu0 %v9923_v50  ;;  %7544 = vmatprep.subr.bf16.mxu1 %v9926_v51  ;;  %v10010_v50 = vld [vmem:[%s11047_s8 + $0xf8c] ss:$16 sps:$4 sm:$0xff]   ;;  %v10005_v51 = vld [vmem:[%s11047_s8 + $0xf80] ss:$16 sps:$4 sm:$0xff]  }
 0x20b   : > { %6889 = vmatpush1.bf16.msra.mxu0 %v9921_v52  ;;  %7545 = vmatpush1.bf16.msra.mxu1 %v9924_v53  ;;  %v10013_v52 = vld [vmem:[%s11047_s8 + $0xfa4] ss:$16 sps:$4 sm:$0xff]   ;;  %v10016_v53 = vld [vmem:[%s11047_s8 + $0xfac] ss:$16 sps:$4 sm:$0xff]  }
 0x20c   : > { %6890 = vmatprep.subr.bf16.mxu0 %v9929_v54  ;;  %7546 = vmatprep.subr.bf16.mxu1 %v9932_v55  ;;  %v10011_v54 = vld [vmem:[%s11047_s8 + $0xfa0] ss:$16 sps:$4 sm:$0xff]   ;;  %v10014_v55 = vld [vmem:[%s11047_s8 + $0xfa8] ss:$16 sps:$4 sm:$0xff]  }
 0x20f   : > { %6891 = vmatpush1.bf16.msra.mxu0 %v9927_v42  ;;  %7547 = vmatpush1.bf16.msra.mxu1 %v9930_v57  ;;  %v10019_v42 = vld [vmem:[%s11047_s8 + $0xfc4] ss:$16 sps:$4 sm:$0xff]   ;;  %v10022_v57 = vld [vmem:[%s11047_s8 + $0xfcc] ss:$16 sps:$4 sm:$0xff]  }
 0x210   : > { %6901 = vmatprep.subr.bf16.mxu0 %v9935_v58  ;;  %7557 = vmatprep.subr.bf16.mxu1 %v9938_v40  ;;  %v11648_v58 = vld [vmem:[%s12278_s0 + $0x20] sm:$0xff]  ;;  %v10017_v40 = vld [vmem:[%s11047_s8 + $0xfc0] ss:$16 sps:$4 sm:$0xff]  }
 0x212   : > { %6893 = vmatmul.mubr.bf16.vlgmr.msra.gmra.mrb[0].mxu0 %v428_v60  ;;  %7549 = vmatmul.mubr.bf16.vlgmr.msra.gmra.mrb[0].mxu1 %v428_v60  ;;  %v10025_v60 = vld [vmem:[%s11047_s8 + $0xfe4] ss:$16 sps:$4 sm:$0xff]  }
 0x213   : > { %6902 = vmatpush1.bf16.msra.mxu0 %v9933_v61  ;;  %7558 = vmatpush1.bf16.msra.mxu1 %v9936_v62  ;;  %v10028_v61 = vld [vmem:[%s11047_s8 + $0xfec] ss:$16 sps:$4 sm:$0xff]   ;;  %v11656_v62 = vrot.slane %v11648_v58, %v11106_v49 }
 0x214   : > { %6903 = vmatprep.subr.bf16.mxu0 %v9941_v63  ;;  %7559 = vmatprep.subr.bf16.mxu1 %v9944_v0  ;;  %v10023_v63 = vld [vmem:[%s11047_s8 + $0xfe0] ss:$16 sps:$4 sm:$0xff]   ;;  %v10026_v0 = vld [vmem:[%s11047_s8 + $0xfe8] ss:$16 sps:$4 sm:$0xff]  }
 0x215   : > { %6933 = vmatprep.mubr.bf16.mxu0 %v431_v1  ;;  %7589 = vmatprep.mubr.bf16.mxu1 %v431_v1  ;;  %v10032_v1 = vld [vmem:[%s11047_s8 + $0x1004] ss:$16 sps:$4 sm:$0xff]  }
 0x217   : > { %6904 = vmatpush1.bf16.msra.mxu0 %v9939_v47  ;;  %7560 = vmatpush1.bf16.msra.mxu1 %v9942_v2  ;;  %v10035_v47 = vld [vmem:[%s11047_s8 + $0x100c] ss:$16 sps:$4 sm:$0xff]   ;;  %v331_v2 = vcombine.high %v11656_v62, %v11656_v62 }
 0x218   : > { %6905 = vmatprep.subr.bf16.mxu0 %v9947_v3  ;;  %7561 = vmatprep.subr.bf16.mxu1 %v9950_v4  ;;  %v430_v3 = vpack.c.bf16 %v11579_v56, %v11579_v56  ;;  %v10030_v4 = vld [vmem:[%s11047_s8 + $0x1000] ss:$16 sps:$4 sm:$0xff]  }
 0x219   : > { %v10036_v56 = vld [vmem:[%s11047_s8 + $0x1020] ss:$16 sps:$4 sm:$0xff]  }
 0x21b   : > { %6906 = vmatpush1.bf16.msra.mxu0 %v9945_v5  ;;  %7562 = vmatpush1.bf16.msra.mxu1 %v9948_v6  ;;  %v10033_v5 = vld [vmem:[%s11047_s8 + $0x1008] ss:$16 sps:$4 sm:$0xff]   ;;  %v10038_v6 = vld [vmem:[%s11047_s8 + $0x1024] ss:$16 sps:$4 sm:$0xff]  }
 0x21c   : > { %6907 = vmatprep.subr.bf16.mxu0 %v9953_v7  ;;  %7563 = vmatprep.subr.bf16.mxu1 %v9956_v8  ;;  %v10041_v7 = vld [vmem:[%s11047_s8 + $0x102c] ss:$16 sps:$4 sm:$0xff]   ;;  %v433_v8 = vpack.c.bf16 %v331_v2, %v331_v2  ;;  %v10114_v2 = vld [vmem:[%s11047_s8 + $0x11c0] ss:$16 sps:$4 sm:$0xff]  }
 0x21f   : > { %6908 = vmatpush1.bf16.msra.mxu0 %v9951_v10  ;;  %7564 = vmatpush1.bf16.msra.mxu1 %v9954_v11  ;;  %v10039_v10 = vld [vmem:[%s11047_s8 + $0x1028] ss:$16 sps:$4 sm:$0xff]   ;;  %v10044_v11 = vld [vmem:[%s11047_s8 + $0x1044] ss:$16 sps:$4 sm:$0xff]  }
 0x220   : > { %6909 = vmatprep.subr.bf16.mxu0 %v9959_v12  ;;  %7565 = vmatprep.subr.bf16.mxu1 %v9962_v13  ;;  %v10047_v12 = vld [vmem:[%s11047_s8 + $0x104c] ss:$16 sps:$4 sm:$0xff]   ;;  %v10042_v13 = vld [vmem:[%s11047_s8 + $0x1040] ss:$16 sps:$4 sm:$0xff]  }
 0x223   : > { %6910 = vmatpush1.bf16.msra.mxu0 %v9957_v14  ;;  %7566 = vmatpush1.bf16.msra.mxu1 %v9960_v15  ;;  %v10045_v14 = vld [vmem:[%s11047_s8 + $0x1048] ss:$16 sps:$4 sm:$0xff]   ;;  %v10050_v15 = vld [vmem:[%s11047_s8 + $0x1064] ss:$16 sps:$4 sm:$0xff]  }
 0x224   : > { %6911 = vmatprep.subr.bf16.mxu0 %v9965_v16  ;;  %7567 = vmatprep.subr.bf16.mxu1 %v9968_v17  ;;  %v10053_v16 = vld [vmem:[%s11047_s8 + $0x106c] ss:$16 sps:$4 sm:$0xff]   ;;  %v10048_v17 = vld [vmem:[%s11047_s8 + $0x1060] ss:$16 sps:$4 sm:$0xff]  }
 0x227   : > { %6912 = vmatpush1.bf16.msra.mxu0 %v9963_v18  ;;  %7568 = vmatpush1.bf16.msra.mxu1 %v9966_v19  ;;  %v10051_v18 = vld [vmem:[%s11047_s8 + $0x1068] ss:$16 sps:$4 sm:$0xff]   ;;  %v10056_v19 = vld [vmem:[%s11047_s8 + $0x1084] ss:$16 sps:$4 sm:$0xff]  }
 0x228   : > { %6913 = vmatprep.subr.bf16.mxu0 %v9971_v20  ;;  %7569 = vmatprep.subr.bf16.mxu1 %v9974_v21  ;;  %v10059_v20 = vld [vmem:[%s11047_s8 + $0x108c] ss:$16 sps:$4 sm:$0xff]   ;;  %v10054_v21 = vld [vmem:[%s11047_s8 + $0x1080] ss:$16 sps:$4 sm:$0xff]  }
 0x22b   : > { %6914 = vmatpush1.bf16.msra.mxu0 %v9969_v22  ;;  %7570 = vmatpush1.bf16.msra.mxu1 %v9972_v24  ;;  %v10057_v22 = vld [vmem:[%s11047_s8 + $0x1088] ss:$16 sps:$4 sm:$0xff]   ;;  %v10062_v24 = vld [vmem:[%s11047_s8 + $0x10a4] ss:$16 sps:$4 sm:$0xff]  }
 0x22c   : > { %6915 = vmatprep.subr.bf16.mxu0 %v9977_v23  ;;  %7571 = vmatprep.subr.bf16.mxu1 %v9980_v9  ;;  %v10065_v23 = vld [vmem:[%s11047_s8 + $0x10ac] ss:$16 sps:$4 sm:$0xff]   ;;  %v10060_v9 = vld [vmem:[%s11047_s8 + $0x10a0] ss:$16 sps:$4 sm:$0xff]  }
 0x22f   : > { %6916 = vmatpush1.bf16.msra.mxu0 %v9975_v27  ;;  %7572 = vmatpush1.bf16.msra.mxu1 %v9978_v29  ;;  %v10063_v27 = vld [vmem:[%s11047_s8 + $0x10a8] ss:$16 sps:$4 sm:$0xff]   ;;  %v10068_v29 = vld [vmem:[%s11047_s8 + $0x10c4] ss:$16 sps:$4 sm:$0xff]  }
 0x230   : > { %6917 = vmatprep.subr.bf16.mxu0 %v9983_v30  ;;  %7573 = vmatprep.subr.bf16.mxu1 %v9986_v31  ;;  %v10071_v30 = vld [vmem:[%s11047_s8 + $0x10cc] ss:$16 sps:$4 sm:$0xff]   ;;  %v10066_v31 = vld [vmem:[%s11047_s8 + $0x10c0] ss:$16 sps:$4 sm:$0xff]  }
 0x233   : > { %6918 = vmatpush1.bf16.msra.mxu0 %v9981_v33  ;;  %7574 = vmatpush1.bf16.msra.mxu1 %v9984_v34  ;;  %v10069_v33 = vld [vmem:[%s11047_s8 + $0x10c8] ss:$16 sps:$4 sm:$0xff]   ;;  %v10074_v34 = vld [vmem:[%s11047_s8 + $0x10e4] ss:$16 sps:$4 sm:$0xff]  }
 0x234   : > { %6919 = vmatprep.subr.bf16.mxu0 %v9989_v35  ;;  %7575 = vmatprep.subr.bf16.mxu1 %v9992_v26  ;;  %v10077_v35 = vld [vmem:[%s11047_s8 + $0x10ec] ss:$16 sps:$4 sm:$0xff]   ;;  %v10072_v26 = vld [vmem:[%s11047_s8 + $0x10e0] ss:$16 sps:$4 sm:$0xff]  }
 0x237   : > { %6920 = vmatpush1.bf16.msra.mxu0 %v9987_v36  ;;  %7576 = vmatpush1.bf16.msra.mxu1 %v9990_v37  ;;  %v10075_v36 = vld [vmem:[%s11047_s8 + $0x10e8] ss:$16 sps:$4 sm:$0xff]   ;;  %v10080_v37 = vld [vmem:[%s11047_s8 + $0x1104] ss:$16 sps:$4 sm:$0xff]  }
 0x238   : > { %6921 = vmatprep.subr.bf16.mxu0 %v9995_v38  ;;  %7577 = vmatprep.subr.bf16.mxu1 %v9998_v39  ;;  %v10083_v38 = vld [vmem:[%s11047_s8 + $0x110c] ss:$16 sps:$4 sm:$0xff]   ;;  %v10078_v39 = vld [vmem:[%s11047_s8 + $0x1100] ss:$16 sps:$4 sm:$0xff]  }
 0x23b   : > { %6922 = vmatpush1.bf16.msra.mxu0 %v9993_v28  ;;  %7578 = vmatpush1.bf16.msra.mxu1 %v9996_v41  ;;  %v10081_v28 = vld [vmem:[%s11047_s8 + $0x1108] ss:$16 sps:$4 sm:$0xff]   ;;  %v10086_v41 = vld [vmem:[%s11047_s8 + $0x1124] ss:$16 sps:$4 sm:$0xff]  }
 0x23c   : > { %6923 = vmatprep.subr.bf16.mxu0 %v10001_v44  ;;  %7579 = vmatprep.subr.bf16.mxu1 %v10004_v45  ;;  %v10089_v44 = vld [vmem:[%s11047_s8 + $0x112c] ss:$16 sps:$4 sm:$0xff]   ;;  %v10084_v45 = vld [vmem:[%s11047_s8 + $0x1120] ss:$16 sps:$4 sm:$0xff]  }
 0x23f   : > { %6924 = vmatpush1.bf16.msra.mxu0 %v9999_v25  ;;  %7580 = vmatpush1.bf16.msra.mxu1 %v10002_v46  ;;  %v10087_v25 = vld [vmem:[%s11047_s8 + $0x1128] ss:$16 sps:$4 sm:$0xff]   ;;  %v10092_v46 = vld [vmem:[%s11047_s8 + $0x1144] ss:$16 sps:$4 sm:$0xff]  }
 0x240   : > { %6925 = vmatprep.subr.bf16.mxu0 %v10007_v48  ;;  %7581 = vmatprep.subr.bf16.mxu1 %v10010_v50  ;;  %v10095_v48 = vld [vmem:[%s11047_s8 + $0x114c] ss:$16 sps:$4 sm:$0xff]   ;;  %v10090_v50 = vld [vmem:[%s11047_s8 + $0x1140] ss:$16 sps:$4 sm:$0xff]  }
 0x243   : > { %6926 = vmatpush1.bf16.msra.mxu0 %v10005_v51  ;;  %7582 = vmatpush1.bf16.msra.mxu1 %v10008_v32  ;;  %v10093_v51 = vld [vmem:[%s11047_s8 + $0x1148] ss:$16 sps:$4 sm:$0xff]   ;;  %v10098_v32 = vld [vmem:[%s11047_s8 + $0x1164] ss:$16 sps:$4 sm:$0xff]  }
 0x244   : > { %6927 = vmatprep.subr.bf16.mxu0 %v10013_v52  ;;  %7583 = vmatprep.subr.bf16.mxu1 %v10016_v53  ;;  %v10101_v52 = vld [vmem:[%s11047_s8 + $0x116c] ss:$16 sps:$4 sm:$0xff]   ;;  %v10096_v53 = vld [vmem:[%s11047_s8 + $0x1160] ss:$16 sps:$4 sm:$0xff]  }
 0x247   : > { %6928 = vmatpush1.bf16.msra.mxu0 %v10011_v54  ;;  %7584 = vmatpush1.bf16.msra.mxu1 %v10014_v55  ;;  %v10099_v54 = vld [vmem:[%s11047_s8 + $0x1168] ss:$16 sps:$4 sm:$0xff]   ;;  %v10104_v55 = vld [vmem:[%s11047_s8 + $0x1184] ss:$16 sps:$4 sm:$0xff]  }
 0x248   : > { %6929 = vmatprep.subr.bf16.mxu0 %v10019_v42  ;;  %7585 = vmatprep.subr.bf16.mxu1 %v10022_v57  ;;  %v10107_v42 = vld [vmem:[%s11047_s8 + $0x118c] ss:$16 sps:$4 sm:$0xff]   ;;  %v10102_v57 = vld [vmem:[%s11047_s8 + $0x1180] ss:$16 sps:$4 sm:$0xff]  }
 0x24b   : > { %6930 = vmatpush1.bf16.msra.mxu0 %v10017_v40  ;;  %7586 = vmatpush1.bf16.msra.mxu1 %v10020_v59  ;;  %v10105_v40 = vld [vmem:[%s11047_s8 + $0x1188] ss:$16 sps:$4 sm:$0xff]   ;;  %v10110_v59 = vld [vmem:[%s11047_s8 + $0x11a4] ss:$16 sps:$4 sm:$0xff]  }
 0x24c   : > { %6931 = vmatprep.subr.bf16.mxu0 %v10025_v60  ;;  %7587 = vmatprep.subr.bf16.mxu1 %v10028_v61  ;;  %v10113_v60 = vld [vmem:[%s11047_s8 + $0x11ac] ss:$16 sps:$4 sm:$0xff]   ;;  %v10108_v61 = vld [vmem:[%s11047_s8 + $0x11a0] ss:$16 sps:$4 sm:$0xff]  }
 0x24f   : > { %6932 = vmatpush1.bf16.msra.mxu0 %v10023_v63  ;;  %7588 = vmatpush1.bf16.msra.mxu1 %v10026_v0  ;;  %v10111_v63 = vld [vmem:[%s11047_s8 + $0x11a8] ss:$16 sps:$4 sm:$0xff]   ;;  %v10116_v0 = vld [vmem:[%s11047_s8 + $0x11c4] ss:$16 sps:$4 sm:$0xff]  }
 0x250   : > { %6942 = vmatprep.subr.bf16.mxu0 %v10032_v1  ;;  %7598 = vmatprep.subr.bf16.mxu1 %v10035_v47  ;;  %v10119_v1 = vld [vmem:[%s11047_s8 + $0x11cc] ss:$16 sps:$4 sm:$0xff]   ;;  %v316_v47 = vcombine.high %v11648_v58, %v11648_v58  ;;  %v10120_v58 = vld [vmem:[%s11047_s8 + $0x11e0] ss:$16 sps:$4 sm:$0xff]  }
 0x252   : > { %6934 = vmatmul.mubr.bf16.vlgmr.msra.gmra.mrb[0].mxu0 %v430_v3  ;;  %7590 = vmatmul.mubr.bf16.vlgmr.msra.gmra.mrb[0].mxu1 %v430_v3  ;;  %v10117_v3 = vld [vmem:[%s11047_s8 + $0x11c8] ss:$16 sps:$4 sm:$0xff]  }
 0x253   : > { %6943 = vmatpush1.bf16.msra.mxu0 %v10030_v4  ;;  %7599 = vmatpush1.bf16.msra.mxu1 %v10033_v5  ;;  %v10122_v4 = vld [vmem:[%s11047_s8 + $0x11e4] ss:$16 sps:$4 sm:$0xff]   ;;  %v10125_v5 = vld [vmem:[%s11047_s8 + $0x11ec] ss:$16 sps:$4 sm:$0xff]  }
 0x254   : > { %6944 = vmatprep.subr.bf16.mxu0 %v10038_v6  ;;  %7600 = vmatprep.subr.bf16.mxu1 %v10041_v7  ;;  %v11729_v6 = vrot.slane %v316_v47, %v11106_v49  ;;  %v10123_v7 = vld [vmem:[%s11047_s8 + $0x11e8] ss:$16 sps:$4 sm:$0xff]  }
 0x255   : > { %6974 = vmatprep.mubr.bf16.mxu0 %v433_v8  ;;  %7630 = vmatprep.mubr.bf16.mxu1 %v433_v8  ;;  %v10128_v8 = vld [vmem:[%s11047_s8 + $0x1204] ss:$16 sps:$4 sm:$0xff]   ;;  %v10201_v47 = vld [vmem:[%s11047_s8 + $0x1388] ss:$16 sps:$4 sm:$0xff]  }
 0x257   : > { %6945 = vmatpush1.bf16.msra.mxu0 %v10036_v56  ;;  %7601 = vmatpush1.bf16.msra.mxu1 %v10039_v10  ;;  %v10131_v56 = vld [vmem:[%s11047_s8 + $0x120c] ss:$16 sps:$4 sm:$0xff]   ;;  %v332_v10 = vcombine.high %v11729_v6, %v11729_v6 }
 0x258   : > { %6946 = vmatprep.subr.bf16.mxu0 %v10044_v11  ;;  %7602 = vmatprep.subr.bf16.mxu1 %v10047_v12  ;;  %v432_v11 = vpack.c.bf16 %v11656_v62, %v11656_v62  ;;  %v10126_v12 = vld [vmem:[%s11047_s8 + $0x1200] ss:$16 sps:$4 sm:$0xff]  }
 0x259   : > { %v10132_v62 = vld [vmem:[%s11047_s8 + $0x1220] ss:$16 sps:$4 sm:$0xff]  }
 0x25b   : > { %6947 = vmatpush1.bf16.msra.mxu0 %v10042_v13  ;;  %7603 = vmatpush1.bf16.msra.mxu1 %v10045_v14  ;;  %v10129_v13 = vld [vmem:[%s11047_s8 + $0x1208] ss:$16 sps:$4 sm:$0xff]   ;;  %v10134_v14 = vld [vmem:[%s11047_s8 + $0x1224] ss:$16 sps:$4 sm:$0xff]  }
 0x25c   : > { %6948 = vmatprep.subr.bf16.mxu0 %v10050_v15  ;;  %7604 = vmatprep.subr.bf16.mxu1 %v10053_v16  ;;  %v10137_v15 = vld [vmem:[%s11047_s8 + $0x122c] ss:$16 sps:$4 sm:$0xff]   ;;  %v435_v16 = vpack.c.bf16 %v332_v10, %v332_v10  ;;  %v10213_v10 = vld [vmem:[%s11047_s8 + $0x13c8] ss:$16 sps:$4 sm:$0xff]  }
 0x25f   : > { %6949 = vmatpush1.bf16.msra.mxu0 %v10048_v17  ;;  %7605 = vmatpush1.bf16.msra.mxu1 %v10051_v18  ;;  %v10135_v17 = vld [vmem:[%s11047_s8 + $0x1228] ss:$16 sps:$4 sm:$0xff]   ;;  %v10140_v18 = vld [vmem:[%s11047_s8 + $0x1244] ss:$16 sps:$4 sm:$0xff]  }
 0x260   : > { %6950 = vmatprep.subr.bf16.mxu0 %v10056_v19  ;;  %7606 = vmatprep.subr.bf16.mxu1 %v10059_v20  ;;  %v10143_v19 = vld [vmem:[%s11047_s8 + $0x124c] ss:$16 sps:$4 sm:$0xff]   ;;  %v10138_v20 = vld [vmem:[%s11047_s8 + $0x1240] ss:$16 sps:$4 sm:$0xff]  }
 0x263   : > { %6951 = vmatpush1.bf16.msra.mxu0 %v10054_v21  ;;  %7607 = vmatpush1.bf16.msra.mxu1 %v10057_v22  ;;  %v10141_v21 = vld [vmem:[%s11047_s8 + $0x1248] ss:$16 sps:$4 sm:$0xff]   ;;  %v10146_v22 = vld [vmem:[%s11047_s8 + $0x1264] ss:$16 sps:$4 sm:$0xff]  }
 0x264   : > { %6952 = vmatprep.subr.bf16.mxu0 %v10062_v24  ;;  %7608 = vmatprep.subr.bf16.mxu1 %v10065_v23  ;;  %v10149_v24 = vld [vmem:[%s11047_s8 + $0x126c] ss:$16 sps:$4 sm:$0xff]   ;;  %v10144_v23 = vld [vmem:[%s11047_s8 + $0x1260] ss:$16 sps:$4 sm:$0xff]  }
 0x267   : > { %6953 = vmatpush1.bf16.msra.mxu0 %v10060_v9  ;;  %7609 = vmatpush1.bf16.msra.mxu1 %v10063_v27  ;;  %v10147_v9 = vld [vmem:[%s11047_s8 + $0x1268] ss:$16 sps:$4 sm:$0xff]   ;;  %v10152_v27 = vld [vmem:[%s11047_s8 + $0x1284] ss:$16 sps:$4 sm:$0xff]  }
 0x268   : > { %6954 = vmatprep.subr.bf16.mxu0 %v10068_v29  ;;  %7610 = vmatprep.subr.bf16.mxu1 %v10071_v30  ;;  %v10155_v29 = vld [vmem:[%s11047_s8 + $0x128c] ss:$16 sps:$4 sm:$0xff]   ;;  %v10150_v30 = vld [vmem:[%s11047_s8 + $0x1280] ss:$16 sps:$4 sm:$0xff]  }
 0x26b   : > { %6955 = vmatpush1.bf16.msra.mxu0 %v10066_v31  ;;  %7611 = vmatpush1.bf16.msra.mxu1 %v10069_v33  ;;  %v10153_v31 = vld [vmem:[%s11047_s8 + $0x1288] ss:$16 sps:$4 sm:$0xff]   ;;  %v10158_v33 = vld [vmem:[%s11047_s8 + $0x12a4] ss:$16 sps:$4 sm:$0xff]  }
 0x26c   : > { %6956 = vmatprep.subr.bf16.mxu0 %v10074_v34  ;;  %7612 = vmatprep.subr.bf16.mxu1 %v10077_v35  ;;  %v10161_v34 = vld [vmem:[%s11047_s8 + $0x12ac] ss:$16 sps:$4 sm:$0xff]   ;;  %v10156_v35 = vld [vmem:[%s11047_s8 + $0x12a0] ss:$16 sps:$4 sm:$0xff]  }
 0x26f   : > { %6957 = vmatpush1.bf16.msra.mxu0 %v10072_v26  ;;  %7613 = vmatpush1.bf16.msra.mxu1 %v10075_v36  ;;  %v10159_v26 = vld [vmem:[%s11047_s8 + $0x12a8] ss:$16 sps:$4 sm:$0xff]   ;;  %v10164_v36 = vld [vmem:[%s11047_s8 + $0x12c4] ss:$16 sps:$4 sm:$0xff]  }
 0x270   : > { %6958 = vmatprep.subr.bf16.mxu0 %v10080_v37  ;;  %7614 = vmatprep.subr.bf16.mxu1 %v10083_v38  ;;  %v10167_v37 = vld [vmem:[%s11047_s8 + $0x12cc] ss:$16 sps:$4 sm:$0xff]   ;;  %v10162_v38 = vld [vmem:[%s11047_s8 + $0x12c0] ss:$16 sps:$4 sm:$0xff]  }
 0x273   : > { %6959 = vmatpush1.bf16.msra.mxu0 %v10078_v39  ;;  %7615 = vmatpush1.bf16.msra.mxu1 %v10081_v28  ;;  %v10165_v39 = vld [vmem:[%s11047_s8 + $0x12c8] ss:$16 sps:$4 sm:$0xff]   ;;  %v10170_v28 = vld [vmem:[%s11047_s8 + $0x12e4] ss:$16 sps:$4 sm:$0xff]  }
 0x274   : > { %6960 = vmatprep.subr.bf16.mxu0 %v10086_v41  ;;  %7616 = vmatprep.subr.bf16.mxu1 %v10089_v44  ;;  %v10173_v41 = vld [vmem:[%s11047_s8 + $0x12ec] ss:$16 sps:$4 sm:$0xff]   ;;  %v10168_v44 = vld [vmem:[%s11047_s8 + $0x12e0] ss:$16 sps:$4 sm:$0xff]  }
 0x277   : > { %6961 = vmatpush1.bf16.msra.mxu0 %v10084_v45  ;;  %7617 = vmatpush1.bf16.msra.mxu1 %v10087_v25  ;;  %v10171_v45 = vld [vmem:[%s11047_s8 + $0x12e8] ss:$16 sps:$4 sm:$0xff]   ;;  %v10176_v25 = vld [vmem:[%s11047_s8 + $0x1304] ss:$16 sps:$4 sm:$0xff]  }
 0x278   : > { %6962 = vmatprep.subr.bf16.mxu0 %v10092_v46  ;;  %7618 = vmatprep.subr.bf16.mxu1 %v10095_v48  ;;  %v10179_v46 = vld [vmem:[%s11047_s8 + $0x130c] ss:$16 sps:$4 sm:$0xff]   ;;  %v10174_v48 = vld [vmem:[%s11047_s8 + $0x1300] ss:$16 sps:$4 sm:$0xff]  }
 0x27b   : > { %6963 = vmatpush1.bf16.msra.mxu0 %v10090_v50  ;;  %7619 = vmatpush1.bf16.msra.mxu1 %v10093_v51  ;;  %v10177_v50 = vld [vmem:[%s11047_s8 + $0x1308] ss:$16 sps:$4 sm:$0xff]   ;;  %v10182_v51 = vld [vmem:[%s11047_s8 + $0x1324] ss:$16 sps:$4 sm:$0xff]  }
 0x27c   : > { %6964 = vmatprep.subr.bf16.mxu0 %v10098_v32  ;;  %7620 = vmatprep.subr.bf16.mxu1 %v10101_v52  ;;  %v10185_v32 = vld [vmem:[%s11047_s8 + $0x132c] ss:$16 sps:$4 sm:$0xff]   ;;  %v10180_v52 = vld [vmem:[%s11047_s8 + $0x1320] ss:$16 sps:$4 sm:$0xff]  }
 0x27f   : > { %6965 = vmatpush1.bf16.msra.mxu0 %v10096_v53  ;;  %7621 = vmatpush1.bf16.msra.mxu1 %v10099_v54  ;;  %v10183_v53 = vld [vmem:[%s11047_s8 + $0x1328] ss:$16 sps:$4 sm:$0xff]   ;;  %v10188_v54 = vld [vmem:[%s11047_s8 + $0x1344] ss:$16 sps:$4 sm:$0xff]  }
 0x280   : > { %6966 = vmatprep.subr.bf16.mxu0 %v10104_v55  ;;  %7622 = vmatprep.subr.bf16.mxu1 %v10107_v42  ;;  %v10191_v55 = vld [vmem:[%s11047_s8 + $0x134c] ss:$16 sps:$4 sm:$0xff]   ;;  %v10186_v42 = vld [vmem:[%s11047_s8 + $0x1340] ss:$16 sps:$4 sm:$0xff]  }
 0x283   : > { %6967 = vmatpush1.bf16.msra.mxu0 %v10102_v57  ;;  %7623 = vmatpush1.bf16.msra.mxu1 %v10105_v40  ;;  %v10189_v57 = vld [vmem:[%s11047_s8 + $0x1348] ss:$16 sps:$4 sm:$0xff]   ;;  %v10194_v40 = vld [vmem:[%s11047_s8 + $0x1364] ss:$16 sps:$4 sm:$0xff]  }
 0x284   : > { %6968 = vmatprep.subr.bf16.mxu0 %v10110_v59  ;;  %7624 = vmatprep.subr.bf16.mxu1 %v10113_v60  ;;  %v10197_v59 = vld [vmem:[%s11047_s8 + $0x136c] ss:$16 sps:$4 sm:$0xff]   ;;  %v10192_v60 = vld [vmem:[%s11047_s8 + $0x1360] ss:$16 sps:$4 sm:$0xff]  }
 0x287   : > { %6969 = vmatpush1.bf16.msra.mxu0 %v10108_v61  ;;  %7625 = vmatpush1.bf16.msra.mxu1 %v10111_v63  ;;  %v10195_v61 = vld [vmem:[%s11047_s8 + $0x1368] ss:$16 sps:$4 sm:$0xff]   ;;  %v10200_v63 = vld [vmem:[%s11047_s8 + $0x1384] ss:$16 sps:$4 sm:$0xff]  }
 0x288   : > { %6970 = vmatprep.subr.bf16.mxu0 %v10116_v0  ;;  %7626 = vmatprep.subr.bf16.mxu1 %v10119_v1  ;;  %v10203_v0 = vld [vmem:[%s11047_s8 + $0x138c] ss:$16 sps:$4 sm:$0xff]   ;;  %v10198_v1 = vld [vmem:[%s11047_s8 + $0x1380] ss:$16 sps:$4 sm:$0xff]  }
 0x28b   : > { %6971 = vmatpush1.bf16.msra.mxu0 %v10114_v2  ;;  %7627 = vmatpush1.bf16.msra.mxu1 %v10117_v3  ;;  %v10206_v2 = vld [vmem:[%s11047_s8 + $0x13a4] ss:$16 sps:$4 sm:$0xff]   ;;  %v10209_v3 = vld [vmem:[%s11047_s8 + $0x13ac] ss:$16 sps:$4 sm:$0xff]  }
 0x28c   : > { %6972 = vmatprep.subr.bf16.mxu0 %v10122_v4  ;;  %7628 = vmatprep.subr.bf16.mxu1 %v10125_v5  ;;  %v10204_v4 = vld [vmem:[%s11047_s8 + $0x13a0] ss:$16 sps:$4 sm:$0xff]   ;;  %v10207_v5 = vld [vmem:[%s11047_s8 + $0x13a8] ss:$16 sps:$4 sm:$0xff]  }
 0x28f   : > { %6973 = vmatpush1.bf16.msra.mxu0 %v10120_v58  ;;  %7629 = vmatpush1.bf16.msra.mxu1 %v10123_v7  ;;  %v10212_v58 = vld [vmem:[%s11047_s8 + $0x13c4] ss:$16 sps:$4 sm:$0xff]   ;;  %v10215_v7 = vld [vmem:[%s11047_s8 + $0x13cc] ss:$16 sps:$4 sm:$0xff]  }
 0x290   : > { %6983 = vmatprep.subr.bf16.mxu0 %v10128_v8  ;;  %7639 = vmatprep.subr.bf16.mxu1 %v10131_v56  ;;  %v11798_v8 = vld [vmem:[%s12278_s0 + $0x28] sm:$0xff] }
 0x291   : > { %v10210_v56 = vld [vmem:[%s11047_s8 + $0x13c0] ss:$16 sps:$4 sm:$0xff]  }
 0x292   : > { %6975 = vmatmul.mubr.bf16.vlgmr.msra.gmra.mrb[0].mxu0 %v432_v11  ;;  %7631 = vmatmul.mubr.bf16.vlgmr.msra.gmra.mrb[0].mxu1 %v432_v11  ;;  %v10218_v11 = vld [vmem:[%s11047_s8 + $0x13e4] ss:$16 sps:$4 sm:$0xff]  }
 0x293   : > { %6984 = vmatpush1.bf16.msra.mxu0 %v10126_v12  ;;  %7640 = vmatpush1.bf16.msra.mxu1 %v10129_v13  ;;  %v10221_v12 = vld [vmem:[%s11047_s8 + $0x13ec] ss:$16 sps:$4 sm:$0xff]   ;;  %v11806_v13 = vrot.slane %v11798_v8, %v11106_v49 }
 0x294   : > { %6985 = vmatprep.subr.bf16.mxu0 %v10134_v14  ;;  %7641 = vmatprep.subr.bf16.mxu1 %v10137_v15  ;;  %v10216_v14 = vld [vmem:[%s11047_s8 + $0x13e0] ss:$16 sps:$4 sm:$0xff]   ;;  %v10219_v15 = vld [vmem:[%s11047_s8 + $0x13e8] ss:$16 sps:$4 sm:$0xff]  }
 0x295   : > { %7015 = vmatprep.mubr.bf16.mxu0 %v435_v16  ;;  %7671 = vmatprep.mubr.bf16.mxu1 %v435_v16  ;;  %v10225_v16 = vld [vmem:[%s11047_s8 + $0x1404] ss:$16 sps:$4 sm:$0xff]  }
 0x297   : > { %6986 = vmatpush1.bf16.msra.mxu0 %v10132_v62  ;;  %7642 = vmatpush1.bf16.msra.mxu1 %v10135_v17  ;;  %v10228_v62 = vld [vmem:[%s11047_s8 + $0x140c] ss:$16 sps:$4 sm:$0xff]   ;;  %v348_v17 = vcombine.high %v11806_v13, %v11806_v13 }
 0x298   : > { %6987 = vmatprep.subr.bf16.mxu0 %v10140_v18  ;;  %7643 = vmatprep.subr.bf16.mxu1 %v10143_v19  ;;  %v434_v18 = vpack.c.bf16 %v11729_v6, %v11729_v6  ;;  %v10223_v19 = vld [vmem:[%s11047_s8 + $0x1400] ss:$16 sps:$4 sm:$0xff]  }
 0x299   : > { %v10229_v6 = vld [vmem:[%s11047_s8 + $0x1420] ss:$16 sps:$4 sm:$0xff]  }
 0x29b   : > { %6988 = vmatpush1.bf16.msra.mxu0 %v10138_v20  ;;  %7644 = vmatpush1.bf16.msra.mxu1 %v10141_v21  ;;  %v10226_v20 = vld [vmem:[%s11047_s8 + $0x1408] ss:$16 sps:$4 sm:$0xff]   ;;  %v10231_v21 = vld [vmem:[%s11047_s8 + $0x1424] ss:$16 sps:$4 sm:$0xff]  }
 0x29c   : > { %6989 = vmatprep.subr.bf16.mxu0 %v10146_v22  ;;  %7645 = vmatprep.subr.bf16.mxu1 %v10149_v24  ;;  %v10234_v22 = vld [vmem:[%s11047_s8 + $0x142c] ss:$16 sps:$4 sm:$0xff]   ;;  %v437_v24 = vpack.c.bf16 %v348_v17, %v348_v17  ;;  %v10307_v17 = vld [vmem:[%s11047_s8 + $0x15c0] ss:$16 sps:$4 sm:$0xff]  }
 0x29f   : > { %6990 = vmatpush1.bf16.msra.mxu0 %v10144_v23  ;;  %7646 = vmatpush1.bf16.msra.mxu1 %v10147_v9  ;;  %v10232_v23 = vld [vmem:[%s11047_s8 + $0x1428] ss:$16 sps:$4 sm:$0xff]   ;;  %v10237_v9 = vld [vmem:[%s11047_s8 + $0x1444] ss:$16 sps:$4 sm:$0xff]  }
 0x2a0   : > { %6991 = vmatprep.subr.bf16.mxu0 %v10152_v27  ;;  %7647 = vmatprep.subr.bf16.mxu1 %v10155_v29  ;;  %v10240_v27 = vld [vmem:[%s11047_s8 + $0x144c] ss:$16 sps:$4 sm:$0xff]   ;;  %v10235_v29 = vld [vmem:[%s11047_s8 + $0x1440] ss:$16 sps:$4 sm:$0xff]  }
 0x2a3   : > { %6992 = vmatpush1.bf16.msra.mxu0 %v10150_v30  ;;  %7648 = vmatpush1.bf16.msra.mxu1 %v10153_v31  ;;  %v10238_v30 = vld [vmem:[%s11047_s8 + $0x1448] ss:$16 sps:$4 sm:$0xff]   ;;  %v10243_v31 = vld [vmem:[%s11047_s8 + $0x1464] ss:$16 sps:$4 sm:$0xff]  }
 0x2a4   : > { %6993 = vmatprep.subr.bf16.mxu0 %v10158_v33  ;;  %7649 = vmatprep.subr.bf16.mxu1 %v10161_v34  ;;  %v10246_v33 = vld [vmem:[%s11047_s8 + $0x146c] ss:$16 sps:$4 sm:$0xff]   ;;  %v10241_v34 = vld [vmem:[%s11047_s8 + $0x1460] ss:$16 sps:$4 sm:$0xff]  }
 0x2a7   : > { %6994 = vmatpush1.bf16.msra.mxu0 %v10156_v35  ;;  %7650 = vmatpush1.bf16.msra.mxu1 %v10159_v26  ;;  %v10244_v35 = vld [vmem:[%s11047_s8 + $0x1468] ss:$16 sps:$4 sm:$0xff]   ;;  %v10249_v26 = vld [vmem:[%s11047_s8 + $0x1484] ss:$16 sps:$4 sm:$0xff]  }
 0x2a8   : > { %6995 = vmatprep.subr.bf16.mxu0 %v10164_v36  ;;  %7651 = vmatprep.subr.bf16.mxu1 %v10167_v37  ;;  %v10252_v36 = vld [vmem:[%s11047_s8 + $0x148c] ss:$16 sps:$4 sm:$0xff]   ;;  %v10247_v37 = vld [vmem:[%s11047_s8 + $0x1480] ss:$16 sps:$4 sm:$0xff]  }
 0x2ab   : > { %6996 = vmatpush1.bf16.msra.mxu0 %v10162_v38  ;;  %7652 = vmatpush1.bf16.msra.mxu1 %v10165_v39  ;;  %v10250_v38 = vld [vmem:[%s11047_s8 + $0x1488] ss:$16 sps:$4 sm:$0xff]   ;;  %v10255_v39 = vld [vmem:[%s11047_s8 + $0x14a4] ss:$16 sps:$4 sm:$0xff]  }
 0x2ac   : > { %6997 = vmatprep.subr.bf16.mxu0 %v10170_v28  ;;  %7653 = vmatprep.subr.bf16.mxu1 %v10173_v41  ;;  %v10258_v28 = vld [vmem:[%s11047_s8 + $0x14ac] ss:$16 sps:$4 sm:$0xff]   ;;  %v10253_v41 = vld [vmem:[%s11047_s8 + $0x14a0] ss:$16 sps:$4 sm:$0xff]  }
 0x2af   : > { %6998 = vmatpush1.bf16.msra.mxu0 %v10168_v44  ;;  %7654 = vmatpush1.bf16.msra.mxu1 %v10171_v45  ;;  %v10256_v44 = vld [vmem:[%s11047_s8 + $0x14a8] ss:$16 sps:$4 sm:$0xff]   ;;  %v10261_v45 = vld [vmem:[%s11047_s8 + $0x14c4] ss:$16 sps:$4 sm:$0xff]  }
 0x2b0   : > { %6999 = vmatprep.subr.bf16.mxu0 %v10176_v25  ;;  %7655 = vmatprep.subr.bf16.mxu1 %v10179_v46  ;;  %v10264_v25 = vld [vmem:[%s11047_s8 + $0x14cc] ss:$16 sps:$4 sm:$0xff]   ;;  %v10259_v46 = vld [vmem:[%s11047_s8 + $0x14c0] ss:$16 sps:$4 sm:$0xff]  }
 0x2b3   : > { %7000 = vmatpush1.bf16.msra.mxu0 %v10174_v48  ;;  %7656 = vmatpush1.bf16.msra.mxu1 %v10177_v50  ;;  %v10262_v48 = vld [vmem:[%s11047_s8 + $0x14c8] ss:$16 sps:$4 sm:$0xff]   ;;  %v10267_v50 = vld [vmem:[%s11047_s8 + $0x14e4] ss:$16 sps:$4 sm:$0xff]  }
 0x2b4   : > { %7001 = vmatprep.subr.bf16.mxu0 %v10182_v51  ;;  %7657 = vmatprep.subr.bf16.mxu1 %v10185_v32  ;;  %v10270_v51 = vld [vmem:[%s11047_s8 + $0x14ec] ss:$16 sps:$4 sm:$0xff]   ;;  %v10265_v32 = vld [vmem:[%s11047_s8 + $0x14e0] ss:$16 sps:$4 sm:$0xff]  }
 0x2b7   : > { %7002 = vmatpush1.bf16.msra.mxu0 %v10180_v52  ;;  %7658 = vmatpush1.bf16.msra.mxu1 %v10183_v53  ;;  %v10268_v52 = vld [vmem:[%s11047_s8 + $0x14e8] ss:$16 sps:$4 sm:$0xff]   ;;  %v10273_v53 = vld [vmem:[%s11047_s8 + $0x1504] ss:$16 sps:$4 sm:$0xff]  }
 0x2b8   : > { %7003 = vmatprep.subr.bf16.mxu0 %v10188_v54  ;;  %7659 = vmatprep.subr.bf16.mxu1 %v10191_v55  ;;  %v10276_v54 = vld [vmem:[%s11047_s8 + $0x150c] ss:$16 sps:$4 sm:$0xff]   ;;  %v10271_v55 = vld [vmem:[%s11047_s8 + $0x1500] ss:$16 sps:$4 sm:$0xff]  }
 0x2bb   : > { %7004 = vmatpush1.bf16.msra.mxu0 %v10186_v42  ;;  %7660 = vmatpush1.bf16.msra.mxu1 %v10189_v57  ;;  %v10274_v42 = vld [vmem:[%s11047_s8 + $0x1508] ss:$16 sps:$4 sm:$0xff]   ;;  %v10279_v57 = vld [vmem:[%s11047_s8 + $0x1524] ss:$16 sps:$4 sm:$0xff]  }
 0x2bc   : > { %7005 = vmatprep.subr.bf16.mxu0 %v10194_v40  ;;  %7661 = vmatprep.subr.bf16.mxu1 %v10197_v59  ;;  %v10282_v40 = vld [vmem:[%s11047_s8 + $0x152c] ss:$16 sps:$4 sm:$0xff]   ;;  %v10277_v59 = vld [vmem:[%s11047_s8 + $0x1520] ss:$16 sps:$4 sm:$0xff]  }
 0x2bf   : > { %7006 = vmatpush1.bf16.msra.mxu0 %v10192_v60  ;;  %7662 = vmatpush1.bf16.msra.mxu1 %v10195_v61  ;;  %v10280_v60 = vld [vmem:[%s11047_s8 + $0x1528] ss:$16 sps:$4 sm:$0xff]   ;;  %v10285_v61 = vld [vmem:[%s11047_s8 + $0x1544] ss:$16 sps:$4 sm:$0xff]  }
 0x2c0   : > { %7007 = vmatprep.subr.bf16.mxu0 %v10200_v63  ;;  %7663 = vmatprep.subr.bf16.mxu1 %v10203_v0  ;;  %v10288_v63 = vld [vmem:[%s11047_s8 + $0x154c] ss:$16 sps:$4 sm:$0xff]   ;;  %v10283_v0 = vld [vmem:[%s11047_s8 + $0x1540] ss:$16 sps:$4 sm:$0xff]  }
 0x2c3   : > { %7008 = vmatpush1.bf16.msra.mxu0 %v10198_v1  ;;  %7664 = vmatpush1.bf16.msra.mxu1 %v10201_v47  ;;  %v10286_v1 = vld [vmem:[%s11047_s8 + $0x1548] ss:$16 sps:$4 sm:$0xff]   ;;  %v10291_v47 = vld [vmem:[%s11047_s8 + $0x1564] ss:$16 sps:$4 sm:$0xff]  }
 0x2c4   : > { %7009 = vmatprep.subr.bf16.mxu0 %v10206_v2  ;;  %7665 = vmatprep.subr.bf16.mxu1 %v10209_v3  ;;  %v10294_v2 = vld [vmem:[%s11047_s8 + $0x156c] ss:$16 sps:$4 sm:$0xff]   ;;  %v10289_v3 = vld [vmem:[%s11047_s8 + $0x1560] ss:$16 sps:$4 sm:$0xff]  }
 0x2c7   : > { %7010 = vmatpush1.bf16.msra.mxu0 %v10204_v4  ;;  %7666 = vmatpush1.bf16.msra.mxu1 %v10207_v5  ;;  %v10292_v4 = vld [vmem:[%s11047_s8 + $0x1568] ss:$16 sps:$4 sm:$0xff]   ;;  %v10297_v5 = vld [vmem:[%s11047_s8 + $0x1584] ss:$16 sps:$4 sm:$0xff]  }
 0x2c8   : > { %7011 = vmatprep.subr.bf16.mxu0 %v10212_v58  ;;  %7667 = vmatprep.subr.bf16.mxu1 %v10215_v7  ;;  %v10300_v58 = vld [vmem:[%s11047_s8 + $0x158c] ss:$16 sps:$4 sm:$0xff]   ;;  %v10295_v7 = vld [vmem:[%s11047_s8 + $0x1580] ss:$16 sps:$4 sm:$0xff]  }
 0x2cb   : > { %7012 = vmatpush1.bf16.msra.mxu0 %v10210_v56  ;;  %7668 = vmatpush1.bf16.msra.mxu1 %v10213_v10  ;;  %v10298_v56 = vld [vmem:[%s11047_s8 + $0x1588] ss:$16 sps:$4 sm:$0xff]   ;;  %v10303_v10 = vld [vmem:[%s11047_s8 + $0x15a4] ss:$16 sps:$4 sm:$0xff]  }
 0x2cc   : > { %7013 = vmatprep.subr.bf16.mxu0 %v10218_v11  ;;  %7669 = vmatprep.subr.bf16.mxu1 %v10221_v12  ;;  %v10306_v11 = vld [vmem:[%s11047_s8 + $0x15ac] ss:$16 sps:$4 sm:$0xff]   ;;  %v10301_v12 = vld [vmem:[%s11047_s8 + $0x15a0] ss:$16 sps:$4 sm:$0xff]  }
 0x2cf   : > { %7014 = vmatpush1.bf16.msra.mxu0 %v10216_v14  ;;  %7670 = vmatpush1.bf16.msra.mxu1 %v10219_v15  ;;  %v10304_v14 = vld [vmem:[%s11047_s8 + $0x15a8] ss:$16 sps:$4 sm:$0xff]   ;;  %v10309_v15 = vld [vmem:[%s11047_s8 + $0x15c4] ss:$16 sps:$4 sm:$0xff]  }
 0x2d0   : > { %7024 = vmatprep.subr.bf16.mxu0 %v10225_v16  ;;  %7680 = vmatprep.subr.bf16.mxu1 %v10228_v62  ;;  %v10312_v16 = vld [vmem:[%s11047_s8 + $0x15cc] ss:$16 sps:$4 sm:$0xff]   ;;  %v333_v62 = vcombine.high %v11798_v8, %v11798_v8  ;;  %v10313_v8 = vld [vmem:[%s11047_s8 + $0x15e0] ss:$16 sps:$4 sm:$0xff]  }
 0x2d2   : > { %7016 = vmatmul.mubr.bf16.vlgmr.msra.gmra.mrb[0].mxu0 %v434_v18  ;;  %7672 = vmatmul.mubr.bf16.vlgmr.msra.gmra.mrb[0].mxu1 %v434_v18  ;;  %v10310_v18 = vld [vmem:[%s11047_s8 + $0x15c8] ss:$16 sps:$4 sm:$0xff]  }
 0x2d3   : > { %7025 = vmatpush1.bf16.msra.mxu0 %v10223_v19  ;;  %7681 = vmatpush1.bf16.msra.mxu1 %v10226_v20  ;;  %v10315_v19 = vld [vmem:[%s11047_s8 + $0x15e4] ss:$16 sps:$4 sm:$0xff]   ;;  %v10318_v20 = vld [vmem:[%s11047_s8 + $0x15ec] ss:$16 sps:$4 sm:$0xff]  }
 0x2d4   : > { %7026 = vmatprep.subr.bf16.mxu0 %v10231_v21  ;;  %7682 = vmatprep.subr.bf16.mxu1 %v10234_v22  ;;  %v11879_v21 = vrot.slane %v333_v62, %v11106_v49  ;;  %v10316_v22 = vld [vmem:[%s11047_s8 + $0x15e8] ss:$16 sps:$4 sm:$0xff]  }
 0x2d5   : > { %7056 = vmatprep.mubr.bf16.mxu0 %v437_v24  ;;  %7712 = vmatprep.mubr.bf16.mxu1 %v437_v24  ;;  %v10321_v24 = vld [vmem:[%s11047_s8 + $0x1604] ss:$16 sps:$4 sm:$0xff]   ;;  %v10394_v62 = vld [vmem:[%s11047_s8 + $0x1788] ss:$16 sps:$4 sm:$0xff]  }
 0x2d7   : > { %7027 = vmatpush1.bf16.msra.mxu0 %v10229_v6  ;;  %7683 = vmatpush1.bf16.msra.mxu1 %v10232_v23  ;;  %v10324_v6 = vld [vmem:[%s11047_s8 + $0x160c] ss:$16 sps:$4 sm:$0xff]   ;;  %v349_v23 = vcombine.high %v11879_v21, %v11879_v21 }
 0x2d8   : > { %7028 = vmatprep.subr.bf16.mxu0 %v10237_v9  ;;  %7684 = vmatprep.subr.bf16.mxu1 %v10240_v27  ;;  %v436_v9 = vpack.c.bf16 %v11806_v13, %v11806_v13  ;;  %v10319_v27 = vld [vmem:[%s11047_s8 + $0x1600] ss:$16 sps:$4 sm:$0xff]  }
 0x2d9   : > { %v10325_v13 = vld [vmem:[%s11047_s8 + $0x1620] ss:$16 sps:$4 sm:$0xff]  }
 0x2db   : > { %7029 = vmatpush1.bf16.msra.mxu0 %v10235_v29  ;;  %7685 = vmatpush1.bf16.msra.mxu1 %v10238_v30  ;;  %v10322_v29 = vld [vmem:[%s11047_s8 + $0x1608] ss:$16 sps:$4 sm:$0xff]   ;;  %v10327_v30 = vld [vmem:[%s11047_s8 + $0x1624] ss:$16 sps:$4 sm:$0xff]  }
 0x2dc   : > { %7030 = vmatprep.subr.bf16.mxu0 %v10243_v31  ;;  %7686 = vmatprep.subr.bf16.mxu1 %v10246_v33  ;;  %v10330_v31 = vld [vmem:[%s11047_s8 + $0x162c] ss:$16 sps:$4 sm:$0xff]   ;;  %v439_v33 = vpack.c.bf16 %v349_v23, %v349_v23  ;;  %v10406_v23 = vld [vmem:[%s11047_s8 + $0x17c8] ss:$16 sps:$4 sm:$0xff]  }
 0x2df   : > { %7031 = vmatpush1.bf16.msra.mxu0 %v10241_v34  ;;  %7687 = vmatpush1.bf16.msra.mxu1 %v10244_v35  ;;  %v10328_v34 = vld [vmem:[%s11047_s8 + $0x1628] ss:$16 sps:$4 sm:$0xff]   ;;  %v10333_v35 = vld [vmem:[%s11047_s8 + $0x1644] ss:$16 sps:$4 sm:$0xff]  }
 0x2e0   : > { %7032 = vmatprep.subr.bf16.mxu0 %v10249_v26  ;;  %7688 = vmatprep.subr.bf16.mxu1 %v10252_v36  ;;  %v10336_v26 = vld [vmem:[%s11047_s8 + $0x164c] ss:$16 sps:$4 sm:$0xff]   ;;  %v10331_v36 = vld [vmem:[%s11047_s8 + $0x1640] ss:$16 sps:$4 sm:$0xff]  }
 0x2e3   : > { %7033 = vmatpush1.bf16.msra.mxu0 %v10247_v37  ;;  %7689 = vmatpush1.bf16.msra.mxu1 %v10250_v38  ;;  %v10334_v37 = vld [vmem:[%s11047_s8 + $0x1648] ss:$16 sps:$4 sm:$0xff]   ;;  %v10339_v38 = vld [vmem:[%s11047_s8 + $0x1664] ss:$16 sps:$4 sm:$0xff]  }
 0x2e4   : > { %7034 = vmatprep.subr.bf16.mxu0 %v10255_v39  ;;  %7690 = vmatprep.subr.bf16.mxu1 %v10258_v28  ;;  %v10342_v39 = vld [vmem:[%s11047_s8 + $0x166c] ss:$16 sps:$4 sm:$0xff]   ;;  %v10337_v28 = vld [vmem:[%s11047_s8 + $0x1660] ss:$16 sps:$4 sm:$0xff]  }
 0x2e7   : > { %7035 = vmatpush1.bf16.msra.mxu0 %v10253_v41  ;;  %7691 = vmatpush1.bf16.msra.mxu1 %v10256_v44  ;;  %v10340_v41 = vld [vmem:[%s11047_s8 + $0x1668] ss:$16 sps:$4 sm:$0xff]   ;;  %v10345_v44 = vld [vmem:[%s11047_s8 + $0x1684] ss:$16 sps:$4 sm:$0xff]  }
 0x2e8   : > { %7036 = vmatprep.subr.bf16.mxu0 %v10261_v45  ;;  %7692 = vmatprep.subr.bf16.mxu1 %v10264_v25  ;;  %v10348_v45 = vld [vmem:[%s11047_s8 + $0x168c] ss:$16 sps:$4 sm:$0xff]   ;;  %v10343_v25 = vld [vmem:[%s11047_s8 + $0x1680] ss:$16 sps:$4 sm:$0xff]  }
 0x2eb   : > { %7037 = vmatpush1.bf16.msra.mxu0 %v10259_v46  ;;  %7693 = vmatpush1.bf16.msra.mxu1 %v10262_v48  ;;  %v10346_v46 = vld [vmem:[%s11047_s8 + $0x1688] ss:$16 sps:$4 sm:$0xff]   ;;  %v10351_v48 = vld [vmem:[%s11047_s8 + $0x16a4] ss:$16 sps:$4 sm:$0xff]  }
 0x2ec   : > { %7038 = vmatprep.subr.bf16.mxu0 %v10267_v50  ;;  %7694 = vmatprep.subr.bf16.mxu1 %v10270_v51  ;;  %v10354_v50 = vld [vmem:[%s11047_s8 + $0x16ac] ss:$16 sps:$4 sm:$0xff]   ;;  %v10349_v51 = vld [vmem:[%s11047_s8 + $0x16a0] ss:$16 sps:$4 sm:$0xff]  }
 0x2ef   : > { %7039 = vmatpush1.bf16.msra.mxu0 %v10265_v32  ;;  %7695 = vmatpush1.bf16.msra.mxu1 %v10268_v52  ;;  %v10352_v32 = vld [vmem:[%s11047_s8 + $0x16a8] ss:$16 sps:$4 sm:$0xff]   ;;  %v10357_v52 = vld [vmem:[%s11047_s8 + $0x16c4] ss:$16 sps:$4 sm:$0xff]  }
 0x2f0   : > { %7040 = vmatprep.subr.bf16.mxu0 %v10273_v53  ;;  %7696 = vmatprep.subr.bf16.mxu1 %v10276_v54  ;;  %v10360_v53 = vld [vmem:[%s11047_s8 + $0x16cc] ss:$16 sps:$4 sm:$0xff]   ;;  %v10355_v54 = vld [vmem:[%s11047_s8 + $0x16c0] ss:$16 sps:$4 sm:$0xff]  }
 0x2f3   : > { %7041 = vmatpush1.bf16.msra.mxu0 %v10271_v55  ;;  %7697 = vmatpush1.bf16.msra.mxu1 %v10274_v42  ;;  %v10358_v55 = vld [vmem:[%s11047_s8 + $0x16c8] ss:$16 sps:$4 sm:$0xff]   ;;  %v10363_v42 = vld [vmem:[%s11047_s8 + $0x16e4] ss:$16 sps:$4 sm:$0xff]  }
 0x2f4   : > { %7042 = vmatprep.subr.bf16.mxu0 %v10279_v57  ;;  %7698 = vmatprep.subr.bf16.mxu1 %v10282_v40  ;;  %v10366_v57 = vld [vmem:[%s11047_s8 + $0x16ec] ss:$16 sps:$4 sm:$0xff]   ;;  %v10361_v40 = vld [vmem:[%s11047_s8 + $0x16e0] ss:$16 sps:$4 sm:$0xff]  }
 0x2f7   : > { %7043 = vmatpush1.bf16.msra.mxu0 %v10277_v59  ;;  %7699 = vmatpush1.bf16.msra.mxu1 %v10280_v60  ;;  %v10364_v59 = vld [vmem:[%s11047_s8 + $0x16e8] ss:$16 sps:$4 sm:$0xff]   ;;  %v10369_v60 = vld [vmem:[%s11047_s8 + $0x1704] ss:$16 sps:$4 sm:$0xff]  }
 0x2f8   : > { %7044 = vmatprep.subr.bf16.mxu0 %v10285_v61  ;;  %7700 = vmatprep.subr.bf16.mxu1 %v10288_v63  ;;  %v10372_v61 = vld [vmem:[%s11047_s8 + $0x170c] ss:$16 sps:$4 sm:$0xff]   ;;  %v10367_v63 = vld [vmem:[%s11047_s8 + $0x1700] ss:$16 sps:$4 sm:$0xff]  }
 0x2fb   : > { %7045 = vmatpush1.bf16.msra.mxu0 %v10283_v0  ;;  %7701 = vmatpush1.bf16.msra.mxu1 %v10286_v1  ;;  %v10370_v0 = vld [vmem:[%s11047_s8 + $0x1708] ss:$16 sps:$4 sm:$0xff]   ;;  %v10375_v1 = vld [vmem:[%s11047_s8 + $0x1724] ss:$16 sps:$4 sm:$0xff]  }
 0x2fc   : > { %7046 = vmatprep.subr.bf16.mxu0 %v10291_v47  ;;  %7702 = vmatprep.subr.bf16.mxu1 %v10294_v2  ;;  %v10378_v47 = vld [vmem:[%s11047_s8 + $0x172c] ss:$16 sps:$4 sm:$0xff]   ;;  %v10373_v2 = vld [vmem:[%s11047_s8 + $0x1720] ss:$16 sps:$4 sm:$0xff]  }
 0x2ff   : > { %7047 = vmatpush1.bf16.msra.mxu0 %v10289_v3  ;;  %7703 = vmatpush1.bf16.msra.mxu1 %v10292_v4  ;;  %v10376_v3 = vld [vmem:[%s11047_s8 + $0x1728] ss:$16 sps:$4 sm:$0xff]   ;;  %v10381_v4 = vld [vmem:[%s11047_s8 + $0x1744] ss:$16 sps:$4 sm:$0xff]  }
 0x300   : > { %7048 = vmatprep.subr.bf16.mxu0 %v10297_v5  ;;  %7704 = vmatprep.subr.bf16.mxu1 %v10300_v58  ;;  %v10384_v5 = vld [vmem:[%s11047_s8 + $0x174c] ss:$16 sps:$4 sm:$0xff]   ;;  %v10379_v58 = vld [vmem:[%s11047_s8 + $0x1740] ss:$16 sps:$4 sm:$0xff]  }
 0x303   : > { %7049 = vmatpush1.bf16.msra.mxu0 %v10295_v7  ;;  %7705 = vmatpush1.bf16.msra.mxu1 %v10298_v56  ;;  %v10382_v7 = vld [vmem:[%s11047_s8 + $0x1748] ss:$16 sps:$4 sm:$0xff]   ;;  %v10387_v56 = vld [vmem:[%s11047_s8 + $0x1764] ss:$16 sps:$4 sm:$0xff]  }
 0x304   : > { %7050 = vmatprep.subr.bf16.mxu0 %v10303_v10  ;;  %7706 = vmatprep.subr.bf16.mxu1 %v10306_v11  ;;  %v10390_v10 = vld [vmem:[%s11047_s8 + $0x176c] ss:$16 sps:$4 sm:$0xff]   ;;  %v10385_v11 = vld [vmem:[%s11047_s8 + $0x1760] ss:$16 sps:$4 sm:$0xff]  }
 0x307   : > { %7051 = vmatpush1.bf16.msra.mxu0 %v10301_v12  ;;  %7707 = vmatpush1.bf16.msra.mxu1 %v10304_v14  ;;  %v10388_v12 = vld [vmem:[%s11047_s8 + $0x1768] ss:$16 sps:$4 sm:$0xff]   ;;  %v10393_v14 = vld [vmem:[%s11047_s8 + $0x1784] ss:$16 sps:$4 sm:$0xff]  }
 0x308   : > { %7052 = vmatprep.subr.bf16.mxu0 %v10309_v15  ;;  %7708 = vmatprep.subr.bf16.mxu1 %v10312_v16  ;;  %v10396_v15 = vld [vmem:[%s11047_s8 + $0x178c] ss:$16 sps:$4 sm:$0xff]   ;;  %v10391_v16 = vld [vmem:[%s11047_s8 + $0x1780] ss:$16 sps:$4 sm:$0xff]  }
 0x30b   : > { %7053 = vmatpush1.bf16.msra.mxu0 %v10307_v17  ;;  %7709 = vmatpush1.bf16.msra.mxu1 %v10310_v18  ;;  %v10399_v17 = vld [vmem:[%s11047_s8 + $0x17a4] ss:$16 sps:$4 sm:$0xff]   ;;  %v10402_v18 = vld [vmem:[%s11047_s8 + $0x17ac] ss:$16 sps:$4 sm:$0xff]  }
 0x30c   : > { %7054 = vmatprep.subr.bf16.mxu0 %v10315_v19  ;;  %7710 = vmatprep.subr.bf16.mxu1 %v10318_v20  ;;  %v10397_v19 = vld [vmem:[%s11047_s8 + $0x17a0] ss:$16 sps:$4 sm:$0xff]   ;;  %v10400_v20 = vld [vmem:[%s11047_s8 + $0x17a8] ss:$16 sps:$4 sm:$0xff]  }
 0x30f   : > { %7055 = vmatpush1.bf16.msra.mxu0 %v10313_v8  ;;  %7711 = vmatpush1.bf16.msra.mxu1 %v10316_v22  ;;  %v10405_v8 = vld [vmem:[%s11047_s8 + $0x17c4] ss:$16 sps:$4 sm:$0xff]   ;;  %v10408_v22 = vld [vmem:[%s11047_s8 + $0x17cc] ss:$16 sps:$4 sm:$0xff]  }
 0x310   : > { %7065 = vmatprep.subr.bf16.mxu0 %v10321_v24  ;;  %7721 = vmatprep.subr.bf16.mxu1 %v10324_v6  ;;  %v11948_v24 = vld [vmem:[%s12278_s0 + $0x30] sm:$0xff]  ;;  %v10403_v6 = vld [vmem:[%s11047_s8 + $0x17c0] ss:$16 sps:$4 sm:$0xff]  }
 0x312   : > { %7057 = vmatmul.mubr.bf16.vlgmr.msra.gmra.mrb[0].mxu0 %v436_v9  ;;  %7713 = vmatmul.mubr.bf16.vlgmr.msra.gmra.mrb[0].mxu1 %v436_v9  ;;  %v10411_v9 = vld [vmem:[%s11047_s8 + $0x17e4] ss:$16 sps:$4 sm:$0xff]  }
 0x313   : > { %7066 = vmatpush1.bf16.msra.mxu0 %v10319_v27  ;;  %7722 = vmatpush1.bf16.msra.mxu1 %v10322_v29  ;;  %v10414_v27 = vld [vmem:[%s11047_s8 + $0x17ec] ss:$16 sps:$4 sm:$0xff]   ;;  %v11956_v29 = vrot.slane %v11948_v24, %v11106_v49 }
 0x314   : > { %7067 = vmatprep.subr.bf16.mxu0 %v10327_v30  ;;  %7723 = vmatprep.subr.bf16.mxu1 %v10330_v31  ;;  %v10409_v30 = vld [vmem:[%s11047_s8 + $0x17e0] ss:$16 sps:$4 sm:$0xff]   ;;  %v10412_v31 = vld [vmem:[%s11047_s8 + $0x17e8] ss:$16 sps:$4 sm:$0xff]  }
 0x315   : > { %7097 = vmatprep.mubr.bf16.mxu0 %v439_v33  ;;  %7753 = vmatprep.mubr.bf16.mxu1 %v439_v33  ;;  %v10418_v33 = vld [vmem:[%s11047_s8 + $0x1804] ss:$16 sps:$4 sm:$0xff]  }
 0x317   : > { %7068 = vmatpush1.bf16.msra.mxu0 %v10325_v13  ;;  %7724 = vmatpush1.bf16.msra.mxu1 %v10328_v34  ;;  %v10421_v13 = vld [vmem:[%s11047_s8 + $0x180c] ss:$16 sps:$4 sm:$0xff]   ;;  %v365_v34 = vcombine.high %v11956_v29, %v11956_v29 }
 0x318   : > { %7069 = vmatprep.subr.bf16.mxu0 %v10333_v35  ;;  %7725 = vmatprep.subr.bf16.mxu1 %v10336_v26  ;;  %v438_v35 = vpack.c.bf16 %v11879_v21, %v11879_v21  ;;  %v10416_v26 = vld [vmem:[%s11047_s8 + $0x1800] ss:$16 sps:$4 sm:$0xff]  }
 0x319   : > { %v10422_v21 = vld [vmem:[%s11047_s8 + $0x1820] ss:$16 sps:$4 sm:$0xff]  }
 0x31b   : > { %7070 = vmatpush1.bf16.msra.mxu0 %v10331_v36  ;;  %7726 = vmatpush1.bf16.msra.mxu1 %v10334_v37  ;;  %v10419_v36 = vld [vmem:[%s11047_s8 + $0x1808] ss:$16 sps:$4 sm:$0xff]   ;;  %v10424_v37 = vld [vmem:[%s11047_s8 + $0x1824] ss:$16 sps:$4 sm:$0xff]  }
 0x31c   : > { %7071 = vmatprep.subr.bf16.mxu0 %v10339_v38  ;;  %7727 = vmatprep.subr.bf16.mxu1 %v10342_v39  ;;  %v10427_v38 = vld [vmem:[%s11047_s8 + $0x182c] ss:$16 sps:$4 sm:$0xff]   ;;  %v441_v39 = vpack.c.bf16 %v365_v34, %v365_v34  ;;  %v10500_v34 = vld [vmem:[%s11047_s8 + $0x19c0] ss:$16 sps:$4 sm:$0xff]  }
 0x31f   : > { %7072 = vmatpush1.bf16.msra.mxu0 %v10337_v28  ;;  %7728 = vmatpush1.bf16.msra.mxu1 %v10340_v41  ;;  %v10425_v28 = vld [vmem:[%s11047_s8 + $0x1828] ss:$16 sps:$4 sm:$0xff]   ;;  %v10430_v41 = vld [vmem:[%s11047_s8 + $0x1844] ss:$16 sps:$4 sm:$0xff]  }
 0x320   : > { %7073 = vmatprep.subr.bf16.mxu0 %v10345_v44  ;;  %7729 = vmatprep.subr.bf16.mxu1 %v10348_v45  ;;  %v10433_v44 = vld [vmem:[%s11047_s8 + $0x184c] ss:$16 sps:$4 sm:$0xff]   ;;  %v10428_v45 = vld [vmem:[%s11047_s8 + $0x1840] ss:$16 sps:$4 sm:$0xff]  }
 0x323   : > { %7074 = vmatpush1.bf16.msra.mxu0 %v10343_v25  ;;  %7730 = vmatpush1.bf16.msra.mxu1 %v10346_v46  ;;  %v10431_v25 = vld [vmem:[%s11047_s8 + $0x1848] ss:$16 sps:$4 sm:$0xff]   ;;  %v10436_v46 = vld [vmem:[%s11047_s8 + $0x1864] ss:$16 sps:$4 sm:$0xff]  }
 0x324   : > { %7075 = vmatprep.subr.bf16.mxu0 %v10351_v48  ;;  %7731 = vmatprep.subr.bf16.mxu1 %v10354_v50  ;;  %v10439_v48 = vld [vmem:[%s11047_s8 + $0x186c] ss:$16 sps:$4 sm:$0xff]   ;;  %v10434_v50 = vld [vmem:[%s11047_s8 + $0x1860] ss:$16 sps:$4 sm:$0xff]  }
 0x327   : > { %7076 = vmatpush1.bf16.msra.mxu0 %v10349_v51  ;;  %7732 = vmatpush1.bf16.msra.mxu1 %v10352_v32  ;;  %v10437_v51 = vld [vmem:[%s11047_s8 + $0x1868] ss:$16 sps:$4 sm:$0xff]   ;;  %v10442_v32 = vld [vmem:[%s11047_s8 + $0x1884] ss:$16 sps:$4 sm:$0xff]  }
 0x328   : > { %7077 = vmatprep.subr.bf16.mxu0 %v10357_v52  ;;  %7733 = vmatprep.subr.bf16.mxu1 %v10360_v53  ;;  %v10445_v52 = vld [vmem:[%s11047_s8 + $0x188c] ss:$16 sps:$4 sm:$0xff]   ;;  %v10440_v53 = vld [vmem:[%s11047_s8 + $0x1880] ss:$16 sps:$4 sm:$0xff]  }
 0x32b   : > { %7078 = vmatpush1.bf16.msra.mxu0 %v10355_v54  ;;  %7734 = vmatpush1.bf16.msra.mxu1 %v10358_v55  ;;  %v10443_v54 = vld [vmem:[%s11047_s8 + $0x1888] ss:$16 sps:$4 sm:$0xff]   ;;  %v10448_v55 = vld [vmem:[%s11047_s8 + $0x18a4] ss:$16 sps:$4 sm:$0xff]  }
 0x32c   : > { %7079 = vmatprep.subr.bf16.mxu0 %v10363_v42  ;;  %7735 = vmatprep.subr.bf16.mxu1 %v10366_v57  ;;  %v10451_v42 = vld [vmem:[%s11047_s8 + $0x18ac] ss:$16 sps:$4 sm:$0xff]   ;;  %v10446_v57 = vld [vmem:[%s11047_s8 + $0x18a0] ss:$16 sps:$4 sm:$0xff]  }
 0x32f   : > { %7080 = vmatpush1.bf16.msra.mxu0 %v10361_v40  ;;  %7736 = vmatpush1.bf16.msra.mxu1 %v10364_v59  ;;  %v10449_v40 = vld [vmem:[%s11047_s8 + $0x18a8] ss:$16 sps:$4 sm:$0xff]   ;;  %v10454_v59 = vld [vmem:[%s11047_s8 + $0x18c4] ss:$16 sps:$4 sm:$0xff]  }
 0x330   : > { %7081 = vmatprep.subr.bf16.mxu0 %v10369_v60  ;;  %7737 = vmatprep.subr.bf16.mxu1 %v10372_v61  ;;  %v10457_v60 = vld [vmem:[%s11047_s8 + $0x18cc] ss:$16 sps:$4 sm:$0xff]   ;;  %v10452_v61 = vld [vmem:[%s11047_s8 + $0x18c0] ss:$16 sps:$4 sm:$0xff]  }
 0x333   : > { %7082 = vmatpush1.bf16.msra.mxu0 %v10367_v63  ;;  %7738 = vmatpush1.bf16.msra.mxu1 %v10370_v0  ;;  %v10455_v63 = vld [vmem:[%s11047_s8 + $0x18c8] ss:$16 sps:$4 sm:$0xff]   ;;  %v10460_v0 = vld [vmem:[%s11047_s8 + $0x18e4] ss:$16 sps:$4 sm:$0xff]  }
 0x334   : > { %7083 = vmatprep.subr.bf16.mxu0 %v10375_v1  ;;  %7739 = vmatprep.subr.bf16.mxu1 %v10378_v47  ;;  %v10463_v1 = vld [vmem:[%s11047_s8 + $0x18ec] ss:$16 sps:$4 sm:$0xff]   ;;  %v10458_v47 = vld [vmem:[%s11047_s8 + $0x18e0] ss:$16 sps:$4 sm:$0xff]  }
 0x337   : > { %7084 = vmatpush1.bf16.msra.mxu0 %v10373_v2  ;;  %7740 = vmatpush1.bf16.msra.mxu1 %v10376_v3  ;;  %v10461_v2 = vld [vmem:[%s11047_s8 + $0x18e8] ss:$16 sps:$4 sm:$0xff]   ;;  %v10466_v3 = vld [vmem:[%s11047_s8 + $0x1904] ss:$16 sps:$4 sm:$0xff]  }
 0x338   : > { %7085 = vmatprep.subr.bf16.mxu0 %v10381_v4  ;;  %7741 = vmatprep.subr.bf16.mxu1 %v10384_v5  ;;  %v10469_v4 = vld [vmem:[%s11047_s8 + $0x190c] ss:$16 sps:$4 sm:$0xff]   ;;  %v10464_v5 = vld [vmem:[%s11047_s8 + $0x1900] ss:$16 sps:$4 sm:$0xff]  }
 0x33b   : > { %7086 = vmatpush1.bf16.msra.mxu0 %v10379_v58  ;;  %7742 = vmatpush1.bf16.msra.mxu1 %v10382_v7  ;;  %v10467_v58 = vld [vmem:[%s11047_s8 + $0x1908] ss:$16 sps:$4 sm:$0xff]   ;;  %v10472_v7 = vld [vmem:[%s11047_s8 + $0x1924] ss:$16 sps:$4 sm:$0xff]  }
 0x33c   : > { %7087 = vmatprep.subr.bf16.mxu0 %v10387_v56  ;;  %7743 = vmatprep.subr.bf16.mxu1 %v10390_v10  ;;  %v10475_v56 = vld [vmem:[%s11047_s8 + $0x192c] ss:$16 sps:$4 sm:$0xff]   ;;  %v10470_v10 = vld [vmem:[%s11047_s8 + $0x1920] ss:$16 sps:$4 sm:$0xff]  }
 0x33f   : > { %7088 = vmatpush1.bf16.msra.mxu0 %v10385_v11  ;;  %7744 = vmatpush1.bf16.msra.mxu1 %v10388_v12  ;;  %v10473_v11 = vld [vmem:[%s11047_s8 + $0x1928] ss:$16 sps:$4 sm:$0xff]   ;;  %v10478_v12 = vld [vmem:[%s11047_s8 + $0x1944] ss:$16 sps:$4 sm:$0xff]  }
 0x340   : > { %7089 = vmatprep.subr.bf16.mxu0 %v10393_v14  ;;  %7745 = vmatprep.subr.bf16.mxu1 %v10396_v15  ;;  %v10481_v14 = vld [vmem:[%s11047_s8 + $0x194c] ss:$16 sps:$4 sm:$0xff]   ;;  %v10476_v15 = vld [vmem:[%s11047_s8 + $0x1940] ss:$16 sps:$4 sm:$0xff]  }
 0x343   : > { %7090 = vmatpush1.bf16.msra.mxu0 %v10391_v16  ;;  %7746 = vmatpush1.bf16.msra.mxu1 %v10394_v62  ;;  %v10479_v16 = vld [vmem:[%s11047_s8 + $0x1948] ss:$16 sps:$4 sm:$0xff]   ;;  %v10484_v62 = vld [vmem:[%s11047_s8 + $0x1964] ss:$16 sps:$4 sm:$0xff]  }
 0x344   : > { %7091 = vmatprep.subr.bf16.mxu0 %v10399_v17  ;;  %7747 = vmatprep.subr.bf16.mxu1 %v10402_v18  ;;  %v10487_v17 = vld [vmem:[%s11047_s8 + $0x196c] ss:$16 sps:$4 sm:$0xff]   ;;  %v10482_v18 = vld [vmem:[%s11047_s8 + $0x1960] ss:$16 sps:$4 sm:$0xff]  }
 0x347   : > { %7092 = vmatpush1.bf16.msra.mxu0 %v10397_v19  ;;  %7748 = vmatpush1.bf16.msra.mxu1 %v10400_v20  ;;  %v10485_v19 = vld [vmem:[%s11047_s8 + $0x1968] ss:$16 sps:$4 sm:$0xff]   ;;  %v10490_v20 = vld [vmem:[%s11047_s8 + $0x1984] ss:$16 sps:$4 sm:$0xff]  }
 0x348   : > { %7093 = vmatprep.subr.bf16.mxu0 %v10405_v8  ;;  %7749 = vmatprep.subr.bf16.mxu1 %v10408_v22  ;;  %v10493_v8 = vld [vmem:[%s11047_s8 + $0x198c] ss:$16 sps:$4 sm:$0xff]   ;;  %v10488_v22 = vld [vmem:[%s11047_s8 + $0x1980] ss:$16 sps:$4 sm:$0xff]  }
 0x34b   : > { %7094 = vmatpush1.bf16.msra.mxu0 %v10403_v6  ;;  %7750 = vmatpush1.bf16.msra.mxu1 %v10406_v23  ;;  %v10491_v6 = vld [vmem:[%s11047_s8 + $0x1988] ss:$16 sps:$4 sm:$0xff]   ;;  %v10496_v23 = vld [vmem:[%s11047_s8 + $0x19a4] ss:$16 sps:$4 sm:$0xff]  }
 0x34c   : > { %7095 = vmatprep.subr.bf16.mxu0 %v10411_v9  ;;  %7751 = vmatprep.subr.bf16.mxu1 %v10414_v27  ;;  %v10499_v9 = vld [vmem:[%s11047_s8 + $0x19ac] ss:$16 sps:$4 sm:$0xff]   ;;  %v10494_v27 = vld [vmem:[%s11047_s8 + $0x19a0] ss:$16 sps:$4 sm:$0xff]  }
 0x34f   : > { %7096 = vmatpush1.bf16.msra.mxu0 %v10409_v30  ;;  %7752 = vmatpush1.bf16.msra.mxu1 %v10412_v31  ;;  %v10497_v30 = vld [vmem:[%s11047_s8 + $0x19a8] ss:$16 sps:$4 sm:$0xff]   ;;  %v10502_v31 = vld [vmem:[%s11047_s8 + $0x19c4] ss:$16 sps:$4 sm:$0xff]  }
 0x350   : > { %7106 = vmatprep.subr.bf16.mxu0 %v10418_v33  ;;  %7762 = vmatprep.subr.bf16.mxu1 %v10421_v13  ;;  %v10505_v33 = vld [vmem:[%s11047_s8 + $0x19cc] ss:$16 sps:$4 sm:$0xff]   ;;  %v350_v13 = vcombine.high %v11948_v24, %v11948_v24  ;;  %v10506_v24 = vld [vmem:[%s11047_s8 + $0x19e0] ss:$16 sps:$4 sm:$0xff]  }
 0x352   : > { %7098 = vmatmul.mubr.bf16.vlgmr.msra.gmra.mrb[0].mxu0 %v438_v35  ;;  %7754 = vmatmul.mubr.bf16.vlgmr.msra.gmra.mrb[0].mxu1 %v438_v35  ;;  %v10503_v35 = vld [vmem:[%s11047_s8 + $0x19c8] ss:$16 sps:$4 sm:$0xff]  }
 0x353   : > { %7107 = vmatpush1.bf16.msra.mxu0 %v10416_v26  ;;  %7763 = vmatpush1.bf16.msra.mxu1 %v10419_v36  ;;  %v10508_v26 = vld [vmem:[%s11047_s8 + $0x19e4] ss:$16 sps:$4 sm:$0xff]   ;;  %v10511_v36 = vld [vmem:[%s11047_s8 + $0x19ec] ss:$16 sps:$4 sm:$0xff]  }
 0x354   : > { %7108 = vmatprep.subr.bf16.mxu0 %v10424_v37  ;;  %7764 = vmatprep.subr.bf16.mxu1 %v10427_v38  ;;  %v12029_v37 = vrot.slane %v350_v13, %v11106_v49  ;;  %v10509_v38 = vld [vmem:[%s11047_s8 + $0x19e8] ss:$16 sps:$4 sm:$0xff]  }
 0x355   : > { %7138 = vmatprep.mubr.bf16.mxu0 %v441_v39  ;;  %7794 = vmatprep.mubr.bf16.mxu1 %v441_v39  ;;  %v10514_v39 = vld [vmem:[%s11047_s8 + $0x1a04] ss:$16 sps:$4 sm:$0xff]   ;;  %v10587_v13 = vld [vmem:[%s11047_s8 + $0x1b88] ss:$16 sps:$4 sm:$0xff]  }
 0x357   : > { %7109 = vmatpush1.bf16.msra.mxu0 %v10422_v21  ;;  %7765 = vmatpush1.bf16.msra.mxu1 %v10425_v28  ;;  %v10517_v21 = vld [vmem:[%s11047_s8 + $0x1a0c] ss:$16 sps:$4 sm:$0xff]   ;;  %v366_v28 = vcombine.high %v12029_v37, %v12029_v37 }
 0x358   : > { %7110 = vmatprep.subr.bf16.mxu0 %v10430_v41  ;;  %7766 = vmatprep.subr.bf16.mxu1 %v10433_v44  ;;  %v440_v41 = vpack.c.bf16 %v11956_v29, %v11956_v29  ;;  %v10512_v44 = vld [vmem:[%s11047_s8 + $0x1a00] ss:$16 sps:$4 sm:$0xff]  }
 0x359   : > { %v10518_v29 = vld [vmem:[%s11047_s8 + $0x1a20] ss:$16 sps:$4 sm:$0xff]  }
 0x35b   : > { %7111 = vmatpush1.bf16.msra.mxu0 %v10428_v45  ;;  %7767 = vmatpush1.bf16.msra.mxu1 %v10431_v25  ;;  %v10515_v45 = vld [vmem:[%s11047_s8 + $0x1a08] ss:$16 sps:$4 sm:$0xff]   ;;  %v10520_v25 = vld [vmem:[%s11047_s8 + $0x1a24] ss:$16 sps:$4 sm:$0xff]  }
 0x35c   : > { %7112 = vmatprep.subr.bf16.mxu0 %v10436_v46  ;;  %7768 = vmatprep.subr.bf16.mxu1 %v10439_v48  ;;  %v10523_v46 = vld [vmem:[%s11047_s8 + $0x1a2c] ss:$16 sps:$4 sm:$0xff]   ;;  %v443_v48 = vpack.c.bf16 %v366_v28, %v366_v28  ;;  %v10599_v28 = vld [vmem:[%s11047_s8 + $0x1bc8] ss:$16 sps:$4 sm:$0xff]  }
 0x35f   : > { %7113 = vmatpush1.bf16.msra.mxu0 %v10434_v50  ;;  %7769 = vmatpush1.bf16.msra.mxu1 %v10437_v51  ;;  %v10521_v50 = vld [vmem:[%s11047_s8 + $0x1a28] ss:$16 sps:$4 sm:$0xff]   ;;  %v10526_v51 = vld [vmem:[%s11047_s8 + $0x1a44] ss:$16 sps:$4 sm:$0xff]  }
 0x360   : > { %7114 = vmatprep.subr.bf16.mxu0 %v10442_v32  ;;  %7770 = vmatprep.subr.bf16.mxu1 %v10445_v52  ;;  %v10529_v32 = vld [vmem:[%s11047_s8 + $0x1a4c] ss:$16 sps:$4 sm:$0xff]   ;;  %v10524_v52 = vld [vmem:[%s11047_s8 + $0x1a40] ss:$16 sps:$4 sm:$0xff]  }
 0x363   : > { %7115 = vmatpush1.bf16.msra.mxu0 %v10440_v53  ;;  %7771 = vmatpush1.bf16.msra.mxu1 %v10443_v54  ;;  %v10527_v53 = vld [vmem:[%s11047_s8 + $0x1a48] ss:$16 sps:$4 sm:$0xff]   ;;  %v10532_v54 = vld [vmem:[%s11047_s8 + $0x1a64] ss:$16 sps:$4 sm:$0xff]  }
 0x364   : > { %7116 = vmatprep.subr.bf16.mxu0 %v10448_v55  ;;  %7772 = vmatprep.subr.bf16.mxu1 %v10451_v42  ;;  %v10535_v55 = vld [vmem:[%s11047_s8 + $0x1a6c] ss:$16 sps:$4 sm:$0xff]   ;;  %v10530_v42 = vld [vmem:[%s11047_s8 + $0x1a60] ss:$16 sps:$4 sm:$0xff]  }
 0x367   : > { %7117 = vmatpush1.bf16.msra.mxu0 %v10446_v57  ;;  %7773 = vmatpush1.bf16.msra.mxu1 %v10449_v40  ;;  %v10533_v57 = vld [vmem:[%s11047_s8 + $0x1a68] ss:$16 sps:$4 sm:$0xff]   ;;  %v10538_v40 = vld [vmem:[%s11047_s8 + $0x1a84] ss:$16 sps:$4 sm:$0xff]  }
 0x368   : > { %7118 = vmatprep.subr.bf16.mxu0 %v10454_v59  ;;  %7774 = vmatprep.subr.bf16.mxu1 %v10457_v60  ;;  %v10541_v59 = vld [vmem:[%s11047_s8 + $0x1a8c] ss:$16 sps:$4 sm:$0xff]   ;;  %v10536_v60 = vld [vmem:[%s11047_s8 + $0x1a80] ss:$16 sps:$4 sm:$0xff]  }
 0x36b   : > { %7119 = vmatpush1.bf16.msra.mxu0 %v10452_v61  ;;  %7775 = vmatpush1.bf16.msra.mxu1 %v10455_v63  ;;  %v10539_v61 = vld [vmem:[%s11047_s8 + $0x1a88] ss:$16 sps:$4 sm:$0xff]   ;;  %v10544_v63 = vld [vmem:[%s11047_s8 + $0x1aa4] ss:$16 sps:$4 sm:$0xff]  }
 0x36c   : > { %7120 = vmatprep.subr.bf16.mxu0 %v10460_v0  ;;  %7776 = vmatprep.subr.bf16.mxu1 %v10463_v1  ;;  %v10547_v0 = vld [vmem:[%s11047_s8 + $0x1aac] ss:$16 sps:$4 sm:$0xff]   ;;  %v10542_v1 = vld [vmem:[%s11047_s8 + $0x1aa0] ss:$16 sps:$4 sm:$0xff]  }
 0x36f   : > { %7121 = vmatpush1.bf16.msra.mxu0 %v10458_v47  ;;  %7777 = vmatpush1.bf16.msra.mxu1 %v10461_v2  ;;  %v10545_v47 = vld [vmem:[%s11047_s8 + $0x1aa8] ss:$16 sps:$4 sm:$0xff]   ;;  %v10550_v2 = vld [vmem:[%s11047_s8 + $0x1ac4] ss:$16 sps:$4 sm:$0xff]  }
 0x370   : > { %7122 = vmatprep.subr.bf16.mxu0 %v10466_v3  ;;  %7778 = vmatprep.subr.bf16.mxu1 %v10469_v4  ;;  %v10553_v3 = vld [vmem:[%s11047_s8 + $0x1acc] ss:$16 sps:$4 sm:$0xff]   ;;  %v10548_v4 = vld [vmem:[%s11047_s8 + $0x1ac0] ss:$16 sps:$4 sm:$0xff]  }
 0x373   : > { %7123 = vmatpush1.bf16.msra.mxu0 %v10464_v5  ;;  %7779 = vmatpush1.bf16.msra.mxu1 %v10467_v58  ;;  %v10551_v5 = vld [vmem:[%s11047_s8 + $0x1ac8] ss:$16 sps:$4 sm:$0xff]   ;;  %v10556_v58 = vld [vmem:[%s11047_s8 + $0x1ae4] ss:$16 sps:$4 sm:$0xff]  }
 0x374   : > { %7124 = vmatprep.subr.bf16.mxu0 %v10472_v7  ;;  %7780 = vmatprep.subr.bf16.mxu1 %v10475_v56  ;;  %v10559_v7 = vld [vmem:[%s11047_s8 + $0x1aec] ss:$16 sps:$4 sm:$0xff]   ;;  %v10554_v56 = vld [vmem:[%s11047_s8 + $0x1ae0] ss:$16 sps:$4 sm:$0xff]  }
 0x377   : > { %7125 = vmatpush1.bf16.msra.mxu0 %v10470_v10  ;;  %7781 = vmatpush1.bf16.msra.mxu1 %v10473_v11  ;;  %v10557_v10 = vld [vmem:[%s11047_s8 + $0x1ae8] ss:$16 sps:$4 sm:$0xff]   ;;  %v10562_v11 = vld [vmem:[%s11047_s8 + $0x1b04] ss:$16 sps:$4 sm:$0xff]  }
 0x378   : > { %7126 = vmatprep.subr.bf16.mxu0 %v10478_v12  ;;  %7782 = vmatprep.subr.bf16.mxu1 %v10481_v14  ;;  %v10565_v12 = vld [vmem:[%s11047_s8 + $0x1b0c] ss:$16 sps:$4 sm:$0xff]   ;;  %v10560_v14 = vld [vmem:[%s11047_s8 + $0x1b00] ss:$16 sps:$4 sm:$0xff]  }
 0x37b   : > { %7127 = vmatpush1.bf16.msra.mxu0 %v10476_v15  ;;  %7783 = vmatpush1.bf16.msra.mxu1 %v10479_v16  ;;  %v10563_v15 = vld [vmem:[%s11047_s8 + $0x1b08] ss:$16 sps:$4 sm:$0xff]   ;;  %v10568_v16 = vld [vmem:[%s11047_s8 + $0x1b24] ss:$16 sps:$4 sm:$0xff]  }
 0x37c   : > { %7128 = vmatprep.subr.bf16.mxu0 %v10484_v62  ;;  %7784 = vmatprep.subr.bf16.mxu1 %v10487_v17  ;;  %v10571_v62 = vld [vmem:[%s11047_s8 + $0x1b2c] ss:$16 sps:$4 sm:$0xff]   ;;  %v10566_v17 = vld [vmem:[%s11047_s8 + $0x1b20] ss:$16 sps:$4 sm:$0xff]  }
 0x37f   : > { %7129 = vmatpush1.bf16.msra.mxu0 %v10482_v18  ;;  %7785 = vmatpush1.bf16.msra.mxu1 %v10485_v19  ;;  %v10569_v18 = vld [vmem:[%s11047_s8 + $0x1b28] ss:$16 sps:$4 sm:$0xff]   ;;  %v10574_v19 = vld [vmem:[%s11047_s8 + $0x1b44] ss:$16 sps:$4 sm:$0xff]  }
 0x380   : > { %7130 = vmatprep.subr.bf16.mxu0 %v10490_v20  ;;  %7786 = vmatprep.subr.bf16.mxu1 %v10493_v8  ;;  %v10577_v20 = vld [vmem:[%s11047_s8 + $0x1b4c] ss:$16 sps:$4 sm:$0xff]   ;;  %v10572_v8 = vld [vmem:[%s11047_s8 + $0x1b40] ss:$16 sps:$4 sm:$0xff]  }
 0x383   : > { %7131 = vmatpush1.bf16.msra.mxu0 %v10488_v22  ;;  %7787 = vmatpush1.bf16.msra.mxu1 %v10491_v6  ;;  %v10575_v22 = vld [vmem:[%s11047_s8 + $0x1b48] ss:$16 sps:$4 sm:$0xff]   ;;  %v10580_v6 = vld [vmem:[%s11047_s8 + $0x1b64] ss:$16 sps:$4 sm:$0xff]  }
 0x384   : > { %7132 = vmatprep.subr.bf16.mxu0 %v10496_v23  ;;  %7788 = vmatprep.subr.bf16.mxu1 %v10499_v9  ;;  %v10583_v23 = vld [vmem:[%s11047_s8 + $0x1b6c] ss:$16 sps:$4 sm:$0xff]   ;;  %v10578_v9 = vld [vmem:[%s11047_s8 + $0x1b60] ss:$16 sps:$4 sm:$0xff]  }
 0x387   : > { %7133 = vmatpush1.bf16.msra.mxu0 %v10494_v27  ;;  %7789 = vmatpush1.bf16.msra.mxu1 %v10497_v30  ;;  %v10581_v27 = vld [vmem:[%s11047_s8 + $0x1b68] ss:$16 sps:$4 sm:$0xff]   ;;  %v10586_v30 = vld [vmem:[%s11047_s8 + $0x1b84] ss:$16 sps:$4 sm:$0xff]  }
 0x388   : > { %7134 = vmatprep.subr.bf16.mxu0 %v10502_v31  ;;  %7790 = vmatprep.subr.bf16.mxu1 %v10505_v33  ;;  %v10589_v31 = vld [vmem:[%s11047_s8 + $0x1b8c] ss:$16 sps:$4 sm:$0xff]   ;;  %v10584_v33 = vld [vmem:[%s11047_s8 + $0x1b80] ss:$16 sps:$4 sm:$0xff]  }
 0x38b   : > { %7135 = vmatpush1.bf16.msra.mxu0 %v10500_v34  ;;  %7791 = vmatpush1.bf16.msra.mxu1 %v10503_v35  ;;  %v10592_v34 = vld [vmem:[%s11047_s8 + $0x1ba4] ss:$16 sps:$4 sm:$0xff]   ;;  %v10595_v35 = vld [vmem:[%s11047_s8 + $0x1bac] ss:$16 sps:$4 sm:$0xff]  }
 0x38c   : > { %7136 = vmatprep.subr.bf16.mxu0 %v10508_v26  ;;  %7792 = vmatprep.subr.bf16.mxu1 %v10511_v36  ;;  %v10590_v26 = vld [vmem:[%s11047_s8 + $0x1ba0] ss:$16 sps:$4 sm:$0xff]   ;;  %v10593_v36 = vld [vmem:[%s11047_s8 + $0x1ba8] ss:$16 sps:$4 sm:$0xff]  }
 0x38f   : > { %7137 = vmatpush1.bf16.msra.mxu0 %v10506_v24  ;;  %7793 = vmatpush1.bf16.msra.mxu1 %v10509_v38  ;;  %v10598_v24 = vld [vmem:[%s11047_s8 + $0x1bc4] ss:$16 sps:$4 sm:$0xff]   ;;  %v10601_v38 = vld [vmem:[%s11047_s8 + $0x1bcc] ss:$16 sps:$4 sm:$0xff]  }
 0x390   : > { %7147 = vmatprep.subr.bf16.mxu0 %v10514_v39  ;;  %7803 = vmatprep.subr.bf16.mxu1 %v10517_v21  ;;  %v12098_v39 = vld [vmem:[%s12278_s0 + $0x38] sm:$0xff] }
 0x391   : > { %v10596_v21 = vld [vmem:[%s11047_s8 + $0x1bc0] ss:$16 sps:$4 sm:$0xff]  }
 0x392   : > { %7139 = vmatmul.mubr.bf16.vlgmr.msra.gmra.mrb[0].mxu0 %v440_v41  ;;  %7795 = vmatmul.mubr.bf16.vlgmr.msra.gmra.mrb[0].mxu1 %v440_v41  ;;  %v10604_v41 = vld [vmem:[%s11047_s8 + $0x1be4] ss:$16 sps:$4 sm:$0xff]  }
 0x393   : > { %7148 = vmatpush1.bf16.msra.mxu0 %v10512_v44  ;;  %7804 = vmatpush1.bf16.msra.mxu1 %v10515_v45  ;;  %v10607_v44 = vld [vmem:[%s11047_s8 + $0x1bec] ss:$16 sps:$4 sm:$0xff]   ;;  %v12106_v45 = vrot.slane %v12098_v39, %v11106_v49 }
 0x394   : > { %7149 = vmatprep.subr.bf16.mxu0 %v10520_v25  ;;  %7805 = vmatprep.subr.bf16.mxu1 %v10523_v46  ;;  %v10602_v25 = vld [vmem:[%s11047_s8 + $0x1be0] ss:$16 sps:$4 sm:$0xff]   ;;  %v10605_v46 = vld [vmem:[%s11047_s8 + $0x1be8] ss:$16 sps:$4 sm:$0xff]  }
 0x395   : > { %7179 = vmatprep.mubr.bf16.mxu0 %v443_v48  ;;  %7835 = vmatprep.mubr.bf16.mxu1 %v443_v48  ;;  %v10611_v48 = vld [vmem:[%s11047_s8 + $0x1c04] ss:$16 sps:$4 sm:$0xff]  }
 0x397   : > { %7150 = vmatpush1.bf16.msra.mxu0 %v10518_v29  ;;  %7806 = vmatpush1.bf16.msra.mxu1 %v10521_v50  ;;  %v10614_v29 = vld [vmem:[%s11047_s8 + $0x1c0c] ss:$16 sps:$4 sm:$0xff]   ;;  %v382_v50 = vcombine.high %v12106_v45, %v12106_v45 }
 0x398   : > { %7151 = vmatprep.subr.bf16.mxu0 %v10526_v51  ;;  %7807 = vmatprep.subr.bf16.mxu1 %v10529_v32  ;;  %v442_v51 = vpack.c.bf16 %v12029_v37, %v12029_v37  ;;  %v10609_v32 = vld [vmem:[%s11047_s8 + $0x1c00] ss:$16 sps:$4 sm:$0xff]  }
 0x399   : > { %v10615_v37 = vld [vmem:[%s11047_s8 + $0x1c20] ss:$16 sps:$4 sm:$0xff]  }
 0x39b   : > { %7152 = vmatpush1.bf16.msra.mxu0 %v10524_v52  ;;  %7808 = vmatpush1.bf16.msra.mxu1 %v10527_v53  ;;  %v10612_v52 = vld [vmem:[%s11047_s8 + $0x1c08] ss:$16 sps:$4 sm:$0xff]   ;;  %v10617_v53 = vld [vmem:[%s11047_s8 + $0x1c24] ss:$16 sps:$4 sm:$0xff]  }
 0x39c   : > { %7153 = vmatprep.subr.bf16.mxu0 %v10532_v54  ;;  %7809 = vmatprep.subr.bf16.mxu1 %v10535_v55  ;;  %v10620_v54 = vld [vmem:[%s11047_s8 + $0x1c2c] ss:$16 sps:$4 sm:$0xff]   ;;  %v445_v55 = vpack.c.bf16 %v382_v50, %v382_v50  ;;  %v10693_v50 = vld [vmem:[%s11047_s8 + $0x1dc0] ss:$16 sps:$4 sm:$0xff]  }
 0x39f   : > { %7154 = vmatpush1.bf16.msra.mxu0 %v10530_v42  ;;  %7810 = vmatpush1.bf16.msra.mxu1 %v10533_v57  ;;  %v10618_v42 = vld [vmem:[%s11047_s8 + $0x1c28] ss:$16 sps:$4 sm:$0xff]   ;;  %v10623_v57 = vld [vmem:[%s11047_s8 + $0x1c44] ss:$16 sps:$4 sm:$0xff]  }
 0x3a0   : > { %7155 = vmatprep.subr.bf16.mxu0 %v10538_v40  ;;  %7811 = vmatprep.subr.bf16.mxu1 %v10541_v59  ;;  %v10626_v40 = vld [vmem:[%s11047_s8 + $0x1c4c] ss:$16 sps:$4 sm:$0xff]   ;;  %v10621_v59 = vld [vmem:[%s11047_s8 + $0x1c40] ss:$16 sps:$4 sm:$0xff]  }
 0x3a3   : > { %7156 = vmatpush1.bf16.msra.mxu0 %v10536_v60  ;;  %7812 = vmatpush1.bf16.msra.mxu1 %v10539_v61  ;;  %v10624_v60 = vld [vmem:[%s11047_s8 + $0x1c48] ss:$16 sps:$4 sm:$0xff]   ;;  %v10629_v61 = vld [vmem:[%s11047_s8 + $0x1c64] ss:$16 sps:$4 sm:$0xff]  }
 0x3a4   : > { %7157 = vmatprep.subr.bf16.mxu0 %v10544_v63  ;;  %7813 = vmatprep.subr.bf16.mxu1 %v10547_v0  ;;  %v10632_v63 = vld [vmem:[%s11047_s8 + $0x1c6c] ss:$16 sps:$4 sm:$0xff]   ;;  %v10627_v0 = vld [vmem:[%s11047_s8 + $0x1c60] ss:$16 sps:$4 sm:$0xff]  }
 0x3a7   : > { %7158 = vmatpush1.bf16.msra.mxu0 %v10542_v1  ;;  %7814 = vmatpush1.bf16.msra.mxu1 %v10545_v47  ;;  %v10630_v1 = vld [vmem:[%s11047_s8 + $0x1c68] ss:$16 sps:$4 sm:$0xff]   ;;  %v10635_v47 = vld [vmem:[%s11047_s8 + $0x1c84] ss:$16 sps:$4 sm:$0xff]  }
 0x3a8   : > { %7159 = vmatprep.subr.bf16.mxu0 %v10550_v2  ;;  %7815 = vmatprep.subr.bf16.mxu1 %v10553_v3  ;;  %v10638_v2 = vld [vmem:[%s11047_s8 + $0x1c8c] ss:$16 sps:$4 sm:$0xff]   ;;  %v10633_v3 = vld [vmem:[%s11047_s8 + $0x1c80] ss:$16 sps:$4 sm:$0xff]  }
 0x3ab   : > { %7160 = vmatpush1.bf16.msra.mxu0 %v10548_v4  ;;  %7816 = vmatpush1.bf16.msra.mxu1 %v10551_v5  ;;  %v10636_v4 = vld [vmem:[%s11047_s8 + $0x1c88] ss:$16 sps:$4 sm:$0xff]   ;;  %v10641_v5 = vld [vmem:[%s11047_s8 + $0x1ca4] ss:$16 sps:$4 sm:$0xff]  }
 0x3ac   : > { %7161 = vmatprep.subr.bf16.mxu0 %v10556_v58  ;;  %7817 = vmatprep.subr.bf16.mxu1 %v10559_v7  ;;  %v10644_v58 = vld [vmem:[%s11047_s8 + $0x1cac] ss:$16 sps:$4 sm:$0xff]   ;;  %v10639_v7 = vld [vmem:[%s11047_s8 + $0x1ca0] ss:$16 sps:$4 sm:$0xff]  }
 0x3af   : > { %7162 = vmatpush1.bf16.msra.mxu0 %v10554_v56  ;;  %7818 = vmatpush1.bf16.msra.mxu1 %v10557_v10  ;;  %v10642_v56 = vld [vmem:[%s11047_s8 + $0x1ca8] ss:$16 sps:$4 sm:$0xff]   ;;  %v10647_v10 = vld [vmem:[%s11047_s8 + $0x1cc4] ss:$16 sps:$4 sm:$0xff]  }
 0x3b0   : > { %7163 = vmatprep.subr.bf16.mxu0 %v10562_v11  ;;  %7819 = vmatprep.subr.bf16.mxu1 %v10565_v12  ;;  %v10650_v11 = vld [vmem:[%s11047_s8 + $0x1ccc] ss:$16 sps:$4 sm:$0xff]   ;;  %v10645_v12 = vld [vmem:[%s11047_s8 + $0x1cc0] ss:$16 sps:$4 sm:$0xff]  }
 0x3b3   : > { %7164 = vmatpush1.bf16.msra.mxu0 %v10560_v14  ;;  %7820 = vmatpush1.bf16.msra.mxu1 %v10563_v15  ;;  %v10648_v14 = vld [vmem:[%s11047_s8 + $0x1cc8] ss:$16 sps:$4 sm:$0xff]   ;;  %v10653_v15 = vld [vmem:[%s11047_s8 + $0x1ce4] ss:$16 sps:$4 sm:$0xff]  }
 0x3b4   : > { %7165 = vmatprep.subr.bf16.mxu0 %v10568_v16  ;;  %7821 = vmatprep.subr.bf16.mxu1 %v10571_v62  ;;  %v10656_v16 = vld [vmem:[%s11047_s8 + $0x1cec] ss:$16 sps:$4 sm:$0xff]   ;;  %v10651_v62 = vld [vmem:[%s11047_s8 + $0x1ce0] ss:$16 sps:$4 sm:$0xff]  }
 0x3b7   : > { %7166 = vmatpush1.bf16.msra.mxu0 %v10566_v17  ;;  %7822 = vmatpush1.bf16.msra.mxu1 %v10569_v18  ;;  %v10654_v17 = vld [vmem:[%s11047_s8 + $0x1ce8] ss:$16 sps:$4 sm:$0xff]   ;;  %v10659_v18 = vld [vmem:[%s11047_s8 + $0x1d04] ss:$16 sps:$4 sm:$0xff]  }
 0x3b8   : > { %7167 = vmatprep.subr.bf16.mxu0 %v10574_v19  ;;  %7823 = vmatprep.subr.bf16.mxu1 %v10577_v20  ;;  %v10662_v19 = vld [vmem:[%s11047_s8 + $0x1d0c] ss:$16 sps:$4 sm:$0xff]   ;;  %v10657_v20 = vld [vmem:[%s11047_s8 + $0x1d00] ss:$16 sps:$4 sm:$0xff]  }
 0x3bb   : > { %7168 = vmatpush1.bf16.msra.mxu0 %v10572_v8  ;;  %7824 = vmatpush1.bf16.msra.mxu1 %v10575_v22  ;;  %v10660_v8 = vld [vmem:[%s11047_s8 + $0x1d08] ss:$16 sps:$4 sm:$0xff]   ;;  %v10665_v22 = vld [vmem:[%s11047_s8 + $0x1d24] ss:$16 sps:$4 sm:$0xff]  }
 0x3bc   : > { %7169 = vmatprep.subr.bf16.mxu0 %v10580_v6  ;;  %7825 = vmatprep.subr.bf16.mxu1 %v10583_v23  ;;  %v10668_v6 = vld [vmem:[%s11047_s8 + $0x1d2c] ss:$16 sps:$4 sm:$0xff]   ;;  %v10663_v23 = vld [vmem:[%s11047_s8 + $0x1d20] ss:$16 sps:$4 sm:$0xff]  }
 0x3bf   : > { %7170 = vmatpush1.bf16.msra.mxu0 %v10578_v9  ;;  %7826 = vmatpush1.bf16.msra.mxu1 %v10581_v27  ;;  %v10666_v9 = vld [vmem:[%s11047_s8 + $0x1d28] ss:$16 sps:$4 sm:$0xff]   ;;  %v10671_v27 = vld [vmem:[%s11047_s8 + $0x1d44] ss:$16 sps:$4 sm:$0xff]  }
 0x3c0   : > { %7171 = vmatprep.subr.bf16.mxu0 %v10586_v30  ;;  %7827 = vmatprep.subr.bf16.mxu1 %v10589_v31  ;;  %v10674_v30 = vld [vmem:[%s11047_s8 + $0x1d4c] ss:$16 sps:$4 sm:$0xff]   ;;  %v10669_v31 = vld [vmem:[%s11047_s8 + $0x1d40] ss:$16 sps:$4 sm:$0xff]  }
 0x3c3   : > { %7172 = vmatpush1.bf16.msra.mxu0 %v10584_v33  ;;  %7828 = vmatpush1.bf16.msra.mxu1 %v10587_v13  ;;  %v10672_v33 = vld [vmem:[%s11047_s8 + $0x1d48] ss:$16 sps:$4 sm:$0xff]   ;;  %v10677_v13 = vld [vmem:[%s11047_s8 + $0x1d64] ss:$16 sps:$4 sm:$0xff]  }
 0x3c4   : > { %7173 = vmatprep.subr.bf16.mxu0 %v10592_v34  ;;  %7829 = vmatprep.subr.bf16.mxu1 %v10595_v35  ;;  %v10680_v34 = vld [vmem:[%s11047_s8 + $0x1d6c] ss:$16 sps:$4 sm:$0xff]   ;;  %v10675_v35 = vld [vmem:[%s11047_s8 + $0x1d60] ss:$16 sps:$4 sm:$0xff]  }
 0x3c7   : > { %7174 = vmatpush1.bf16.msra.mxu0 %v10590_v26  ;;  %7830 = vmatpush1.bf16.msra.mxu1 %v10593_v36  ;;  %v10678_v26 = vld [vmem:[%s11047_s8 + $0x1d68] ss:$16 sps:$4 sm:$0xff]   ;;  %v10683_v36 = vld [vmem:[%s11047_s8 + $0x1d84] ss:$16 sps:$4 sm:$0xff]  }
 0x3c8   : > { %7175 = vmatprep.subr.bf16.mxu0 %v10598_v24  ;;  %7831 = vmatprep.subr.bf16.mxu1 %v10601_v38  ;;  %v10686_v24 = vld [vmem:[%s11047_s8 + $0x1d8c] ss:$16 sps:$4 sm:$0xff]   ;;  %v10681_v38 = vld [vmem:[%s11047_s8 + $0x1d80] ss:$16 sps:$4 sm:$0xff]  }
 0x3cb   : > { %7176 = vmatpush1.bf16.msra.mxu0 %v10596_v21  ;;  %7832 = vmatpush1.bf16.msra.mxu1 %v10599_v28  ;;  %v10684_v21 = vld [vmem:[%s11047_s8 + $0x1d88] ss:$16 sps:$4 sm:$0xff]   ;;  %v10689_v28 = vld [vmem:[%s11047_s8 + $0x1da4] ss:$16 sps:$4 sm:$0xff]  }
 0x3cc   : > { %7177 = vmatprep.subr.bf16.mxu0 %v10604_v41  ;;  %7833 = vmatprep.subr.bf16.mxu1 %v10607_v44  ;;  %v10692_v41 = vld [vmem:[%s11047_s8 + $0x1dac] ss:$16 sps:$4 sm:$0xff]   ;;  %v10687_v44 = vld [vmem:[%s11047_s8 + $0x1da0] ss:$16 sps:$4 sm:$0xff]  }
 0x3cf   : > { %7178 = vmatpush1.bf16.msra.mxu0 %v10602_v25  ;;  %7834 = vmatpush1.bf16.msra.mxu1 %v10605_v46  ;;  %v10690_v25 = vld [vmem:[%s11047_s8 + $0x1da8] ss:$16 sps:$4 sm:$0xff]   ;;  %v10695_v46 = vld [vmem:[%s11047_s8 + $0x1dc4] ss:$16 sps:$4 sm:$0xff]  }
 0x3d0   : > { %7188 = vmatprep.subr.bf16.mxu0 %v10611_v48  ;;  %7844 = vmatprep.subr.bf16.mxu1 %v10614_v29  ;;  %v10698_v48 = vld [vmem:[%s11047_s8 + $0x1dcc] ss:$16 sps:$4 sm:$0xff]   ;;  %v367_v29 = vcombine.high %v12098_v39, %v12098_v39  ;;  %v10699_v39 = vld [vmem:[%s11047_s8 + $0x1de0] ss:$16 sps:$4 sm:$0xff]  }
 0x3d2   : > { %7180 = vmatmul.mubr.bf16.vlgmr.msra.gmra.mrb[0].mxu0 %v442_v51  ;;  %7836 = vmatmul.mubr.bf16.vlgmr.msra.gmra.mrb[0].mxu1 %v442_v51  ;;  %v10696_v51 = vld [vmem:[%s11047_s8 + $0x1dc8] ss:$16 sps:$4 sm:$0xff]  }
 0x3d3   : > { %7189 = vmatpush1.bf16.msra.mxu0 %v10609_v32  ;;  %7845 = vmatpush1.bf16.msra.mxu1 %v10612_v52  ;;  %v10701_v32 = vld [vmem:[%s11047_s8 + $0x1de4] ss:$16 sps:$4 sm:$0xff]   ;;  %v10704_v52 = vld [vmem:[%s11047_s8 + $0x1dec] ss:$16 sps:$4 sm:$0xff]  }
 0x3d4   : > { %7190 = vmatprep.subr.bf16.mxu0 %v10617_v53  ;;  %7846 = vmatprep.subr.bf16.mxu1 %v10620_v54  ;;  %v12179_v53 = vrot.slane %v367_v29, %v11106_v49  ;;  %v10702_v54 = vld [vmem:[%s11047_s8 + $0x1de8] ss:$16 sps:$4 sm:$0xff]  }
 0x3d5   : > { %7220 = vmatprep.mubr.bf16.mxu0 %v445_v55  ;;  %7876 = vmatprep.mubr.bf16.mxu1 %v445_v55  ;;  %v10707_v55 = vld [vmem:[%s11047_s8 + $0x1e04] ss:$16 sps:$4 sm:$0xff]   ;;  %v10780_v29 = vld [vmem:[%s11047_s8 + $0x1f88] ss:$16 sps:$4 sm:$0xff]  }
 0x3d7   : > { %7191 = vmatpush1.bf16.msra.mxu0 %v10615_v37  ;;  %7847 = vmatpush1.bf16.msra.mxu1 %v10618_v42  ;;  %v10710_v37 = vld [vmem:[%s11047_s8 + $0x1e0c] ss:$16 sps:$4 sm:$0xff]   ;;  %v383_v42 = vcombine.high %v12179_v53, %v12179_v53 }
 0x3d8   : > { %7192 = vmatprep.subr.bf16.mxu0 %v10623_v57  ;;  %7848 = vmatprep.subr.bf16.mxu1 %v10626_v40  ;;  %v444_v57 = vpack.c.bf16 %v12106_v45, %v12106_v45  ;;  %v10705_v40 = vld [vmem:[%s11047_s8 + $0x1e00] ss:$16 sps:$4 sm:$0xff]  }
 0x3d9   : > { %v10711_v45 = vld [vmem:[%s11047_s8 + $0x1e20] ss:$16 sps:$4 sm:$0xff]  }
 0x3db   : > { %7193 = vmatpush1.bf16.msra.mxu0 %v10621_v59  ;;  %7849 = vmatpush1.bf16.msra.mxu1 %v10624_v60  ;;  %v10708_v59 = vld [vmem:[%s11047_s8 + $0x1e08] ss:$16 sps:$4 sm:$0xff]   ;;  %v10713_v60 = vld [vmem:[%s11047_s8 + $0x1e24] ss:$16 sps:$4 sm:$0xff]  }
 0x3dc   : > { %7194 = vmatprep.subr.bf16.mxu0 %v10629_v61  ;;  %7850 = vmatprep.subr.bf16.mxu1 %v10632_v63  ;;  %v10716_v61 = vld [vmem:[%s11047_s8 + $0x1e2c] ss:$16 sps:$4 sm:$0xff]   ;;  %v447_v63 = vpack.c.bf16 %v383_v42, %v383_v42  ;;  %v10797_v42 = vld [vmem:[%s11047_s8 + $0x1fe4] ss:$16 sps:$4 sm:$0xff]  }
 0x3df   : > { %7195 = vmatpush1.bf16.msra.mxu0 %v10627_v0  ;;  %7851 = vmatpush1.bf16.msra.mxu1 %v10630_v1  ;;  %v10714_v0 = vld [vmem:[%s11047_s8 + $0x1e28] ss:$16 sps:$4 sm:$0xff]   ;;  %v10719_v1 = vld [vmem:[%s11047_s8 + $0x1e44] ss:$16 sps:$4 sm:$0xff]  }
 0x3e0   : > { %7196 = vmatprep.subr.bf16.mxu0 %v10635_v47  ;;  %7852 = vmatprep.subr.bf16.mxu1 %v10638_v2  ;;  %v10722_v47 = vld [vmem:[%s11047_s8 + $0x1e4c] ss:$16 sps:$4 sm:$0xff]   ;;  %v10717_v2 = vld [vmem:[%s11047_s8 + $0x1e40] ss:$16 sps:$4 sm:$0xff]  }
 0x3e3   : > { %7197 = vmatpush1.bf16.msra.mxu0 %v10633_v3  ;;  %7853 = vmatpush1.bf16.msra.mxu1 %v10636_v4  ;;  %v10720_v3 = vld [vmem:[%s11047_s8 + $0x1e48] ss:$16 sps:$4 sm:$0xff]   ;;  %v10725_v4 = vld [vmem:[%s11047_s8 + $0x1e64] ss:$16 sps:$4 sm:$0xff]  }
 0x3e4   : > { %7198 = vmatprep.subr.bf16.mxu0 %v10641_v5  ;;  %7854 = vmatprep.subr.bf16.mxu1 %v10644_v58  ;;  %v10728_v5 = vld [vmem:[%s11047_s8 + $0x1e6c] ss:$16 sps:$4 sm:$0xff]   ;;  %v10723_v58 = vld [vmem:[%s11047_s8 + $0x1e60] ss:$16 sps:$4 sm:$0xff]  }
 0x3e7   : > { %7199 = vmatpush1.bf16.msra.mxu0 %v10639_v7  ;;  %7855 = vmatpush1.bf16.msra.mxu1 %v10642_v56  ;;  %v10726_v7 = vld [vmem:[%s11047_s8 + $0x1e68] ss:$16 sps:$4 sm:$0xff]   ;;  %v10731_v56 = vld [vmem:[%s11047_s8 + $0x1e84] ss:$16 sps:$4 sm:$0xff]  }
 0x3e8   : > { %7200 = vmatprep.subr.bf16.mxu0 %v10647_v10  ;;  %7856 = vmatprep.subr.bf16.mxu1 %v10650_v11  ;;  %v10734_v10 = vld [vmem:[%s11047_s8 + $0x1e8c] ss:$16 sps:$4 sm:$0xff]   ;;  %v10729_v11 = vld [vmem:[%s11047_s8 + $0x1e80] ss:$16 sps:$4 sm:$0xff]  }
 0x3eb   : > { %7201 = vmatpush1.bf16.msra.mxu0 %v10645_v12  ;;  %7857 = vmatpush1.bf16.msra.mxu1 %v10648_v14  ;;  %v10732_v12 = vld [vmem:[%s11047_s8 + $0x1e88] ss:$16 sps:$4 sm:$0xff]   ;;  %v10737_v14 = vld [vmem:[%s11047_s8 + $0x1ea4] ss:$16 sps:$4 sm:$0xff]  }
 0x3ec   : > { %7202 = vmatprep.subr.bf16.mxu0 %v10653_v15  ;;  %7858 = vmatprep.subr.bf16.mxu1 %v10656_v16  ;;  %v10740_v15 = vld [vmem:[%s11047_s8 + $0x1eac] ss:$16 sps:$4 sm:$0xff]   ;;  %v10735_v16 = vld [vmem:[%s11047_s8 + $0x1ea0] ss:$16 sps:$4 sm:$0xff]  }
 0x3ef   : > { %7203 = vmatpush1.bf16.msra.mxu0 %v10651_v62  ;;  %7859 = vmatpush1.bf16.msra.mxu1 %v10654_v17  ;;  %v10738_v62 = vld [vmem:[%s11047_s8 + $0x1ea8] ss:$16 sps:$4 sm:$0xff]   ;;  %v10743_v17 = vld [vmem:[%s11047_s8 + $0x1ec4] ss:$16 sps:$4 sm:$0xff]  }
 0x3f0   : > { %7204 = vmatprep.subr.bf16.mxu0 %v10659_v18  ;;  %7860 = vmatprep.subr.bf16.mxu1 %v10662_v19  ;;  %v10746_v18 = vld [vmem:[%s11047_s8 + $0x1ecc] ss:$16 sps:$4 sm:$0xff]   ;;  %v10741_v19 = vld [vmem:[%s11047_s8 + $0x1ec0] ss:$16 sps:$4 sm:$0xff]  }
 0x3f3   : > { %7205 = vmatpush1.bf16.msra.mxu0 %v10657_v20  ;;  %7861 = vmatpush1.bf16.msra.mxu1 %v10660_v8  ;;  %v10744_v20 = vld [vmem:[%s11047_s8 + $0x1ec8] ss:$16 sps:$4 sm:$0xff]   ;;  %v10749_v8 = vld [vmem:[%s11047_s8 + $0x1ee4] ss:$16 sps:$4 sm:$0xff]  }
 0x3f4   : > { %7206 = vmatprep.subr.bf16.mxu0 %v10665_v22  ;;  %7862 = vmatprep.subr.bf16.mxu1 %v10668_v6  ;;  %v10752_v22 = vld [vmem:[%s11047_s8 + $0x1eec] ss:$16 sps:$4 sm:$0xff]   ;;  %v10747_v6 = vld [vmem:[%s11047_s8 + $0x1ee0] ss:$16 sps:$4 sm:$0xff]  }
 0x3f7   : > { %7207 = vmatpush1.bf16.msra.mxu0 %v10663_v23  ;;  %7863 = vmatpush1.bf16.msra.mxu1 %v10666_v9  ;;  %v10750_v23 = vld [vmem:[%s11047_s8 + $0x1ee8] ss:$16 sps:$4 sm:$0xff]   ;;  %v10755_v9 = vld [vmem:[%s11047_s8 + $0x1f04] ss:$16 sps:$4 sm:$0xff]  }
 0x3f8   : > { %7208 = vmatprep.subr.bf16.mxu0 %v10671_v27  ;;  %7864 = vmatprep.subr.bf16.mxu1 %v10674_v30  ;;  %v10758_v27 = vld [vmem:[%s11047_s8 + $0x1f0c] ss:$16 sps:$4 sm:$0xff]   ;;  %v10753_v30 = vld [vmem:[%s11047_s8 + $0x1f00] ss:$16 sps:$4 sm:$0xff]  }
 0x3fb   : > { %7209 = vmatpush1.bf16.msra.mxu0 %v10669_v31  ;;  %7865 = vmatpush1.bf16.msra.mxu1 %v10672_v33  ;;  %v10756_v31 = vld [vmem:[%s11047_s8 + $0x1f08] ss:$16 sps:$4 sm:$0xff]   ;;  %v10761_v33 = vld [vmem:[%s11047_s8 + $0x1f24] ss:$16 sps:$4 sm:$0xff]  }
 0x3fc   : > { %7210 = vmatprep.subr.bf16.mxu0 %v10677_v13  ;;  %7866 = vmatprep.subr.bf16.mxu1 %v10680_v34  ;;  %v10764_v13 = vld [vmem:[%s11047_s8 + $0x1f2c] ss:$16 sps:$4 sm:$0xff]   ;;  %v10759_v34 = vld [vmem:[%s11047_s8 + $0x1f20] ss:$16 sps:$4 sm:$0xff]  }
 0x3ff   : > { %7211 = vmatpush1.bf16.msra.mxu0 %v10675_v35  ;;  %7867 = vmatpush1.bf16.msra.mxu1 %v10678_v26  ;;  %v10762_v35 = vld [vmem:[%s11047_s8 + $0x1f28] ss:$16 sps:$4 sm:$0xff]   ;;  %v10767_v26 = vld [vmem:[%s11047_s8 + $0x1f44] ss:$16 sps:$4 sm:$0xff]  }
 0x400   : > { %7212 = vmatprep.subr.bf16.mxu0 %v10683_v36  ;;  %7868 = vmatprep.subr.bf16.mxu1 %v10686_v24  ;;  %v10770_v36 = vld [vmem:[%s11047_s8 + $0x1f4c] ss:$16 sps:$4 sm:$0xff]   ;;  %v10765_v24 = vld [vmem:[%s11047_s8 + $0x1f40] ss:$16 sps:$4 sm:$0xff]  }
 0x403   : > { %7213 = vmatpush1.bf16.msra.mxu0 %v10681_v38  ;;  %7869 = vmatpush1.bf16.msra.mxu1 %v10684_v21  ;;  %v10768_v38 = vld [vmem:[%s11047_s8 + $0x1f48] ss:$16 sps:$4 sm:$0xff]   ;;  %v10773_v21 = vld [vmem:[%s11047_s8 + $0x1f64] ss:$16 sps:$4 sm:$0xff]  }
 0x404   : > { %7214 = vmatprep.subr.bf16.mxu0 %v10689_v28  ;;  %7870 = vmatprep.subr.bf16.mxu1 %v10692_v41  ;;  %v10776_v28 = vld [vmem:[%s11047_s8 + $0x1f6c] ss:$16 sps:$4 sm:$0xff]   ;;  %v10771_v41 = vld [vmem:[%s11047_s8 + $0x1f60] ss:$16 sps:$4 sm:$0xff]  }
 0x407   : > { %7215 = vmatpush1.bf16.msra.mxu0 %v10687_v44  ;;  %7871 = vmatpush1.bf16.msra.mxu1 %v10690_v25  ;;  %v10774_v44 = vld [vmem:[%s11047_s8 + $0x1f68] ss:$16 sps:$4 sm:$0xff]   ;;  %v10779_v25 = vld [vmem:[%s11047_s8 + $0x1f84] ss:$16 sps:$4 sm:$0xff]  }
 0x408   : > { %7216 = vmatprep.subr.bf16.mxu0 %v10695_v46  ;;  %7872 = vmatprep.subr.bf16.mxu1 %v10698_v48  ;;  %v10782_v46 = vld [vmem:[%s11047_s8 + $0x1f8c] ss:$16 sps:$4 sm:$0xff]   ;;  %v10777_v48 = vld [vmem:[%s11047_s8 + $0x1f80] ss:$16 sps:$4 sm:$0xff]  }
 0x40b   : > { %7217 = vmatpush1.bf16.msra.mxu0 %v10693_v50  ;;  %7873 = vmatpush1.bf16.msra.mxu1 %v10696_v51  ;;  %v10785_v50 = vld [vmem:[%s11047_s8 + $0x1fa4] ss:$16 sps:$4 sm:$0xff]   ;;  %v10788_v51 = vld [vmem:[%s11047_s8 + $0x1fac] ss:$16 sps:$4 sm:$0xff]  }
 0x40c   : > { %7218 = vmatprep.subr.bf16.mxu0 %v10701_v32  ;;  %7874 = vmatprep.subr.bf16.mxu1 %v10704_v52  ;;  %v10783_v32 = vld [vmem:[%s11047_s8 + $0x1fa0] ss:$16 sps:$4 sm:$0xff]   ;;  %v10786_v52 = vld [vmem:[%s11047_s8 + $0x1fa8] ss:$16 sps:$4 sm:$0xff]  }
 0x40f   : > { %7219 = vmatpush1.bf16.msra.mxu0 %v10699_v39  ;;  %7875 = vmatpush1.bf16.msra.mxu1 %v10702_v54  ;;  %v10791_v39 = vld [vmem:[%s11047_s8 + $0x1fc4] ss:$16 sps:$4 sm:$0xff]   ;;  %v10794_v54 = vld [vmem:[%s11047_s8 + $0x1fcc] ss:$16 sps:$4 sm:$0xff]  }
 0x410   : > { %7229 = vmatprep.subr.bf16.mxu0 %v10707_v55  ;;  %7885 = vmatprep.subr.bf16.mxu1 %v10710_v37  ;;  %v10789_v55 = vld [vmem:[%s11047_s8 + $0x1fc0] ss:$16 sps:$4 sm:$0xff]   ;;  %v10792_v37 = vld [vmem:[%s11047_s8 + $0x1fc8] ss:$16 sps:$4 sm:$0xff]  }
 0x412   : > { %7221 = vmatmul.mubr.bf16.vlgmr.msra.gmra.mrb[0].mxu0 %v444_v57  ;;  %7877 = vmatmul.mubr.bf16.vlgmr.msra.gmra.mrb[0].mxu1 %v444_v57  ;;  %v10800_v57 = vld [vmem:[%s11047_s8 + $0x1fec] ss:$16 sps:$4 sm:$0xff]  }
 0x413   : > { %7230 = vmatpush1.bf16.msra.mxu0 %v10705_v40  ;;  %7886 = vmatpush1.bf16.msra.mxu1 %v10708_v59  ;;  %v10795_v40 = vld [vmem:[%s11047_s8 + $0x1fe0] ss:$16 sps:$4 sm:$0xff]   ;;  %v10798_v59 = vld [vmem:[%s11047_s8 + $0x1fe8] ss:$16 sps:$4 sm:$0xff]  }
 0x414   : > { %7231 = vmatprep.subr.bf16.mxu0 %v10713_v60  ;;  %7887 = vmatprep.subr.bf16.mxu1 %v10716_v61  ;;  %v446_v60 = vpack.c.bf16 %v12179_v53, %v12179_v53  ;;  %v1476_v61 = vsub.s32 0, %v11098_v43 }
 0x415   : > { %7261 = vmatprep.mubr.bf16.mxu0 %v447_v63  ;;  %7917 = vmatprep.mubr.bf16.mxu1 %v447_v63  ;;  %v1484_v63 = vsub.s32 2, %v11098_v43 }
 0x417   : > { %7232 = vmatpush1.bf16.msra.mxu0 %v10711_v45  ;;  %7888 = vmatpush1.bf16.msra.mxu1 %v10714_v0  ;;  %v1472_v45 = vld [vmem:[%s11053_s29] sm:$0xf]  ;;  %v1480_v0 = vsub.s32 1, %v11098_v43 }
 0x418   : > { %7233 = vmatprep.subr.bf16.mxu0 %v10719_v1  ;;  %7889 = vmatprep.subr.bf16.mxu1 %v10722_v47  ;;  %v1488_v1 = vsub.s32 3, %v11098_v43  ;;  %v1477_v47 = vrot.slane %v1472_v45, %v1476_v61 }
 0x41a   : > { %v1489_v53 = vrot.slane %v1472_v45, %v1488_v1 }
 0x41b   : > { %7234 = vmatpush1.bf16.msra.mxu0 %v10717_v2  ;;  %7890 = vmatpush1.bf16.msra.mxu1 %v10720_v3  ;;  %v1485_v2 = vrot.slane %v1472_v45, %v1484_v63  ;;  %v1481_v3 = vrot.slane %v1472_v45, %v1480_v0 }
 0x41c   : > { %7235 = vmatprep.subr.bf16.mxu0 %v10725_v4  ;;  %7891 = vmatprep.subr.bf16.mxu1 %v10728_v5 }
 0x41f   : > { %7236 = vmatpush1.bf16.msra.mxu0 %v10723_v58  ;;  %7892 = vmatpush1.bf16.msra.mxu1 %v10726_v7 }
 0x420   : > { %7237 = vmatprep.subr.bf16.mxu0 %v10731_v56  ;;  %7893 = vmatprep.subr.bf16.mxu1 %v10734_v10 }
 0x423   : > { %7238 = vmatpush1.bf16.msra.mxu0 %v10729_v11  ;;  %7894 = vmatpush1.bf16.msra.mxu1 %v10732_v12 }
 0x424   : > { %7239 = vmatprep.subr.bf16.mxu0 %v10737_v14  ;;  %7895 = vmatprep.subr.bf16.mxu1 %v10740_v15 }
 0x427   : > { %7240 = vmatpush1.bf16.msra.mxu0 %v10735_v16  ;;  %7896 = vmatpush1.bf16.msra.mxu1 %v10738_v62 }
 0x428   : > { %7241 = vmatprep.subr.bf16.mxu0 %v10743_v17  ;;  %7897 = vmatprep.subr.bf16.mxu1 %v10746_v18 }
 0x42b   : > { %7242 = vmatpush1.bf16.msra.mxu0 %v10741_v19  ;;  %7898 = vmatpush1.bf16.msra.mxu1 %v10744_v20 }
 0x42c   : > { %7243 = vmatprep.subr.bf16.mxu0 %v10749_v8  ;;  %7899 = vmatprep.subr.bf16.mxu1 %v10752_v22 }
 0x42f   : > { %7244 = vmatpush1.bf16.msra.mxu0 %v10747_v6  ;;  %7900 = vmatpush1.bf16.msra.mxu1 %v10750_v23 }
 0x430   : > { %7245 = vmatprep.subr.bf16.mxu0 %v10755_v9  ;;  %7901 = vmatprep.subr.bf16.mxu1 %v10758_v27 }
 0x433   : > { %7246 = vmatpush1.bf16.msra.mxu0 %v10753_v30  ;;  %7902 = vmatpush1.bf16.msra.mxu1 %v10756_v31 }
 0x434   : > { %7247 = vmatprep.subr.bf16.mxu0 %v10761_v33  ;;  %7903 = vmatprep.subr.bf16.mxu1 %v10764_v13 }
 0x437   : > { %7248 = vmatpush1.bf16.msra.mxu0 %v10759_v34  ;;  %7904 = vmatpush1.bf16.msra.mxu1 %v10762_v35 }
 0x438   : > { %7249 = vmatprep.subr.bf16.mxu0 %v10767_v26  ;;  %7905 = vmatprep.subr.bf16.mxu1 %v10770_v36 }
 0x43b   : > { %7250 = vmatpush1.bf16.msra.mxu0 %v10765_v24  ;;  %7906 = vmatpush1.bf16.msra.mxu1 %v10768_v38 }
 0x43c   : > { %7251 = vmatprep.subr.bf16.mxu0 %v10773_v21  ;;  %7907 = vmatprep.subr.bf16.mxu1 %v10776_v28 }
 0x43f   : > { %7252 = vmatpush1.bf16.msra.mxu0 %v10771_v41  ;;  %7908 = vmatpush1.bf16.msra.mxu1 %v10774_v44 }
 0x440   : > { %7253 = vmatprep.subr.bf16.mxu0 %v10779_v25  ;;  %7909 = vmatprep.subr.bf16.mxu1 %v10782_v46 }
 0x443   : > { %7254 = vmatpush1.bf16.msra.mxu0 %v10777_v48  ;;  %7910 = vmatpush1.bf16.msra.mxu1 %v10780_v29 }
 0x444   : > { %7255 = vmatprep.subr.bf16.mxu0 %v10785_v50  ;;  %7911 = vmatprep.subr.bf16.mxu1 %v10788_v51 }
 0x447   : > { %7256 = vmatpush1.bf16.msra.mxu0 %v10783_v32  ;;  %7912 = vmatpush1.bf16.msra.mxu1 %v10786_v52 }
 0x448   : > { %7257 = vmatprep.subr.bf16.mxu0 %v10791_v39  ;;  %7913 = vmatprep.subr.bf16.mxu1 %v10794_v54 }
 0x44b   : > { %7258 = vmatpush1.bf16.msra.mxu0 %v10789_v55  ;;  %7914 = vmatpush1.bf16.msra.mxu1 %v10792_v37 }
 0x44c   : > { %7259 = vmatprep.subr.bf16.mxu0 %v10797_v42  ;;  %7915 = vmatprep.subr.bf16.mxu1 %v10800_v57 }
 0x44f   : > { %7260 = vmatpush1.bf16.msra.mxu0 %v10795_v40  ;;  %7916 = vmatpush1.bf16.msra.mxu1 %v10798_v59 }
 0x452   : > { %7262 = vmatmul.mubr.bf16.vlgmr.msra.gmra.mrb[0].mxu0 %v446_v60  ;;  %7918 = vmatmul.mubr.bf16.vlgmr.msra.gmra.mrb[0].mxu1 %v446_v60 }
 0x525   : > { %v7263_v4 = vpop.f32.mrb[0].mxu0  ;;  %v7919_v5 = vpop.f32.mrb[0].mxu1 }
 0x526   : > { %v9086_v58 = vadd.f32 %v7263_v4, %v1477_v47  ;;  %v9088_v7 = vadd.f32 %v7919_v5, %v1485_v2  ;;  %v7265_v56 = vpop.f32.mrb[1].mxu0  ;;  %v7921_v10 = vpop.f32.mrb[1].mxu1 }
 0x527   : > { %v9087_v11 = vadd.f32 %v7265_v56, %v1481_v3  ;;  %v9089_v12 = vadd.f32 %v7921_v10, %v1489_v53  ;;  %v7267_v14 = vpop.f32.mrb[2].mxu0  ;;  %v7923_v15 = vpop.f32.mrb[2].mxu1 }
 0x528   : > { %v7926_v16 = vmax.f32 %v9086_v58, 0.0  ;;  %v7928_v43 = vmax.f32 %v9088_v7, 0.0  ;;  %v7268_v62 = vpop.f32.mrb[3].mxu0  ;;  %v7924_v17 = vpop.f32.mrb[3].mxu1 }
 0x529   : > { %v7927_v18 = vmax.f32 %v9087_v11, 0.0  ;;  %v7929_v19 = vmax.f32 %v9089_v12, 0.0 }
 0x52b   : > { %v7934_v20 = vcombine.low %v7926_v16, %v7927_v18  ;;  %v7935_v8 = vcombine.low %v7928_v43, %v7929_v19 }
 0x52d   : > { %v7942_v22 = vrot.slane %v7934_v20, %v11106_v49  ;;  %v7949_v6 = vrot.slane %v7935_v8, %v11106_v49 }
 0x52f   : > { %v7950_v23 = vcombine.low %v7942_v22, %v7949_v6 }
 0x531   : > { %7952 = vst [vmem:[%s230_s9] sm:$0xff] %v7950_v23 }
 0x532 PF: > { %p16_p8 = scmp.ge.s32.totalorder %s10948_s17, 6   ;;  %s12288_s12 = smov %s10892_s13 }
 0x533   : > { %s12289_s13 = smov %s10896_s14  ;;  %s12290_s14 = smov %s10958_s20 }
 0x534   : > { %s12291_s15 = smov %s10948_s17  ;;  %18 = sbr.rel (!%p16_p8) target bundleno = 5 (0x5), region = 85 }
 0x53b   :  { %7975 = vsyncpa [#allocation3], 1 }
 0x53c   :  { %7977 = vsyncpa [#allocation3 + $0x1], 1 }
 0x53d   :  { %7978 = vsyncpa [#allocation5], 1 }
 0x53e   :  { %7980 = vsyncpa [#allocation5 + $0x1], 1 }

</bundles_post_ra>
